<compile_context>
chip_gen: v5e
topology: v5e:2x2
jax: 0.10.0
libtpu: 0.0.40
codegen_flags: <defaults>
</compile_context>

<pallas_src>
import math
import functools

import jax
import jax.numpy as jnp
from jax import lax
from jax.experimental import pallas as pl
from jax.experimental.pallas import tpu as pltpu


def _round_up(x, m):
    return ((x + m - 1) // m) * m


# --------------------------- fused MLP kernel ------------------------------ #

def _fused_mlp_kernel(*refs, num_inputs, num_layers, has_layernorm,
                      has_residual, eps):
    """One batch tile through the whole MLP.

    refs = (x_0, ..., x_{k-1}, [res],
            w0_0, ..., w0_{k-1}, b0,          # first layer, split over inputs
            w1, b1, ..., w_{L-1}, b_{L-1},
            [gamma, beta],
            o_ref)
    Weights / biases / LN params are VMEM-resident (constant index_map)."""
    idx = 0
    xs = refs[idx:idx + num_inputs]
    idx += num_inputs
    res_ref = None
    if has_residual:
        res_ref = refs[idx]
        idx += 1
    o_ref = refs[-1]
    p = refs[idx:-1]

    # ---- first Linear: sum of partial matmuls over the split inputs ----
    pi = 0
    h = None
    for k in range(num_inputs):
        w = p[pi][...]
        pi += 1
        part = jnp.dot(xs[k][...].astype(jnp.float32), w,
                       preferred_element_type=jnp.float32)
        h = part if h is None else h + part
    h = h + p[pi][...]                         # bias b0, shape (1, out)
    pi += 1
    if num_layers > 1:
        h = jnp.maximum(h, 0.0)

    # ---- remaining Linear (+ReLU) layers ----
    for i in range(1, num_layers):
        w = p[pi][...]
        b = p[pi + 1][...]
        pi += 2
        h = jnp.dot(h, w, preferred_element_type=jnp.float32) + b
        if i != num_layers - 1:
            h = jnp.maximum(h, 0.0)

    # ---- LayerNorm (single-pass statistics) ----
    if has_layernorm:
        gamma = p[pi][...]
        beta = p[pi + 1][...]
        pi += 2
        d = h.shape[-1]
        s = jnp.sum(h, axis=-1, keepdims=True)
        ss = jnp.sum(h * h, axis=-1, keepdims=True)
        mean = s * (1.0 / d)
        var = ss * (1.0 / d) - mean * mean
        h = (h - mean) * lax.rsqrt(var + eps) * gamma + beta

    # ---- fused residual (node_out = x + mlp(...)) ----
    if has_residual:
        h = h + res_ref[...].astype(jnp.float32)

    o_ref[...] = h.astype(o_ref.dtype)


def fused_mlp(params, inputs, *, residual=None, tile_rows=512, eps=1e-5):
    """Whole MLP (Linear/ReLU chain + optional LayerNorm + optional residual)
    as ONE pallas_call, tiled over the batch dimension ("parallel" axis,
    double-buffered activations), with all weights kept resident in VMEM.

    `inputs` may be a list of [n, f_k] arrays (the logical concatenation along
    the feature axis); the first layer's weight is split accordingly so the
    concatenated activation never touches HBM."""
    if not isinstance(inputs, (list, tuple)):
        inputs = [inputs]
    inputs = list(inputs)
    n = inputs[0].shape[0]
    dtype = inputs[0].dtype
    linears = params["linears"]
    num_layers = len(linears)
    out_f = int(linears[-1][0].shape[1])
    has_ln = params["layernorm"] is not None
    has_res = residual is not None

    # split the first-layer weight to match the (un-concatenated) inputs
    w0, b0 = linears[0]
    feat_sizes = [int(a.shape[1]) for a in inputs]
    assert sum(feat_sizes) == int(w0.shape[0])
    w0_parts = []
    off = 0
    for f in feat_sizes:
        w0_parts.append(w0[off:off + f])
        off += f

    # batch tile: multiple of 8 sublanes, capped at tile_rows (VMEM-safe on
    # v5e/v6e/v7x: <=512 rows x <=128 f32 features per input buffer)
    tb = min(tile_rows, _round_up(n, 8))
    n_pad = _round_up(n, tb)
    pad = n_pad - n
    if pad:
        inputs = [jnp.pad(a, ((0, pad), (0, 0))) for a in inputs]
        if has_res:
            residual = jnp.pad(residual, ((0, pad), (0, 0)))

    weight_args = list(w0_parts) + [b0.reshape(1, -1)]
    for (w, b) in linears[1:]:
        weight_args += [w, b.reshape(1, -1)]
    if has_ln:
        g, bb = params["layernorm"]
        weight_args += [g.reshape(1, -1), bb.reshape(1, -1)]

    call_args = list(inputs)
    if has_res:
        call_args.append(residual)
    call_args += weight_args

    in_specs = [pl.BlockSpec((tb, int(a.shape[1])), lambda i: (i, 0))
                for a in inputs]
    if has_res:
        in_specs.append(
            pl.BlockSpec((tb, int(residual.shape[1])), lambda i: (i, 0)))
    in_specs += [pl.BlockSpec(a.shape, lambda i: (0, 0)) for a in weight_args]

    flops = 2 * n_pad * sum(int(w.shape[0]) * int(w.shape[1])
                            for (w, _) in linears)
    bytes_accessed = int(
        sum(int(a.size) * a.dtype.itemsize for a in call_args)
        + n_pad * out_f * jnp.dtype(dtype).itemsize)

    out = pl.pallas_call(
        functools.partial(_fused_mlp_kernel,
                          num_inputs=len(inputs),
                          num_layers=num_layers,
                          has_layernorm=has_ln,
                          has_residual=has_res,
                          eps=eps),
        grid=(n_pad // tb,),
        out_shape=jax.ShapeDtypeStruct((n_pad, out_f), dtype),
        in_specs=in_specs,
        out_specs=pl.BlockSpec((tb, out_f), lambda i: (i, 0)),
        compiler_params=pltpu.CompilerParams(
            dimension_semantics=("parallel",)),
        cost_estimate=pl.CostEstimate(
            flops=flops,
            transcendentals=n_pad if has_ln else 0,
            bytes_accessed=bytes_accessed),
    )(*call_args)
    return out[:n]


# --------------------------- parameter init -------------------------------- #

def init_mlp_params(key, input_size, hidden_size, output_size, layers,
                    layernorm=True, dtype=jnp.float32):
    """Matches MLP.reset_parameters: W ~ N(0, 1/sqrt(in_features)), b = 0.
    Weights stored as [in_features, out_features] (already transposed)."""
    params = {"linears": [], "layernorm": None}
    for i in range(layers):
        in_f = input_size if i == 0 else hidden_size
        out_f = output_size if i == layers - 1 else hidden_size
        key, wk = jax.random.split(key)
        w = (jax.random.normal(wk, (in_f, out_f), dtype=jnp.float32)
             * (1.0 / math.sqrt(in_f))).astype(dtype)
        b = jnp.zeros((out_f,), dtype=dtype)
        params["linears"].append((w, b))
    if layernorm:
        params["layernorm"] = (jnp.ones((output_size,), dtype=dtype),
                               jnp.zeros((output_size,), dtype=dtype))
    return params


def init_simulator_params(key, hidden_size=128, n_mp_layers=10, dim=3):
    keys = jax.random.split(key, 3 + 2 * n_mp_layers)
    params = {
        "node_in": init_mlp_params(keys[0], dim * 2, hidden_size, hidden_size, 3),
        "edge_in": init_mlp_params(keys[1], dim + 1, hidden_size, hidden_size, 3),
        "node_out": init_mlp_params(keys[2], hidden_size, hidden_size, dim, 3,
                                    layernorm=False),
        "layers": [],
    }
    for l in range(n_mp_layers):
        params["layers"].append({
            "lin_edge": init_mlp_params(keys[3 + 2 * l], hidden_size * 3,
                                        hidden_size, hidden_size, 3),
            "lin_node": init_mlp_params(keys[4 + 2 * l], hidden_size * 2,
                                        hidden_size, hidden_size, 3),
        })
    return params


# --------------------------- GNS forward pass ------------------------------ #

def interaction_network(params, x, edge_index, edge_feature, mlp_fn):
    """InteractionNetwork.forward (PyG MessagePassing, flow source->target)."""
    src = edge_index[0]            # x_j (sender)
    dst = edge_index[1]            # x_i (receiver); also the scatter index
    # TODO(synk): the graph gather (x[idx]) and scatter-add aggregation are
    # plain JAX take / .at[].add, not Pallas kernels.
    # message: lin_edge(cat(x_i, x_j, edge_feature)); concat is fused into the
    # kernel by splitting the first-layer weight.
    msg = mlp_fn(params["lin_edge"], [x[dst], x[src], edge_feature])
    aggr = jnp.zeros((x.shape[0], msg.shape[-1]), msg.dtype).at[dst].add(msg)
    # node update: x + lin_node(cat(x, aggr)); residual fused into the kernel.
    node_out = mlp_fn(params["lin_node"], [x, aggr], residual=x)
    return node_out, edge_feature + msg


def simulator_forward(params, x, edge_index, edge_attr, mlp_fn=fused_mlp):
    node_feature = mlp_fn(params["node_in"], x)
    edge_feature = mlp_fn(params["edge_in"], edge_attr)
    for layer_params in params["layers"]:
        node_feature, edge_feature = interaction_network(
            layer_params, node_feature, edge_index, edge_feature, mlp_fn)
    return mlp_fn(params["node_out"], node_feature)


# --------------------------- plain-JAX reference ---------------------------- #

def mlp_ref(params, inputs, *, residual=None, eps=1e-5, **_):
    if isinstance(inputs, (list, tuple)):
        x = jnp.concatenate(list(inputs), axis=-1)
    else:
        x = inputs
    n = len(params["linears"])
    for i, (w, b) in enumerate(params["linears"]):
        x = jnp.dot(x, w, precision=lax.Precision.HIGHEST) + b
        if i != n - 1:
            x = jnp.maximum(x, 0.0)
    if params["layernorm"] is not None:
        g, bb = params["layernorm"]
        mean = jnp.mean(x, axis=-1, keepdims=True)
        var = jnp.mean((x - mean) ** 2, axis=-1, keepdims=True)
        x = (x - mean) * lax.rsqrt(var + eps) * g + bb
    if residual is not None:
        x = residual + x
    return x


# --------------------------------- demo ------------------------------------ #

if __name__ == "__main__":
    key = jax.random.PRNGKey(0)
    k_param, k_x, k_e, k_idx = jax.random.split(key, 4)

    hidden_size, n_mp_layers, dim = 128, 3, 3
    n_nodes, n_edges = 64, 256

    params = init_simulator_params(k_param, hidden_size, n_mp_layers, dim)
    x = jax.random.normal(k_x, (n_nodes, dim * 2), dtype=jnp.float32)
    edge_attr = jax.random.normal(k_e, (n_edges, dim + 1), dtype=jnp.float32)
    edge_index = jax.random.randint(k_idx, (2, n_edges), 0, n_nodes,
                                    dtype=jnp.int32)

    fwd = jax.jit(simulator_forward)
    out = fwd(params, x, edge_index, edge_attr)
    jax.block_until_ready(out)

    ref = simulator_forward(params, x, edge_index, edge_attr, mlp_fn=mlp_ref)
    assert out.shape == (n_nodes, dim)
    assert bool(jnp.allclose(out, ref, atol=2e-3, rtol=2e-3)), (
        "max abs diff = %g" % float(jnp.max(jnp.abs(out - ref))))

    print("KERNEL_OK")
</pallas_src>

<mosaic_0001>
module attributes {stable_mosaic.version = 11 : i64} {
  func.func @_fused_mlp_kernel(%arg0: i32, %arg1: memref<64x6xf32, #tpu.memory_space<vmem>>, %arg2: memref<6x128xf32, #tpu.memory_space<vmem>>, %arg3: memref<1x128xf32, #tpu.memory_space<vmem>>, %arg4: memref<128x128xf32, #tpu.memory_space<vmem>>, %arg5: memref<1x128xf32, #tpu.memory_space<vmem>>, %arg6: memref<128x128xf32, #tpu.memory_space<vmem>>, %arg7: memref<1x128xf32, #tpu.memory_space<vmem>>, %arg8: memref<1x128xf32, #tpu.memory_space<vmem>>, %arg9: memref<1x128xf32, #tpu.memory_space<vmem>>, %arg10: memref<64x128xf32, #tpu.memory_space<vmem>>) attributes {dimension_semantics = [#tpu.dimension_semantics<parallel>], iteration_bounds = array<i64: 1>, scalar_prefetch = 0 : i64, scratch_operands = 0 : i64, tpu.core_type = #tpu.core_type<tc>, window_params = [{transform_indices = @transform_0, window_bounds = array<i64: 64, 6>}, {pipeline_mode = #tpu.pipeline_mode<synchronous>, transform_indices = @transform_1, window_bounds = array<i64: 6, 128>}, {pipeline_mode = #tpu.pipeline_mode<synchronous>, transform_indices = @transform_2, window_bounds = array<i64: 1, 128>}, {pipeline_mode = #tpu.pipeline_mode<synchronous>, transform_indices = @transform_3, window_bounds = array<i64: 128, 128>}, {pipeline_mode = #tpu.pipeline_mode<synchronous>, transform_indices = @transform_4, window_bounds = array<i64: 1, 128>}, {pipeline_mode = #tpu.pipeline_mode<synchronous>, transform_indices = @transform_5, window_bounds = array<i64: 128, 128>}, {pipeline_mode = #tpu.pipeline_mode<synchronous>, transform_indices = @transform_6, window_bounds = array<i64: 1, 128>}, {pipeline_mode = #tpu.pipeline_mode<synchronous>, transform_indices = @transform_7, window_bounds = array<i64: 1, 128>}, {pipeline_mode = #tpu.pipeline_mode<synchronous>, transform_indices = @transform_8, window_bounds = array<i64: 1, 128>}, {transform_indices = @transform_9, window_bounds = array<i64: 64, 128>}]} {
    %c0 = arith.constant 0 : index
    %c0_0 = arith.constant 0 : index
    %0 = vector.load %arg2[%c0, %c0_0] : memref<6x128xf32, #tpu.memory_space<vmem>>, vector<6x128xf32>
    %c0_1 = arith.constant 0 : index
    %c0_2 = arith.constant 0 : index
    %1 = vector.load %arg1[%c0_1, %c0_2] : memref<64x6xf32, #tpu.memory_space<vmem>>, vector<64x6xf32>
    %cst = arith.constant dense<0.000000e+00> : vector<64x128xf32>
    %2 = tpu.matmul %1, %0, %cst {dimension_numbers = #tpu.dot_dimension_numbers<[1], [0], [0], [1], [0, 0, 1, 1], [], []>} : vector<64x6xf32>, vector<6x128xf32>, vector<64x128xf32> -> vector<64x128xf32>
    %c0_3 = arith.constant 0 : index
    %c0_4 = arith.constant 0 : index
    %3 = vector.load %arg3[%c0_3, %c0_4] : memref<1x128xf32, #tpu.memory_space<vmem>>, vector<1x128xf32>
    %4 = vector.broadcast %3 : vector<1x128xf32> to vector<64x128xf32>
    %5 = arith.addf %2, %4 : vector<64x128xf32>
    %cst_5 = arith.constant 0.000000e+00 : f32
    %6 = vector.broadcast %cst_5 : f32 to vector<64x128xf32>
    %7 = arith.maximumf %5, %6 : vector<64x128xf32>
    %c0_6 = arith.constant 0 : index
    %c0_7 = arith.constant 0 : index
    %8 = vector.load %arg4[%c0_6, %c0_7] : memref<128x128xf32, #tpu.memory_space<vmem>>, vector<128x128xf32>
    %c0_8 = arith.constant 0 : index
    %c0_9 = arith.constant 0 : index
    %9 = vector.load %arg5[%c0_8, %c0_9] : memref<1x128xf32, #tpu.memory_space<vmem>>, vector<1x128xf32>
    %cst_10 = arith.constant dense<0.000000e+00> : vector<64x128xf32>
    %10 = tpu.matmul %7, %8, %cst_10 {dimension_numbers = #tpu.dot_dimension_numbers<[1], [0], [0], [1], [0, 0, 1, 1], [], []>} : vector<64x128xf32>, vector<128x128xf32>, vector<64x128xf32> -> vector<64x128xf32>
    %11 = vector.broadcast %9 : vector<1x128xf32> to vector<64x128xf32>
    %12 = arith.addf %10, %11 : vector<64x128xf32>
    %cst_11 = arith.constant 0.000000e+00 : f32
    %13 = vector.broadcast %cst_11 : f32 to vector<64x128xf32>
    %14 = arith.maximumf %12, %13 : vector<64x128xf32>
    %c0_12 = arith.constant 0 : index
    %c0_13 = arith.constant 0 : index
    %15 = vector.load %arg6[%c0_12, %c0_13] : memref<128x128xf32, #tpu.memory_space<vmem>>, vector<128x128xf32>
    %c0_14 = arith.constant 0 : index
    %c0_15 = arith.constant 0 : index
    %16 = vector.load %arg7[%c0_14, %c0_15] : memref<1x128xf32, #tpu.memory_space<vmem>>, vector<1x128xf32>
    %cst_16 = arith.constant dense<0.000000e+00> : vector<64x128xf32>
    %17 = tpu.matmul %14, %15, %cst_16 {dimension_numbers = #tpu.dot_dimension_numbers<[1], [0], [0], [1], [0, 0, 1, 1], [], []>} : vector<64x128xf32>, vector<128x128xf32>, vector<64x128xf32> -> vector<64x128xf32>
    %18 = vector.broadcast %16 : vector<1x128xf32> to vector<64x128xf32>
    %19 = arith.addf %17, %18 : vector<64x128xf32>
    %c0_17 = arith.constant 0 : index
    %c0_18 = arith.constant 0 : index
    %20 = vector.load %arg8[%c0_17, %c0_18] : memref<1x128xf32, #tpu.memory_space<vmem>>, vector<1x128xf32>
    %c0_19 = arith.constant 0 : index
    %c0_20 = arith.constant 0 : index
    %21 = vector.load %arg9[%c0_19, %c0_20] : memref<1x128xf32, #tpu.memory_space<vmem>>, vector<1x128xf32>
    %cst_21 = arith.constant dense<0.000000e+00> : vector<64xf32>
    %22 = vector.multi_reduction <add>, %19, %cst_21 [1] : vector<64x128xf32> to vector<64xf32>
    %23 = vector.shape_cast %22 : vector<64xf32> to vector<64x1xf32>
    %24 = arith.mulf %19, %19 : vector<64x128xf32>
    %cst_22 = arith.constant dense<0.000000e+00> : vector<64xf32>
    %25 = vector.multi_reduction <add>, %24, %cst_22 [1] : vector<64x128xf32> to vector<64xf32>
    %26 = vector.shape_cast %25 : vector<64xf32> to vector<64x1xf32>
    %cst_23 = arith.constant 7.812500e-03 : f32
    %27 = vector.broadcast %cst_23 : f32 to vector<64x1xf32>
    %28 = arith.mulf %23, %27 : vector<64x1xf32>
    %cst_24 = arith.constant 7.812500e-03 : f32
    %29 = vector.broadcast %cst_24 : f32 to vector<64x1xf32>
    %30 = arith.mulf %26, %29 : vector<64x1xf32>
    %31 = arith.mulf %28, %28 : vector<64x1xf32>
    %32 = arith.subf %30, %31 : vector<64x1xf32>
    %33 = vector.broadcast %28 : vector<64x1xf32> to vector<64x128xf32>
    %34 = arith.subf %19, %33 : vector<64x128xf32>
    %cst_25 = arith.constant 9.99999974E-6 : f32
    %35 = vector.broadcast %cst_25 : f32 to vector<64x1xf32>
    %36 = arith.addf %32, %35 : vector<64x1xf32>
    %37 = math.rsqrt %36 : vector<64x1xf32>
    %38 = vector.broadcast %37 : vector<64x1xf32> to vector<64x128xf32>
    %39 = arith.mulf %34, %38 : vector<64x128xf32>
    %40 = vector.broadcast %20 : vector<1x128xf32> to vector<64x128xf32>
    %41 = arith.mulf %39, %40 : vector<64x128xf32>
    %42 = vector.broadcast %21 : vector<1x128xf32> to vector<64x128xf32>
    %43 = arith.addf %41, %42 : vector<64x128xf32>
    %c0_26 = arith.constant 0 : index
    %c0_27 = arith.constant 0 : index
    %44 = vector.load %arg10[%c0_26, %c0_27] : memref<64x128xf32, #tpu.memory_space<vmem>>, vector<64x128xf32>
    tpu.vector_store %arg10[%c0_26, %c0_27], %43 {strides = array<i32>} : memref<64x128xf32, #tpu.memory_space<vmem>>, vector<64x128xf32>,
    return
  }
  func.func @transform_0(%arg0: i32) -> (i32, i32) {
    %c0_i32 = arith.constant 0 : i32
    %c0_i32_0 = arith.constant 0 : i32
    return %arg0, %c0_i32 : i32, i32
  }
  func.func @transform_1(%arg0: i32) -> (i32, i32) {
    %c0_i32 = arith.constant 0 : i32
    %c0_i32_0 = arith.constant 0 : i32
    %c0_i32_1 = arith.constant 0 : i32
    return %c0_i32, %c0_i32_0 : i32, i32
  }
  func.func @transform_2(%arg0: i32) -> (i32, i32) {
    %c0_i32 = arith.constant 0 : i32
    %c0_i32_0 = arith.constant 0 : i32
    %c0_i32_1 = arith.constant 0 : i32
    return %c0_i32, %c0_i32_0 : i32, i32
  }
  func.func @transform_3(%arg0: i32) -> (i32, i32) {
    %c0_i32 = arith.constant 0 : i32
    %c0_i32_0 = arith.constant 0 : i32
    %c0_i32_1 = arith.constant 0 : i32
    return %c0_i32, %c0_i32_0 : i32, i32
  }
  func.func @transform_4(%arg0: i32) -> (i32, i32) {
    %c0_i32 = arith.constant 0 : i32
    %c0_i32_0 = arith.constant 0 : i32
    %c0_i32_1 = arith.constant 0 : i32
    return %c0_i32, %c0_i32_0 : i32, i32
  }
  func.func @transform_5(%arg0: i32) -> (i32, i32) {
    %c0_i32 = arith.constant 0 : i32
    %c0_i32_0 = arith.constant 0 : i32
    %c0_i32_1 = arith.constant 0 : i32
    return %c0_i32, %c0_i32_0 : i32, i32
  }
  func.func @transform_6(%arg0: i32) -> (i32, i32) {
    %c0_i32 = arith.constant 0 : i32
    %c0_i32_0 = arith.constant 0 : i32
    %c0_i32_1 = arith.constant 0 : i32
    return %c0_i32, %c0_i32_0 : i32, i32
  }
  func.func @transform_7(%arg0: i32) -> (i32, i32) {
    %c0_i32 = arith.constant 0 : i32
    %c0_i32_0 = arith.constant 0 : i32
    %c0_i32_1 = arith.constant 0 : i32
    return %c0_i32, %c0_i32_0 : i32, i32
  }
  func.func @transform_8(%arg0: i32) -> (i32, i32) {
    %c0_i32 = arith.constant 0 : i32
    %c0_i32_0 = arith.constant 0 : i32
    %c0_i32_1 = arith.constant 0 : i32
    return %c0_i32, %c0_i32_0 : i32, i32
  }
  func.func @transform_9(%arg0: i32) -> (i32, i32) {
    %c0_i32 = arith.constant 0 : i32
    %c0_i32_0 = arith.constant 0 : i32
    return %arg0, %c0_i32 : i32, i32
  }
}

module attributes {stable_mosaic.version = 11 : i64} {
  func.func @_fused_mlp_kernel(%arg0: i32, %arg1: memref<256x4xf32, #tpu.memory_space<vmem>>, %arg2: memref<4x128xf32, #tpu.memory_space<vmem>>, %arg3: memref<1x128xf32, #tpu.memory_space<vmem>>, %arg4: memref<128x128xf32, #tpu.memory_space<vmem>>, %arg5: memref<1x128xf32, #tpu.memory_space<vmem>>, %arg6: memref<128x128xf32, #tpu.memory_space<vmem>>, %arg7: memref<1x128xf32, #tpu.memory_space<vmem>>, %arg8: memref<1x128xf32, #tpu.memory_space<vmem>>, %arg9: memref<1x128xf32, #tpu.memory_space<vmem>>, %arg10: memref<256x128xf32, #tpu.memory_space<vmem>>) attributes {dimension_semantics = [#tpu.dimension_semantics<parallel>], iteration_bounds = array<i64: 1>, scalar_prefetch = 0 : i64, scratch_operands = 0 : i64, tpu.core_type = #tpu.core_type<tc>, window_params = [{transform_indices = @transform_0, window_bounds = array<i64: 256, 4>}, {pipeline_mode = #tpu.pipeline_mode<synchronous>, transform_indices = @transform_1, window_bounds = array<i64: 4, 128>}, {pipeline_mode = #tpu.pipeline_mode<synchronous>, transform_indices = @transform_2, window_bounds = array<i64: 1, 128>}, {pipeline_mode = #tpu.pipeline_mode<synchronous>, transform_indices = @transform_3, window_bounds = array<i64: 128, 128>}, {pipeline_mode = #tpu.pipeline_mode<synchronous>, transform_indices = @transform_4, window_bounds = array<i64: 1, 128>}, {pipeline_mode = #tpu.pipeline_mode<synchronous>, transform_indices = @transform_5, window_bounds = array<i64: 128, 128>}, {pipeline_mode = #tpu.pipeline_mode<synchronous>, transform_indices = @transform_6, window_bounds = array<i64: 1, 128>}, {pipeline_mode = #tpu.pipeline_mode<synchronous>, transform_indices = @transform_7, window_bounds = array<i64: 1, 128>}, {pipeline_mode = #tpu.pipeline_mode<synchronous>, transform_indices = @transform_8, window_bounds = array<i64: 1, 128>}, {transform_indices = @transform_9, window_bounds = array<i64: 256, 128>}]} {
    %c0 = arith.constant 0 : index
    %c0_0 = arith.constant 0 : index
    %0 = vector.load %arg2[%c0, %c0_0] : memref<4x128xf32, #tpu.memory_space<vmem>>, vector<4x128xf32>
    %c0_1 = arith.constant 0 : index
    %c0_2 = arith.constant 0 : index
    %1 = vector.load %arg1[%c0_1, %c0_2] : memref<256x4xf32, #tpu.memory_space<vmem>>, vector<256x4xf32>
    %cst = arith.constant dense<0.000000e+00> : vector<256x128xf32>
    %2 = tpu.matmul %1, %0, %cst {dimension_numbers = #tpu.dot_dimension_numbers<[1], [0], [0], [1], [0, 0, 1, 1], [], []>} : vector<256x4xf32>, vector<4x128xf32>, vector<256x128xf32> -> vector<256x128xf32>
    %c0_3 = arith.constant 0 : index
    %c0_4 = arith.constant 0 : index
    %3 = vector.load %arg3[%c0_3, %c0_4] : memref<1x128xf32, #tpu.memory_space<vmem>>, vector<1x128xf32>
    %4 = vector.broadcast %3 : vector<1x128xf32> to vector<256x128xf32>
    %5 = arith.addf %2, %4 : vector<256x128xf32>
    %cst_5 = arith.constant 0.000000e+00 : f32
    %6 = vector.broadcast %cst_5 : f32 to vector<256x128xf32>
    %7 = arith.maximumf %5, %6 : vector<256x128xf32>
    %c0_6 = arith.constant 0 : index
    %c0_7 = arith.constant 0 : index
    %8 = vector.load %arg4[%c0_6, %c0_7] : memref<128x128xf32, #tpu.memory_space<vmem>>, vector<128x128xf32>
    %c0_8 = arith.constant 0 : index
    %c0_9 = arith.constant 0 : index
    %9 = vector.load %arg5[%c0_8, %c0_9] : memref<1x128xf32, #tpu.memory_space<vmem>>, vector<1x128xf32>
    %cst_10 = arith.constant dense<0.000000e+00> : vector<256x128xf32>
    %10 = tpu.matmul %7, %8, %cst_10 {dimension_numbers = #tpu.dot_dimension_numbers<[1], [0], [0], [1], [0, 0, 1, 1], [], []>} : vector<256x128xf32>, vector<128x128xf32>, vector<256x128xf32> -> vector<256x128xf32>
    %11 = vector.broadcast %9 : vector<1x128xf32> to vector<256x128xf32>
    %12 = arith.addf %10, %11 : vector<256x128xf32>
    %cst_11 = arith.constant 0.000000e+00 : f32
    %13 = vector.broadcast %cst_11 : f32 to vector<256x128xf32>
    %14 = arith.maximumf %12, %13 : vector<256x128xf32>
    %c0_12 = arith.constant 0 : index
    %c0_13 = arith.constant 0 : index
    %15 = vector.load %arg6[%c0_12, %c0_13] : memref<128x128xf32, #tpu.memory_space<vmem>>, vector<128x128xf32>
    %c0_14 = arith.constant 0 : index
    %c0_15 = arith.constant 0 : index
    %16 = vector.load %arg7[%c0_14, %c0_15] : memref<1x128xf32, #tpu.memory_space<vmem>>, vector<1x128xf32>
    %cst_16 = arith.constant dense<0.000000e+00> : vector<256x128xf32>
    %17 = tpu.matmul %14, %15, %cst_16 {dimension_numbers = #tpu.dot_dimension_numbers<[1], [0], [0], [1], [0, 0, 1, 1], [], []>} : vector<256x128xf32>, vector<128x128xf32>, vector<256x128xf32> -> vector<256x128xf32>
    %18 = vector.broadcast %16 : vector<1x128xf32> to vector<256x128xf32>
    %19 = arith.addf %17, %18 : vector<256x128xf32>
    %c0_17 = arith.constant 0 : index
    %c0_18 = arith.constant 0 : index
    %20 = vector.load %arg8[%c0_17, %c0_18] : memref<1x128xf32, #tpu.memory_space<vmem>>, vector<1x128xf32>
    %c0_19 = arith.constant 0 : index
    %c0_20 = arith.constant 0 : index
    %21 = vector.load %arg9[%c0_19, %c0_20] : memref<1x128xf32, #tpu.memory_space<vmem>>, vector<1x128xf32>
    %cst_21 = arith.constant dense<0.000000e+00> : vector<256xf32>
    %22 = vector.multi_reduction <add>, %19, %cst_21 [1] : vector<256x128xf32> to vector<256xf32>
    %23 = vector.shape_cast %22 : vector<256xf32> to vector<256x1xf32>
    %24 = arith.mulf %19, %19 : vector<256x128xf32>
    %cst_22 = arith.constant dense<0.000000e+00> : vector<256xf32>
    %25 = vector.multi_reduction <add>, %24, %cst_22 [1] : vector<256x128xf32> to vector<256xf32>
    %26 = vector.shape_cast %25 : vector<256xf32> to vector<256x1xf32>
    %cst_23 = arith.constant 7.812500e-03 : f32
    %27 = vector.broadcast %cst_23 : f32 to vector<256x1xf32>
    %28 = arith.mulf %23, %27 : vector<256x1xf32>
    %cst_24 = arith.constant 7.812500e-03 : f32
    %29 = vector.broadcast %cst_24 : f32 to vector<256x1xf32>
    %30 = arith.mulf %26, %29 : vector<256x1xf32>
    %31 = arith.mulf %28, %28 : vector<256x1xf32>
    %32 = arith.subf %30, %31 : vector<256x1xf32>
    %33 = vector.broadcast %28 : vector<256x1xf32> to vector<256x128xf32>
    %34 = arith.subf %19, %33 : vector<256x128xf32>
    %cst_25 = arith.constant 9.99999974E-6 : f32
    %35 = vector.broadcast %cst_25 : f32 to vector<256x1xf32>
    %36 = arith.addf %32, %35 : vector<256x1xf32>
    %37 = math.rsqrt %36 : vector<256x1xf32>
    %38 = vector.broadcast %37 : vector<256x1xf32> to vector<256x128xf32>
    %39 = arith.mulf %34, %38 : vector<256x128xf32>
    %40 = vector.broadcast %20 : vector<1x128xf32> to vector<256x128xf32>
    %41 = arith.mulf %39, %40 : vector<256x128xf32>
    %42 = vector.broadcast %21 : vector<1x128xf32> to vector<256x128xf32>
    %43 = arith.addf %41, %42 : vector<256x128xf32>
    %c0_26 = arith.constant 0 : index
    %c0_27 = arith.constant 0 : index
    %44 = vector.load %arg10[%c0_26, %c0_27] : memref<256x128xf32, #tpu.memory_space<vmem>>, vector<256x128xf32>
    tpu.vector_store %arg10[%c0_26, %c0_27], %43 {strides = array<i32>} : memref<256x128xf32, #tpu.memory_space<vmem>>, vector<256x128xf32>,
    return
  }
  func.func @transform_0(%arg0: i32) -> (i32, i32) {
    %c0_i32 = arith.constant 0 : i32
    %c0_i32_0 = arith.constant 0 : i32
    return %arg0, %c0_i32 : i32, i32
  }
  func.func @transform_1(%arg0: i32) -> (i32, i32) {
    %c0_i32 = arith.constant 0 : i32
    %c0_i32_0 = arith.constant 0 : i32
    %c0_i32_1 = arith.constant 0 : i32
    return %c0_i32, %c0_i32_0 : i32, i32
  }
  func.func @transform_2(%arg0: i32) -> (i32, i32) {
    %c0_i32 = arith.constant 0 : i32
    %c0_i32_0 = arith.constant 0 : i32
    %c0_i32_1 = arith.constant 0 : i32
    return %c0_i32, %c0_i32_0 : i32, i32
  }
  func.func @transform_3(%arg0: i32) -> (i32, i32) {
    %c0_i32 = arith.constant 0 : i32
    %c0_i32_0 = arith.constant 0 : i32
    %c0_i32_1 = arith.constant 0 : i32
    return %c0_i32, %c0_i32_0 : i32, i32
  }
  func.func @transform_4(%arg0: i32) -> (i32, i32) {
    %c0_i32 = arith.constant 0 : i32
    %c0_i32_0 = arith.constant 0 : i32
    %c0_i32_1 = arith.constant 0 : i32
    return %c0_i32, %c0_i32_0 : i32, i32
  }
  func.func @transform_5(%arg0: i32) -> (i32, i32) {
    %c0_i32 = arith.constant 0 : i32
    %c0_i32_0 = arith.constant 0 : i32
    %c0_i32_1 = arith.constant 0 : i32
    return %c0_i32, %c0_i32_0 : i32, i32
  }
  func.func @transform_6(%arg0: i32) -> (i32, i32) {
    %c0_i32 = arith.constant 0 : i32
    %c0_i32_0 = arith.constant 0 : i32
    %c0_i32_1 = arith.constant 0 : i32
    return %c0_i32, %c0_i32_0 : i32, i32
  }
  func.func @transform_7(%arg0: i32) -> (i32, i32) {
    %c0_i32 = arith.constant 0 : i32
    %c0_i32_0 = arith.constant 0 : i32
    %c0_i32_1 = arith.constant 0 : i32
    return %c0_i32, %c0_i32_0 : i32, i32
  }
  func.func @transform_8(%arg0: i32) -> (i32, i32) {
    %c0_i32 = arith.constant 0 : i32
    %c0_i32_0 = arith.constant 0 : i32
    %c0_i32_1 = arith.constant 0 : i32
    return %c0_i32, %c0_i32_0 : i32, i32
  }
  func.func @transform_9(%arg0: i32) -> (i32, i32) {
    %c0_i32 = arith.constant 0 : i32
    %c0_i32_0 = arith.constant 0 : i32
    return %arg0, %c0_i32 : i32, i32
  }
}

module attributes {stable_mosaic.version = 11 : i64} {
  func.func @_fused_mlp_kernel(%arg0: i32, %arg1: memref<256x128xf32, #tpu.memory_space<vmem>>, %arg2: memref<256x128xf32, #tpu.memory_space<vmem>>, %arg3: memref<256x128xf32, #tpu.memory_space<vmem>>, %arg4: memref<128x128xf32, #tpu.memory_space<vmem>>, %arg5: memref<128x128xf32, #tpu.memory_space<vmem>>, %arg6: memref<128x128xf32, #tpu.memory_space<vmem>>, %arg7: memref<1x128xf32, #tpu.memory_space<vmem>>, %arg8: memref<128x128xf32, #tpu.memory_space<vmem>>, %arg9: memref<1x128xf32, #tpu.memory_space<vmem>>, %arg10: memref<128x128xf32, #tpu.memory_space<vmem>>, %arg11: memref<1x128xf32, #tpu.memory_space<vmem>>, %arg12: memref<1x128xf32, #tpu.memory_space<vmem>>, %arg13: memref<1x128xf32, #tpu.memory_space<vmem>>, %arg14: memref<256x128xf32, #tpu.memory_space<vmem>>) attributes {dimension_semantics = [#tpu.dimension_semantics<parallel>], iteration_bounds = array<i64: 1>, scalar_prefetch = 0 : i64, scratch_operands = 0 : i64, tpu.core_type = #tpu.core_type<tc>, window_params = [{transform_indices = @transform_0, window_bounds = array<i64: 256, 128>}, {transform_indices = @transform_1, window_bounds = array<i64: 256, 128>}, {transform_indices = @transform_2, window_bounds = array<i64: 256, 128>}, {pipeline_mode = #tpu.pipeline_mode<synchronous>, transform_indices = @transform_3, window_bounds = array<i64: 128, 128>}, {pipeline_mode = #tpu.pipeline_mode<synchronous>, transform_indices = @transform_4, window_bounds = array<i64: 128, 128>}, {pipeline_mode = #tpu.pipeline_mode<synchronous>, transform_indices = @transform_5, window_bounds = array<i64: 128, 128>}, {pipeline_mode = #tpu.pipeline_mode<synchronous>, transform_indices = @transform_6, window_bounds = array<i64: 1, 128>}, {pipeline_mode = #tpu.pipeline_mode<synchronous>, transform_indices = @transform_7, window_bounds = array<i64: 128, 128>}, {pipeline_mode = #tpu.pipeline_mode<synchronous>, transform_indices = @transform_8, window_bounds = array<i64: 1, 128>}, {pipeline_mode = #tpu.pipeline_mode<synchronous>, transform_indices = @transform_9, window_bounds = array<i64: 128, 128>}, {pipeline_mode = #tpu.pipeline_mode<synchronous>, transform_indices = @transform_10, window_bounds = array<i64: 1, 128>}, {pipeline_mode = #tpu.pipeline_mode<synchronous>, transform_indices = @transform_11, window_bounds = array<i64: 1, 128>}, {pipeline_mode = #tpu.pipeline_mode<synchronous>, transform_indices = @transform_12, window_bounds = array<i64: 1, 128>}, {transform_indices = @transform_13, window_bounds = array<i64: 256, 128>}]} {
    %c0 = arith.constant 0 : index
    %c0_0 = arith.constant 0 : index
    %0 = vector.load %arg4[%c0, %c0_0] : memref<128x128xf32, #tpu.memory_space<vmem>>, vector<128x128xf32>
    %c0_1 = arith.constant 0 : index
    %c0_2 = arith.constant 0 : index
    %1 = vector.load %arg1[%c0_1, %c0_2] : memref<256x128xf32, #tpu.memory_space<vmem>>, vector<256x128xf32>
    %cst = arith.constant dense<0.000000e+00> : vector<256x128xf32>
    %2 = tpu.matmul %1, %0, %cst {dimension_numbers = #tpu.dot_dimension_numbers<[1], [0], [0], [1], [0, 0, 1, 1], [], []>} : vector<256x128xf32>, vector<128x128xf32>, vector<256x128xf32> -> vector<256x128xf32>
    %c0_3 = arith.constant 0 : index
    %c0_4 = arith.constant 0 : index
    %3 = vector.load %arg5[%c0_3, %c0_4] : memref<128x128xf32, #tpu.memory_space<vmem>>, vector<128x128xf32>
    %c0_5 = arith.constant 0 : index
    %c0_6 = arith.constant 0 : index
    %4 = vector.load %arg2[%c0_5, %c0_6] : memref<256x128xf32, #tpu.memory_space<vmem>>, vector<256x128xf32>
    %cst_7 = arith.constant dense<0.000000e+00> : vector<256x128xf32>
    %5 = tpu.matmul %4, %3, %cst_7 {dimension_numbers = #tpu.dot_dimension_numbers<[1], [0], [0], [1], [0, 0, 1, 1], [], []>} : vector<256x128xf32>, vector<128x128xf32>, vector<256x128xf32> -> vector<256x128xf32>
    %6 = arith.addf %2, %5 : vector<256x128xf32>
    %c0_8 = arith.constant 0 : index
    %c0_9 = arith.constant 0 : index
    %7 = vector.load %arg6[%c0_8, %c0_9] : memref<128x128xf32, #tpu.memory_space<vmem>>, vector<128x128xf32>
    %c0_10 = arith.constant 0 : index
    %c0_11 = arith.constant 0 : index
    %8 = vector.load %arg3[%c0_10, %c0_11] : memref<256x128xf32, #tpu.memory_space<vmem>>, vector<256x128xf32>
    %cst_12 = arith.constant dense<0.000000e+00> : vector<256x128xf32>
    %9 = tpu.matmul %8, %7, %cst_12 {dimension_numbers = #tpu.dot_dimension_numbers<[1], [0], [0], [1], [0, 0, 1, 1], [], []>} : vector<256x128xf32>, vector<128x128xf32>, vector<256x128xf32> -> vector<256x128xf32>
    %10 = arith.addf %6, %9 : vector<256x128xf32>
    %c0_13 = arith.constant 0 : index
    %c0_14 = arith.constant 0 : index
    %11 = vector.load %arg7[%c0_13, %c0_14] : memref<1x128xf32, #tpu.memory_space<vmem>>, vector<1x128xf32>
    %12 = vector.broadcast %11 : vector<1x128xf32> to vector<256x128xf32>
    %13 = arith.addf %10, %12 : vector<256x128xf32>
    %cst_15 = arith.constant 0.000000e+00 : f32
    %14 = vector.broadcast %cst_15 : f32 to vector<256x128xf32>
    %15 = arith.maximumf %13, %14 : vector<256x128xf32>
    %c0_16 = arith.constant 0 : index
    %c0_17 = arith.constant 0 : index
    %16 = vector.load %arg8[%c0_16, %c0_17] : memref<128x128xf32, #tpu.memory_space<vmem>>, vector<128x128xf32>
    %c0_18 = arith.constant 0 : index
    %c0_19 = arith.constant 0 : index
    %17 = vector.load %arg9[%c0_18, %c0_19] : memref<1x128xf32, #tpu.memory_space<vmem>>, vector<1x128xf32>
    %cst_20 = arith.constant dense<0.000000e+00> : vector<256x128xf32>
    %18 = tpu.matmul %15, %16, %cst_20 {dimension_numbers = #tpu.dot_dimension_numbers<[1], [0], [0], [1], [0, 0, 1, 1], [], []>} : vector<256x128xf32>, vector<128x128xf32>, vector<256x128xf32> -> vector<256x128xf32>
    %19 = vector.broadcast %17 : vector<1x128xf32> to vector<256x128xf32>
    %20 = arith.addf %18, %19 : vector<256x128xf32>
    %cst_21 = arith.constant 0.000000e+00 : f32
    %21 = vector.broadcast %cst_21 : f32 to vector<256x128xf32>
    %22 = arith.maximumf %20, %21 : vector<256x128xf32>
    %c0_22 = arith.constant 0 : index
    %c0_23 = arith.constant 0 : index
    %23 = vector.load %arg10[%c0_22, %c0_23] : memref<128x128xf32, #tpu.memory_space<vmem>>, vector<128x128xf32>
    %c0_24 = arith.constant 0 : index
    %c0_25 = arith.constant 0 : index
    %24 = vector.load %arg11[%c0_24, %c0_25] : memref<1x128xf32, #tpu.memory_space<vmem>>, vector<1x128xf32>
    %cst_26 = arith.constant dense<0.000000e+00> : vector<256x128xf32>
    %25 = tpu.matmul %22, %23, %cst_26 {dimension_numbers = #tpu.dot_dimension_numbers<[1], [0], [0], [1], [0, 0, 1, 1], [], []>} : vector<256x128xf32>, vector<128x128xf32>, vector<256x128xf32> -> vector<256x128xf32>
    %26 = vector.broadcast %24 : vector<1x128xf32> to vector<256x128xf32>
    %27 = arith.addf %25, %26 : vector<256x128xf32>
    %c0_27 = arith.constant 0 : index
    %c0_28 = arith.constant 0 : index
    %28 = vector.load %arg12[%c0_27, %c0_28] : memref<1x128xf32, #tpu.memory_space<vmem>>, vector<1x128xf32>
    %c0_29 = arith.constant 0 : index
    %c0_30 = arith.constant 0 : index
    %29 = vector.load %arg13[%c0_29, %c0_30] : memref<1x128xf32, #tpu.memory_space<vmem>>, vector<1x128xf32>
    %cst_31 = arith.constant dense<0.000000e+00> : vector<256xf32>
    %30 = vector.multi_reduction <add>, %27, %cst_31 [1] : vector<256x128xf32> to vector<256xf32>
    %31 = vector.shape_cast %30 : vector<256xf32> to vector<256x1xf32>
    %32 = arith.mulf %27, %27 : vector<256x128xf32>
    %cst_32 = arith.constant dense<0.000000e+00> : vector<256xf32>
    %33 = vector.multi_reduction <add>, %32, %cst_32 [1] : vector<256x128xf32> to vector<256xf32>
    %34 = vector.shape_cast %33 : vector<256xf32> to vector<256x1xf32>
    %cst_33 = arith.constant 7.812500e-03 : f32
    %35 = vector.broadcast %cst_33 : f32 to vector<256x1xf32>
    %36 = arith.mulf %31, %35 : vector<256x1xf32>
    %cst_34 = arith.constant 7.812500e-03 : f32
    %37 = vector.broadcast %cst_34 : f32 to vector<256x1xf32>
    %38 = arith.mulf %34, %37 : vector<256x1xf32>
    %39 = arith.mulf %36, %36 : vector<256x1xf32>
    %40 = arith.subf %38, %39 : vector<256x1xf32>
    %41 = vector.broadcast %36 : vector<256x1xf32> to vector<256x128xf32>
    %42 = arith.subf %27, %41 : vector<256x128xf32>
    %cst_35 = arith.constant 9.99999974E-6 : f32
    %43 = vector.broadcast %cst_35 : f32 to vector<256x1xf32>
    %44 = arith.addf %40, %43 : vector<256x1xf32>
    %45 = math.rsqrt %44 : vector<256x1xf32>
    %46 = vector.broadcast %45 : vector<256x1xf32> to vector<256x128xf32>
    %47 = arith.mulf %42, %46 : vector<256x128xf32>
    %48 = vector.broadcast %28 : vector<1x128xf32> to vector<256x128xf32>
    %49 = arith.mulf %47, %48 : vector<256x128xf32>
    %50 = vector.broadcast %29 : vector<1x128xf32> to vector<256x128xf32>
    %51 = arith.addf %49, %50 : vector<256x128xf32>
    %c0_36 = arith.constant 0 : index
    %c0_37 = arith.constant 0 : index
    %52 = vector.load %arg14[%c0_36, %c0_37] : memref<256x128xf32, #tpu.memory_space<vmem>>, vector<256x128xf32>
    tpu.vector_store %arg14[%c0_36, %c0_37], %51 {strides = array<i32>} : memref<256x128xf32, #tpu.memory_space<vmem>>, vector<256x128xf32>,
    return
  }
  func.func @transform_0(%arg0: i32) -> (i32, i32) {
    %c0_i32 = arith.constant 0 : i32
    %c0_i32_0 = arith.constant 0 : i32
    return %arg0, %c0_i32 : i32, i32
  }
  func.func @transform_1(%arg0: i32) -> (i32, i32) {
    %c0_i32 = arith.constant 0 : i32
    %c0_i32_0 = arith.constant 0 : i32
    return %arg0, %c0_i32 : i32, i32
  }
  func.func @transform_2(%arg0: i32) -> (i32, i32) {
    %c0_i32 = arith.constant 0 : i32
    %c0_i32_0 = arith.constant 0 : i32
    return %arg0, %c0_i32 : i32, i32
  }
  func.func @transform_3(%arg0: i32) -> (i32, i32) {
    %c0_i32 = arith.constant 0 : i32
    %c0_i32_0 = arith.constant 0 : i32
    %c0_i32_1 = arith.constant 0 : i32
    return %c0_i32, %c0_i32_0 : i32, i32
  }
  func.func @transform_4(%arg0: i32) -> (i32, i32) {
    %c0_i32 = arith.constant 0 : i32
    %c0_i32_0 = arith.constant 0 : i32
    %c0_i32_1 = arith.constant 0 : i32
    return %c0_i32, %c0_i32_0 : i32, i32
  }
  func.func @transform_5(%arg0: i32) -> (i32, i32) {
    %c0_i32 = arith.constant 0 : i32
    %c0_i32_0 = arith.constant 0 : i32
    %c0_i32_1 = arith.constant 0 : i32
    return %c0_i32, %c0_i32_0 : i32, i32
  }
  func.func @transform_6(%arg0: i32) -> (i32, i32) {
    %c0_i32 = arith.constant 0 : i32
    %c0_i32_0 = arith.constant 0 : i32
    %c0_i32_1 = arith.constant 0 : i32
    return %c0_i32, %c0_i32_0 : i32, i32
  }
  func.func @transform_7(%arg0: i32) -> (i32, i32) {
    %c0_i32 = arith.constant 0 : i32
    %c0_i32_0 = arith.constant 0 : i32
    %c0_i32_1 = arith.constant 0 : i32
    return %c0_i32, %c0_i32_0 : i32, i32
  }
  func.func @transform_8(%arg0: i32) -> (i32, i32) {
    %c0_i32 = arith.constant 0 : i32
    %c0_i32_0 = arith.constant 0 : i32
    %c0_i32_1 = arith.constant 0 : i32
    return %c0_i32, %c0_i32_0 : i32, i32
  }
  func.func @transform_9(%arg0: i32) -> (i32, i32) {
    %c0_i32 = arith.constant 0 : i32
    %c0_i32_0 = arith.constant 0 : i32
    %c0_i32_1 = arith.constant 0 : i32
    return %c0_i32, %c0_i32_0 : i32, i32
  }
  func.func @transform_10(%arg0: i32) -> (i32, i32) {
    %c0_i32 = arith.constant 0 : i32
    %c0_i32_0 = arith.constant 0 : i32
    %c0_i32_1 = arith.constant 0 : i32
    return %c0_i32, %c0_i32_0 : i32, i32
  }
  func.func @transform_11(%arg0: i32) -> (i32, i32) {
    %c0_i32 = arith.constant 0 : i32
    %c0_i32_0 = arith.constant 0 : i32
    %c0_i32_1 = arith.constant 0 : i32
    return %c0_i32, %c0_i32_0 : i32, i32
  }
  func.func @transform_12(%arg0: i32) -> (i32, i32) {
    %c0_i32 = arith.constant 0 : i32
    %c0_i32_0 = arith.constant 0 : i32
    %c0_i32_1 = arith.constant 0 : i32
    return %c0_i32, %c0_i32_0 : i32, i32
  }
  func.func @transform_13(%arg0: i32) -> (i32, i32) {
    %c0_i32 = arith.constant 0 : i32
    %c0_i32_0 = arith.constant 0 : i32
    return %arg0, %c0_i32 : i32, i32
  }
}

module attributes {stable_mosaic.version = 11 : i64} {
  func.func @_fused_mlp_kernel(%arg0: i32, %arg1: memref<64x128xf32, #tpu.memory_space<vmem>>, %arg2: memref<64x128xf32, #tpu.memory_space<vmem>>, %arg3: memref<64x128xf32, #tpu.memory_space<vmem>>, %arg4: memref<128x128xf32, #tpu.memory_space<vmem>>, %arg5: memref<128x128xf32, #tpu.memory_space<vmem>>, %arg6: memref<1x128xf32, #tpu.memory_space<vmem>>, %arg7: memref<128x128xf32, #tpu.memory_space<vmem>>, %arg8: memref<1x128xf32, #tpu.memory_space<vmem>>, %arg9: memref<128x128xf32, #tpu.memory_space<vmem>>, %arg10: memref<1x128xf32, #tpu.memory_space<vmem>>, %arg11: memref<1x128xf32, #tpu.memory_space<vmem>>, %arg12: memref<1x128xf32, #tpu.memory_space<vmem>>, %arg13: memref<64x128xf32, #tpu.memory_space<vmem>>) attributes {dimension_semantics = [#tpu.dimension_semantics<parallel>], iteration_bounds = array<i64: 1>, scalar_prefetch = 0 : i64, scratch_operands = 0 : i64, tpu.core_type = #tpu.core_type<tc>, window_params = [{transform_indices = @transform_0, window_bounds = array<i64: 64, 128>}, {transform_indices = @transform_1, window_bounds = array<i64: 64, 128>}, {transform_indices = @transform_2, window_bounds = array<i64: 64, 128>}, {pipeline_mode = #tpu.pipeline_mode<synchronous>, transform_indices = @transform_3, window_bounds = array<i64: 128, 128>}, {pipeline_mode = #tpu.pipeline_mode<synchronous>, transform_indices = @transform_4, window_bounds = array<i64: 128, 128>}, {pipeline_mode = #tpu.pipeline_mode<synchronous>, transform_indices = @transform_5, window_bounds = array<i64: 1, 128>}, {pipeline_mode = #tpu.pipeline_mode<synchronous>, transform_indices = @transform_6, window_bounds = array<i64: 128, 128>}, {pipeline_mode = #tpu.pipeline_mode<synchronous>, transform_indices = @transform_7, window_bounds = array<i64: 1, 128>}, {pipeline_mode = #tpu.pipeline_mode<synchronous>, transform_indices = @transform_8, window_bounds = array<i64: 128, 128>}, {pipeline_mode = #tpu.pipeline_mode<synchronous>, transform_indices = @transform_9, window_bounds = array<i64: 1, 128>}, {pipeline_mode = #tpu.pipeline_mode<synchronous>, transform_indices = @transform_10, window_bounds = array<i64: 1, 128>}, {pipeline_mode = #tpu.pipeline_mode<synchronous>, transform_indices = @transform_11, window_bounds = array<i64: 1, 128>}, {transform_indices = @transform_12, window_bounds = array<i64: 64, 128>}]} {
    %c0 = arith.constant 0 : index
    %c0_0 = arith.constant 0 : index
    %0 = vector.load %arg4[%c0, %c0_0] : memref<128x128xf32, #tpu.memory_space<vmem>>, vector<128x128xf32>
    %c0_1 = arith.constant 0 : index
    %c0_2 = arith.constant 0 : index
    %1 = vector.load %arg1[%c0_1, %c0_2] : memref<64x128xf32, #tpu.memory_space<vmem>>, vector<64x128xf32>
    %cst = arith.constant dense<0.000000e+00> : vector<64x128xf32>
    %2 = tpu.matmul %1, %0, %cst {dimension_numbers = #tpu.dot_dimension_numbers<[1], [0], [0], [1], [0, 0, 1, 1], [], []>} : vector<64x128xf32>, vector<128x128xf32>, vector<64x128xf32> -> vector<64x128xf32>
    %c0_3 = arith.constant 0 : index
    %c0_4 = arith.constant 0 : index
    %3 = vector.load %arg5[%c0_3, %c0_4] : memref<128x128xf32, #tpu.memory_space<vmem>>, vector<128x128xf32>
    %c0_5 = arith.constant 0 : index
    %c0_6 = arith.constant 0 : index
    %4 = vector.load %arg2[%c0_5, %c0_6] : memref<64x128xf32, #tpu.memory_space<vmem>>, vector<64x128xf32>
    %cst_7 = arith.constant dense<0.000000e+00> : vector<64x128xf32>
    %5 = tpu.matmul %4, %3, %cst_7 {dimension_numbers = #tpu.dot_dimension_numbers<[1], [0], [0], [1], [0, 0, 1, 1], [], []>} : vector<64x128xf32>, vector<128x128xf32>, vector<64x128xf32> -> vector<64x128xf32>
    %6 = arith.addf %2, %5 : vector<64x128xf32>
    %c0_8 = arith.constant 0 : index
    %c0_9 = arith.constant 0 : index
    %7 = vector.load %arg6[%c0_8, %c0_9] : memref<1x128xf32, #tpu.memory_space<vmem>>, vector<1x128xf32>
    %8 = vector.broadcast %7 : vector<1x128xf32> to vector<64x128xf32>
    %9 = arith.addf %6, %8 : vector<64x128xf32>
    %cst_10 = arith.constant 0.000000e+00 : f32
    %10 = vector.broadcast %cst_10 : f32 to vector<64x128xf32>
    %11 = arith.maximumf %9, %10 : vector<64x128xf32>
    %c0_11 = arith.constant 0 : index
    %c0_12 = arith.constant 0 : index
    %12 = vector.load %arg7[%c0_11, %c0_12] : memref<128x128xf32, #tpu.memory_space<vmem>>, vector<128x128xf32>
    %c0_13 = arith.constant 0 : index
    %c0_14 = arith.constant 0 : index
    %13 = vector.load %arg8[%c0_13, %c0_14] : memref<1x128xf32, #tpu.memory_space<vmem>>, vector<1x128xf32>
    %cst_15 = arith.constant dense<0.000000e+00> : vector<64x128xf32>
    %14 = tpu.matmul %11, %12, %cst_15 {dimension_numbers = #tpu.dot_dimension_numbers<[1], [0], [0], [1], [0, 0, 1, 1], [], []>} : vector<64x128xf32>, vector<128x128xf32>, vector<64x128xf32> -> vector<64x128xf32>
    %15 = vector.broadcast %13 : vector<1x128xf32> to vector<64x128xf32>
    %16 = arith.addf %14, %15 : vector<64x128xf32>
    %cst_16 = arith.constant 0.000000e+00 : f32
    %17 = vector.broadcast %cst_16 : f32 to vector<64x128xf32>
    %18 = arith.maximumf %16, %17 : vector<64x128xf32>
    %c0_17 = arith.constant 0 : index
    %c0_18 = arith.constant 0 : index
    %19 = vector.load %arg9[%c0_17, %c0_18] : memref<128x128xf32, #tpu.memory_space<vmem>>, vector<128x128xf32>
    %c0_19 = arith.constant 0 : index
    %c0_20 = arith.constant 0 : index
    %20 = vector.load %arg10[%c0_19, %c0_20] : memref<1x128xf32, #tpu.memory_space<vmem>>, vector<1x128xf32>
    %cst_21 = arith.constant dense<0.000000e+00> : vector<64x128xf32>
    %21 = tpu.matmul %18, %19, %cst_21 {dimension_numbers = #tpu.dot_dimension_numbers<[1], [0], [0], [1], [0, 0, 1, 1], [], []>} : vector<64x128xf32>, vector<128x128xf32>, vector<64x128xf32> -> vector<64x128xf32>
    %22 = vector.broadcast %20 : vector<1x128xf32> to vector<64x128xf32>
    %23 = arith.addf %21, %22 : vector<64x128xf32>
    %c0_22 = arith.constant 0 : index
    %c0_23 = arith.constant 0 : index
    %24 = vector.load %arg11[%c0_22, %c0_23] : memref<1x128xf32, #tpu.memory_space<vmem>>, vector<1x128xf32>
    %c0_24 = arith.constant 0 : index
    %c0_25 = arith.constant 0 : index
    %25 = vector.load %arg12[%c0_24, %c0_25] : memref<1x128xf32, #tpu.memory_space<vmem>>, vector<1x128xf32>
    %cst_26 = arith.constant dense<0.000000e+00> : vector<64xf32>
    %26 = vector.multi_reduction <add>, %23, %cst_26 [1] : vector<64x128xf32> to vector<64xf32>
    %27 = vector.shape_cast %26 : vector<64xf32> to vector<64x1xf32>
    %28 = arith.mulf %23, %23 : vector<64x128xf32>
    %cst_27 = arith.constant dense<0.000000e+00> : vector<64xf32>
    %29 = vector.multi_reduction <add>, %28, %cst_27 [1] : vector<64x128xf32> to vector<64xf32>
    %30 = vector.shape_cast %29 : vector<64xf32> to vector<64x1xf32>
    %cst_28 = arith.constant 7.812500e-03 : f32
    %31 = vector.broadcast %cst_28 : f32 to vector<64x1xf32>
    %32 = arith.mulf %27, %31 : vector<64x1xf32>
    %cst_29 = arith.constant 7.812500e-03 : f32
    %33 = vector.broadcast %cst_29 : f32 to vector<64x1xf32>
    %34 = arith.mulf %30, %33 : vector<64x1xf32>
    %35 = arith.mulf %32, %32 : vector<64x1xf32>
    %36 = arith.subf %34, %35 : vector<64x1xf32>
    %37 = vector.broadcast %32 : vector<64x1xf32> to vector<64x128xf32>
    %38 = arith.subf %23, %37 : vector<64x128xf32>
    %cst_30 = arith.constant 9.99999974E-6 : f32
    %39 = vector.broadcast %cst_30 : f32 to vector<64x1xf32>
    %40 = arith.addf %36, %39 : vector<64x1xf32>
    %41 = math.rsqrt %40 : vector<64x1xf32>
    %42 = vector.broadcast %41 : vector<64x1xf32> to vector<64x128xf32>
    %43 = arith.mulf %38, %42 : vector<64x128xf32>
    %44 = vector.broadcast %24 : vector<1x128xf32> to vector<64x128xf32>
    %45 = arith.mulf %43, %44 : vector<64x128xf32>
    %46 = vector.broadcast %25 : vector<1x128xf32> to vector<64x128xf32>
    %47 = arith.addf %45, %46 : vector<64x128xf32>
    %c0_31 = arith.constant 0 : index
    %c0_32 = arith.constant 0 : index
    %48 = vector.load %arg3[%c0_31, %c0_32] : memref<64x128xf32, #tpu.memory_space<vmem>>, vector<64x128xf32>
    %49 = arith.addf %47, %48 : vector<64x128xf32>
    %c0_33 = arith.constant 0 : index
    %c0_34 = arith.constant 0 : index
    %50 = vector.load %arg13[%c0_33, %c0_34] : memref<64x128xf32, #tpu.memory_space<vmem>>, vector<64x128xf32>
    tpu.vector_store %arg13[%c0_33, %c0_34], %49 {strides = array<i32>} : memref<64x128xf32, #tpu.memory_space<vmem>>, vector<64x128xf32>,
    return
  }
  func.func @transform_0(%arg0: i32) -> (i32, i32) {
    %c0_i32 = arith.constant 0 : i32
    %c0_i32_0 = arith.constant 0 : i32
    return %arg0, %c0_i32 : i32, i32
  }
  func.func @transform_1(%arg0: i32) -> (i32, i32) {
    %c0_i32 = arith.constant 0 : i32
    %c0_i32_0 = arith.constant 0 : i32
    return %arg0, %c0_i32 : i32, i32
  }
  func.func @transform_2(%arg0: i32) -> (i32, i32) {
    %c0_i32 = arith.constant 0 : i32
    %c0_i32_0 = arith.constant 0 : i32
    return %arg0, %c0_i32 : i32, i32
  }
  func.func @transform_3(%arg0: i32) -> (i32, i32) {
    %c0_i32 = arith.constant 0 : i32
    %c0_i32_0 = arith.constant 0 : i32
    %c0_i32_1 = arith.constant 0 : i32
    return %c0_i32, %c0_i32_0 : i32, i32
  }
  func.func @transform_4(%arg0: i32) -> (i32, i32) {
    %c0_i32 = arith.constant 0 : i32
    %c0_i32_0 = arith.constant 0 : i32
    %c0_i32_1 = arith.constant 0 : i32
    return %c0_i32, %c0_i32_0 : i32, i32
  }
  func.func @transform_5(%arg0: i32) -> (i32, i32) {
    %c0_i32 = arith.constant 0 : i32
    %c0_i32_0 = arith.constant 0 : i32
    %c0_i32_1 = arith.constant 0 : i32
    return %c0_i32, %c0_i32_0 : i32, i32
  }
  func.func @transform_6(%arg0: i32) -> (i32, i32) {
    %c0_i32 = arith.constant 0 : i32
    %c0_i32_0 = arith.constant 0 : i32
    %c0_i32_1 = arith.constant 0 : i32
    return %c0_i32, %c0_i32_0 : i32, i32
  }
  func.func @transform_7(%arg0: i32) -> (i32, i32) {
    %c0_i32 = arith.constant 0 : i32
    %c0_i32_0 = arith.constant 0 : i32
    %c0_i32_1 = arith.constant 0 : i32
    return %c0_i32, %c0_i32_0 : i32, i32
  }
  func.func @transform_8(%arg0: i32) -> (i32, i32) {
    %c0_i32 = arith.constant 0 : i32
    %c0_i32_0 = arith.constant 0 : i32
    %c0_i32_1 = arith.constant 0 : i32
    return %c0_i32, %c0_i32_0 : i32, i32
  }
  func.func @transform_9(%arg0: i32) -> (i32, i32) {
    %c0_i32 = arith.constant 0 : i32
    %c0_i32_0 = arith.constant 0 : i32
    %c0_i32_1 = arith.constant 0 : i32
    return %c0_i32, %c0_i32_0 : i32, i32
  }
  func.func @transform_10(%arg0: i32) -> (i32, i32) {
    %c0_i32 = arith.constant 0 : i32
    %c0_i32_0 = arith.constant 0 : i32
    %c0_i32_1 = arith.constant 0 : i32
    return %c0_i32, %c0_i32_0 : i32, i32
  }
  func.func @transform_11(%arg0: i32) -> (i32, i32) {
    %c0_i32 = arith.constant 0 : i32
    %c0_i32_0 = arith.constant 0 : i32
    %c0_i32_1 = arith.constant 0 : i32
    return %c0_i32, %c0_i32_0 : i32, i32
  }
  func.func @transform_12(%arg0: i32) -> (i32, i32) {
    %c0_i32 = arith.constant 0 : i32
    %c0_i32_0 = arith.constant 0 : i32
    return %arg0, %c0_i32 : i32, i32
  }
}

module attributes {stable_mosaic.version = 11 : i64} {
  func.func @_fused_mlp_kernel(%arg0: i32, %arg1: memref<64x128xf32, #tpu.memory_space<vmem>>, %arg2: memref<128x128xf32, #tpu.memory_space<vmem>>, %arg3: memref<1x128xf32, #tpu.memory_space<vmem>>, %arg4: memref<128x128xf32, #tpu.memory_space<vmem>>, %arg5: memref<1x128xf32, #tpu.memory_space<vmem>>, %arg6: memref<128x3xf32, #tpu.memory_space<vmem>>, %arg7: memref<1x3xf32, #tpu.memory_space<vmem>>, %arg8: memref<64x3xf32, #tpu.memory_space<vmem>>) attributes {dimension_semantics = [#tpu.dimension_semantics<parallel>], iteration_bounds = array<i64: 1>, scalar_prefetch = 0 : i64, scratch_operands = 0 : i64, tpu.core_type = #tpu.core_type<tc>, window_params = [{transform_indices = @transform_0, window_bounds = array<i64: 64, 128>}, {pipeline_mode = #tpu.pipeline_mode<synchronous>, transform_indices = @transform_1, window_bounds = array<i64: 128, 128>}, {pipeline_mode = #tpu.pipeline_mode<synchronous>, transform_indices = @transform_2, window_bounds = array<i64: 1, 128>}, {pipeline_mode = #tpu.pipeline_mode<synchronous>, transform_indices = @transform_3, window_bounds = array<i64: 128, 128>}, {pipeline_mode = #tpu.pipeline_mode<synchronous>, transform_indices = @transform_4, window_bounds = array<i64: 1, 128>}, {pipeline_mode = #tpu.pipeline_mode<synchronous>, transform_indices = @transform_5, window_bounds = array<i64: 128, 3>}, {pipeline_mode = #tpu.pipeline_mode<synchronous>, transform_indices = @transform_6, window_bounds = array<i64: 1, 3>}, {transform_indices = @transform_7, window_bounds = array<i64: 64, 3>}]} {
    %c0 = arith.constant 0 : index
    %c0_0 = arith.constant 0 : index
    %0 = vector.load %arg2[%c0, %c0_0] : memref<128x128xf32, #tpu.memory_space<vmem>>, vector<128x128xf32>
    %c0_1 = arith.constant 0 : index
    %c0_2 = arith.constant 0 : index
    %1 = vector.load %arg1[%c0_1, %c0_2] : memref<64x128xf32, #tpu.memory_space<vmem>>, vector<64x128xf32>
    %cst = arith.constant dense<0.000000e+00> : vector<64x128xf32>
    %2 = tpu.matmul %1, %0, %cst {dimension_numbers = #tpu.dot_dimension_numbers<[1], [0], [0], [1], [0, 0, 1, 1], [], []>} : vector<64x128xf32>, vector<128x128xf32>, vector<64x128xf32> -> vector<64x128xf32>
    %c0_3 = arith.constant 0 : index
    %c0_4 = arith.constant 0 : index
    %3 = vector.load %arg3[%c0_3, %c0_4] : memref<1x128xf32, #tpu.memory_space<vmem>>, vector<1x128xf32>
    %4 = vector.broadcast %3 : vector<1x128xf32> to vector<64x128xf32>
    %5 = arith.addf %2, %4 : vector<64x128xf32>
    %cst_5 = arith.constant 0.000000e+00 : f32
    %6 = vector.broadcast %cst_5 : f32 to vector<64x128xf32>
    %7 = arith.maximumf %5, %6 : vector<64x128xf32>
    %c0_6 = arith.constant 0 : index
    %c0_7 = arith.constant 0 : index
    %8 = vector.load %arg4[%c0_6, %c0_7] : memref<128x128xf32, #tpu.memory_space<vmem>>, vector<128x128xf32>
    %c0_8 = arith.constant 0 : index
    %c0_9 = arith.constant 0 : index
    %9 = vector.load %arg5[%c0_8, %c0_9] : memref<1x128xf32, #tpu.memory_space<vmem>>, vector<1x128xf32>
    %cst_10 = arith.constant dense<0.000000e+00> : vector<64x128xf32>
    %10 = tpu.matmul %7, %8, %cst_10 {dimension_numbers = #tpu.dot_dimension_numbers<[1], [0], [0], [1], [0, 0, 1, 1], [], []>} : vector<64x128xf32>, vector<128x128xf32>, vector<64x128xf32> -> vector<64x128xf32>
    %11 = vector.broadcast %9 : vector<1x128xf32> to vector<64x128xf32>
    %12 = arith.addf %10, %11 : vector<64x128xf32>
    %cst_11 = arith.constant 0.000000e+00 : f32
    %13 = vector.broadcast %cst_11 : f32 to vector<64x128xf32>
    %14 = arith.maximumf %12, %13 : vector<64x128xf32>
    %c0_12 = arith.constant 0 : index
    %c0_13 = arith.constant 0 : index
    %15 = vector.load %arg6[%c0_12, %c0_13] : memref<128x3xf32, #tpu.memory_space<vmem>>, vector<128x3xf32>
    %c0_14 = arith.constant 0 : index
    %c0_15 = arith.constant 0 : index
    %16 = vector.load %arg7[%c0_14, %c0_15] : memref<1x3xf32, #tpu.memory_space<vmem>>, vector<1x3xf32>
    %cst_16 = arith.constant dense<0.000000e+00> : vector<64x3xf32>
    %17 = tpu.matmul %14, %15, %cst_16 {dimension_numbers = #tpu.dot_dimension_numbers<[1], [0], [0], [1], [0, 0, 1, 1], [], []>} : vector<64x128xf32>, vector<128x3xf32>, vector<64x3xf32> -> vector<64x3xf32>
    %18 = vector.broadcast %16 : vector<1x3xf32> to vector<64x3xf32>
    %19 = arith.addf %17, %18 : vector<64x3xf32>
    %c0_17 = arith.constant 0 : index
    %c0_18 = arith.constant 0 : index
    %20 = vector.load %arg8[%c0_17, %c0_18] : memref<64x3xf32, #tpu.memory_space<vmem>>, vector<64x3xf32>
    tpu.vector_store %arg8[%c0_17, %c0_18], %19 {strides = array<i32>} : memref<64x3xf32, #tpu.memory_space<vmem>>, vector<64x3xf32>,
    return
  }
  func.func @transform_0(%arg0: i32) -> (i32, i32) {
    %c0_i32 = arith.constant 0 : i32
    %c0_i32_0 = arith.constant 0 : i32
    return %arg0, %c0_i32 : i32, i32
  }
  func.func @transform_1(%arg0: i32) -> (i32, i32) {
    %c0_i32 = arith.constant 0 : i32
    %c0_i32_0 = arith.constant 0 : i32
    %c0_i32_1 = arith.constant 0 : i32
    return %c0_i32, %c0_i32_0 : i32, i32
  }
  func.func @transform_2(%arg0: i32) -> (i32, i32) {
    %c0_i32 = arith.constant 0 : i32
    %c0_i32_0 = arith.constant 0 : i32
    %c0_i32_1 = arith.constant 0 : i32
    return %c0_i32, %c0_i32_0 : i32, i32
  }
  func.func @transform_3(%arg0: i32) -> (i32, i32) {
    %c0_i32 = arith.constant 0 : i32
    %c0_i32_0 = arith.constant 0 : i32
    %c0_i32_1 = arith.constant 0 : i32
    return %c0_i32, %c0_i32_0 : i32, i32
  }
  func.func @transform_4(%arg0: i32) -> (i32, i32) {
    %c0_i32 = arith.constant 0 : i32
    %c0_i32_0 = arith.constant 0 : i32
    %c0_i32_1 = arith.constant 0 : i32
    return %c0_i32, %c0_i32_0 : i32, i32
  }
  func.func @transform_5(%arg0: i32) -> (i32, i32) {
    %c0_i32 = arith.constant 0 : i32
    %c0_i32_0 = arith.constant 0 : i32
    %c0_i32_1 = arith.constant 0 : i32
    return %c0_i32, %c0_i32_0 : i32, i32
  }
  func.func @transform_6(%arg0: i32) -> (i32, i32) {
    %c0_i32 = arith.constant 0 : i32
    %c0_i32_0 = arith.constant 0 : i32
    %c0_i32_1 = arith.constant 0 : i32
    return %c0_i32, %c0_i32_0 : i32, i32
  }
  func.func @transform_7(%arg0: i32) -> (i32, i32) {
    %c0_i32 = arith.constant 0 : i32
    %c0_i32_0 = arith.constant 0 : i32
    return %arg0, %c0_i32 : i32, i32
  }
}

</mosaic_0001>

<bundles_post_ra>
// kernel: simulator_forward.9
= control target key start
LH: loop header
LB: loop body
LE: loop exit
PB: predicated region body
PF: predicated region fallthrough
CT: control target
= control target key end

     0   :  { %14 = vsyncpa [#allocation3], 0  ;;  %s573_s12 = smov [#allocation2]   ;;  %s574_s14 = smov 128   ;;  %s844_s0 = inlined_call_operand.vmem [shape: f32[64,6], index: 0, kind: input, shape index: {}]   ;;  %s845_s1 = inlined_call_operand.vmem [shape: f32[6,128], index: 1, kind: input, shape index: {}]   ;;  %s846_s2 = inlined_call_operand.vmem [shape: f32[1,128], index: 2, kind: input, shape index: {}]   ;;  %s847_s3 = inlined_call_operand.vmem [shape: f32[128,128], index: 3, kind: input, shape index: {}]   ;;  %s848_s4 = inlined_call_operand.vmem [shape: f32[1,128], index: 4, kind: input, shape index: {}]   ;;  %s849_s5 = inlined_call_operand.hbm [shape: f32[128,128], index: 5, kind: input, shape index: {}]   ;;  %s850_s6 = inlined_call_operand.vmem [shape: f32[1,128], index: 6, kind: input, shape index: {}]   ;;  %s851_s7 = inlined_call_operand.vmem [shape: f32[1,128], index: 7, kind: input, shape index: {}]   ;;  %s852_s8 = inlined_call_operand.vmem [shape: f32[1,128], index: 8, kind: input, shape index: {}]   ;;  %s853_s9 = inlined_call_operand.vmem [shape: f32[64,128], index: 9, kind: output, shape index: {}]  }
   0x1   :  { %s29_s11 = sshll.u32 %s849_s5, 4  ;;  %s31_s13 = sshll.u32 %s573_s12, 4  ;;  %s30_s11 = int_to_ptr.hbm [resolvable:$true] %s29_s11  ;;  %s32_s13 = int_to_ptr.vmem [resolvable:$true] %s31_s13 }
   0x2   :  { %s575_s15 = smov 8  }
   0x3   :  { %37 = dma.hbm_to_vmem [thread:$0]  %s30_s11, 2048, %s32_s13, [#allocation3], %s574_s14, %s574_s14, %s575_s15  }
   0x4   :  { %571 = dma.done.wait [#allocation3], 2048  }
   0x5   :  { %572 = vsyncadd [#allocation3], 4294965248  ;;  %vm86_vm0 = vcmask 1045504   ;;  %vm61_vm1 = vcmask 48128   ;;  %v48_v0 = vld [vmem:[%s845_s1] sm:$0x3f] }
   0x6   :  { %v49_v1 = vld [vmem:[%s844_s0] sm:$0xff]  ;;  %482 = vmatpush.msk.msra.mxu0 %vm86_vm0, %v48_v0  ;;  %v50_v2 = vld [vmem:[%s844_s0 + $0x8] sm:$0xff]  ;;  %v51_v3 = vld [vmem:[%s844_s0 + $0x10] sm:$0xff] }
   0x7   :  { %483 = vmatmul.msk.f32.vlgmr.msra.gmra.mxu0 %vm61_vm1, %v49_v1  ;;  %v52_v4 = vld [vmem:[%s844_s0 + $0x18] sm:$0xff]  ;;  %v153_v6 = vld [vmem:[%s847_s3 + $0x70] sm:$0xff]  ;;  %v152_v7 = vld [vmem:[%s847_s3 + $0x68] sm:$0xff] }
   0x8   :  { %v154_v5 = vld [vmem:[%s847_s3 + $0x78] sm:$0xff]  ;;  %v151_v8 = vld [vmem:[%s847_s3 + $0x60] sm:$0xff]  ;;  %v149_v11 = vld [vmem:[%s847_s3 + $0x50] sm:$0xff] }
   0x9   :  { %159 = vmatpush.msra.mxu1 %v154_v5  ;;  %491 = vmatpush.msra.mxu3 %v154_v5  ;;  %v53_v9 = vld [vmem:[%s844_s0 + $0x20] sm:$0xff]  ;;  %v150_v10 = vld [vmem:[%s847_s3 + $0x58] sm:$0xff]  ;;  %v148_v12 = vld [vmem:[%s847_s3 + $0x48] sm:$0xff] }
   0xa   :  { %v147_v13 = vld [vmem:[%s847_s3 + $0x40] sm:$0xff]  ;;  %v54_v14 = vld [vmem:[%s844_s0 + $0x28] sm:$0xff]  ;;  %v146_v15 = vld [vmem:[%s847_s3 + $0x38] sm:$0xff] }
   0xb   :  { %160 = vmatpush.msra.mxu1 %v153_v6  ;;  %492 = vmatpush.msra.mxu3 %v153_v6  ;;  %v145_v16 = vld [vmem:[%s847_s3 + $0x30] sm:$0xff]  ;;  %v144_v17 = vld [vmem:[%s847_s3 + $0x28] sm:$0xff]  ;;  %v143_v18 = vld [vmem:[%s847_s3 + $0x20] sm:$0xff] }
   0xc   :  { %v55_v19 = vld [vmem:[%s844_s0 + $0x30] sm:$0xff]  ;;  %v142_v20 = vld [vmem:[%s847_s3 + $0x18] sm:$0xff]  ;;  %v140_v23 = vld [vmem:[%s847_s3 + $0x8] sm:$0xff] }
   0xd   :  { %161 = vmatpush.msra.mxu1 %v152_v7  ;;  %493 = vmatpush.msra.mxu3 %v152_v7  ;;  %v56_v21 = vld [vmem:[%s844_s0 + $0x38] sm:$0xff]  ;;  %v141_v22 = vld [vmem:[%s847_s3 + $0x10] sm:$0xff]  ;;  %v139_v24 = vld [vmem:[%s847_s3] sm:$0xff] }
   0xe   :  { %v715_v25 = vld [vmem:[%s846_s2] ss:$0 sm:$0xff]  ;;  %v223_v38 = vld [vmem:[#allocation2 + $0x78] sm:$0xff]  ;;  %v222_v39 = vld [vmem:[#allocation2 + $0x70] sm:$0xff] }
   0xf   :  { %484 = vmatmul.msk.f32.gmra.mxu0 %vm61_vm1, %v50_v2  ;;  %162 = vmatpush.msra.mxu1 %v151_v8  ;;  %v221_v40 = vld [vmem:[#allocation2 + $0x68] sm:$0xff]  ;;  %v220_v43 = vld [vmem:[#allocation2 + $0x60] sm:$0xff]  ;;  %v219_v45 = vld [vmem:[#allocation2 + $0x58] sm:$0xff] }
  0x10   :  { %494 = vmatpush.msra.mxu3 %v151_v8  ;;  %228 = vmatpush.msra.mxu2 %v223_v38  ;;  %v218_v46 = vld [vmem:[#allocation2 + $0x50] sm:$0xff]  ;;  %v217_v47 = vld [vmem:[#allocation2 + $0x48] sm:$0xff]  ;;  %v216_v50 = vld [vmem:[#allocation2 + $0x40] sm:$0xff] }
  0x11   :  { %163 = vmatpush.msra.mxu1 %v150_v10  ;;  %v215_v52 = vld [vmem:[#allocation2 + $0x38] sm:$0xff]  ;;  %v214_v53 = vld [vmem:[#allocation2 + $0x30] sm:$0xff]  ;;  %v213_v54 = vld [vmem:[#allocation2 + $0x28] sm:$0xff] }
  0x12   :  { %495 = vmatpush.msra.mxu3 %v150_v10  ;;  %229 = vmatpush.msra.mxu2 %v222_v39  ;;  %v212_v57 = vld [vmem:[#allocation2 + $0x20] sm:$0xff]  ;;  %v211_v59 = vld [vmem:[#allocation2 + $0x18] sm:$0xff]  ;;  %v210_v63 = vld [vmem:[#allocation2 + $0x10] sm:$0xff] }
  0x13   :  { %164 = vmatpush.msra.mxu1 %v149_v11  ;;  %v209_v0 = vld [vmem:[#allocation2 + $0x8] sm:$0xff]  ;;  %v208_v1 = vld [vmem:[#allocation2] sm:$0xff] }
  0x14   :  { %496 = vmatpush.msra.mxu3 %v149_v11  ;;  %230 = vmatpush.msra.mxu2 %v221_v40  ;;  %v527_v2 = vld [vmem:[%s848_s4] ss:$0 sm:$0xff] }
  0x15   :  { %165 = vmatpush.msra.mxu1 %v148_v12 }
  0x16   :  { %497 = vmatpush.msra.mxu3 %v148_v12  ;;  %231 = vmatpush.msra.mxu2 %v220_v43 }
  0x17   :  { %485 = vmatmul.msk.f32.gmra.mxu0 %vm61_vm1, %v51_v3  ;;  %166 = vmatpush.msra.mxu1 %v147_v13 }
  0x18   :  { %498 = vmatpush.msra.mxu3 %v147_v13  ;;  %232 = vmatpush.msra.mxu2 %v219_v45 }
  0x19   :  { %167 = vmatpush.msra.mxu1 %v146_v15 }
  0x1a   :  { %499 = vmatpush.msra.mxu3 %v146_v15  ;;  %233 = vmatpush.msra.mxu2 %v218_v46 }
  0x1b   :  { %168 = vmatpush.msra.mxu1 %v145_v16 }
  0x1c   :  { %500 = vmatpush.msra.mxu3 %v145_v16  ;;  %234 = vmatpush.msra.mxu2 %v217_v47 }
  0x1d   :  { %169 = vmatpush.msra.mxu1 %v144_v17 }
  0x1e   :  { %501 = vmatpush.msra.mxu3 %v144_v17  ;;  %235 = vmatpush.msra.mxu2 %v216_v50 }
  0x1f   :  { %486 = vmatmul.msk.f32.gmra.mxu0 %vm61_vm1, %v52_v4  ;;  %170 = vmatpush.msra.mxu1 %v143_v18 }
  0x20   :  { %502 = vmatpush.msra.mxu3 %v143_v18  ;;  %236 = vmatpush.msra.mxu2 %v215_v52 }
  0x21   :  { %171 = vmatpush.msra.mxu1 %v142_v20 }
  0x22   :  { %503 = vmatpush.msra.mxu3 %v142_v20  ;;  %237 = vmatpush.msra.mxu2 %v214_v53 }
  0x23   :  { %172 = vmatpush.msra.mxu1 %v141_v22 }
  0x24   :  { %504 = vmatpush.msra.mxu3 %v141_v22  ;;  %238 = vmatpush.msra.mxu2 %v213_v54 }
  0x25   :  { %173 = vmatpush.msra.mxu1 %v140_v23 }
  0x26   :  { %505 = vmatpush.msra.mxu3 %v140_v23  ;;  %239 = vmatpush.msra.mxu2 %v212_v57 }
  0x27   :  { %487 = vmatmul.msk.f32.gmra.mxu0 %vm61_vm1, %v53_v9  ;;  %174 = vmatpush.msra.mxu1 %v139_v24 }
  0x28   :  { %506 = vmatpush.msra.mxu3 %v139_v24  ;;  %240 = vmatpush.msra.mxu2 %v211_v59 }
  0x2a   :  { %507 = vmatpush.msrb.mxu3 %v223_v38  ;;  %241 = vmatpush.msra.mxu2 %v210_v63 }
  0x2c   :  { %508 = vmatpush.msrb.mxu3 %v222_v39  ;;  %242 = vmatpush.msra.mxu2 %v209_v0 }
  0x2e   :  { %509 = vmatpush.msrb.mxu3 %v221_v40  ;;  %243 = vmatpush.msra.mxu2 %v208_v1 }
  0x2f   :  { %488 = vmatmul.msk.f32.gmra.mxu0 %vm61_vm1, %v54_v14 }
  0x30   :  { %510 = vmatpush.msrb.mxu3 %v220_v43 }
  0x32   :  { %511 = vmatpush.msrb.mxu3 %v219_v45 }
  0x34   :  { %512 = vmatpush.msrb.mxu3 %v218_v46 }
  0x36   :  { %513 = vmatpush.msrb.mxu3 %v217_v47 }
  0x37   :  { %489 = vmatmul.msk.f32.gmra.mxu0 %vm61_vm1, %v55_v19 }
  0x38   :  { %514 = vmatpush.msrb.mxu3 %v216_v50 }
  0x3a   :  { %515 = vmatpush.msrb.mxu3 %v215_v52 }
  0x3c   :  { %516 = vmatpush.msrb.mxu3 %v214_v53 }
  0x3e   :  { %517 = vmatpush.msrb.mxu3 %v213_v54 }
  0x3f   :  { %490 = vmatmul.msk.f32.gmra.mxu0 %vm61_vm1, %v56_v21 }
  0x40   :  { %518 = vmatpush.msrb.mxu3 %v212_v57 }
  0x42   :  { %519 = vmatpush.msrb.mxu3 %v211_v59 }
  0x44   :  { %520 = vmatpush.msrb.mxu3 %v210_v63 }
  0x46   :  { %521 = vmatpush.msrb.mxu3 %v209_v0 }
  0x48   :  { %522 = vmatpush.msrb.mxu3 %v208_v1 }
  0x84   :  { %v107_v26 = vpop.f32.mrf.mxu0 }
  0x85   :  { %v108_v27 = vadd.f32 %v715_v25, %v107_v26 }
  0x87   :  { %v131_v28 = vmax.f32 %v108_v27, 0.0  ;;  %v528_v27 = vld [vmem:[%s850_s6] ss:$0 sm:$0xff] }
  0x89   :  { %175 = vmatmul.f32.vlgmr.msra.gmra.mxu1 %v131_v28 }
  0x8c   :  { %v110_v29 = vpop.f32.mrf.mxu0 }
  0x8d   :  { %v111_v30 = vadd.f32 %v715_v25, %v110_v29 }
  0x8f   :  { %v132_v31 = vmax.f32 %v111_v30, 0.0 }
  0x91   :  { %178 = vmatmul.f32.gmra.mxu1 %v132_v31 }
  0x94   :  { %v113_v32 = vpop.f32.mrf.mxu0 }
  0x95   :  { %v114_v33 = vadd.f32 %v715_v25, %v113_v32 }
  0x97   :  { %v133_v34 = vmax.f32 %v114_v33, 0.0 }
  0x99   :  { %181 = vmatmul.f32.gmra.mxu1 %v133_v34 }
  0x9c   :  { %v116_v35 = vpop.f32.mrf.mxu0 }
  0x9d   :  { %v117_v36 = vadd.f32 %v715_v25, %v116_v35 }
  0x9f   :  { %v134_v37 = vmax.f32 %v117_v36, 0.0 }
  0xa1   :  { %184 = vmatmul.f32.gmra.mxu1 %v134_v37 }
  0xa4   :  { %v119_v41 = vpop.f32.mrf.mxu0 }
  0xa5   :  { %v120_v42 = vadd.f32 %v715_v25, %v119_v41 }
  0xa7   :  { %v135_v44 = vmax.f32 %v120_v42, 0.0 }
  0xa9   :  { %187 = vmatmul.f32.gmra.mxu1 %v135_v44 }
  0xac   :  { %v122_v48 = vpop.f32.mrf.mxu0 }
  0xad   :  { %v123_v49 = vadd.f32 %v715_v25, %v122_v48 }
  0xaf   :  { %v136_v51 = vmax.f32 %v123_v49, 0.0 }
  0xb1   :  { %190 = vmatmul.f32.vlgmr.msra.gmra.mxu3 %v136_v51 }
  0xb4   :  { %v125_v55 = vpop.f32.mrf.mxu0 }
  0xb5   :  { %v126_v56 = vadd.f32 %v715_v25, %v125_v55 }
  0xb7   :  { %v137_v58 = vmax.f32 %v126_v56, 0.0 }
  0xb9   :  { %193 = vmatmul.f32.gmra.mxu3 %v137_v58 }
  0xbc   :  { %v128_v60 = vpop.f32.mrf.mxu0 }
  0xbd   :  { %v129_v61 = vadd.f32 %v715_v25, %v128_v60 }
  0xbf   :  { %v138_v62 = vmax.f32 %v129_v61, 0.0 }
  0xc1   :  { %196 = vmatmul.f32.gmra.mxu3 %v138_v62 }
 0x106   :  { %v176_v3 = vpop.f32.mrf.mxu1 }
 0x107   :  { %v177_v4 = vadd.f32 %v527_v2, %v176_v3 }
 0x109   :  { %v200_v5 = vmax.f32 %v177_v4, 0.0 }
 0x10b   :  { %244 = vmatmul.f32.vlgmr.msra.gmra.mxu2 %v200_v5 }
 0x10e   :  { %v179_v6 = vpop.f32.mrf.mxu1 }
 0x10f   :  { %v180_v7 = vadd.f32 %v527_v2, %v179_v6 }
 0x111   :  { %v201_v8 = vmax.f32 %v180_v7, 0.0 }
 0x113   :  { %247 = vmatmul.f32.gmra.mxu2 %v201_v8 }
 0x116   :  { %v182_v9 = vpop.f32.mrf.mxu1 }
 0x117   :  { %v183_v10 = vadd.f32 %v527_v2, %v182_v9 }
 0x119   :  { %v202_v11 = vmax.f32 %v183_v10, 0.0 }
 0x11b   :  { %250 = vmatmul.f32.gmra.mxu2 %v202_v11 }
 0x11e   :  { %v185_v12 = vpop.f32.mrf.mxu1 }
 0x11f   :  { %v186_v13 = vadd.f32 %v527_v2, %v185_v12  ;;  %v777_v12 = vld [vmem:[%s851_s7] ss:$0 sm:$0xff] }
 0x121   :  { %v203_v14 = vmax.f32 %v186_v13, 0.0 }
 0x123   :  { %253 = vmatmul.f32.gmra.mxu2 %v203_v14 }
 0x126   :  { %v188_v15 = vpop.f32.mrf.mxu1 }
 0x127   :  { %v189_v16 = vadd.f32 %v527_v2, %v188_v15 }
 0x129   :  { %v204_v17 = vmax.f32 %v189_v16, 0.0 }
 0x12b   :  { %256 = vmatmul.f32.gmra.mxu2 %v204_v17  ;;  %v784_v17 = vld [vmem:[%s852_s8] ss:$0 sm:$0xff] }
 0x134   :  { %v191_v18 = vpop.f32.mrf.mxu3 }
 0x135   :  { %v192_v19 = vadd.f32 %v527_v2, %v191_v18 }
 0x137   :  { %v205_v20 = vmax.f32 %v192_v19, 0.0 }
 0x139   :  { %259 = vmatmul.f32.gmra.mxu2 %v205_v20 }
 0x13c   :  { %v194_v21 = vpop.f32.mrf.mxu3 }
 0x13d   :  { %v195_v22 = vadd.f32 %v527_v2, %v194_v21 }
 0x13f   :  { %v206_v23 = vmax.f32 %v195_v22, 0.0 }
 0x141   :  { %262 = vmatmul.f32.vlgmr.msrb.gmra.mxu3 %v206_v23 }
 0x144   :  { %v197_v24 = vpop.f32.mrf.mxu3 }
 0x145   :  { %v198_v25 = vadd.f32 %v527_v2, %v197_v24 }
 0x147   :  { %v207_v26 = vmax.f32 %v198_v25, 0.0 }
 0x149   :  { %265 = vmatmul.f32.gmra.mxu3 %v207_v26 }
 0x18e   :  { %v245_v28 = vpop.f32.mrf.mxu2 }
 0x18f   :  { %v731_v29 = vadd.f32 %v528_v27, %v245_v28 }
 0x191   :  { %271 = vadd.xlane.f32.xlu0 %v731_v29  ;;  %v287_v30 = vmul.f32 %v731_v29, %v731_v29 }
 0x193   :  { %295 = vadd.xlane.f32.xlu2 %v287_v30 }
 0x196   :  { %v248_v31 = vpop.f32.mrf.mxu2 }
 0x197   :  { %v736_v32 = vadd.f32 %v528_v27, %v248_v31 }
 0x199   :  { %273 = vadd.xlane.f32.xlu0 %v736_v32  ;;  %v288_v35 = vmul.f32 %v736_v32, %v736_v32 }
 0x19e   :  { %v251_v33 = vpop.f32.mrf.mxu2 }
 0x19f   :  { %v739_v34 = vadd.f32 %v528_v27, %v251_v33 }
 0x1a1   :  { %275 = vadd.xlane.f32.xlu1 %v739_v34  ;;  %297 = vadd.xlane.f32.xlu0 %v288_v35  ;;  %v289_v38 = vmul.f32 %v739_v34, %v739_v34 }
 0x1a6   :  { %v254_v36 = vpop.f32.mrf.mxu2 }
 0x1a7   :  { %v744_v37 = vadd.f32 %v528_v27, %v254_v36 }
 0x1a9   :  { %299 = vadd.xlane.f32.xlu1 %v289_v38  ;;  %v290_v39 = vmul.f32 %v744_v37, %v744_v37 }
 0x1ab   :  { %301 = vadd.xlane.f32.xlu2 %v290_v39 }
 0x1ae   :  { %v257_v40 = vpop.f32.mrf.mxu2 }
 0x1af   :  { %v750_v41 = vadd.f32 %v528_v27, %v257_v40 }
 0x1b1   :  { %277 = vadd.xlane.f32.xlu1 %v744_v37  ;;  %v291_v42 = vmul.f32 %v750_v41, %v750_v41 }
 0x1b3   :  { %303 = vadd.xlane.f32.xlu0 %v291_v42  ;;  %279 = vadd.xlane.f32.xlu2 %v750_v41 }
 0x1bc   :  { %v260_v43 = vpop.f32.mrf.mxu2 }
 0x1bd   :  { %v756_v44 = vadd.f32 %v528_v27, %v260_v43 }
 0x1bf   :  { %281 = vadd.xlane.f32.xlu2 %v756_v44  ;;  %v292_v51 = vmul.f32 %v756_v44, %v756_v44 }
 0x1c4   :  { %v263_v45 = vpop.f32.mrf.mxu3 }
 0x1c5   :  { %v759_v46 = vadd.f32 %v528_v27, %v263_v45 }
 0x1c7   :  { %283 = vadd.xlane.f32.xlu0 %v759_v46  ;;  %v293_v47 = vmul.f32 %v759_v46, %v759_v46 }
 0x1c9   :  { %307 = vadd.xlane.f32.xlu2 %v293_v47 }
 0x1cc   :  { %v266_v48 = vpop.f32.mrf.mxu3 }
 0x1cd   :  { %v764_v49 = vadd.f32 %v528_v27, %v266_v48 }
 0x1cf   :  { %285 = vadd.xlane.f32.xlu1 %v764_v49  ;;  %v294_v50 = vmul.f32 %v764_v49, %v764_v49 }
 0x1d1   :  { %309 = vadd.xlane.f32.xlu0 %v294_v50 }
 0x1d7   :  { %305 = vadd.xlane.f32.xlu1 %v292_v51 }
 0x204   :  { %v272_v52 = vpop.xlane.xlu0 %271 }
 0x205   :  { %v311_v53 = vmul.f32 0.0078125, %v272_v52 }
 0x206   :  { %v296_v54 = vpop.xlane.xlu2 %295 }
 0x207   :  { %v327_v55 = vmul.f32 %v311_v53, %v311_v53  ;;  %v319_v56 = vmul.f32 0.0078125, %v296_v54  ;;  %v343_v11 = vsub.f32 %v731_v29, %v311_v53 }
 0x209   :  { %v335_v57 = vsub.f32 %v319_v56, %v327_v55 }
 0x20b   :  { %v351_v58 = vadd.f32 1e-05, %v335_v57 }
 0x20c   :  { %v274_v59 = vpop.xlane.xlu0 %273 }
 0x20d   :  { %531 = vrsqrt.f32 %v351_v58  ;;  %v312_v60 = vmul.f32 0.0078125, %v274_v59  ;;  %vm365_vm3 = vweird.f32 %v351_v58 }
 0x20f   :  { %v328_v1 = vmul.f32 %v312_v60, %v312_v60  ;;  %v344_v47 = vsub.f32 %v736_v32, %v312_v60 }
 0x213   :  { %v532_v61 = vpop.eup %531 }
 0x214   :  { %v360_v62 = vmul.f32 %v532_v61, %v351_v58  ;;  %v276_v63 = vpop.xlane.xlu1 %275  ;;  %v298_v0 = vpop.xlane.xlu0 %297  ;;  %vm366_vm2 = vweird.f32 %v532_v61 }
 0x215   :  { %v320_v2 = vmul.f32 0.0078125, %v298_v0  ;;  %v771_v6 = vmul.f32 0.0078125, %v276_v63  ;;  %vm367_vm4 = vmor %vm365_vm3, %vm366_vm2 }
 0x216   :  { %v361_v3 = vmul.f32 %v532_v61, %v360_v62 }
 0x217   :  { %v336_v4 = vsub.f32 %v320_v2, %v328_v1  ;;  %v329_v13 = vmul.f32 %v771_v6, %v771_v6  ;;  %v345_v32 = vsub.f32 %v739_v34, %v771_v6 }
 0x218   :  { %v362_v5 = vmul.f32 0.5, %v361_v3 }
 0x219   :  { %v352_v7 = vadd.f32 1e-05, %v336_v4 }
 0x21a   :  { %v363_v8 = vsub.f32 1.5, %v362_v5 }
 0x21b   :  { %533 = vrsqrt.f32 %v352_v7  ;;  %vm375_vm6 = vweird.f32 %v352_v7 }
 0x21c   :  { %v364_v9 = vmul.f32 %v532_v61, %v363_v8  ;;  %v300_v10 = vpop.xlane.xlu1 %299 }
 0x21d   :  { %v321_v14 = vmul.f32 0.0078125, %v300_v10 }
 0x21e   :  { %v368_v15 = vsel %vm367_vm4, %v532_v61, %v364_v9  ;;  %v302_v16 = vpop.xlane.xlu2 %301 }
 0x21f   :  { %v439_v18 = vmul.f32 %v368_v15, %v343_v11  ;;  %v337_v19 = vsub.f32 %v321_v14, %v329_v13  ;;  %v322_v31 = vmul.f32 0.0078125, %v302_v16 }
 0x221   :  { %v534_v20 = vpop.eup %533  ;;  %v450_v21 = vmul.f32 %v777_v12, %v439_v18  ;;  %v353_v22 = vadd.f32 1e-05, %v337_v19 }
 0x222   :  { %v370_v23 = vmul.f32 %v534_v20, %v352_v7  ;;  %vm376_vm5 = vweird.f32 %v534_v20 }
 0x223   :  { %v461_v24 = vadd.f32 %v784_v17, %v450_v21  ;;  %535 = vrsqrt.f32 %v353_v22  ;;  %vm377_vm7 = vmor %vm375_vm6, %vm376_vm5  ;;  %vm385_vm9 = vweird.f32 %v353_v22 }
 0x224   :  { %v371_v25 = vmul.f32 %v534_v20, %v370_v23  ;;  %v278_v26 = vpop.xlane.xlu1 %277 }
 0x225   :  { %469 = vst [vmem:[%s853_s9] sm:$0xff] %v461_v24  ;;  %v791_v27 = vmul.f32 0.0078125, %v278_v26 }
 0x226   :  { %v372_v28 = vmul.f32 0.5, %v371_v25  ;;  %v304_v29 = vpop.xlane.xlu0 %303  ;;  %v280_v30 = vpop.xlane.xlu2 %279 }
 0x227   :  { %v330_v33 = vmul.f32 %v791_v27, %v791_v27  ;;  %v795_v35 = vmul.f32 0.0078125, %v280_v30  ;;  %v323_v40 = vmul.f32 0.0078125, %v304_v29  ;;  %v346_v15 = vsub.f32 %v744_v37, %v791_v27 }
 0x228   :  { %v373_v36 = vsub.f32 1.5, %v372_v28 }
 0x229   :  { %v536_v38 = vpop.eup %535  ;;  %v338_v39 = vsub.f32 %v322_v31, %v330_v33  ;;  %v331_v42 = vmul.f32 %v795_v35, %v795_v35 }
 0x22a   :  { %v374_v43 = vmul.f32 %v534_v20, %v373_v36  ;;  %v380_v45 = vmul.f32 %v536_v38, %v353_v22  ;;  %vm386_vm8 = vweird.f32 %v536_v38  ;;  %v347_v22 = vsub.f32 %v750_v41, %v795_v35 }
 0x22b   :  { %v354_v48 = vadd.f32 1e-05, %v338_v39  ;;  %v339_v50 = vsub.f32 %v323_v40, %v331_v42  ;;  %vm387_vm10 = vmor %vm385_vm9, %vm386_vm8 }
 0x22c   :  { %v378_v51 = vsel %vm377_vm7, %v534_v20, %v374_v43  ;;  %v381_v52 = vmul.f32 %v536_v38, %v380_v45 }
 0x22d   :  { %v440_v53 = vmul.f32 %v378_v51, %v344_v47  ;;  %537 = vrsqrt.f32 %v354_v48  ;;  %v355_v54 = vadd.f32 1e-05, %v339_v50  ;;  %vm395_vm12 = vweird.f32 %v354_v48 }
 0x22e   :  { %v382_v55 = vmul.f32 0.5, %v381_v52 }
 0x22f   :  { %v451_v56 = vmul.f32 %v777_v12, %v440_v53  ;;  %539 = vrsqrt.f32 %v355_v54  ;;  %vm405_vm15 = vweird.f32 %v355_v54 }
 0x230   :  { %v383_v57 = vsub.f32 1.5, %v382_v55 }
 0x231   :  { %v462_v58 = vadd.f32 %v784_v17, %v451_v56 }
 0x232   :  { %v384_v59 = vmul.f32 %v536_v38, %v383_v57  ;;  %v282_v63 = vpop.xlane.xlu2 %281 }
 0x233   :  { %v538_v61 = vpop.eup %537  ;;  %470 = vst [vmem:[%s853_s9 + $0x8] sm:$0xff] %v462_v58  ;;  %v316_v36 = vmul.f32 0.0078125, %v282_v63 }
 0x234   :  { %v388_v60 = vsel %vm387_vm10, %v536_v38, %v384_v59  ;;  %v390_v62 = vmul.f32 %v538_v61, %v354_v48  ;;  %vm396_vm11 = vweird.f32 %v538_v61 }
 0x235   :  { %v540_v0 = vpop.eup %539  ;;  %v441_v1 = vmul.f32 %v388_v60, %v345_v32  ;;  %vm397_vm14 = vmor %vm395_vm12, %vm396_vm11  ;;  %v332_v45 = vmul.f32 %v316_v36, %v316_v36 }
 0x236   :  { %v391_v2 = vmul.f32 %v538_v61, %v390_v62  ;;  %v400_v3 = vmul.f32 %v540_v0, %v355_v54  ;;  %vm406_vm13 = vweird.f32 %v540_v0 }
 0x237   :  { %v452_v4 = vmul.f32 %v777_v12, %v441_v1  ;;  %vm407_vm0 = vmor %vm405_vm15, %vm406_vm13 }
 0x238   :  { %v392_v5 = vmul.f32 0.5, %v391_v2  ;;  %v401_v7 = vmul.f32 %v540_v0, %v400_v3 }
 0x239   :  { %v463_v8 = vadd.f32 %v784_v17, %v452_v4 }
 0x23a   :  { %v393_v9 = vsub.f32 1.5, %v392_v5  ;;  %v402_v34 = vmul.f32 0.5, %v401_v7  ;;  %v284_v6 = vpop.xlane.xlu0 %283 }
 0x23b   :  { %471 = vst [vmem:[%s853_s9 + $0x10] sm:$0xff] %v463_v8  ;;  %v317_v10 = vmul.f32 0.0078125, %v284_v6  ;;  %v348_v6 = vsub.f32 %v756_v44, %v316_v36 }
 0x23c   :  { %v394_v11 = vmul.f32 %v538_v61, %v393_v9  ;;  %v403_v13 = vsub.f32 1.5, %v402_v34  ;;  %v308_v14 = vpop.xlane.xlu2 %307 }
 0x23d   :  { %v333_v16 = vmul.f32 %v317_v10, %v317_v10  ;;  %v325_v18 = vmul.f32 0.0078125, %v308_v14  ;;  %v349_v56 = vsub.f32 %v759_v46, %v317_v10 }
 0x23e   :  { %v398_v19 = vsel %vm397_vm14, %v538_v61, %v394_v11  ;;  %v404_v20 = vmul.f32 %v540_v0, %v403_v13 }
 0x23f   :  { %v442_v21 = vmul.f32 %v398_v19, %v346_v15  ;;  %v341_v23 = vsub.f32 %v325_v18, %v333_v16 }
 0x240   :  { %v408_v24 = vsel %vm407_vm0, %v540_v0, %v404_v20 }
 0x241   :  { %v453_v25 = vmul.f32 %v777_v12, %v442_v21  ;;  %v443_v26 = vmul.f32 %v408_v24, %v347_v22  ;;  %v357_v28 = vadd.f32 1e-05, %v341_v23 }
 0x242   :  { %v286_v29 = vpop.xlane.xlu1 %285 }
 0x243   :  { %v464_v37 = vadd.f32 %v784_v17, %v453_v25  ;;  %v454_v27 = vmul.f32 %v777_v12, %v443_v26  ;;  %541 = vrsqrt.f32 %v357_v28  ;;  %v318_v30 = vmul.f32 0.0078125, %v286_v29 }
 0x244   :  { %v310_v31 = vpop.xlane.xlu0 %309  ;;  %vm425_vm2 = vweird.f32 %v357_v28 }
 0x245   :  { %472 = vst [vmem:[%s853_s9 + $0x18] sm:$0xff] %v464_v37  ;;  %v465_v41 = vadd.f32 %v784_v17, %v454_v27  ;;  %v326_v33 = vmul.f32 0.0078125, %v310_v31  ;;  %v334_v35 = vmul.f32 %v318_v30, %v318_v30  ;;  %v350_v3 = vsub.f32 %v764_v49, %v318_v30 }
 0x247   :  { %473 = vst [vmem:[%s853_s9 + $0x20] sm:$0xff] %v465_v41  ;;  %v342_v38 = vsub.f32 %v326_v33, %v334_v35 }
 0x249   :  { %v542_v39 = vpop.eup %541  ;;  %v358_v42 = vadd.f32 1e-05, %v342_v38 }
 0x24a   :  { %v420_v40 = vmul.f32 %v542_v39, %v357_v28  ;;  %v306_v43 = vpop.xlane.xlu1 %305  ;;  %vm426_vm1 = vweird.f32 %v542_v39 }
 0x24b   :  { %v324_v47 = vmul.f32 0.0078125, %v306_v43  ;;  %543 = vrsqrt.f32 %v358_v42  ;;  %vm427_vm3 = vmor %vm425_vm2, %vm426_vm1  ;;  %vm435_vm5 = vweird.f32 %v358_v42 }
 0x24c   :  { %v421_v48 = vmul.f32 %v542_v39, %v420_v40 }
 0x24d   :  { %v340_v50 = vsub.f32 %v324_v47, %v332_v45 }
 0x24e   :  { %v422_v51 = vmul.f32 0.5, %v421_v48 }
 0x24f   :  { %v356_v52 = vadd.f32 1e-05, %v340_v50 }
 0x250   :  { %v423_v53 = vsub.f32 1.5, %v422_v51 }
 0x251   :  { %545 = vrsqrt.f32 %v356_v52  ;;  %v544_v54 = vpop.eup %543  ;;  %vm415_vm8 = vweird.f32 %v356_v52 }
 0x252   :  { %v424_v55 = vmul.f32 %v542_v39, %v423_v53  ;;  %v430_v57 = vmul.f32 %v544_v54, %v358_v42  ;;  %vm436_vm4 = vweird.f32 %v544_v54 }
 0x253   :  { %vm437_vm6 = vmor %vm435_vm5, %vm436_vm4 }
 0x254   :  { %v428_v58 = vsel %vm427_vm3, %v542_v39, %v424_v55  ;;  %v431_v61 = vmul.f32 %v544_v54, %v430_v57 }
 0x255   :  { %v445_v59 = vmul.f32 %v428_v58, %v349_v56 }
 0x256   :  { %v432_v62 = vmul.f32 0.5, %v431_v61 }
 0x257   :  { %v546_v32 = vpop.eup %545  ;;  %v456_v60 = vmul.f32 %v777_v12, %v445_v59 }
 0x258   :  { %v410_v63 = vmul.f32 %v546_v32, %v356_v52  ;;  %v433_v1 = vsub.f32 1.5, %v432_v62  ;;  %vm416_vm7 = vweird.f32 %v546_v32 }
 0x259   :  { %v467_v0 = vadd.f32 %v784_v17, %v456_v60  ;;  %vm417_vm9 = vmor %vm415_vm8, %vm416_vm7 }
 0x25a   :  { %v411_v2 = vmul.f32 %v546_v32, %v410_v63  ;;  %v434_v46 = vmul.f32 %v544_v54, %v433_v1 }
 0x25b   :  { %475 = vst [vmem:[%s853_s9 + $0x30] sm:$0xff] %v467_v0 }
 0x25c   :  { %v412_v4 = vmul.f32 0.5, %v411_v2  ;;  %v438_v5 = vsel %vm437_vm6, %v544_v54, %v434_v46 }
 0x25d   :  { %v446_v7 = vmul.f32 %v438_v5, %v350_v3 }
 0x25e   :  { %v413_v8 = vsub.f32 1.5, %v412_v4 }
 0x25f   :  { %v457_v9 = vmul.f32 %v777_v12, %v446_v7 }
 0x260   :  { %v414_v34 = vmul.f32 %v546_v32, %v413_v8 }
 0x261   :  { %v468_v10 = vadd.f32 %v784_v17, %v457_v9 }
 0x262   :  { %v418_v11 = vsel %vm417_vm9, %v546_v32, %v414_v34 }
 0x263   :  { %v444_v13 = vmul.f32 %v418_v11, %v348_v6  ;;  %476 = vst [vmem:[%s853_s9 + $0x38] sm:$0xff] %v468_v10 }
 0x265   :  { %v455_v49 = vmul.f32 %v777_v12, %v444_v13 }
 0x267   :  { %v466_v14 = vadd.f32 %v784_v17, %v455_v49 }
 0x269   :  { %474 = vst [vmem:[%s853_s9 + $0x28] sm:$0xff] %v466_v14 }
 0x26a   :  { %481 = vsyncpa [#allocation3], 1 }

// kernel: simulator_forward.10
= control target key start
LH: loop header
LB: loop body
LE: loop exit
PB: predicated region body
PF: predicated region fallthrough
CT: control target
= control target key end

     0   :  { %vm166_vm0 = vcmask 1043456   ;;  %vm69_vm1 = vcmask 31744   ;;  %s2524_s1 = inlined_call_operand.vmem [shape: f32[4,128], index: 1, kind: input, shape index: {}]   ;;  %s2525_s0 = inlined_call_operand.vmem [shape: f32[256,4], index: 0, kind: input, shape index: {}]   ;;  %s2526_s2 = inlined_call_operand.vmem [shape: f32[1,128], index: 2, kind: input, shape index: {}]   ;;  %s2527_s3 = inlined_call_operand.vmem [shape: f32[128,128], index: 3, kind: input, shape index: {}]   ;;  %s2528_s4 = inlined_call_operand.vmem [shape: f32[1,128], index: 4, kind: input, shape index: {}]   ;;  %s2529_s5 = inlined_call_operand.vmem [shape: f32[128,128], index: 5, kind: input, shape index: {}]   ;;  %s2530_s6 = inlined_call_operand.vmem [shape: f32[1,128], index: 6, kind: input, shape index: {}]   ;;  %s2531_s7 = inlined_call_operand.vmem [shape: f32[1,128], index: 7, kind: input, shape index: {}]   ;;  %s2532_s8 = inlined_call_operand.vmem [shape: f32[1,128], index: 8, kind: input, shape index: {}]   ;;  %s2533_s9 = inlined_call_operand.vmem [shape: f32[256,128], index: 9, kind: output, shape index: {}]  }
   0x1   :  { %v32_v0 = vld [vmem:[%s2524_s1] sm:$0xf]  ;;  %v34_v2 = vld [vmem:[%s2525_s0 + $0x8] sm:$0xff]  ;;  %v35_v3 = vld [vmem:[%s2525_s0 + $0x10] sm:$0xff] }
   0x2   :  { %v33_v1 = vld [vmem:[%s2525_s0] sm:$0xff]  ;;  %1425 = vmatpush.msk.msra.mxu0 %vm166_vm0, %v32_v0  ;;  %1458 = vmatpush.msk.msra.mxu3 %vm166_vm0, %v32_v0  ;;  %v36_v4 = vld [vmem:[%s2525_s0 + $0x18] sm:$0xff]  ;;  %v38_v6 = vld [vmem:[%s2525_s0 + $0x28] sm:$0xff] }
   0x3   :  { %1426 = vmatmul.msk.f32.vlgmr.msra.gmra.mxu0 %vm69_vm1, %v33_v1  ;;  %v37_v5 = vld [vmem:[%s2525_s0 + $0x20] sm:$0xff]  ;;  %v39_v7 = vld [vmem:[%s2525_s0 + $0x30] sm:$0xff]  ;;  %v40_v8 = vld [vmem:[%s2525_s0 + $0x38] sm:$0xff] }
   0x4   :  { %v41_v9 = vld [vmem:[%s2525_s0 + $0x40] sm:$0xff]  ;;  %v330_v10 = vld [vmem:[%s2527_s3 + $0x78] sm:$0xff]  ;;  %v329_v11 = vld [vmem:[%s2527_s3 + $0x70] sm:$0xff] }
   0x5   :  { %335 = vmatpush.msra.mxu1 %v330_v10  ;;  %1459 = vmatpush.msrb.mxu3 %v330_v10  ;;  %v328_v12 = vld [vmem:[%s2527_s3 + $0x68] sm:$0xff]  ;;  %v327_v14 = vld [vmem:[%s2527_s3 + $0x60] sm:$0xff]  ;;  %v326_v15 = vld [vmem:[%s2527_s3 + $0x58] sm:$0xff] }
   0x6   :  { %v42_v13 = vld [vmem:[%s2525_s0 + $0x48] sm:$0xff]  ;;  %v325_v16 = vld [vmem:[%s2527_s3 + $0x50] sm:$0xff]  ;;  %v323_v19 = vld [vmem:[%s2527_s3 + $0x40] sm:$0xff] }
   0x7   :  { %336 = vmatpush.msra.mxu1 %v329_v11  ;;  %1460 = vmatpush.msrb.mxu3 %v329_v11  ;;  %v324_v17 = vld [vmem:[%s2527_s3 + $0x48] sm:$0xff]  ;;  %v43_v18 = vld [vmem:[%s2525_s0 + $0x50] sm:$0xff]  ;;  %v322_v20 = vld [vmem:[%s2527_s3 + $0x38] sm:$0xff] }
   0x8   :  { %v321_v21 = vld [vmem:[%s2527_s3 + $0x30] sm:$0xff]  ;;  %v320_v22 = vld [vmem:[%s2527_s3 + $0x28] sm:$0xff]  ;;  %v44_v23 = vld [vmem:[%s2525_s0 + $0x58] sm:$0xff] }
   0x9   :  { %337 = vmatpush.msra.mxu1 %v328_v12  ;;  %1461 = vmatpush.msrb.mxu3 %v328_v12  ;;  %v319_v24 = vld [vmem:[%s2527_s3 + $0x20] sm:$0xff]  ;;  %v318_v25 = vld [vmem:[%s2527_s3 + $0x18] sm:$0xff]  ;;  %v317_v26 = vld [vmem:[%s2527_s3 + $0x10] sm:$0xff] }
   0xa   :  { %v45_v27 = vld [vmem:[%s2525_s0 + $0x60] sm:$0xff]  ;;  %v316_v28 = vld [vmem:[%s2527_s3 + $0x8] sm:$0xff]  ;;  %v47_v31 = vld [vmem:[%s2525_s0 + $0x70] sm:$0xff] }
   0xb   :  { %1427 = vmatmul.msk.f32.gmra.mxu0 %vm69_vm1, %v34_v2  ;;  %338 = vmatpush.msra.mxu1 %v327_v14  ;;  %v315_v29 = vld [vmem:[%s2527_s3] sm:$0xff]  ;;  %v46_v30 = vld [vmem:[%s2525_s0 + $0x68] sm:$0xff]  ;;  %v48_v32 = vld [vmem:[%s2525_s0 + $0x78] sm:$0xff] }
   0xc   :  { %1462 = vmatpush.msrb.mxu3 %v327_v14  ;;  %v1731_v33 = vld [vmem:[%s2526_s2] ss:$0 sm:$0xff]  ;;  %v50_v39 = vld [vmem:[%s2525_s0 + $0x88] sm:$0xff]  ;;  %v51_v43 = vld [vmem:[%s2525_s0 + $0x90] sm:$0xff] }
   0xd   :  { %339 = vmatpush.msra.mxu1 %v326_v15  ;;  %v49_v35 = vld [vmem:[%s2525_s0 + $0x80] sm:$0xff]  ;;  %v52_v47 = vld [vmem:[%s2525_s0 + $0x98] sm:$0xff]  ;;  %v54_v55 = vld [vmem:[%s2525_s0 + $0xa8] sm:$0xff] }
   0xe   :  { %1463 = vmatpush.msrb.mxu3 %v326_v15  ;;  %v53_v51 = vld [vmem:[%s2525_s0 + $0xa0] sm:$0xff]  ;;  %v59_v58 = vld [vmem:[%s2525_s0 + $0xd0] sm:$0xff]  ;;  %v60_v63 = vld [vmem:[%s2525_s0 + $0xd8] sm:$0xff] }
   0xf   :  { %340 = vmatpush.msra.mxu1 %v325_v16  ;;  %1452 = vmatmul.msk.f32.vlgmr.msra.gmra.mxu3 %vm69_vm1, %v59_v58  ;;  %v55_v60 = vld [vmem:[%s2525_s0 + $0xb0] sm:$0xff]  ;;  %v56_v1 = vld [vmem:[%s2525_s0 + $0xb8] sm:$0xff]  ;;  %v58_v12 = vld [vmem:[%s2525_s0 + $0xc8] sm:$0xff] }
  0x10   :  { %1464 = vmatpush.msrb.mxu3 %v325_v16  ;;  %v495_v10 = vld [vmem:[%s2529_s5 + $0x78] sm:$0xff]  ;;  %v494_v14 = vld [vmem:[%s2529_s5 + $0x70] sm:$0xff]  ;;  %v493_v16 = vld [vmem:[%s2529_s5 + $0x68] sm:$0xff] }
  0x11   :  { %341 = vmatpush.msra.mxu1 %v324_v17  ;;  %500 = vmatpush.msra.mxu2 %v495_v10 }
  0x12   :  { %1465 = vmatpush.msrb.mxu3 %v324_v17  ;;  %v63_v17 = vld [vmem:[%s2525_s0 + $0xf0] sm:$0xff] }
  0x13   :  { %1428 = vmatmul.msk.f32.gmra.mxu0 %vm69_vm1, %v35_v3  ;;  %342 = vmatpush.msra.mxu1 %v323_v19 }
  0x14   :  { %1466 = vmatpush.msrb.mxu3 %v323_v19  ;;  %501 = vmatpush.msra.mxu2 %v494_v14  ;;  %v491_v19 = vld [vmem:[%s2529_s5 + $0x58] sm:$0xff] }
  0x15   :  { %343 = vmatpush.msra.mxu1 %v322_v20 }
  0x16   :  { %1467 = vmatpush.msrb.mxu3 %v322_v20  ;;  %502 = vmatpush.msra.mxu2 %v493_v16 }
  0x17   :  { %344 = vmatpush.msra.mxu1 %v321_v21  ;;  %1453 = vmatmul.msk.f32.gmra.mxu3 %vm69_vm1, %v60_v63 }
  0x18   :  { %1468 = vmatpush.msrb.mxu3 %v321_v21 }
  0x19   :  { %345 = vmatpush.msra.mxu1 %v320_v22 }
  0x1a   :  { %1469 = vmatpush.msrb.mxu3 %v320_v22  ;;  %v490_v22 = vld [vmem:[%s2529_s5 + $0x50] sm:$0xff] }
  0x1b   :  { %1429 = vmatmul.msk.f32.gmra.mxu0 %vm69_vm1, %v36_v4  ;;  %346 = vmatpush.msra.mxu1 %v319_v24  ;;  %v61_v4 = vld [vmem:[%s2525_s0 + $0xe0] sm:$0xff] }
  0x1c   :  { %1470 = vmatpush.msrb.mxu3 %v319_v24  ;;  %v489_v24 = vld [vmem:[%s2529_s5 + $0x48] sm:$0xff] }
  0x1d   :  { %347 = vmatpush.msra.mxu1 %v318_v25 }
  0x1e   :  { %1471 = vmatpush.msrb.mxu3 %v318_v25  ;;  %v64_v25 = vld [vmem:[%s2525_s0 + $0xf8] sm:$0xff] }
  0x1f   :  { %348 = vmatpush.msra.mxu1 %v317_v26  ;;  %1454 = vmatmul.msk.f32.gmra.mxu3 %vm69_vm1, %v61_v4 }
  0x20   :  { %1472 = vmatpush.msrb.mxu3 %v317_v26  ;;  %v488_v26 = vld [vmem:[%s2529_s5 + $0x40] sm:$0xff] }
  0x21   :  { %349 = vmatpush.msra.mxu1 %v316_v28 }
  0x22   :  { %1473 = vmatpush.msrb.mxu3 %v316_v28 }
  0x23   :  { %1430 = vmatmul.msk.f32.gmra.mxu0 %vm69_vm1, %v37_v5  ;;  %350 = vmatpush.msra.mxu1 %v315_v29 }
  0x24   :  { %1474 = vmatpush.msrb.mxu3 %v315_v29 }
  0x26   :  { %1475 = vmatpush.msra.mxu3 %v495_v10 }
  0x28   :  { %1476 = vmatpush.msra.mxu3 %v494_v14 }
  0x2a   :  { %1477 = vmatpush.msra.mxu3 %v493_v16 }
  0x2b   :  { %1431 = vmatmul.msk.f32.gmra.mxu0 %vm69_vm1, %v38_v6  ;;  %v57_v6 = vld [vmem:[%s2525_s0 + $0xc0] sm:$0xff] }
  0x33   :  { %1432 = vmatmul.msk.f32.gmra.mxu0 %vm69_vm1, %v39_v7 }
  0x3b   :  { %1433 = vmatmul.msk.f32.gmra.mxu0 %vm69_vm1, %v40_v8 }
  0x43   :  { %1434 = vmatmul.msk.f32.gmra.mxu0 %vm69_vm1, %v41_v9  ;;  %v62_v9 = vld [vmem:[%s2525_s0 + $0xe8] sm:$0xff] }
  0x44   :  { %1455 = vmatmul.msk.f32.gmra.mxu3 %vm69_vm1, %v62_v9 }
  0x4b   :  { %1435 = vmatmul.msk.f32.gmra.mxu0 %vm69_vm1, %v42_v13 }
  0x4c   :  { %1456 = vmatmul.msk.f32.gmra.mxu3 %vm69_vm1, %v63_v17 }
  0x53   :  { %1436 = vmatmul.msk.f32.gmra.mxu0 %vm69_vm1, %v43_v18  ;;  %v492_v18 = vld [vmem:[%s2529_s5 + $0x60] sm:$0xff] }
  0x54   :  { %503 = vmatpush.msra.mxu2 %v492_v18  ;;  %1478 = vmatpush.msra.mxu3 %v492_v18 }
  0x55   :  { %1457 = vmatmul.msk.f32.gmra.mxu3 %vm69_vm1, %v64_v25 }
  0x56   :  { %504 = vmatpush.msra.mxu2 %v491_v19  ;;  %1479 = vmatpush.msra.mxu3 %v491_v19 }
  0x58   :  { %505 = vmatpush.msra.mxu2 %v490_v22  ;;  %1480 = vmatpush.msra.mxu3 %v490_v22 }
  0x5a   :  { %506 = vmatpush.msra.mxu2 %v489_v24  ;;  %1481 = vmatpush.msra.mxu3 %v489_v24 }
  0x5b   :  { %1437 = vmatmul.msk.f32.gmra.mxu0 %vm69_vm1, %v44_v23 }
  0x5c   :  { %507 = vmatpush.msra.mxu2 %v488_v26  ;;  %1482 = vmatpush.msra.mxu3 %v488_v26 }
  0x63   :  { %1438 = vmatmul.msk.f32.gmra.mxu0 %vm69_vm1, %v45_v27  ;;  %v487_v27 = vld [vmem:[%s2529_s5 + $0x38] sm:$0xff] }
  0x64   :  { %508 = vmatpush.msra.mxu2 %v487_v27  ;;  %1483 = vmatpush.msra.mxu3 %v487_v27 }
  0x6b   :  { %1439 = vmatmul.msk.f32.gmra.mxu0 %vm69_vm1, %v46_v30  ;;  %v486_v30 = vld [vmem:[%s2529_s5 + $0x30] sm:$0xff] }
  0x6c   :  { %509 = vmatpush.msra.mxu2 %v486_v30  ;;  %1484 = vmatpush.msra.mxu3 %v486_v30 }
  0x73   :  { %1440 = vmatmul.msk.f32.gmra.mxu0 %vm69_vm1, %v47_v31 }
  0x7b   :  { %1441 = vmatmul.msk.f32.gmra.mxu0 %vm69_vm1, %v48_v32  ;;  %v485_v32 = vld [vmem:[%s2529_s5 + $0x28] sm:$0xff] }
  0x7c   :  { %510 = vmatpush.msra.mxu2 %v485_v32  ;;  %1485 = vmatpush.msra.mxu3 %v485_v32 }
  0x80   :  { %v187_v34 = vpop.f32.mrf.mxu0 }
  0x81   :  { %v188_v36 = vadd.f32 %v1731_v33, %v187_v34  ;;  %v484_v34 = vld [vmem:[%s2529_s5 + $0x20] sm:$0xff] }
  0x82   :  { %511 = vmatpush.msra.mxu2 %v484_v34  ;;  %1486 = vmatpush.msra.mxu3 %v484_v34 }
  0x83   :  { %1442 = vmatmul.msk.f32.gmra.mxu0 %vm69_vm1, %v49_v35  ;;  %v283_v37 = vmax.f32 %v188_v36, 0.0  ;;  %v483_v35 = vld [vmem:[%s2529_s5 + $0x18] sm:$0xff] }
  0x84   :  { %512 = vmatpush.msra.mxu2 %v483_v35  ;;  %1487 = vmatpush.msra.mxu3 %v483_v35 }
  0x85   :  { %351 = vmatmul.f32.vlgmr.msra.gmra.mxu1 %v283_v37 }
  0x88   :  { %v190_v38 = vpop.f32.mrf.mxu0 }
  0x89   :  { %v191_v40 = vadd.f32 %v1731_v33, %v190_v38  ;;  %v482_v38 = vld [vmem:[%s2529_s5 + $0x10] sm:$0xff] }
  0x8a   :  { %513 = vmatpush.msra.mxu2 %v482_v38  ;;  %1488 = vmatpush.msra.mxu3 %v482_v38 }
  0x8b   :  { %1443 = vmatmul.msk.f32.gmra.mxu0 %vm69_vm1, %v50_v39  ;;  %v284_v41 = vmax.f32 %v191_v40, 0.0  ;;  %v481_v40 = vld [vmem:[%s2529_s5 + $0x8] sm:$0xff] }
  0x8c   :  { %514 = vmatpush.msra.mxu2 %v481_v40  ;;  %1489 = vmatpush.msra.mxu3 %v481_v40 }
  0x8d   :  { %354 = vmatmul.f32.gmra.mxu1 %v284_v41  ;;  %v480_v41 = vld [vmem:[%s2529_s5] sm:$0xff] }
  0x8e   :  { %515 = vmatpush.msra.mxu2 %v480_v41  ;;  %1490 = vmatpush.msra.mxu3 %v480_v41 }
  0x90   :  { %v193_v42 = vpop.f32.mrf.mxu0 }
  0x91   :  { %v194_v44 = vadd.f32 %v1731_v33, %v193_v42 }
  0x92   :  { %v265_v38 = vpop.f32.mrf.mxu3 }
  0x93   :  { %v285_v45 = vmax.f32 %v194_v44, 0.0  ;;  %1444 = vmatmul.msk.f32.gmra.mxu0 %vm69_vm1, %v51_v43 }
  0x95   :  { %357 = vmatmul.f32.gmra.mxu1 %v285_v45 }
  0x98   :  { %v196_v46 = vpop.f32.mrf.mxu0 }
  0x99   :  { %v197_v48 = vadd.f32 %v1731_v33, %v196_v46 }
  0x9b   :  { %v286_v49 = vmax.f32 %v197_v48, 0.0  ;;  %1445 = vmatmul.msk.f32.gmra.mxu0 %vm69_vm1, %v52_v47 }
  0x9d   :  { %360 = vmatmul.f32.gmra.mxu1 %v286_v49 }
  0xa0   :  { %v199_v50 = vpop.f32.mrf.mxu0 }
  0xa1   :  { %v200_v52 = vadd.f32 %v1731_v33, %v199_v50 }
  0xa3   :  { %v287_v53 = vmax.f32 %v200_v52, 0.0  ;;  %1446 = vmatmul.msk.f32.gmra.mxu0 %vm69_vm1, %v53_v51  ;;  %v1864_v51 = vld [vmem:[%s2528_s4] ss:$0 sm:$0xff] }
  0xa5   :  { %363 = vmatmul.f32.gmra.mxu1 %v287_v53 }
  0xa8   :  { %v202_v54 = vpop.f32.mrf.mxu0 }
  0xa9   :  { %v203_v56 = vadd.f32 %v1731_v33, %v202_v54 }
  0xab   :  { %v288_v57 = vmax.f32 %v203_v56, 0.0  ;;  %1447 = vmatmul.msk.f32.gmra.mxu0 %vm69_vm1, %v54_v55 }
  0xad   :  { %366 = vmatmul.f32.gmra.mxu1 %v288_v57 }
  0xb0   :  { %v205_v59 = vpop.f32.mrf.mxu0 }
  0xb1   :  { %v206_v61 = vadd.f32 %v1731_v33, %v205_v59 }
  0xb3   :  { %v289_v62 = vmax.f32 %v206_v61, 0.0  ;;  %1448 = vmatmul.msk.f32.gmra.mxu0 %vm69_vm1, %v55_v60 }
  0xb5   :  { %369 = vmatmul.f32.gmra.mxu1 %v289_v62 }
  0xb8   :  { %v208_v0 = vpop.f32.mrf.mxu0 }
  0xb9   :  { %v209_v2 = vadd.f32 %v1731_v33, %v208_v0 }
  0xbb   :  { %v290_v3 = vmax.f32 %v209_v2, 0.0  ;;  %1449 = vmatmul.msk.f32.gmra.mxu0 %vm69_vm1, %v56_v1 }
  0xbd   :  { %372 = vmatmul.f32.gmra.mxu1 %v290_v3 }
  0xc0   :  { %v211_v5 = vpop.f32.mrf.mxu0 }
  0xc1   :  { %v212_v7 = vadd.f32 %v1731_v33, %v211_v5 }
  0xc3   :  { %v291_v8 = vmax.f32 %v212_v7, 0.0  ;;  %1450 = vmatmul.msk.f32.gmra.mxu0 %vm69_vm1, %v57_v6 }
  0xc5   :  { %375 = vmatmul.f32.gmra.mxu1 %v291_v8 }
  0xc8   :  { %v214_v11 = vpop.f32.mrf.mxu0 }
  0xc9   :  { %v215_v13 = vadd.f32 %v1731_v33, %v214_v11 }
  0xcb   :  { %v292_v15 = vmax.f32 %v215_v13, 0.0  ;;  %1451 = vmatmul.msk.f32.gmra.mxu0 %vm69_vm1, %v58_v12 }
  0xcd   :  { %378 = vmatmul.f32.gmra.mxu1 %v292_v15 }
  0xd0   :  { %v217_v20 = vpop.f32.mrf.mxu0 }
  0xd1   :  { %v218_v21 = vadd.f32 %v1731_v33, %v217_v20 }
  0xd3   :  { %v293_v23 = vmax.f32 %v218_v21, 0.0 }
  0xd5   :  { %381 = vmatmul.f32.gmra.mxu1 %v293_v23 }
  0xd8   :  { %v220_v28 = vpop.f32.mrf.mxu0 }
  0xd9   :  { %v221_v29 = vadd.f32 %v1731_v33, %v220_v28 }
  0xdb   :  { %v294_v31 = vmax.f32 %v221_v29, 0.0 }
  0xdd   :  { %384 = vmatmul.f32.gmra.mxu1 %v294_v31 }
  0xe0   :  { %v223_v36 = vpop.f32.mrf.mxu0 }
  0xe1   :  { %v224_v37 = vadd.f32 %v1731_v33, %v223_v36 }
  0xe3   :  { %v295_v39 = vmax.f32 %v224_v37, 0.0 }
  0xe5   :  { %387 = vmatmul.f32.gmra.mxu1 %v295_v39 }
  0xe8   :  { %v226_v42 = vpop.f32.mrf.mxu0 }
  0xe9   :  { %v227_v43 = vadd.f32 %v1731_v33, %v226_v42 }
  0xeb   :  { %v296_v44 = vmax.f32 %v227_v43, 0.0 }
  0xed   :  { %390 = vmatmul.f32.gmra.mxu1 %v296_v44 }
  0xf0   :  { %v229_v45 = vpop.f32.mrf.mxu0 }
  0xf1   :  { %v230_v46 = vadd.f32 %v1731_v33, %v229_v45 }
  0xf3   :  { %v297_v47 = vmax.f32 %v230_v46, 0.0 }
  0xf5   :  { %393 = vmatmul.f32.gmra.mxu1 %v297_v47  ;;  %v268_v47 = vpop.f32.mrf.mxu3 }
  0xf8   :  { %v232_v48 = vpop.f32.mrf.mxu0 }
  0xf9   :  { %v233_v49 = vadd.f32 %v1731_v33, %v232_v48 }
  0xfb   :  { %v298_v50 = vmax.f32 %v233_v49, 0.0 }
  0xfd   :  { %396 = vmatmul.f32.gmra.mxu1 %v298_v50 }
 0x100   :  { %v235_v52 = vpop.f32.mrf.mxu0 }
 0x101   :  { %v236_v53 = vadd.f32 %v1731_v33, %v235_v52  ;;  %v266_v52 = vadd.f32 %v1731_v33, %v265_v38 }
 0x102   :  { %v352_v54 = vpop.f32.mrf.mxu1 }
 0x103   :  { %v299_v55 = vmax.f32 %v236_v53, 0.0  ;;  %v353_v56 = vadd.f32 %v1864_v51, %v352_v54  ;;  %v309_v53 = vmax.f32 %v266_v52, 0.0 }
 0x105   :  { %v448_v57 = vmax.f32 %v353_v56, 0.0  ;;  %399 = vmatmul.f32.gmra.mxu1 %v299_v55  ;;  %v271_v56 = vpop.f32.mrf.mxu3 }
 0x107   :  { %516 = vmatmul.f32.vlgmr.msra.gmra.mxu2 %v448_v57 }
 0x108   :  { %v238_v58 = vpop.f32.mrf.mxu0 }
 0x109   :  { %v239_v59 = vadd.f32 %v1731_v33, %v238_v58  ;;  %v269_v58 = vadd.f32 %v1731_v33, %v268_v47 }
 0x10a   :  { %v355_v60 = vpop.f32.mrf.mxu1 }
 0x10b   :  { %v300_v61 = vmax.f32 %v239_v59, 0.0  ;;  %v356_v62 = vadd.f32 %v1864_v51, %v355_v60  ;;  %v310_v59 = vmax.f32 %v269_v58, 0.0 }
 0x10d   :  { %v449_v63 = vmax.f32 %v356_v62, 0.0  ;;  %402 = vmatmul.f32.gmra.mxu1 %v300_v61 }
 0x10f   :  { %519 = vmatmul.f32.gmra.mxu2 %v449_v63  ;;  %v272_v63 = vadd.f32 %v1731_v33, %v271_v56 }
 0x110   :  { %v241_v0 = vpop.f32.mrf.mxu0 }
 0x111   :  { %v242_v1 = vadd.f32 %v1731_v33, %v241_v0  ;;  %v274_v0 = vpop.f32.mrf.mxu3 }
 0x112   :  { %v358_v2 = vpop.f32.mrf.mxu1 }
 0x113   :  { %v301_v3 = vmax.f32 %v242_v1, 0.0  ;;  %v359_v4 = vadd.f32 %v1864_v51, %v358_v2  ;;  %v311_v1 = vmax.f32 %v272_v63, 0.0 }
 0x115   :  { %v450_v5 = vmax.f32 %v359_v4, 0.0  ;;  %405 = vmatmul.f32.gmra.mxu1 %v301_v3 }
 0x117   :  { %522 = vmatmul.f32.gmra.mxu2 %v450_v5  ;;  %v275_v5 = vadd.f32 %v1731_v33, %v274_v0 }
 0x118   :  { %v244_v6 = vpop.f32.mrf.mxu0 }
 0x119   :  { %v245_v7 = vadd.f32 %v1731_v33, %v244_v6  ;;  %v277_v6 = vpop.f32.mrf.mxu3 }
 0x11a   :  { %v361_v8 = vpop.f32.mrf.mxu1 }
 0x11b   :  { %v302_v9 = vmax.f32 %v245_v7, 0.0  ;;  %v362_v10 = vadd.f32 %v1864_v51, %v361_v8  ;;  %v312_v7 = vmax.f32 %v275_v5, 0.0 }
 0x11d   :  { %v451_v11 = vmax.f32 %v362_v10, 0.0  ;;  %408 = vmatmul.f32.gmra.mxu1 %v302_v9 }
 0x11f   :  { %525 = vmatmul.f32.gmra.mxu2 %v451_v11  ;;  %v278_v11 = vadd.f32 %v1731_v33, %v277_v6 }
 0x120   :  { %v247_v12 = vpop.f32.mrf.mxu0 }
 0x121   :  { %v248_v13 = vadd.f32 %v1731_v33, %v247_v12  ;;  %v313_v12 = vmax.f32 %v278_v11, 0.0 }
 0x122   :  { %v364_v14 = vpop.f32.mrf.mxu1 }
 0x123   :  { %v303_v15 = vmax.f32 %v248_v13, 0.0  ;;  %v365_v16 = vadd.f32 %v1864_v51, %v364_v14  ;;  %v280_v14 = vpop.f32.mrf.mxu3 }
 0x125   :  { %v452_v17 = vmax.f32 %v365_v16, 0.0  ;;  %411 = vmatmul.f32.gmra.mxu1 %v303_v15 }
 0x127   :  { %528 = vmatmul.f32.gmra.mxu2 %v452_v17  ;;  %v281_v17 = vadd.f32 %v1731_v33, %v280_v14 }
 0x128   :  { %v250_v18 = vpop.f32.mrf.mxu0 }
 0x129   :  { %v251_v19 = vadd.f32 %v1731_v33, %v250_v18  ;;  %v314_v18 = vmax.f32 %v281_v17, 0.0 }
 0x12a   :  { %v367_v20 = vpop.f32.mrf.mxu1 }
 0x12b   :  { %v304_v21 = vmax.f32 %v251_v19, 0.0  ;;  %v368_v22 = vadd.f32 %v1864_v51, %v367_v20 }
 0x12d   :  { %v453_v23 = vmax.f32 %v368_v22, 0.0  ;;  %414 = vmatmul.f32.gmra.mxu1 %v304_v21 }
 0x12f   :  { %531 = vmatmul.f32.gmra.mxu2 %v453_v23 }
 0x130   :  { %v253_v24 = vpop.f32.mrf.mxu0 }
 0x131   :  { %v254_v25 = vadd.f32 %v1731_v33, %v253_v24 }
 0x132   :  { %v370_v26 = vpop.f32.mrf.mxu1 }
 0x133   :  { %v305_v27 = vmax.f32 %v254_v25, 0.0  ;;  %v371_v28 = vadd.f32 %v1864_v51, %v370_v26  ;;  %v1902_v25 = vld [vmem:[%s2530_s6] ss:$0 sm:$0xff] }
 0x135   :  { %v454_v29 = vmax.f32 %v371_v28, 0.0  ;;  %417 = vmatmul.f32.gmra.mxu1 %v305_v27 }
 0x137   :  { %534 = vmatmul.f32.gmra.mxu2 %v454_v29 }
 0x138   :  { %v256_v30 = vpop.f32.mrf.mxu0 }
 0x139   :  { %v257_v31 = vadd.f32 %v1731_v33, %v256_v30 }
 0x13a   :  { %v373_v32 = vpop.f32.mrf.mxu1 }
 0x13b   :  { %v306_v34 = vmax.f32 %v257_v31, 0.0  ;;  %v374_v35 = vadd.f32 %v1864_v51, %v373_v32 }
 0x13d   :  { %v455_v36 = vmax.f32 %v374_v35, 0.0  ;;  %420 = vmatmul.f32.vlgmr.msrb.gmra.mxu3 %v306_v34 }
 0x13f   :  { %537 = vmatmul.f32.gmra.mxu2 %v455_v36 }
 0x140   :  { %v259_v37 = vpop.f32.mrf.mxu0 }
 0x141   :  { %v260_v39 = vadd.f32 %v1731_v33, %v259_v37 }
 0x142   :  { %v376_v40 = vpop.f32.mrf.mxu1 }
 0x143   :  { %v307_v41 = vmax.f32 %v260_v39, 0.0  ;;  %v377_v42 = vadd.f32 %v1864_v51, %v376_v40 }
 0x145   :  { %v456_v43 = vmax.f32 %v377_v42, 0.0  ;;  %423 = vmatmul.f32.gmra.mxu3 %v307_v41 }
 0x147   :  { %540 = vmatmul.f32.gmra.mxu2 %v456_v43 }
 0x148   :  { %v262_v44 = vpop.f32.mrf.mxu0 }
 0x149   :  { %v263_v45 = vadd.f32 %v1731_v33, %v262_v44 }
 0x14a   :  { %v379_v46 = vpop.f32.mrf.mxu1 }
 0x14b   :  { %v308_v48 = vmax.f32 %v263_v45, 0.0  ;;  %v380_v49 = vadd.f32 %v1864_v51, %v379_v46 }
 0x14d   :  { %v457_v50 = vmax.f32 %v380_v49, 0.0  ;;  %426 = vmatmul.f32.gmra.mxu3 %v308_v48 }
 0x14f   :  { %543 = vmatmul.f32.gmra.mxu2 %v457_v50 }
 0x152   :  { %v382_v54 = vpop.f32.mrf.mxu1 }
 0x153   :  { %v383_v55 = vadd.f32 %v1864_v51, %v382_v54 }
 0x155   :  { %v458_v57 = vmax.f32 %v383_v55, 0.0  ;;  %429 = vmatmul.f32.gmra.mxu3 %v309_v53 }
 0x157   :  { %546 = vmatmul.f32.gmra.mxu2 %v458_v57 }
 0x15a   :  { %v385_v60 = vpop.f32.mrf.mxu1 }
 0x15b   :  { %v386_v61 = vadd.f32 %v1864_v51, %v385_v60 }
 0x15d   :  { %v459_v62 = vmax.f32 %v386_v61, 0.0  ;;  %432 = vmatmul.f32.gmra.mxu3 %v310_v59 }
 0x15f   :  { %549 = vmatmul.f32.gmra.mxu2 %v459_v62 }
 0x162   :  { %v388_v2 = vpop.f32.mrf.mxu1 }
 0x163   :  { %v389_v3 = vadd.f32 %v1864_v51, %v388_v2 }
 0x165   :  { %v460_v4 = vmax.f32 %v389_v3, 0.0  ;;  %435 = vmatmul.f32.gmra.mxu3 %v311_v1 }
 0x167   :  { %552 = vmatmul.f32.gmra.mxu2 %v460_v4 }
 0x16a   :  { %v391_v8 = vpop.f32.mrf.mxu1 }
 0x16b   :  { %v392_v9 = vadd.f32 %v1864_v51, %v391_v8 }
 0x16d   :  { %v461_v10 = vmax.f32 %v392_v9, 0.0  ;;  %438 = vmatmul.f32.gmra.mxu3 %v312_v7 }
 0x16f   :  { %555 = vmatmul.f32.gmra.mxu2 %v461_v10 }
 0x172   :  { %v394_v13 = vpop.f32.mrf.mxu1 }
 0x173   :  { %v395_v15 = vadd.f32 %v1864_v51, %v394_v13 }
 0x175   :  { %v462_v16 = vmax.f32 %v395_v15, 0.0  ;;  %441 = vmatmul.f32.gmra.mxu3 %v313_v12 }
 0x177   :  { %558 = vmatmul.f32.gmra.mxu2 %v462_v16 }
 0x17a   :  { %v397_v19 = vpop.f32.mrf.mxu1 }
 0x17b   :  { %v398_v20 = vadd.f32 %v1864_v51, %v397_v19 }
 0x17d   :  { %v463_v21 = vmax.f32 %v398_v20, 0.0  ;;  %444 = vmatmul.f32.gmra.mxu3 %v314_v18 }
 0x17f   :  { %561 = vmatmul.f32.gmra.mxu2 %v463_v21 }
 0x182   :  { %v400_v22 = vpop.f32.mrf.mxu1 }
 0x183   :  { %v401_v23 = vadd.f32 %v1864_v51, %v400_v22 }
 0x185   :  { %v464_v24 = vmax.f32 %v401_v23, 0.0 }
 0x187   :  { %564 = vmatmul.f32.gmra.mxu2 %v464_v24 }
 0x18a   :  { %v403_v26 = vpop.f32.mrf.mxu1  ;;  %v517_v33 = vpop.f32.mrf.mxu2 }
 0x18b   :  { %v404_v27 = vadd.f32 %v1864_v51, %v403_v26  ;;  %v1906_v28 = vadd.f32 %v1902_v25, %v517_v33 }
 0x18d   :  { %v465_v29 = vmax.f32 %v404_v27, 0.0  ;;  %615 = vadd.xlane.f32.xlu0 %v1906_v28  ;;  %v679_v30 = vmul.f32 %v1906_v28, %v1906_v28 }
 0x18f   :  { %567 = vmatmul.f32.gmra.mxu2 %v465_v29  ;;  %711 = vadd.xlane.f32.xlu2 %v679_v30 }
 0x192   :  { %v406_v31 = vpop.f32.mrf.mxu1  ;;  %v520_v32 = vpop.f32.mrf.mxu2 }
 0x193   :  { %v407_v34 = vadd.f32 %v1864_v51, %v406_v31  ;;  %v1913_v35 = vadd.f32 %v1902_v25, %v520_v32 }
 0x195   :  { %v466_v36 = vmax.f32 %v407_v34, 0.0  ;;  %617 = vadd.xlane.f32.xlu0 %v1913_v35  ;;  %v680_v41 = vmul.f32 %v1913_v35, %v1913_v35 }
 0x197   :  { %570 = vmatmul.f32.gmra.mxu2 %v466_v36 }
 0x19a   :  { %v409_v37 = vpop.f32.mrf.mxu1  ;;  %v523_v38 = vpop.f32.mrf.mxu2 }
 0x19b   :  { %v410_v39 = vadd.f32 %v1864_v51, %v409_v37  ;;  %v1918_v40 = vadd.f32 %v1902_v25, %v523_v38 }
 0x19d   :  { %v467_v42 = vmax.f32 %v410_v39, 0.0  ;;  %619 = vadd.xlane.f32.xlu1 %v1918_v40  ;;  %713 = vadd.xlane.f32.xlu0 %v680_v41  ;;  %v681_v47 = vmul.f32 %v1918_v40, %v1918_v40 }
 0x19f   :  { %573 = vmatmul.f32.gmra.mxu2 %v467_v42 }
 0x1a2   :  { %v412_v43 = vpop.f32.mrf.mxu1  ;;  %v526_v44 = vpop.f32.mrf.mxu2 }
 0x1a3   :  { %v413_v45 = vadd.f32 %v1864_v51, %v412_v43  ;;  %v1925_v46 = vadd.f32 %v1902_v25, %v526_v44 }
 0x1a5   :  { %v468_v48 = vmax.f32 %v413_v45, 0.0  ;;  %715 = vadd.xlane.f32.xlu1 %v681_v47  ;;  %v682_v49 = vmul.f32 %v1925_v46, %v1925_v46 }
 0x1a7   :  { %576 = vmatmul.f32.gmra.mxu2 %v468_v48  ;;  %717 = vadd.xlane.f32.xlu2 %v682_v49 }
 0x1aa   :  { %v415_v50 = vpop.f32.mrf.mxu1  ;;  %v529_v52 = vpop.f32.mrf.mxu2 }
 0x1ab   :  { %v416_v53 = vadd.f32 %v1864_v51, %v415_v50  ;;  %v1933_v54 = vadd.f32 %v1902_v25, %v529_v52 }
 0x1ad   :  { %v469_v55 = vmax.f32 %v416_v53, 0.0  ;;  %621 = vadd.xlane.f32.xlu1 %v1925_v46  ;;  %v683_v56 = vmul.f32 %v1933_v54, %v1933_v54 }
 0x1af   :  { %579 = vmatmul.f32.gmra.mxu2 %v469_v55  ;;  %719 = vadd.xlane.f32.xlu0 %v683_v56 }
 0x1b0   :  { %623 = vadd.xlane.f32.xlu2 %v1933_v54 }
 0x1b2   :  { %v418_v57 = vpop.f32.mrf.mxu1  ;;  %v532_v58 = vpop.f32.mrf.mxu2 }
 0x1b3   :  { %v419_v59 = vadd.f32 %v1864_v51, %v418_v57  ;;  %v1941_v60 = vadd.f32 %v1902_v25, %v532_v58 }
 0x1b5   :  { %v470_v61 = vmax.f32 %v419_v59, 0.0  ;;  %v684_v62 = vmul.f32 %v1941_v60, %v1941_v60 }
 0x1b7   :  { %582 = vmatmul.f32.gmra.mxu2 %v470_v61  ;;  %721 = vadd.xlane.f32.xlu1 %v684_v62 }
 0x1b8   :  { %625 = vadd.xlane.f32.xlu2 %v1941_v60 }
 0x1ba   :  { %v535_v63 = vpop.f32.mrf.mxu2 }
 0x1bb   :  { %v1947_v0 = vadd.f32 %v1902_v25, %v535_v63 }
 0x1bd   :  { %627 = vadd.xlane.f32.xlu0 %v1947_v0  ;;  %v685_v1 = vmul.f32 %v1947_v0, %v1947_v0 }
 0x1c0   :  { %723 = vadd.xlane.f32.xlu2 %v685_v1  ;;  %v421_v2 = vpop.f32.mrf.mxu3 }
 0x1c1   :  { %v422_v3 = vadd.f32 %v1864_v51, %v421_v2 }
 0x1c2   :  { %v538_v4 = vpop.f32.mrf.mxu2 }
 0x1c3   :  { %v471_v5 = vmax.f32 %v422_v3, 0.0  ;;  %v1954_v6 = vadd.f32 %v1902_v25, %v538_v4 }
 0x1c5   :  { %585 = vmatmul.f32.vlgmr.msra.gmra.mxu3 %v471_v5  ;;  %629 = vadd.xlane.f32.xlu1 %v1954_v6  ;;  %v686_v7 = vmul.f32 %v1954_v6, %v1954_v6 }
 0x1c7   :  { %725 = vadd.xlane.f32.xlu0 %v686_v7 }
 0x1c8   :  { %v424_v8 = vpop.f32.mrf.mxu3 }
 0x1c9   :  { %v425_v9 = vadd.f32 %v1864_v51, %v424_v8 }
 0x1ca   :  { %v541_v10 = vpop.f32.mrf.mxu2 }
 0x1cb   :  { %v472_v11 = vmax.f32 %v425_v9, 0.0  ;;  %v1961_v12 = vadd.f32 %v1902_v25, %v541_v10 }
 0x1cd   :  { %588 = vmatmul.f32.gmra.mxu3 %v472_v11  ;;  %631 = vadd.xlane.f32.xlu2 %v1961_v12  ;;  %v687_v13 = vmul.f32 %v1961_v12, %v1961_v12 }
 0x1cf   :  { %727 = vadd.xlane.f32.xlu1 %v687_v13 }
 0x1d0   :  { %v427_v14 = vpop.f32.mrf.mxu3 }
 0x1d1   :  { %v428_v15 = vadd.f32 %v1864_v51, %v427_v14 }
 0x1d2   :  { %v544_v16 = vpop.f32.mrf.mxu2 }
 0x1d3   :  { %v473_v17 = vmax.f32 %v428_v15, 0.0  ;;  %v1968_v18 = vadd.f32 %v1902_v25, %v544_v16 }
 0x1d5   :  { %591 = vmatmul.f32.gmra.mxu3 %v473_v17  ;;  %633 = vadd.xlane.f32.xlu0 %v1968_v18  ;;  %v688_v19 = vmul.f32 %v1968_v18, %v1968_v18 }
 0x1d7   :  { %729 = vadd.xlane.f32.xlu2 %v688_v19 }
 0x1d8   :  { %v430_v20 = vpop.f32.mrf.mxu3 }
 0x1d9   :  { %v431_v21 = vadd.f32 %v1864_v51, %v430_v20 }
 0x1da   :  { %v547_v22 = vpop.f32.mrf.mxu2 }
 0x1db   :  { %v474_v23 = vmax.f32 %v431_v21, 0.0  ;;  %v1975_v24 = vadd.f32 %v1902_v25, %v547_v22 }
 0x1dd   :  { %594 = vmatmul.f32.gmra.mxu3 %v474_v23  ;;  %635 = vadd.xlane.f32.xlu1 %v1975_v24  ;;  %v689_v26 = vmul.f32 %v1975_v24, %v1975_v24 }
 0x1df   :  { %731 = vadd.xlane.f32.xlu0 %v689_v26 }
 0x1e0   :  { %v433_v33 = vpop.f32.mrf.mxu3 }
 0x1e1   :  { %v434_v27 = vadd.f32 %v1864_v51, %v433_v33 }
 0x1e2   :  { %v550_v29 = vpop.f32.mrf.mxu2 }
 0x1e3   :  { %v475_v30 = vmax.f32 %v434_v27, 0.0  ;;  %v1982_v31 = vadd.f32 %v1902_v25, %v550_v29 }
 0x1e5   :  { %597 = vmatmul.f32.gmra.mxu3 %v475_v30  ;;  %637 = vadd.xlane.f32.xlu2 %v1982_v31  ;;  %v690_v32 = vmul.f32 %v1982_v31, %v1982_v31 }
 0x1e7   :  { %733 = vadd.xlane.f32.xlu1 %v690_v32 }
 0x1e8   :  { %v436_v34 = vpop.f32.mrf.mxu3 }
 0x1e9   :  { %v437_v36 = vadd.f32 %v1864_v51, %v436_v34 }
 0x1ea   :  { %v553_v37 = vpop.f32.mrf.mxu2 }
 0x1eb   :  { %v476_v38 = vmax.f32 %v437_v36, 0.0  ;;  %v1989_v39 = vadd.f32 %v1902_v25, %v553_v37 }
 0x1ed   :  { %600 = vmatmul.f32.gmra.mxu3 %v476_v38  ;;  %639 = vadd.xlane.f32.xlu0 %v1989_v39  ;;  %v691_v41 = vmul.f32 %v1989_v39, %v1989_v39 }
 0x1ef   :  { %735 = vadd.xlane.f32.xlu2 %v691_v41 }
 0x1f0   :  { %v439_v42 = vpop.f32.mrf.mxu3 }
 0x1f1   :  { %v440_v43 = vadd.f32 %v1864_v51, %v439_v42  ;;  %v2039_v42 = vld [vmem:[%s2531_s7] ss:$0 sm:$0xff] }
 0x1f2   :  { %v556_v44 = vpop.f32.mrf.mxu2 }
 0x1f3   :  { %v477_v45 = vmax.f32 %v440_v43, 0.0  ;;  %v1996_v47 = vadd.f32 %v1902_v25, %v556_v44 }
 0x1f5   :  { %603 = vmatmul.f32.gmra.mxu3 %v477_v45  ;;  %641 = vadd.xlane.f32.xlu1 %v1996_v47  ;;  %v692_v48 = vmul.f32 %v1996_v47, %v1996_v47 }
 0x1f7   :  { %737 = vadd.xlane.f32.xlu0 %v692_v48 }
 0x1f8   :  { %v442_v49 = vpop.f32.mrf.mxu3 }
 0x1f9   :  { %v443_v50 = vadd.f32 %v1864_v51, %v442_v49 }
 0x1fa   :  { %v559_v52 = vpop.f32.mrf.mxu2 }
 0x1fb   :  { %v478_v53 = vmax.f32 %v443_v50, 0.0  ;;  %v2003_v55 = vadd.f32 %v1902_v25, %v559_v52  ;;  %v2047_v50 = vld [vmem:[%s2532_s8] ss:$0 sm:$0xff] }
 0x1fd   :  { %606 = vmatmul.f32.gmra.mxu3 %v478_v53  ;;  %643 = vadd.xlane.f32.xlu2 %v2003_v55  ;;  %v693_v56 = vmul.f32 %v2003_v55, %v2003_v55 }
 0x1ff   :  { %739 = vadd.xlane.f32.xlu1 %v693_v56 }
 0x200   :  { %v445_v57 = vpop.f32.mrf.mxu3  ;;  %v616_v58 = vpop.xlane.xlu0 %615 }
 0x201   :  { %v446_v59 = vadd.f32 %v1864_v51, %v445_v57  ;;  %v775_v61 = vmul.f32 0.0078125, %v616_v58 }
 0x202   :  { %v562_v62 = vpop.f32.mrf.mxu2  ;;  %v712_v63 = vpop.xlane.xlu2 %711 }
 0x203   :  { %v479_v1 = vmax.f32 %v446_v59, 0.0  ;;  %v839_v2 = vmul.f32 %v775_v61, %v775_v61  ;;  %v2010_v3 = vadd.f32 %v1902_v25, %v562_v62  ;;  %v807_v4 = vmul.f32 0.0078125, %v712_v63 }
 0x204   :  { %v903_v41 = vsub.f32 %v1906_v28, %v775_v61 }
 0x205   :  { %609 = vmatmul.f32.gmra.mxu3 %v479_v1  ;;  %645 = vadd.xlane.f32.xlu0 %v2010_v3  ;;  %v694_v5 = vmul.f32 %v2010_v3, %v2010_v3  ;;  %v871_v7 = vsub.f32 %v807_v4, %v839_v2 }
 0x207   :  { %741 = vadd.xlane.f32.xlu2 %v694_v5  ;;  %v935_v8 = vadd.f32 1e-05, %v871_v7 }
 0x208   :  { %v618_v9 = vpop.xlane.xlu0 %617 }
 0x209   :  { %1496 = vrsqrt.f32 %v935_v8  ;;  %v2018_v11 = vmul.f32 0.0078125, %v618_v9  ;;  %vm973_vm3 = vweird.f32 %v935_v8 }
 0x20a   :  { %v565_v51 = vpop.f32.mrf.mxu2 }
 0x20b   :  { %v2016_v10 = vadd.f32 %v1902_v25, %v565_v51  ;;  %v840_v19 = vmul.f32 %v2018_v11, %v2018_v11 }
 0x20d   :  { %647 = vadd.xlane.f32.xlu1 %v2016_v10  ;;  %v695_v13 = vmul.f32 %v2016_v10, %v2016_v10 }
 0x20f   :  { %743 = vadd.xlane.f32.xlu0 %v695_v13  ;;  %v1497_v14 = vpop.eup %1496 }
 0x210   :  { %v620_v15 = vpop.xlane.xlu1 %619  ;;  %v714_v16 = vpop.xlane.xlu0 %713  ;;  %v968_v17 = vmul.f32 %v1497_v14, %v935_v8  ;;  %vm974_vm2 = vweird.f32 %v1497_v14 }
 0x211   :  { %v808_v20 = vmul.f32 0.0078125, %v714_v16  ;;  %v2028_v27 = vmul.f32 0.0078125, %v620_v15  ;;  %vm975_vm4 = vmor %vm973_vm3, %vm974_vm2 }
 0x212   :  { %v568_v21 = vpop.f32.mrf.mxu2  ;;  %v969_v22 = vmul.f32 %v1497_v14, %v968_v17 }
 0x213   :  { %v872_v23 = vsub.f32 %v808_v20, %v840_v19  ;;  %v2026_v26 = vadd.f32 %v1902_v25, %v568_v21  ;;  %v841_v37 = vmul.f32 %v2028_v27, %v2028_v27 }
 0x214   :  { %v970_v33 = vmul.f32 0.5, %v969_v22  ;;  %v904_v22 = vsub.f32 %v1913_v35, %v2018_v11 }
 0x215   :  { %v936_v29 = vadd.f32 1e-05, %v872_v23  ;;  %649 = vadd.xlane.f32.xlu2 %v2026_v26  ;;  %v696_v30 = vmul.f32 %v2026_v26, %v2026_v26 }
 0x216   :  { %v971_v32 = vsub.f32 1.5, %v970_v33 }
 0x217   :  { %1498 = vrsqrt.f32 %v936_v29  ;;  %745 = vadd.xlane.f32.xlu1 %v696_v30  ;;  %vm983_vm6 = vweird.f32 %v936_v29 }
 0x218   :  { %v716_v34 = vpop.xlane.xlu1 %715  ;;  %v972_v36 = vmul.f32 %v1497_v14, %v971_v32 }
 0x219   :  { %v809_v38 = vmul.f32 0.0078125, %v716_v34 }
 0x21a   :  { %v571_v43 = vpop.f32.mrf.mxu2  ;;  %v718_v44 = vpop.xlane.xlu2 %717  ;;  %v976_v45 = vsel %vm975_vm4, %v1497_v14, %v972_v36 }
 0x21b   :  { %v873_v48 = vsub.f32 %v809_v38, %v841_v37  ;;  %v2042_v49 = vadd.f32 %v1902_v25, %v571_v43  ;;  %v1287_v52 = vmul.f32 %v976_v45, %v903_v41  ;;  %v810_v4 = vmul.f32 0.0078125, %v718_v44 }
 0x21d   :  { %v1499_v28 = vpop.eup %1498  ;;  %v937_v53 = vadd.f32 1e-05, %v873_v48  ;;  %651 = vadd.xlane.f32.xlu0 %v2042_v49  ;;  %v697_v56 = vmul.f32 %v2042_v49, %v2042_v49  ;;  %v1322_v57 = vmul.f32 %v2039_v42, %v1287_v52 }
 0x21e   :  { %v978_v58 = vmul.f32 %v1499_v28, %v936_v29  ;;  %vm984_vm5 = vweird.f32 %v1499_v28 }
 0x21f   :  { %1500 = vrsqrt.f32 %v937_v53  ;;  %747 = vadd.xlane.f32.xlu2 %v697_v56  ;;  %v1357_v59 = vadd.f32 %v2047_v50, %v1322_v57  ;;  %vm985_vm7 = vmor %vm983_vm6, %vm984_vm5  ;;  %vm993_vm9 = vweird.f32 %v937_v53 }
 0x220   :  { %v979_v61 = vmul.f32 %v1499_v28, %v978_v58  ;;  %v622_v62 = vpop.xlane.xlu1 %621  ;;  %v905_v58 = vsub.f32 %v1918_v40, %v2028_v27 }
 0x221   :  { %v2054_v63 = vmul.f32 0.0078125, %v622_v62  ;;  %1389 = vst [vmem:[%s2533_s9] sm:$0xff] %v1357_v59 }
 0x222   :  { %v980_v1 = vmul.f32 0.5, %v979_v61  ;;  %v574_v2 = vpop.f32.mrf.mxu2  ;;  %v720_v8 = vpop.xlane.xlu0 %719 }
 0x223   :  { %v842_v5 = vmul.f32 %v2054_v63, %v2054_v63  ;;  %v2062_v7 = vadd.f32 %v1902_v25, %v574_v2  ;;  %v624_v9 = vpop.xlane.xlu2 %623  ;;  %v811_v20 = vmul.f32 0.0078125, %v720_v8 }
 0x224   :  { %v981_v51 = vsub.f32 1.5, %v980_v1  ;;  %v2064_v13 = vmul.f32 0.0078125, %v624_v9 }
 0x225   :  { %v1501_v14 = vpop.eup %1500  ;;  %v874_v15 = vsub.f32 %v810_v4, %v842_v5  ;;  %653 = vadd.xlane.f32.xlu1 %v2062_v7  ;;  %v698_v16 = vmul.f32 %v2062_v7, %v2062_v7 }
 0x226   :  { %v982_v17 = vmul.f32 %v1499_v28, %v981_v51  ;;  %v988_v19 = vmul.f32 %v1501_v14, %v937_v53  ;;  %v843_v21 = vmul.f32 %v2064_v13, %v2064_v13  ;;  %vm994_vm8 = vweird.f32 %v1501_v14 }
 0x227   :  { %v938_v23 = vadd.f32 1e-05, %v874_v15  ;;  %749 = vadd.xlane.f32.xlu0 %v698_v16  ;;  %vm995_vm10 = vmor %vm993_vm9, %vm994_vm8 }
 0x228   :  { %v986_v33 = vsel %vm985_vm7, %v1499_v28, %v982_v17  ;;  %v989_v29 = vmul.f32 %v1501_v14, %v988_v19  ;;  %v875_v30 = vsub.f32 %v811_v20, %v843_v21 }
 0x229   :  { %v1288_v32 = vmul.f32 %v986_v33, %v904_v22  ;;  %1502 = vrsqrt.f32 %v938_v23  ;;  %vm1003_vm12 = vweird.f32 %v938_v23 }
 0x22a   :  { %v990_v34 = vmul.f32 0.5, %v989_v29  ;;  %v2073_v36 = vadd.f32 1e-05, %v875_v30  ;;  %v577_v37 = vpop.f32.mrf.mxu2  ;;  %v722_v43 = vpop.xlane.xlu1 %721  ;;  %v906_v30 = vsub.f32 %v1925_v46, %v2054_v63 }
 0x22b   :  { %v1323_v38 = vmul.f32 %v2039_v42, %v1288_v32  ;;  %v2077_v41 = vadd.f32 %v1902_v25, %v577_v37  ;;  %v626_v44 = vpop.xlane.xlu2 %625  ;;  %v812_v28 = vmul.f32 0.0078125, %v722_v43 }
 0x22c   :  { %v991_v35 = vsub.f32 1.5, %v990_v34  ;;  %1504 = vrsqrt.f32 %v2073_v36  ;;  %v2080_v11 = vmul.f32 0.0078125, %v626_v44  ;;  %vm1013_vm15 = vweird.f32 %v2073_v36 }
 0x22d   :  { %v1358_v45 = vadd.f32 %v2047_v50, %v1323_v38  ;;  %655 = vadd.xlane.f32.xlu2 %v2077_v41  ;;  %v699_v48 = vmul.f32 %v2077_v41, %v2077_v41 }
 0x22e   :  { %v992_v52 = vmul.f32 %v1501_v14, %v991_v35  ;;  %v844_v56 = vmul.f32 %v2080_v11, %v2080_v11 }
 0x22f   :  { %v1503_v57 = vpop.eup %1502  ;;  %1390 = vst [vmem:[%s2533_s9 + $0x8] sm:$0xff] %v1358_v45  ;;  %751 = vadd.xlane.f32.xlu1 %v699_v48 }
 0x230   :  { %v996_v59 = vsel %vm995_vm10, %v1501_v14, %v992_v52  ;;  %v998_v61 = vmul.f32 %v1503_v57, %v938_v23  ;;  %v876_v62 = vsub.f32 %v812_v28, %v844_v56  ;;  %v628_v1 = vpop.xlane.xlu0 %627  ;;  %vm1004_vm11 = vweird.f32 %v1503_v57 }
 0x231   :  { %v1289_v2 = vmul.f32 %v996_v59, %v905_v58  ;;  %v2093_v53 = vmul.f32 0.0078125, %v628_v1  ;;  %vm1005_vm13 = vmor %vm1003_vm12, %vm1004_vm11  ;;  %v907_v23 = vsub.f32 %v1933_v54, %v2064_v13 }
 0x232   :  { %v1505_v4 = vpop.eup %1504  ;;  %v999_v5 = vmul.f32 %v1503_v57, %v998_v61  ;;  %v2095_v8 = vadd.f32 1e-05, %v876_v62  ;;  %v580_v9 = vpop.f32.mrf.mxu2 }
 0x233   :  { %v1324_v40 = vmul.f32 %v2039_v42, %v1289_v2  ;;  %v1008_v27 = vmul.f32 %v1505_v4, %v2073_v36  ;;  %v845_v51 = vmul.f32 %v2093_v53, %v2093_v53  ;;  %v724_v15 = vpop.xlane.xlu2 %723  ;;  %v2104_v19 = vadd.f32 %v1902_v25, %v580_v9 }
 0x234   :  { %v1000_v14 = vmul.f32 0.5, %v999_v5  ;;  %1506 = vrsqrt.f32 %v2095_v8  ;;  %v813_v20 = vmul.f32 0.0078125, %v724_v15  ;;  %vm1014_vm14 = vweird.f32 %v1505_v4 }
 0x235   :  { %v1359_v16 = vadd.f32 %v2047_v50, %v1324_v40  ;;  %v1009_v17 = vmul.f32 %v1505_v4, %v1008_v27  ;;  %657 = vadd.xlane.f32.xlu0 %v2104_v19  ;;  %v700_v29 = vmul.f32 %v2104_v19, %v2104_v19  ;;  %vm1015_vm0 = vmor %vm1013_vm15, %vm1014_vm14  ;;  %vm1023_vm2 = vweird.f32 %v2095_v8 }
 0x236   :  { %v1001_v21 = vsub.f32 1.5, %v1000_v14  ;;  %v877_v33 = vsub.f32 %v813_v20, %v845_v51  ;;  %v908_v20 = vsub.f32 %v1941_v60, %v2080_v11 }
 0x237   :  { %1391 = vst [vmem:[%s2533_s9 + $0x10] sm:$0xff] %v1359_v16  ;;  %v1010_v22 = vmul.f32 0.5, %v1009_v17  ;;  %753 = vadd.xlane.f32.xlu2 %v700_v29 }
 0x238   :  { %v1002_v32 = vmul.f32 %v1503_v57, %v1001_v21  ;;  %v630_v34 = vpop.xlane.xlu1 %629  ;;  %v2114_v38 = vadd.f32 1e-05, %v877_v33 }
 0x239   :  { %v1011_v37 = vsub.f32 1.5, %v1010_v22  ;;  %v2116_v43 = vmul.f32 0.0078125, %v630_v34 }
 0x23a   :  { %v1507_v44 = vpop.eup %1506  ;;  %v1006_v35 = vsel %vm1005_vm13, %v1503_v57, %v1002_v32  ;;  %v583_v45 = vpop.f32.mrf.mxu2  ;;  %1508 = vrsqrt.f32 %v2114_v38  ;;  %vm1033_vm5 = vweird.f32 %v2114_v38 }
 0x23b   :  { %v1290_v48 = vmul.f32 %v1006_v35, %v906_v30  ;;  %v1012_v52 = vmul.f32 %v1505_v4, %v1011_v37  ;;  %v1018_v46 = vmul.f32 %v1507_v44, %v2095_v8  ;;  %v726_v63 = vpop.xlane.xlu0 %725  ;;  %v846_v28 = vmul.f32 %v2116_v43, %v2116_v43 }
 0x23c   :  { %v2127_v59 = vadd.f32 %v1902_v25, %v583_v45  ;;  %v814_v61 = vmul.f32 0.0078125, %v726_v63  ;;  %vm1024_vm1 = vweird.f32 %v1507_v44 }
 0x23d   :  { %v1325_v56 = vmul.f32 %v2039_v42, %v1290_v48  ;;  %v1016_v57 = vsel %vm1015_vm0, %v1505_v4, %v1012_v52  ;;  %v1019_v58 = vmul.f32 %v1507_v44, %v1018_v46  ;;  %vm1025_vm3 = vmor %vm1023_vm2, %vm1024_vm1 }
 0x23e   :  { %v1291_v36 = vmul.f32 %v1016_v57, %v907_v23  ;;  %659 = vadd.xlane.f32.xlu1 %v2127_v59  ;;  %v701_v54 = vmul.f32 %v2127_v59, %v2127_v59  ;;  %v878_v2 = vsub.f32 %v814_v61, %v846_v28  ;;  %v909_v28 = vsub.f32 %v1947_v0, %v2093_v53 }
 0x23f   :  { %v1360_v62 = vadd.f32 %v2047_v50, %v1325_v56  ;;  %v1020_v1 = vmul.f32 0.5, %v1019_v58 }
 0x240   :  { %v1326_v13 = vmul.f32 %v2039_v42, %v1291_v36  ;;  %v632_v5 = vpop.xlane.xlu2 %631  ;;  %755 = vadd.xlane.f32.xlu0 %v701_v54  ;;  %v1509_v40 = vpop.eup %1508  ;;  %v2140_v51 = vadd.f32 1e-05, %v878_v2 }
 0x241   :  { %1392 = vst [vmem:[%s2533_s9 + $0x18] sm:$0xff] %v1360_v62  ;;  %v1021_v4 = vsub.f32 1.5, %v1020_v1  ;;  %v2137_v9 = vmul.f32 0.0078125, %v632_v5  ;;  %v1028_v16 = vmul.f32 %v1509_v40, %v2114_v38  ;;  %vm1034_vm4 = vweird.f32 %v1509_v40 }
 0x242   :  { %v1361_v27 = vadd.f32 %v2047_v50, %v1326_v13  ;;  %v728_v15 = vpop.xlane.xlu1 %727  ;;  %1510 = vrsqrt.f32 %v2140_v51  ;;  %vm1035_vm6 = vmor %vm1033_vm5, %vm1034_vm4  ;;  %vm1043_vm8 = vweird.f32 %v2140_v51 }
 0x243   :  { %v1022_v14 = vmul.f32 %v1507_v44, %v1021_v4  ;;  %v847_v17 = vmul.f32 %v2137_v9, %v2137_v9  ;;  %v815_v21 = vmul.f32 0.0078125, %v728_v15  ;;  %v1029_v33 = vmul.f32 %v1509_v40, %v1028_v16 }
 0x244   :  { %1393 = vst [vmem:[%s2533_s9 + $0x20] sm:$0xff] %v1361_v27 }
 0x245   :  { %v1026_v22 = vsel %vm1025_vm3, %v1507_v44, %v1022_v14  ;;  %v879_v8 = vsub.f32 %v815_v21, %v847_v17  ;;  %v1030_v30 = vmul.f32 0.5, %v1029_v33 }
 0x246   :  { %v1292_v29 = vmul.f32 %v1026_v22, %v908_v20 }
 0x247   :  { %v2153_v34 = vadd.f32 1e-05, %v879_v8  ;;  %v1031_v45 = vsub.f32 1.5, %v1030_v30 }
 0x248   :  { %v1327_v32 = vmul.f32 %v2039_v42, %v1292_v29  ;;  %v586_v37 = vpop.f32.mrf.mxu3  ;;  %v634_v35 = vpop.xlane.xlu0 %633 }
 0x249   :  { %v2156_v48 = vadd.f32 %v1902_v25, %v586_v37  ;;  %v2158_v60 = vmul.f32 0.0078125, %v634_v35  ;;  %v1511_v11 = vpop.eup %1510  ;;  %1512 = vrsqrt.f32 %v2153_v34  ;;  %v1032_v46 = vmul.f32 %v1509_v40, %v1031_v45 }
 0x24a   :  { %v1362_v44 = vadd.f32 %v2047_v50, %v1327_v32  ;;  %v730_v52 = vpop.xlane.xlu2 %729  ;;  %v1038_v63 = vmul.f32 %v1511_v11, %v2140_v51  ;;  %vm1044_vm7 = vweird.f32 %v1511_v11  ;;  %v910_v51 = vsub.f32 %v1954_v6, %v2116_v43 }
 0x24b   :  { %v848_v23 = vmul.f32 %v2158_v60, %v2158_v60  ;;  %661 = vadd.xlane.f32.xlu2 %v2156_v48  ;;  %v816_v56 = vmul.f32 0.0078125, %v730_v52  ;;  %v702_v57 = vmul.f32 %v2156_v48, %v2156_v48  ;;  %v1036_v38 = vsel %vm1035_vm6, %v1509_v40, %v1032_v46  ;;  %vm1045_vm9 = vmor %vm1043_vm8, %vm1044_vm7 }
 0x24c   :  { %1394 = vst [vmem:[%s2533_s9 + $0x28] sm:$0xff] %v1362_v44  ;;  %v1039_v58 = vmul.f32 %v1511_v11, %v1038_v63  ;;  %v1293_v36 = vmul.f32 %v1036_v38, %v909_v28  ;;  %vm1053_vm11 = vweird.f32 %v2153_v34  ;;  %v911_v46 = vsub.f32 %v1961_v12, %v2137_v9 }
 0x24d   :  { %v880_v61 = vsub.f32 %v816_v56, %v848_v23  ;;  %757 = vadd.xlane.f32.xlu1 %v702_v57 }
 0x24e   :  { %v1040_v62 = vmul.f32 0.5, %v1039_v58  ;;  %v1328_v54 = vmul.f32 %v2039_v42, %v1293_v36 }
 0x24f   :  { %v1513_v1 = vpop.eup %1512  ;;  %v2175_v13 = vadd.f32 1e-05, %v880_v61 }
 0x250   :  { %v589_v2 = vpop.f32.mrf.mxu3  ;;  %v636_v5 = vpop.xlane.xlu1 %635  ;;  %v1041_v4 = vsub.f32 1.5, %v1040_v62  ;;  %v1048_v0 = vmul.f32 %v1513_v1, %v2153_v34  ;;  %v1363_v40 = vadd.f32 %v2047_v50, %v1328_v54  ;;  %vm1054_vm10 = vweird.f32 %v1513_v1 }
 0x251   :  { %v2179_v53 = vadd.f32 %v1902_v25, %v589_v2  ;;  %1514 = vrsqrt.f32 %v2175_v13  ;;  %v2184_v27 = vmul.f32 0.0078125, %v636_v5  ;;  %vm1055_vm12 = vmor %vm1053_vm11, %vm1054_vm10  ;;  %vm1063_vm14 = vweird.f32 %v2175_v13 }
 0x252   :  { %v732_v15 = vpop.xlane.xlu0 %731  ;;  %v1042_v14 = vmul.f32 %v1511_v11, %v1041_v4  ;;  %v1049_v16 = vmul.f32 %v1513_v1, %v1048_v0  ;;  %1395 = vst [vmem:[%s2533_s9 + $0x30] sm:$0xff] %v1363_v40 }
 0x253   :  { %v817_v17 = vmul.f32 0.0078125, %v732_v15  ;;  %663 = vadd.xlane.f32.xlu0 %v2179_v53  ;;  %v703_v20 = vmul.f32 %v2179_v53, %v2179_v53  ;;  %v849_v21 = vmul.f32 %v2184_v27, %v2184_v27  ;;  %v912_v15 = vsub.f32 %v1968_v18, %v2158_v60 }
 0x254   :  { %v1046_v22 = vsel %vm1045_vm9, %v1511_v11, %v1042_v14  ;;  %v1050_v33 = vmul.f32 0.5, %v1049_v16 }
 0x255   :  { %759 = vadd.xlane.f32.xlu2 %v703_v20  ;;  %v1294_v29 = vmul.f32 %v1046_v22, %v910_v51  ;;  %v881_v8 = vsub.f32 %v817_v17, %v849_v21 }
 0x256   :  { %v1051_v30 = vsub.f32 1.5, %v1050_v33 }
 0x257   :  { %v1515_v32 = vpop.eup %1514  ;;  %v1329_v37 = vmul.f32 %v2039_v42, %v1294_v29  ;;  %v2198_v35 = vadd.f32 1e-05, %v881_v8 }
 0x258   :  { %v592_v45 = vpop.f32.mrf.mxu3  ;;  %v638_v44 = vpop.xlane.xlu2 %637  ;;  %v1052_v6 = vmul.f32 %v1513_v1, %v1051_v30  ;;  %v1058_v43 = vmul.f32 %v1515_v32, %v2175_v13  ;;  %vm1064_vm13 = vweird.f32 %v1515_v32 }
 0x259   :  { %v2203_v11 = vadd.f32 %v1902_v25, %v592_v45  ;;  %v1364_v52 = vadd.f32 %v2047_v50, %v1329_v37  ;;  %1516 = vrsqrt.f32 %v2198_v35  ;;  %v2209_v63 = vmul.f32 0.0078125, %v638_v44  ;;  %vm1065_vm15 = vmor %vm1063_vm14, %vm1064_vm13 }
 0x25a   :  { %v734_v23 = vpop.xlane.xlu1 %733  ;;  %v1056_v28 = vsel %vm1055_vm12, %v1513_v1, %v1052_v6  ;;  %v1059_v56 = vmul.f32 %v1515_v32, %v1058_v43  ;;  %vm1073_vm1 = vweird.f32 %v2198_v35 }
 0x25b   :  { %v818_v57 = vmul.f32 0.0078125, %v734_v23  ;;  %665 = vadd.xlane.f32.xlu1 %v2203_v11  ;;  %v704_v34 = vmul.f32 %v2203_v11, %v2203_v11  ;;  %1396 = vst [vmem:[%s2533_s9 + $0x38] sm:$0xff] %v1364_v52  ;;  %v1295_v38 = vmul.f32 %v1056_v28, %v911_v46  ;;  %v850_v12 = vmul.f32 %v2209_v63, %v2209_v63 }
 0x25c   :  { %v1060_v9 = vmul.f32 0.5, %v1059_v56  ;;  %v913_v52 = vsub.f32 %v1975_v24, %v2184_v27 }
 0x25d   :  { %761 = vadd.xlane.f32.xlu0 %v704_v34  ;;  %v1330_v58 = vmul.f32 %v2039_v42, %v1295_v38  ;;  %v882_v36 = vsub.f32 %v818_v57, %v850_v12 }
 0x25e   :  { %v1061_v61 = vsub.f32 1.5, %v1060_v9 }
 0x25f   :  { %v1517_v62 = vpop.eup %1516  ;;  %v1365_v1 = vadd.f32 %v2047_v50, %v1330_v58  ;;  %v2221_v54 = vadd.f32 1e-05, %v882_v36 }
 0x260   :  { %v595_v2 = vpop.f32.mrf.mxu3  ;;  %v640_v5 = vpop.xlane.xlu0 %639  ;;  %v1062_v4 = vmul.f32 %v1515_v32, %v1061_v61  ;;  %v1068_v0 = vmul.f32 %v1517_v62, %v2198_v35  ;;  %vm1074_vm0 = vweird.f32 %v1517_v62 }
 0x261   :  { %v2226_v40 = vadd.f32 %v1902_v25, %v595_v2  ;;  %1397 = vst [vmem:[%s2533_s9 + $0x40] sm:$0xff] %v1365_v1  ;;  %1518 = vrsqrt.f32 %v2221_v54  ;;  %v2234_v14 = vmul.f32 0.0078125, %v640_v5  ;;  %vm1075_vm2 = vmor %vm1073_vm1, %vm1074_vm0  ;;  %vm1083_vm4 = vweird.f32 %v2221_v54 }
 0x262   :  { %v736_v16 = vpop.xlane.xlu2 %735  ;;  %v1066_v17 = vsel %vm1065_vm15, %v1515_v32, %v1062_v4  ;;  %v1069_v13 = vmul.f32 %v1517_v62, %v1068_v0  ;;  %v914_v0 = vsub.f32 %v1982_v31, %v2209_v63 }
 0x263   :  { %v819_v20 = vmul.f32 0.0078125, %v736_v16  ;;  %667 = vadd.xlane.f32.xlu2 %v2226_v40  ;;  %v705_v51 = vmul.f32 %v2226_v40, %v2226_v40  ;;  %v1296_v21 = vmul.f32 %v1066_v17, %v912_v15  ;;  %v851_v22 = vmul.f32 %v2234_v14, %v2234_v14 }
 0x264   :  { %v1070_v33 = vmul.f32 0.5, %v1069_v13 }
 0x265   :  { %763 = vadd.xlane.f32.xlu1 %v705_v51  ;;  %v1331_v18 = vmul.f32 %v2039_v42, %v1296_v21  ;;  %v883_v60 = vsub.f32 %v819_v20, %v851_v22 }
 0x266   :  { %v1071_v29 = vsub.f32 1.5, %v1070_v33 }
 0x267   :  { %v1519_v8 = vpop.eup %1518  ;;  %v1366_v30 = vadd.f32 %v2047_v50, %v1331_v18  ;;  %v2243_v32 = vadd.f32 1e-05, %v883_v60 }
 0x268   :  { %v598_v37 = vpop.f32.mrf.mxu3  ;;  %v642_v45 = vpop.xlane.xlu1 %641  ;;  %v1072_v44 = vmul.f32 %v1517_v62, %v1071_v29  ;;  %v1078_v6 = vmul.f32 %v1519_v8, %v2221_v54  ;;  %vm1084_vm3 = vweird.f32 %v1519_v8 }
 0x269   :  { %v2248_v43 = vadd.f32 %v1902_v25, %v598_v37  ;;  %1398 = vst [vmem:[%s2533_s9 + $0x48] sm:$0xff] %v1366_v30  ;;  %1520 = vrsqrt.f32 %v2243_v32  ;;  %v2256_v46 = vmul.f32 0.0078125, %v642_v45  ;;  %vm1085_vm5 = vmor %vm1083_vm4, %vm1084_vm3  ;;  %vm1093_vm7 = vweird.f32 %v2243_v32  ;;  %v1560_v45 = vld [vmem:[%s2530_s6] ss:$0 sm:$0xff] }
 0x26a   :  { %v738_v23 = vpop.xlane.xlu0 %737  ;;  %v1076_v28 = vsel %vm1075_vm2, %v1517_v62, %v1072_v44  ;;  %v1079_v35 = vmul.f32 %v1519_v8, %v1078_v6  ;;  %v915_v6 = vsub.f32 %v1989_v39, %v2234_v14 }
 0x26b   :  { %v820_v56 = vmul.f32 0.0078125, %v738_v23  ;;  %669 = vadd.xlane.f32.xlu0 %v2248_v43  ;;  %v706_v57 = vmul.f32 %v2248_v43, %v2248_v43  ;;  %v1297_v34 = vmul.f32 %v1076_v28, %v913_v52  ;;  %v852_v38 = vmul.f32 %v2256_v46, %v2256_v46 }
 0x26c   :  { %v1080_v12 = vmul.f32 0.5, %v1079_v35 }
 0x26d   :  { %765 = vadd.xlane.f32.xlu2 %v706_v57  ;;  %v1332_v24 = vmul.f32 %v2039_v42, %v1297_v34  ;;  %v884_v27 = vsub.f32 %v820_v56, %v852_v38 }
 0x26e   :  { %v1081_v9 = vsub.f32 1.5, %v1080_v12 }
 0x26f   :  { %v1521_v58 = vpop.eup %1520  ;;  %v1367_v36 = vadd.f32 %v2047_v50, %v1332_v24  ;;  %v2265_v61 = vadd.f32 1e-05, %v884_v27 }
 0x270   :  { %v601_v62 = vpop.f32.mrf.mxu3  ;;  %v644_v1 = vpop.xlane.xlu2 %643  ;;  %v1082_v2 = vmul.f32 %v1519_v8, %v1081_v9  ;;  %v1088_v5 = vmul.f32 %v1521_v58, %v2243_v32  ;;  %vm1094_vm6 = vweird.f32 %v1521_v58 }
 0x271   :  { %v2270_v4 = vadd.f32 %v1902_v25, %v601_v62  ;;  %1399 = vst [vmem:[%s2533_s9 + $0x50] sm:$0xff] %v1367_v36  ;;  %1522 = vrsqrt.f32 %v2265_v61  ;;  %v2278_v15 = vmul.f32 0.0078125, %v644_v1  ;;  %vm1095_vm8 = vmor %vm1093_vm7, %vm1094_vm6  ;;  %vm1103_vm10 = vweird.f32 %v2265_v61 }
 0x272   :  { %v740_v16 = vpop.xlane.xlu1 %739  ;;  %v1086_v17 = vsel %vm1085_vm5, %v1519_v8, %v1082_v2  ;;  %v1089_v54 = vmul.f32 %v1521_v58, %v1088_v5  ;;  %v916_v2 = vsub.f32 %v1996_v47, %v2256_v46 }
 0x273   :  { %v821_v13 = vmul.f32 0.0078125, %v740_v16  ;;  %671 = vadd.xlane.f32.xlu1 %v2270_v4  ;;  %v707_v25 = vmul.f32 %v2270_v4, %v2270_v4  ;;  %v1298_v20 = vmul.f32 %v1086_v17, %v914_v0  ;;  %v853_v51 = vmul.f32 %v2278_v15, %v2278_v15 }
 0x274   :  { %v1090_v21 = vmul.f32 0.5, %v1089_v54 }
 0x275   :  { %767 = vadd.xlane.f32.xlu0 %v707_v25  ;;  %v1333_v31 = vmul.f32 %v2039_v42, %v1298_v20  ;;  %v885_v63 = vsub.f32 %v821_v13, %v853_v51 }
 0x276   :  { %v1091_v22 = vsub.f32 1.5, %v1090_v21 }
 0x277   :  { %v1523_v33 = vpop.eup %1522  ;;  %v1368_v18 = vadd.f32 %v2047_v50, %v1333_v31  ;;  %v2287_v60 = vadd.f32 1e-05, %v885_v63 }
 0x278   :  { %v604_v29 = vpop.f32.mrf.mxu3  ;;  %v646_v8 = vpop.xlane.xlu0 %645  ;;  %v1092_v30 = vmul.f32 %v1521_v58, %v1091_v22  ;;  %v1098_v37 = vmul.f32 %v1523_v33, %v2265_v61  ;;  %vm1104_vm9 = vweird.f32 %v1523_v33 }
 0x279   :  { %v2294_v44 = vadd.f32 %v1560_v45, %v604_v29  ;;  %1400 = vst [vmem:[%s2533_s9 + $0x58] sm:$0xff] %v1368_v18  ;;  %1524 = vrsqrt.f32 %v2287_v60  ;;  %v2302_v52 = vmul.f32 0.0078125, %v646_v8  ;;  %vm1105_vm11 = vmor %vm1103_vm10, %vm1104_vm9  ;;  %vm1113_vm13 = vweird.f32 %v2287_v60 }
 0x27a   :  { %v742_v32 = vpop.xlane.xlu2 %741  ;;  %v1096_v23 = vsel %vm1095_vm8, %v1521_v58, %v1092_v30  ;;  %v1099_v28 = vmul.f32 %v1523_v33, %v1098_v37  ;;  %v917_v30 = vsub.f32 %v2003_v55, %v2278_v15 }
 0x27b   :  { %v822_v35 = vmul.f32 0.0078125, %v742_v32  ;;  %673 = vadd.xlane.f32.xlu2 %v2294_v44  ;;  %v1299_v56 = vmul.f32 %v1096_v23, %v915_v6  ;;  %v854_v57 = vmul.f32 %v2302_v52, %v2302_v52 }
 0x27c   :  { %v1100_v34 = vmul.f32 0.5, %v1099_v28 }
 0x27d   :  { %v1334_v38 = vmul.f32 %v2039_v42, %v1299_v56  ;;  %v886_v12 = vsub.f32 %v822_v35, %v854_v57 }
 0x27e   :  { %v1101_v39 = vsub.f32 1.5, %v1100_v34 }
 0x27f   :  { %v1525_v14 = vpop.eup %1524  ;;  %v1369_v24 = vadd.f32 %v2047_v50, %v1334_v38  ;;  %v2309_v27 = vadd.f32 1e-05, %v886_v12 }
 0x280   :  { %v607_v9 = vpop.f32.mrf.mxu3  ;;  %v648_v58 = vpop.xlane.xlu1 %647  ;;  %v1102_v36 = vmul.f32 %v1523_v33, %v1101_v39  ;;  %v1108_v62 = vmul.f32 %v1525_v14, %v2287_v60  ;;  %vm1114_vm12 = vweird.f32 %v1525_v14 }
 0x281   :  { %v2313_v1 = vadd.f32 %v1560_v45, %v607_v9  ;;  %1401 = vst [vmem:[%s2533_s9 + $0x60] sm:$0xff] %v1369_v24  ;;  %1526 = vrsqrt.f32 %v2309_v27  ;;  %v2321_v5 = vmul.f32 0.0078125, %v648_v58  ;;  %vm1115_vm14 = vmor %vm1113_vm13, %vm1114_vm12  ;;  %vm1123_vm0 = vweird.f32 %v2309_v27 }
 0x282   :  { %v744_v0 = vpop.xlane.xlu0 %743  ;;  %v1106_v16 = vsel %vm1105_vm11, %v1523_v33, %v1102_v36  ;;  %v1109_v17 = vmul.f32 %v1525_v14, %v1108_v62  ;;  %v918_v36 = vsub.f32 %v2010_v3, %v2302_v52 }
 0x283   :  { %v823_v61 = vmul.f32 0.0078125, %v744_v0  ;;  %675 = vadd.xlane.f32.xlu0 %v2313_v1  ;;  %v709_v54 = vmul.f32 %v2313_v1, %v2313_v1  ;;  %v1300_v13 = vmul.f32 %v1106_v16, %v916_v2  ;;  %v855_v25 = vmul.f32 %v2321_v5, %v2321_v5 }
 0x284   :  { %v1110_v20 = vmul.f32 0.5, %v1109_v17 }
 0x285   :  { %771 = vadd.xlane.f32.xlu2 %v709_v54  ;;  %v1335_v47 = vmul.f32 %v2039_v42, %v1300_v13  ;;  %v887_v46 = vsub.f32 %v823_v61, %v855_v25 }
 0x286   :  { %v1111_v51 = vsub.f32 1.5, %v1110_v20 }
 0x287   :  { %v1527_v21 = vpop.eup %1526  ;;  %v1370_v31 = vadd.f32 %v2047_v50, %v1335_v47  ;;  %v951_v63 = vadd.f32 1e-05, %v887_v46 }
 0x288   :  { %v610_v22 = vpop.f32.mrf.mxu3  ;;  %v1112_v33 = vmul.f32 %v1525_v14, %v1111_v51  ;;  %v1118_v18 = vmul.f32 %v1527_v21, %v2309_v27  ;;  %v650_v8 = vpop.xlane.xlu2 %649  ;;  %vm1124_vm15 = vweird.f32 %v1527_v21 }
 0x289   :  { %v2332_v29 = vadd.f32 %v1560_v45, %v610_v22  ;;  %1402 = vst [vmem:[%s2533_s9 + $0x68] sm:$0xff] %v1370_v31  ;;  %1528 = vrsqrt.f32 %v951_v63  ;;  %v2339_v37 = vmul.f32 0.0078125, %v650_v8  ;;  %vm1125_vm1 = vmor %vm1123_vm0, %vm1124_vm15  ;;  %vm1133_vm3 = vweird.f32 %v951_v63 }
 0x28a   :  { %v1116_v6 = vsel %vm1115_vm14, %v1525_v14, %v1112_v33  ;;  %v1119_v32 = vmul.f32 %v1527_v21, %v1118_v18  ;;  %v746_v23 = vpop.xlane.xlu1 %745  ;;  %v708_v14 = vmul.f32 %v2294_v44, %v2294_v44  ;;  %v919_v31 = vsub.f32 %v2016_v10, %v2321_v5 }
 0x28b   :  { %677 = vadd.xlane.f32.xlu1 %v2332_v29  ;;  %v710_v60 = vmul.f32 %v2332_v29, %v2332_v29  ;;  %v1301_v45 = vmul.f32 %v1116_v6, %v917_v30  ;;  %v856_v28 = vmul.f32 %v2339_v37, %v2339_v37  ;;  %v824_v35 = vmul.f32 0.0078125, %v746_v23 }
 0x28c   :  { %v1120_v56 = vmul.f32 0.5, %v1119_v32 }
 0x28d   :  { %773 = vadd.xlane.f32.xlu0 %v710_v60  ;;  %v1336_v55 = vmul.f32 %v2039_v42, %v1301_v45  ;;  %v888_v15 = vsub.f32 %v824_v35, %v856_v28 }
 0x28e   :  { %v1121_v57 = vsub.f32 1.5, %v1120_v56 }
 0x28f   :  { %v1529_v34 = vpop.eup %1528  ;;  %v1371_v38 = vadd.f32 %v2047_v50, %v1336_v55  ;;  %v952_v12 = vadd.f32 1e-05, %v888_v15  ;;  %v920_v15 = vsub.f32 %v2026_v26, %v2339_v37 }
 0x290   :  { %v652_v39 = vpop.xlane.xlu0 %651  ;;  %v1122_v24 = vmul.f32 %v1527_v21, %v1121_v57  ;;  %v1128_v9 = vmul.f32 %v1529_v34, %v951_v63  ;;  %vm1134_vm2 = vweird.f32 %v1529_v34 }
 0x291   :  { %v2351_v58 = vmul.f32 0.0078125, %v652_v39  ;;  %1403 = vst [vmem:[%s2533_s9 + $0x70] sm:$0xff] %v1371_v38  ;;  %1530 = vrsqrt.f32 %v952_v12  ;;  %vm1135_vm4 = vmor %vm1133_vm3, %vm1134_vm2  ;;  %vm1143_vm6 = vweird.f32 %v952_v12 }
 0x292   :  { %v748_v62 = vpop.xlane.xlu2 %747  ;;  %v1126_v2 = vsel %vm1125_vm1, %v1527_v21, %v1122_v24  ;;  %v1129_v0 = vmul.f32 %v1529_v34, %v1128_v9 }
 0x293   :  { %v857_v16 = vmul.f32 %v2351_v58, %v2351_v58  ;;  %769 = vadd.xlane.f32.xlu1 %v708_v14  ;;  %v1302_v27 = vmul.f32 %v1126_v2, %v918_v36  ;;  %v825_v17 = vmul.f32 0.0078125, %v748_v62 }
 0x294   :  { %v1130_v61 = vmul.f32 0.5, %v1129_v0 }
 0x295   :  { %v1337_v54 = vmul.f32 %v2039_v42, %v1302_v27  ;;  %v889_v13 = vsub.f32 %v825_v17, %v857_v16  ;;  %v921_v27 = vsub.f32 %v2042_v49, %v2351_v58 }
 0x296   :  { %v1131_v25 = vsub.f32 1.5, %v1130_v61 }
 0x297   :  { %v1531_v20 = vpop.eup %1530  ;;  %v1372_v3 = vadd.f32 %v2047_v50, %v1337_v54  ;;  %v953_v52 = vadd.f32 1e-05, %v889_v13 }
 0x298   :  { %v654_v47 = vpop.xlane.xlu1 %653  ;;  %v1132_v46 = vmul.f32 %v1529_v34, %v1131_v25  ;;  %v1138_v51 = vmul.f32 %v1531_v20, %v952_v12  ;;  %vm1144_vm5 = vweird.f32 %v1531_v20 }
 0x299   :  { %v2362_v21 = vmul.f32 0.0078125, %v654_v47  ;;  %1404 = vst [vmem:[%s2533_s9 + $0x78] sm:$0xff] %v1372_v3  ;;  %1532 = vrsqrt.f32 %v953_v52  ;;  %vm1145_vm7 = vmor %vm1143_vm6, %vm1144_vm5  ;;  %vm1153_vm9 = vweird.f32 %v953_v52 }
 0x29a   :  { %v750_v22 = vpop.xlane.xlu0 %749  ;;  %v1136_v33 = vsel %vm1135_vm4, %v1529_v34, %v1132_v46  ;;  %v1139_v18 = vmul.f32 %v1531_v20, %v1138_v51 }
 0x29b   :  { %v858_v8 = vmul.f32 %v2362_v21, %v2362_v21  ;;  %v1303_v30 = vmul.f32 %v1136_v33, %v919_v31  ;;  %v826_v63 = vmul.f32 0.0078125, %v750_v22 }
 0x29c   :  { %v1140_v6 = vmul.f32 0.5, %v1139_v18 }
 0x29d   :  { %v1338_v32 = vmul.f32 %v2039_v42, %v1303_v30  ;;  %v890_v23 = vsub.f32 %v826_v63, %v858_v8  ;;  %v922_v8 = vsub.f32 %v2062_v7, %v2362_v21 }
 0x29e   :  { %v1141_v60 = vsub.f32 1.5, %v1140_v6 }
 0x29f   :  { %v1533_v45 = vpop.eup %1532  ;;  %v1373_v28 = vadd.f32 %v2047_v50, %v1338_v32  ;;  %v954_v10 = vadd.f32 1e-05, %v890_v23 }
 0x2a0   :  { %v656_v5 = vpop.xlane.xlu2 %655  ;;  %v1142_v35 = vmul.f32 %v1531_v20, %v1141_v60  ;;  %v1148_v56 = vmul.f32 %v1533_v45, %v953_v52  ;;  %vm1154_vm8 = vweird.f32 %v1533_v45 }
 0x2a1   :  { %v2373_v55 = vmul.f32 0.0078125, %v656_v5  ;;  %1405 = vst [vmem:[%s2533_s9 + $0x80] sm:$0xff] %v1373_v28  ;;  %1534 = vrsqrt.f32 %v954_v10  ;;  %vm1155_vm10 = vmor %vm1153_vm9, %vm1154_vm8  ;;  %vm1163_vm12 = vweird.f32 %v954_v10 }
 0x2a2   :  { %v752_v57 = vpop.xlane.xlu1 %751  ;;  %v1146_v34 = vsel %vm1145_vm7, %v1531_v20, %v1142_v35  ;;  %v1149_v38 = vmul.f32 %v1533_v45, %v1148_v56 }
 0x2a3   :  { %v859_v39 = vmul.f32 %v2373_v55, %v2373_v55  ;;  %v1304_v14 = vmul.f32 %v1146_v34, %v920_v15  ;;  %v827_v12 = vmul.f32 0.0078125, %v752_v57  ;;  %v923_v57 = vsub.f32 %v2077_v41, %v2373_v55 }
 0x2a4   :  { %v1150_v24 = vmul.f32 0.5, %v1149_v38 }
 0x2a5   :  { %v1339_v9 = vmul.f32 %v2039_v42, %v1304_v14  ;;  %v891_v36 = vsub.f32 %v827_v12, %v859_v39 }
 0x2a6   :  { %v1151_v62 = vsub.f32 1.5, %v1150_v24 }
 0x2a7   :  { %v1535_v2 = vpop.eup %1534  ;;  %v1374_v0 = vadd.f32 %v2047_v50, %v1339_v9  ;;  %v955_v26 = vadd.f32 1e-05, %v891_v36 }
 0x2a8   :  { %v1152_v37 = vmul.f32 %v1533_v45, %v1151_v62  ;;  %v1158_v16 = vmul.f32 %v1535_v2, %v954_v10  ;;  %v658_v17 = vpop.xlane.xlu0 %657  ;;  %vm1164_vm11 = vweird.f32 %v1535_v2  ;;  %v2413_v10 = vld [vmem:[%s2532_s8] ss:$0 sm:$0xff] }
 0x2a9   :  { %1406 = vst [vmem:[%s2533_s9 + $0x88] sm:$0xff] %v1374_v0  ;;  %1536 = vrsqrt.f32 %v955_v26  ;;  %v2389_v13 = vmul.f32 0.0078125, %v658_v17  ;;  %vm1165_vm13 = vmor %vm1163_vm12, %vm1164_vm11  ;;  %vm1173_vm15 = vweird.f32 %v955_v26 }
 0x2aa   :  { %v1156_v61 = vsel %vm1155_vm10, %v1533_v45, %v1152_v37  ;;  %v1159_v54 = vmul.f32 %v1535_v2, %v1158_v16  ;;  %v754_v20 = vpop.xlane.xlu2 %753  ;;  %v2405_v45 = vld [vmem:[%s2531_s7] ss:$0 sm:$0xff] }
 0x2ab   :  { %v1305_v25 = vmul.f32 %v1156_v61, %v921_v27  ;;  %v860_v52 = vmul.f32 %v2389_v13, %v2389_v13  ;;  %v828_v47 = vmul.f32 0.0078125, %v754_v20  ;;  %v924_v27 = vsub.f32 %v2104_v19, %v2389_v13 }
 0x2ac   :  { %v1160_v3 = vmul.f32 0.5, %v1159_v54 }
 0x2ad   :  { %v1340_v46 = vmul.f32 %v2039_v42, %v1305_v25  ;;  %v892_v31 = vsub.f32 %v828_v47, %v860_v52 }
 0x2ae   :  { %v1161_v51 = vsub.f32 1.5, %v1160_v3 }
 0x2af   :  { %v1537_v49 = vpop.eup %1536  ;;  %v1375_v58 = vadd.f32 %v2047_v50, %v1340_v46  ;;  %v956_v18 = vadd.f32 1e-05, %v892_v31 }
 0x2b0   :  { %v1162_v22 = vmul.f32 %v1535_v2, %v1161_v51  ;;  %v1168_v33 = vmul.f32 %v1537_v49, %v955_v26  ;;  %vm1174_vm14 = vweird.f32 %v1537_v49 }
 0x2b1   :  { %1407 = vst [vmem:[%s2533_s9 + $0x90] sm:$0xff] %v1375_v58  ;;  %v660_v30 = vpop.xlane.xlu1 %659  ;;  %1538 = vrsqrt.f32 %v956_v18  ;;  %vm1175_vm0 = vmor %vm1173_vm15, %vm1174_vm14  ;;  %vm1183_vm2 = vweird.f32 %v956_v18 }
 0x2b2   :  { %v1166_v42 = vsel %vm1165_vm13, %v1535_v2, %v1162_v22  ;;  %v1169_v63 = vmul.f32 %v1537_v49, %v1168_v33  ;;  %v2400_v32 = vmul.f32 0.0078125, %v660_v30 }
 0x2b3   :  { %v1306_v6 = vmul.f32 %v1166_v42, %v922_v8  ;;  %v756_v50 = vpop.xlane.xlu0 %755 }
 0x2b4   :  { %v1170_v23 = vmul.f32 0.5, %v1169_v63  ;;  %v829_v60 = vmul.f32 0.0078125, %v756_v50  ;;  %v861_v7 = vmul.f32 %v2400_v32, %v2400_v32  ;;  %v925_v33 = vsub.f32 %v2127_v59, %v2400_v32 }
 0x2b5   :  { %v1341_v28 = vmul.f32 %v2405_v45, %v1306_v6 }
 0x2b6   :  { %v1171_v21 = vsub.f32 1.5, %v1170_v23  ;;  %v893_v35 = vsub.f32 %v829_v60, %v861_v7 }
 0x2b7   :  { %v1376_v5 = vadd.f32 %v2413_v10, %v1341_v28  ;;  %v1539_v56 = vpop.eup %1538 }
 0x2b8   :  { %v1172_v15 = vmul.f32 %v1537_v49, %v1171_v21  ;;  %v1178_v34 = vmul.f32 %v1539_v56, %v956_v18  ;;  %v957_v38 = vadd.f32 1e-05, %v893_v35  ;;  %vm1184_vm1 = vweird.f32 %v1539_v56 }
 0x2b9   :  { %1408 = vst [vmem:[%s2533_s9 + $0x98] sm:$0xff] %v1376_v5  ;;  %vm1185_vm3 = vmor %vm1183_vm2, %vm1184_vm1 }
 0x2ba   :  { %v1176_v39 = vsel %vm1175_vm0, %v1537_v49, %v1172_v15  ;;  %v1179_v12 = vmul.f32 %v1539_v56, %v1178_v34  ;;  %1540 = vrsqrt.f32 %v957_v38  ;;  %vm1193_vm5 = vweird.f32 %v957_v38 }
 0x2bb   :  { %v1307_v14 = vmul.f32 %v1176_v39, %v923_v57 }
 0x2bc   :  { %v1180_v9 = vmul.f32 0.5, %v1179_v12 }
 0x2bd   :  { %v1342_v24 = vmul.f32 %v2405_v45, %v1307_v14 }
 0x2be   :  { %v662_v36 = vpop.xlane.xlu2 %661  ;;  %v1181_v0 = vsub.f32 1.5, %v1180_v9 }
 0x2bf   :  { %v2422_v62 = vmul.f32 0.0078125, %v662_v36  ;;  %v1377_v2 = vadd.f32 %v2413_v10, %v1342_v24 }
 0x2c0   :  { %v758_v55 = vpop.xlane.xlu1 %757  ;;  %v1541_v26 = vpop.eup %1540  ;;  %v1182_v37 = vmul.f32 %v1539_v56, %v1181_v0 }
 0x2c1   :  { %v862_v41 = vmul.f32 %v2422_v62, %v2422_v62  ;;  %1409 = vst [vmem:[%s2533_s9 + $0xa0] sm:$0xff] %v1377_v2  ;;  %v830_v16 = vmul.f32 0.0078125, %v758_v55  ;;  %v1188_v17 = vmul.f32 %v1541_v26, %v957_v38  ;;  %vm1194_vm4 = vweird.f32 %v1541_v26 }
 0x2c2   :  { %v1186_v61 = vsel %vm1185_vm3, %v1539_v56, %v1182_v37  ;;  %vm1195_vm6 = vmor %vm1193_vm5, %vm1194_vm4  ;;  %v926_v14 = vsub.f32 %v2156_v48, %v2422_v62 }
 0x2c3   :  { %v894_v54 = vsub.f32 %v830_v16, %v862_v41  ;;  %v1308_v25 = vmul.f32 %v1186_v61, %v924_v27  ;;  %v1189_v20 = vmul.f32 %v1541_v26, %v1188_v17 }
 0x2c5   :  { %v958_v3 = vadd.f32 1e-05, %v894_v54  ;;  %v1343_v47 = vmul.f32 %v2405_v45, %v1308_v25  ;;  %v1190_v46 = vmul.f32 0.5, %v1189_v20 }
 0x2c6   :  { %v664_v52 = vpop.xlane.xlu0 %663 }
 0x2c7   :  { %v2433_v51 = vmul.f32 0.0078125, %v664_v52  ;;  %1542 = vrsqrt.f32 %v958_v3  ;;  %v1378_v49 = vadd.f32 %v2413_v10, %v1343_v47  ;;  %v1191_v58 = vsub.f32 1.5, %v1190_v46 }
 0x2c8   :  { %v760_v31 = vpop.xlane.xlu2 %759  ;;  %vm1203_vm8 = vweird.f32 %v958_v3 }
 0x2c9   :  { %v863_v19 = vmul.f32 %v2433_v51, %v2433_v51  ;;  %v831_v13 = vmul.f32 0.0078125, %v760_v31  ;;  %1410 = vst [vmem:[%s2533_s9 + $0xa8] sm:$0xff] %v1378_v49  ;;  %v1192_v22 = vmul.f32 %v1541_v26, %v1191_v58  ;;  %v927_v20 = vsub.f32 %v2179_v53, %v2433_v51 }
 0x2cb   :  { %v895_v18 = vsub.f32 %v831_v13, %v863_v19  ;;  %v1196_v8 = vsel %vm1195_vm6, %v1541_v26, %v1192_v22 }
 0x2cc   :  { %v1309_v42 = vmul.f32 %v1196_v8, %v925_v33 }
 0x2cd   :  { %v1543_v30 = vpop.eup %1542  ;;  %v959_v63 = vadd.f32 1e-05, %v895_v18 }
 0x2ce   :  { %v666_v6 = vpop.xlane.xlu1 %665  ;;  %v1198_v50 = vmul.f32 %v1543_v30, %v958_v3  ;;  %v1344_v60 = vmul.f32 %v2405_v45, %v1309_v42  ;;  %vm1204_vm7 = vweird.f32 %v1543_v30 }
 0x2cf   :  { %v2443_v23 = vmul.f32 0.0078125, %v666_v6  ;;  %1544 = vrsqrt.f32 %v959_v63  ;;  %vm1205_vm9 = vmor %vm1203_vm8, %vm1204_vm7  ;;  %vm1213_vm11 = vweird.f32 %v959_v63 }
 0x2d0   :  { %v762_v28 = vpop.xlane.xlu0 %761  ;;  %v1199_v7 = vmul.f32 %v1543_v30, %v1198_v50  ;;  %v1379_v59 = vadd.f32 %v2413_v10, %v1344_v60 }
 0x2d1   :  { %v864_v21 = vmul.f32 %v2443_v23, %v2443_v23  ;;  %v832_v5 = vmul.f32 0.0078125, %v762_v28 }
 0x2d2   :  { %v1200_v32 = vmul.f32 0.5, %v1199_v7  ;;  %1411 = vst [vmem:[%s2533_s9 + $0xb0] sm:$0xff] %v1379_v59 }
 0x2d3   :  { %v896_v35 = vsub.f32 %v832_v5, %v864_v21 }
 0x2d4   :  { %v1201_v56 = vsub.f32 1.5, %v1200_v32 }
 0x2d5   :  { %v960_v15 = vadd.f32 1e-05, %v896_v35  ;;  %v1545_v57 = vpop.eup %1544 }
 0x2d6   :  { %v668_v34 = vpop.xlane.xlu2 %667  ;;  %v1202_v38 = vmul.f32 %v1543_v30, %v1201_v56  ;;  %v1208_v39 = vmul.f32 %v1545_v57, %v959_v63  ;;  %vm1214_vm10 = vweird.f32 %v1545_v57 }
 0x2d7   :  { %1546 = vrsqrt.f32 %v960_v15  ;;  %v2454_v12 = vmul.f32 0.0078125, %v668_v34  ;;  %vm1215_vm12 = vmor %vm1213_vm11, %vm1214_vm10  ;;  %vm1223_vm14 = vweird.f32 %v960_v15 }
 0x2d8   :  { %v764_v24 = vpop.xlane.xlu1 %763  ;;  %v1206_v9 = vsel %vm1205_vm9, %v1543_v30, %v1202_v38  ;;  %v1209_v36 = vmul.f32 %v1545_v57, %v1208_v39  ;;  %v928_v30 = vsub.f32 %v2203_v11, %v2443_v23 }
 0x2d9   :  { %v833_v2 = vmul.f32 0.0078125, %v764_v24  ;;  %v1310_v0 = vmul.f32 %v1206_v9, %v926_v14  ;;  %v865_v41 = vmul.f32 %v2454_v12, %v2454_v12  ;;  %v929_v34 = vsub.f32 %v2226_v40, %v2454_v12 }
 0x2da   :  { %v1210_v55 = vmul.f32 0.5, %v1209_v36 }
 0x2db   :  { %v1345_v26 = vmul.f32 %v2405_v45, %v1310_v0  ;;  %v897_v37 = vsub.f32 %v833_v2, %v865_v41 }
 0x2dc   :  { %v1211_v27 = vsub.f32 1.5, %v1210_v55 }
 0x2dd   :  { %v1547_v16 = vpop.eup %1546  ;;  %v1380_v48 = vadd.f32 %v2413_v10, %v1345_v26  ;;  %v961_v17 = vadd.f32 1e-05, %v897_v37 }
 0x2de   :  { %v1218_v62 = vmul.f32 %v1547_v16, %v960_v15  ;;  %v670_v61 = vpop.xlane.xlu0 %669  ;;  %v1212_v54 = vmul.f32 %v1545_v57, %v1211_v27  ;;  %vm1224_vm13 = vweird.f32 %v1547_v16 }
 0x2df   :  { %v2460_v25 = vmul.f32 0.0078125, %v670_v61  ;;  %1412 = vst [vmem:[%s2533_s9 + $0xb8] sm:$0xff] %v1380_v48  ;;  %1548 = vrsqrt.f32 %v961_v17  ;;  %vm1225_vm15 = vmor %vm1223_vm14, %vm1224_vm13  ;;  %vm1233_vm1 = vweird.f32 %v961_v17 }
 0x2e0   :  { %v1219_v3 = vmul.f32 %v1547_v16, %v1218_v62  ;;  %v766_v52 = vpop.xlane.xlu2 %765  ;;  %v1216_v47 = vsel %vm1215_vm12, %v1545_v57, %v1212_v54 }
 0x2e1   :  { %v866_v46 = vmul.f32 %v2460_v25, %v2460_v25  ;;  %v834_v31 = vmul.f32 0.0078125, %v766_v52  ;;  %v1311_v49 = vmul.f32 %v1216_v47, %v927_v20  ;;  %v930_v40 = vsub.f32 %v2248_v43, %v2460_v25 }
 0x2e2   :  { %v1220_v58 = vmul.f32 0.5, %v1219_v3 }
 0x2e3   :  { %v898_v19 = vsub.f32 %v834_v31, %v866_v46  ;;  %v1346_v13 = vmul.f32 %v2405_v45, %v1311_v49 }
 0x2e4   :  { %v1221_v22 = vsub.f32 1.5, %v1220_v58 }
 0x2e5   :  { %v962_v33 = vadd.f32 1e-05, %v898_v19  ;;  %v1549_v18 = vpop.eup %1548  ;;  %v1381_v53 = vadd.f32 %v2413_v10, %v1346_v13 }
 0x2e6   :  { %v1222_v51 = vmul.f32 %v1547_v16, %v1221_v22  ;;  %v672_v8 = vpop.xlane.xlu1 %671  ;;  %v1228_v42 = vmul.f32 %v1549_v18, %v961_v17  ;;  %vm1234_vm0 = vweird.f32 %v1549_v18 }
 0x2e7   :  { %1550 = vrsqrt.f32 %v962_v33  ;;  %1413 = vst [vmem:[%s2533_s9 + $0xc0] sm:$0xff] %v1381_v53  ;;  %v2476_v6 = vmul.f32 0.0078125, %v672_v8  ;;  %vm1235_vm2 = vmor %vm1233_vm1, %vm1234_vm0  ;;  %vm1243_vm4 = vweird.f32 %v962_v33 }
 0x2e8   :  { %v1226_v63 = vsel %vm1225_vm15, %v1547_v16, %v1222_v51  ;;  %v768_v50 = vpop.xlane.xlu0 %767  ;;  %v1229_v28 = vmul.f32 %v1549_v18, %v1228_v42 }
 0x2e9   :  { %v1312_v60 = vmul.f32 %v1226_v63, %v928_v30  ;;  %v835_v7 = vmul.f32 0.0078125, %v768_v50  ;;  %v867_v21 = vmul.f32 %v2476_v6, %v2476_v6  ;;  %v931_v49 = vsub.f32 %v2270_v4, %v2476_v6 }
 0x2ea   :  { %v1230_v11 = vmul.f32 0.5, %v1229_v28 }
 0x2eb   :  { %v1347_v5 = vmul.f32 %v2405_v45, %v1312_v60  ;;  %v899_v23 = vsub.f32 %v835_v7, %v867_v21 }
 0x2ec   :  { %v1231_v35 = vsub.f32 1.5, %v1230_v11 }
 0x2ed   :  { %v1551_v59 = vpop.eup %1550  ;;  %v1382_v32 = vadd.f32 %v2413_v10, %v1347_v5  ;;  %v963_v15 = vadd.f32 1e-05, %v899_v23 }
 0x2ee   :  { %v1238_v56 = vmul.f32 %v1551_v59, %v962_v33  ;;  %v1232_v57 = vmul.f32 %v1549_v18, %v1231_v35  ;;  %v674_v39 = vpop.xlane.xlu2 %673  ;;  %vm1244_vm3 = vweird.f32 %v1551_v59 }
 0x2ef   :  { %1414 = vst [vmem:[%s2533_s9 + $0xc8] sm:$0xff] %v1382_v32  ;;  %1552 = vrsqrt.f32 %v963_v15  ;;  %vm1245_vm5 = vmor %vm1243_vm4, %vm1244_vm3  ;;  %vm1253_vm7 = vweird.f32 %v963_v15  ;;  %v804_v51 = vmul.f32 0.0078125, %v674_v39 }
 0x2f0   :  { %v1239_v38 = vmul.f32 %v1551_v59, %v1238_v56  ;;  %v1236_v14 = vsel %vm1235_vm2, %v1549_v18, %v1232_v57 }
 0x2f1   :  { %v1313_v24 = vmul.f32 %v1236_v14, %v929_v34  ;;  %v868_v4 = vmul.f32 %v804_v51, %v804_v51 }
 0x2f2   :  { %v1240_v9 = vmul.f32 0.5, %v1239_v38 }
 0x2f3   :  { %v1348_v36 = vmul.f32 %v2405_v45, %v1313_v24 }
 0x2f4   :  { %v1241_v2 = vsub.f32 1.5, %v1240_v9 }
 0x2f5   :  { %v1553_v0 = vpop.eup %1552  ;;  %v1383_v41 = vadd.f32 %v2413_v10, %v1348_v36 }
 0x2f6   :  { %v1242_v55 = vmul.f32 %v1551_v59, %v1241_v2  ;;  %v676_v26 = vpop.xlane.xlu0 %675  ;;  %v1248_v12 = vmul.f32 %v1553_v0, %v963_v15  ;;  %vm1254_vm6 = vweird.f32 %v1553_v0 }
 0x2f7   :  { %v805_v37 = vmul.f32 0.0078125, %v676_v26  ;;  %1415 = vst [vmem:[%s2533_s9 + $0xd0] sm:$0xff] %v1383_v41  ;;  %vm1255_vm8 = vmor %vm1253_vm7, %vm1254_vm6 }
 0x2f8   :  { %v1246_v16 = vsel %vm1245_vm5, %v1551_v59, %v1242_v55  ;;  %v772_v27 = vpop.xlane.xlu2 %771  ;;  %v1249_v62 = vmul.f32 %v1553_v0, %v1248_v12 }
 0x2f9   :  { %v1314_v48 = vmul.f32 %v1246_v16, %v930_v40  ;;  %v869_v17 = vmul.f32 %v805_v37, %v805_v37  ;;  %v837_v61 = vmul.f32 0.0078125, %v772_v27  ;;  %v933_v32 = vsub.f32 %v2313_v1, %v805_v37 }
 0x2fa   :  { %v1250_v20 = vmul.f32 0.5, %v1249_v62  ;;  %v932_v37 = vsub.f32 %v2294_v44, %v804_v51 }
 0x2fb   :  { %v1349_v54 = vmul.f32 %v2405_v45, %v1314_v48  ;;  %v901_v3 = vsub.f32 %v837_v61, %v869_v17 }
 0x2fc   :  { %v1251_v43 = vsub.f32 1.5, %v1250_v20 }
 0x2fd   :  { %v1384_v52 = vadd.f32 %v2413_v10, %v1349_v54  ;;  %v965_v25 = vadd.f32 1e-05, %v901_v3 }
 0x2fe   :  { %v678_v47 = vpop.xlane.xlu1 %677  ;;  %v1252_v46 = vmul.f32 %v1553_v0, %v1251_v43 }
 0x2ff   :  { %1416 = vst [vmem:[%s2533_s9 + $0xd8] sm:$0xff] %v1384_v52  ;;  %v806_v31 = vmul.f32 0.0078125, %v678_v47  ;;  %1554 = vrsqrt.f32 %v965_v25  ;;  %vm1273_vm10 = vweird.f32 %v965_v25 }
 0x300   :  { %v774_v58 = vpop.xlane.xlu0 %773  ;;  %v1256_v19 = vsel %vm1255_vm8, %v1553_v0, %v1252_v46 }
 0x301   :  { %v870_v13 = vmul.f32 %v806_v31, %v806_v31  ;;  %v838_v22 = vmul.f32 0.0078125, %v774_v58  ;;  %v1315_v33 = vmul.f32 %v1256_v19, %v931_v49  ;;  %v934_v36 = vsub.f32 %v2332_v29, %v806_v31 }
 0x303   :  { %v902_v18 = vsub.f32 %v838_v22, %v870_v13  ;;  %v1350_v53 = vmul.f32 %v2405_v45, %v1315_v33 }
 0x305   :  { %v966_v8 = vadd.f32 1e-05, %v902_v18  ;;  %v1555_v30 = vpop.eup %1554  ;;  %v1385_v42 = vadd.f32 %v2413_v10, %v1350_v53 }
 0x306   :  { %v770_v63 = vpop.xlane.xlu1 %769  ;;  %v1268_v50 = vmul.f32 %v1555_v30, %v965_v25  ;;  %vm1274_vm9 = vweird.f32 %v1555_v30 }
 0x307   :  { %1556 = vrsqrt.f32 %v966_v8  ;;  %1417 = vst [vmem:[%s2533_s9 + $0xe0] sm:$0xff] %v1385_v42  ;;  %v836_v6 = vmul.f32 0.0078125, %v770_v63  ;;  %vm1275_vm11 = vmor %vm1273_vm10, %vm1274_vm9  ;;  %vm1283_vm13 = vweird.f32 %v966_v8 }
 0x308   :  { %v1269_v60 = vmul.f32 %v1555_v30, %v1268_v50 }
 0x309   :  { %v900_v28 = vsub.f32 %v836_v6, %v868_v4 }
 0x30a   :  { %v1270_v7 = vmul.f32 0.5, %v1269_v60 }
 0x30b   :  { %v964_v21 = vadd.f32 1e-05, %v900_v28 }
 0x30c   :  { %v1271_v11 = vsub.f32 1.5, %v1270_v7 }
 0x30d   :  { %v1557_v5 = vpop.eup %1556  ;;  %1558 = vrsqrt.f32 %v964_v21  ;;  %vm1263_vm0 = vweird.f32 %v964_v21 }
 0x30e   :  { %v1278_v23 = vmul.f32 %v1557_v5, %v966_v8  ;;  %v1272_v59 = vmul.f32 %v1555_v30, %v1271_v11  ;;  %vm1284_vm12 = vweird.f32 %v1557_v5 }
 0x30f   :  { %vm1285_vm14 = vmor %vm1283_vm13, %vm1284_vm12 }
 0x310   :  { %v1279_v35 = vmul.f32 %v1557_v5, %v1278_v23  ;;  %v1276_v56 = vsel %vm1275_vm11, %v1555_v30, %v1272_v59 }
 0x311   :  { %v1317_v15 = vmul.f32 %v1276_v56, %v933_v32 }
 0x312   :  { %v1280_v57 = vmul.f32 0.5, %v1279_v35 }
 0x313   :  { %v1559_v34 = vpop.eup %1558  ;;  %v1352_v38 = vmul.f32 %v2405_v45, %v1317_v15 }
 0x314   :  { %v1281_v39 = vsub.f32 1.5, %v1280_v57  ;;  %v1258_v14 = vmul.f32 %v1559_v34, %v964_v21  ;;  %vm1264_vm15 = vweird.f32 %v1559_v34 }
 0x315   :  { %v1387_v24 = vadd.f32 %v2413_v10, %v1352_v38  ;;  %vm1265_vm1 = vmor %vm1263_vm0, %vm1264_vm15 }
 0x316   :  { %v1282_v9 = vmul.f32 %v1557_v5, %v1281_v39  ;;  %v1259_v2 = vmul.f32 %v1559_v34, %v1258_v14 }
 0x317   :  { %1419 = vst [vmem:[%s2533_s9 + $0xf0] sm:$0xff] %v1387_v24 }
 0x318   :  { %v1286_v1 = vsel %vm1285_vm14, %v1557_v5, %v1282_v9  ;;  %v1260_v41 = vmul.f32 0.5, %v1259_v2 }
 0x319   :  { %v1318_v0 = vmul.f32 %v1286_v1, %v934_v36 }
 0x31a   :  { %v1261_v26 = vsub.f32 1.5, %v1260_v41 }
 0x31b   :  { %v1353_v55 = vmul.f32 %v2405_v45, %v1318_v0 }
 0x31c   :  { %v1262_v12 = vmul.f32 %v1559_v34, %v1261_v26 }
 0x31d   :  { %v1388_v40 = vadd.f32 %v2413_v10, %v1353_v55 }
 0x31e   :  { %v1266_v29 = vsel %vm1265_vm1, %v1559_v34, %v1262_v12 }
 0x31f   :  { %1420 = vst [vmem:[%s2533_s9 + $0xf8] sm:$0xff] %v1388_v40  ;;  %v1316_v16 = vmul.f32 %v1266_v29, %v932_v37 }
 0x321   :  { %v1351_v27 = vmul.f32 %v2405_v45, %v1316_v16 }
 0x323   :  { %v1386_v48 = vadd.f32 %v2413_v10, %v1351_v27 }
 0x325   :  { %1418 = vst [vmem:[%s2533_s9 + $0xe8] sm:$0xff] %v1386_v48 }

// kernel: simulator_forward.11
= control target key start
LH: loop header
LB: loop body
LE: loop exit
PB: predicated region body
PF: predicated region fallthrough
CT: control target
= control target key end

     0   :  { %s3213_s4 = inlined_call_operand.vmem [shape: f32[128,128], index: 4, kind: input, shape index: {}]   ;;  %s3214_s1 = inlined_call_operand.vmem [shape: f32[256,128], index: 1, kind: input, shape index: {}]   ;;  %s3215_s5 = inlined_call_operand.vmem [shape: f32[128,128], index: 5, kind: input, shape index: {}]   ;;  %s3216_s3 = inlined_call_operand.vmem [shape: f32[128,128], index: 3, kind: input, shape index: {}]   ;;  %s3217_s0 = inlined_call_operand.vmem [shape: f32[256,128], index: 0, kind: input, shape index: {}]   ;;  %s3218_s2 = inlined_call_operand.vmem [shape: f32[256,128], index: 2, kind: input, shape index: {}]   ;;  %s3219_s6 = inlined_call_operand.vmem [shape: f32[1,128], index: 6, kind: input, shape index: {}]   ;;  %s3220_s7 = inlined_call_operand.vmem [shape: f32[128,128], index: 7, kind: input, shape index: {}]   ;;  %s3221_s8 = inlined_call_operand.vmem [shape: f32[1,128], index: 8, kind: input, shape index: {}]   ;;  %s3222_s9 = inlined_call_operand.vmem [shape: f32[128,128], index: 9, kind: input, shape index: {}]   ;;  %s3223_s10 = inlined_call_operand.vmem [shape: f32[1,128], index: 10, kind: input, shape index: {}]   ;;  %s3224_s11 = inlined_call_operand.vmem [shape: f32[1,128], index: 11, kind: input, shape index: {}]   ;;  %s3225_s12 = inlined_call_operand.vmem [shape: f32[1,128], index: 12, kind: input, shape index: {}]   ;;  %s3226_s13 = inlined_call_operand.vmem [shape: f32[256,128], index: 13, kind: output, shape index: {}]  }
   0x1   :  { %v107_v0 = vld [vmem:[%s3213_s4 + $0x78] sm:$0xff]  ;;  %v106_v1 = vld [vmem:[%s3213_s4 + $0x70] sm:$0xff]  ;;  %v105_v2 = vld [vmem:[%s3213_s4 + $0x68] sm:$0xff] }
   0x2   :  { %1737 = vmatpush.msra.mxu1 %v107_v0  ;;  %1738 = vmatpush.msra.mxu2 %v107_v0  ;;  %v104_v3 = vld [vmem:[%s3213_s4 + $0x60] sm:$0xff]  ;;  %v103_v4 = vld [vmem:[%s3213_s4 + $0x58] sm:$0xff]  ;;  %v102_v5 = vld [vmem:[%s3213_s4 + $0x50] sm:$0xff] }
   0x3   :  { %140 = vmatpush.msra.mxu0 %v107_v0  ;;  %1739 = vmatpush.msra.mxu3 %v107_v0  ;;  %v101_v6 = vld [vmem:[%s3213_s4 + $0x48] sm:$0xff]  ;;  %v100_v7 = vld [vmem:[%s3213_s4 + $0x40] sm:$0xff]  ;;  %v99_v8 = vld [vmem:[%s3213_s4 + $0x38] sm:$0xff] }
   0x4   :  { %1740 = vmatpush.msra.mxu1 %v106_v1  ;;  %1741 = vmatpush.msra.mxu2 %v106_v1  ;;  %v98_v9 = vld [vmem:[%s3213_s4 + $0x30] sm:$0xff]  ;;  %v97_v10 = vld [vmem:[%s3213_s4 + $0x28] sm:$0xff]  ;;  %v96_v11 = vld [vmem:[%s3213_s4 + $0x20] sm:$0xff] }
   0x5   :  { %141 = vmatpush.msra.mxu0 %v106_v1  ;;  %1742 = vmatpush.msra.mxu3 %v106_v1  ;;  %v95_v12 = vld [vmem:[%s3213_s4 + $0x18] sm:$0xff]  ;;  %v94_v13 = vld [vmem:[%s3213_s4 + $0x10] sm:$0xff]  ;;  %v93_v14 = vld [vmem:[%s3213_s4 + $0x8] sm:$0xff] }
   0x6   :  { %1743 = vmatpush.msra.mxu1 %v105_v2  ;;  %1744 = vmatpush.msra.mxu2 %v105_v2  ;;  %v92_v15 = vld [vmem:[%s3213_s4] sm:$0xff]  ;;  %v381_v18 = vld [vmem:[%s3215_s5 + $0x78] sm:$0xff]  ;;  %v380_v20 = vld [vmem:[%s3215_s5 + $0x70] sm:$0xff] }
   0x7   :  { %142 = vmatpush.msra.mxu0 %v105_v2  ;;  %1745 = vmatpush.msra.mxu3 %v105_v2  ;;  %v116_v16 = vld [vmem:[%s3214_s1 + $0x40] sm:$0xff]  ;;  %v59_v19 = vld [vmem:[%s3216_s3 + $0x78] sm:$0xff]  ;;  %v58_v21 = vld [vmem:[%s3216_s3 + $0x70] sm:$0xff] }
   0x8   :  { %1746 = vmatpush.msra.mxu1 %v104_v3  ;;  %1747 = vmatpush.msra.mxu2 %v104_v3  ;;  %v124_v17 = vld [vmem:[%s3214_s1 + $0x80] sm:$0xff]  ;;  %v379_v22 = vld [vmem:[%s3215_s5 + $0x68] sm:$0xff]  ;;  %v377_v28 = vld [vmem:[%s3215_s5 + $0x58] sm:$0xff] }
   0x9   :  { %143 = vmatpush.msra.mxu0 %v104_v3  ;;  %1748 = vmatpush.msra.mxu3 %v104_v3  ;;  %v57_v23 = vld [vmem:[%s3216_s3 + $0x68] sm:$0xff]  ;;  %v378_v24 = vld [vmem:[%s3215_s5 + $0x60] sm:$0xff]  ;;  %v55_v29 = vld [vmem:[%s3216_s3 + $0x58] sm:$0xff] }
   0xa   :  { %1749 = vmatpush.msra.mxu1 %v103_v4  ;;  %1750 = vmatpush.msra.mxu2 %v103_v4  ;;  %v56_v25 = vld [vmem:[%s3216_s3 + $0x60] sm:$0xff]  ;;  %v117_v26 = vld [vmem:[%s3214_s1 + $0x48] sm:$0xff]  ;;  %v376_v30 = vld [vmem:[%s3215_s5 + $0x50] sm:$0xff] }
   0xb   :  { %144 = vmatpush.msra.mxu0 %v103_v4  ;;  %1751 = vmatpush.msra.mxu3 %v103_v4  ;;  %v125_v27 = vld [vmem:[%s3214_s1 + $0x88] sm:$0xff]  ;;  %v54_v31 = vld [vmem:[%s3216_s3 + $0x50] sm:$0xff]  ;;  %v374_v34 = vld [vmem:[%s3215_s5 + $0x40] sm:$0xff] }
   0xc   :  { %1752 = vmatpush.msra.mxu1 %v102_v5  ;;  %1753 = vmatpush.msra.mxu2 %v102_v5  ;;  %v375_v32 = vld [vmem:[%s3215_s5 + $0x48] sm:$0xff]  ;;  %v52_v35 = vld [vmem:[%s3216_s3 + $0x40] sm:$0xff]  ;;  %v118_v36 = vld [vmem:[%s3214_s1 + $0x50] sm:$0xff] }
   0xd   :  { %145 = vmatpush.msra.mxu0 %v102_v5  ;;  %1754 = vmatpush.msra.mxu3 %v102_v5  ;;  %v53_v33 = vld [vmem:[%s3216_s3 + $0x48] sm:$0xff]  ;;  %v126_v37 = vld [vmem:[%s3214_s1 + $0x90] sm:$0xff]  ;;  %v373_v38 = vld [vmem:[%s3215_s5 + $0x38] sm:$0xff] }
   0xe   :  { %1755 = vmatpush.msra.mxu1 %v101_v6  ;;  %1756 = vmatpush.msra.mxu2 %v101_v6  ;;  %v51_v39 = vld [vmem:[%s3216_s3 + $0x38] sm:$0xff]  ;;  %v372_v40 = vld [vmem:[%s3215_s5 + $0x30] sm:$0xff]  ;;  %v371_v42 = vld [vmem:[%s3215_s5 + $0x28] sm:$0xff] }
   0xf   :  { %146 = vmatpush.msra.mxu0 %v101_v6  ;;  %1757 = vmatpush.msra.mxu3 %v101_v6  ;;  %v50_v41 = vld [vmem:[%s3216_s3 + $0x30] sm:$0xff]  ;;  %v49_v43 = vld [vmem:[%s3216_s3 + $0x28] sm:$0xff]  ;;  %v370_v44 = vld [vmem:[%s3215_s5 + $0x20] sm:$0xff] }
  0x10   :  { %1758 = vmatpush.msra.mxu1 %v100_v7  ;;  %1759 = vmatpush.msra.mxu2 %v100_v7  ;;  %v48_v45 = vld [vmem:[%s3216_s3 + $0x20] sm:$0xff]  ;;  %v119_v46 = vld [vmem:[%s3214_s1 + $0x58] sm:$0xff]  ;;  %v368_v50 = vld [vmem:[%s3215_s5 + $0x10] sm:$0xff] }
  0x11   :  { %147 = vmatpush.msra.mxu0 %v100_v7  ;;  %1760 = vmatpush.msra.mxu3 %v100_v7  ;;  %v127_v47 = vld [vmem:[%s3214_s1 + $0x98] sm:$0xff]  ;;  %v46_v51 = vld [vmem:[%s3216_s3 + $0x10] sm:$0xff]  ;;  %v367_v52 = vld [vmem:[%s3215_s5 + $0x8] sm:$0xff] }
  0x12   :  { %1761 = vmatpush.msra.mxu1 %v99_v8  ;;  %1762 = vmatpush.msra.mxu2 %v99_v8  ;;  %v369_v48 = vld [vmem:[%s3215_s5 + $0x18] sm:$0xff]  ;;  %v45_v53 = vld [vmem:[%s3216_s3 + $0x8] sm:$0xff]  ;;  %v366_v54 = vld [vmem:[%s3215_s5] sm:$0xff] }
  0x13   :  { %148 = vmatpush.msra.mxu0 %v99_v8  ;;  %1763 = vmatpush.msra.mxu3 %v99_v8  ;;  %v47_v49 = vld [vmem:[%s3216_s3 + $0x18] sm:$0xff]  ;;  %v44_v55 = vld [vmem:[%s3216_s3] sm:$0xff]  ;;  %v121_v59 = vld [vmem:[%s3214_s1 + $0x68] sm:$0xff] }
  0x14   :  { %1764 = vmatpush.msra.mxu1 %v98_v9  ;;  %1765 = vmatpush.msra.mxu2 %v98_v9  ;;  %v120_v56 = vld [vmem:[%s3214_s1 + $0x60] sm:$0xff]  ;;  %v129_v60 = vld [vmem:[%s3214_s1 + $0xa8] sm:$0xff]  ;;  %v122_v62 = vld [vmem:[%s3214_s1 + $0x70] sm:$0xff] }
  0x15   :  { %149 = vmatpush.msra.mxu0 %v98_v9  ;;  %1766 = vmatpush.msra.mxu3 %v98_v9  ;;  %v128_v57 = vld [vmem:[%s3214_s1 + $0xa0] sm:$0xff]  ;;  %v109_v61 = vld [vmem:[%s3214_s1 + $0x8] sm:$0xff]  ;;  %v130_v63 = vld [vmem:[%s3214_s1 + $0xb0] sm:$0xff] }
  0x16   :  { %1767 = vmatpush.msra.mxu1 %v97_v10  ;;  %1768 = vmatpush.msra.mxu2 %v97_v10  ;;  %v108_v58 = vld [vmem:[%s3214_s1] sm:$0xff]  ;;  %v110_v0 = vld [vmem:[%s3214_s1 + $0x10] sm:$0xff]  ;;  %v123_v1 = vld [vmem:[%s3214_s1 + $0x78] sm:$0xff] }
  0x17   :  { %150 = vmatpush.msra.mxu0 %v97_v10  ;;  %1769 = vmatpush.msra.mxu3 %v97_v10  ;;  %v131_v2 = vld [vmem:[%s3214_s1 + $0xb8] sm:$0xff]  ;;  %v60_v4 = vld [vmem:[%s3217_s0] sm:$0xff]  ;;  %v61_v7 = vld [vmem:[%s3217_s0 + $0x8] sm:$0xff] }
  0x18   :  { %1770 = vmatpush.msra.mxu1 %v96_v11  ;;  %1771 = vmatpush.msra.mxu2 %v96_v11  ;;  %v111_v3 = vld [vmem:[%s3214_s1 + $0x18] sm:$0xff]  ;;  %v382_v5 = vld [vmem:[%s3218_s2] sm:$0xff]  ;;  %v383_v8 = vld [vmem:[%s3218_s2 + $0x8] sm:$0xff] }
  0x19   :  { %151 = vmatpush.msra.mxu0 %v96_v11  ;;  %1772 = vmatpush.msra.mxu3 %v96_v11  ;;  %v112_v6 = vld [vmem:[%s3214_s1 + $0x20] sm:$0xff]  ;;  %v113_v9 = vld [vmem:[%s3214_s1 + $0x28] sm:$0xff]  ;;  %v62_v10 = vld [vmem:[%s3217_s0 + $0x10] sm:$0xff] }
  0x1a   :  { %1773 = vmatpush.msra.mxu1 %v95_v12  ;;  %1774 = vmatpush.msra.mxu2 %v95_v12  ;;  %v384_v11 = vld [vmem:[%s3218_s2 + $0x10] sm:$0xff] }
  0x1b   :  { %152 = vmatpush.msra.mxu0 %v95_v12  ;;  %1775 = vmatpush.msra.mxu3 %v95_v12  ;;  %v114_v12 = vld [vmem:[%s3214_s1 + $0x30] sm:$0xff] }
  0x1c   :  { %1776 = vmatpush.msra.mxu1 %v94_v13  ;;  %1777 = vmatpush.msra.mxu2 %v94_v13 }
  0x1d   :  { %153 = vmatpush.msra.mxu0 %v94_v13  ;;  %1778 = vmatpush.msra.mxu3 %v94_v13  ;;  %v63_v13 = vld [vmem:[%s3217_s0 + $0x18] sm:$0xff] }
  0x1e   :  { %1779 = vmatpush.msra.mxu1 %v93_v14  ;;  %1780 = vmatpush.msra.mxu2 %v93_v14 }
  0x1f   :  { %154 = vmatpush.msra.mxu0 %v93_v14  ;;  %1781 = vmatpush.msra.mxu3 %v93_v14  ;;  %v385_v14 = vld [vmem:[%s3218_s2 + $0x18] sm:$0xff] }
  0x20   :  { %1782 = vmatpush.msra.mxu1 %v92_v15  ;;  %1783 = vmatpush.msra.mxu2 %v92_v15 }
  0x21   :  { %180 = vmatmul.f32.vlgmr.msra.gmra.mxu1 %v116_v16  ;;  %204 = vmatmul.f32.vlgmr.msra.gmra.mxu2 %v124_v17  ;;  %v64_v16 = vld [vmem:[%s3217_s0 + $0x20] sm:$0xff] }
  0x22   :  { %414 = vmatpush.msrb.mxu2 %v381_v18  ;;  %253 = vmatpush.msrb.mxu1 %v59_v19  ;;  %v386_v17 = vld [vmem:[%s3218_s2 + $0x20] sm:$0xff]  ;;  %v65_v18 = vld [vmem:[%s3217_s0 + $0x28] sm:$0xff] }
  0x23   :  { %155 = vmatpush.msra.mxu0 %v92_v15  ;;  %1784 = vmatpush.msra.mxu3 %v92_v15  ;;  %v115_v15 = vld [vmem:[%s3214_s1 + $0x38] sm:$0xff]  ;;  %v387_v19 = vld [vmem:[%s3218_s2 + $0x28] sm:$0xff] }
  0x24   :  { %415 = vmatpush.msrb.mxu2 %v380_v20  ;;  %254 = vmatpush.msrb.mxu1 %v58_v21  ;;  %v132_v20 = vld [vmem:[%s3214_s1 + $0xc0] sm:$0xff]  ;;  %v642_v21 = vld [vmem:[%s3220_s7 + $0x78] sm:$0xff] }
  0x25   :  { %156 = vmatmul.f32.vlgmr.msra.gmra.mxu0 %v108_v58  ;;  %228 = vmatmul.f32.vlgmr.msra.gmra.mxu3 %v132_v20  ;;  %v630_v58 = vld [vmem:[%s3220_s7 + $0x18] sm:$0xff]  ;;  %v398_v20 = vld [vmem:[%s3218_s2 + $0x80] sm:$0xff] }
  0x26   :  { %416 = vmatpush.msrb.mxu2 %v379_v22  ;;  %255 = vmatpush.msrb.mxu1 %v57_v23  ;;  %v66_v22 = vld [vmem:[%s3217_s0 + $0x30] sm:$0xff] }
  0x27   :  { %647 = vmatpush.msrb.mxu3 %v642_v21  ;;  %v388_v23 = vld [vmem:[%s3218_s2 + $0x30] sm:$0xff] }
  0x28   :  { %417 = vmatpush.msrb.mxu2 %v378_v24  ;;  %256 = vmatpush.msrb.mxu1 %v56_v25  ;;  %v641_v24 = vld [vmem:[%s3220_s7 + $0x70] sm:$0xff]  ;;  %v133_v25 = vld [vmem:[%s3214_s1 + $0xc8] sm:$0xff] }
  0x29   :  { %183 = vmatmul.f32.gmra.mxu1 %v117_v26  ;;  %207 = vmatmul.f32.gmra.mxu2 %v125_v27  ;;  %v640_v26 = vld [vmem:[%s3220_s7 + $0x68] sm:$0xff]  ;;  %v67_v27 = vld [vmem:[%s3217_s0 + $0x38] sm:$0xff] }
  0x2a   :  { %418 = vmatpush.msrb.mxu2 %v377_v28  ;;  %257 = vmatpush.msrb.mxu1 %v55_v29  ;;  %v389_v28 = vld [vmem:[%s3218_s2 + $0x38] sm:$0xff]  ;;  %v639_v29 = vld [vmem:[%s3220_s7 + $0x60] sm:$0xff] }
  0x2b   :  { %648 = vmatpush.msrb.mxu3 %v641_v24 }
  0x2c   :  { %419 = vmatpush.msrb.mxu2 %v376_v30  ;;  %258 = vmatpush.msrb.mxu1 %v54_v31  ;;  %v134_v30 = vld [vmem:[%s3214_s1 + $0xd0] sm:$0xff]  ;;  %v638_v31 = vld [vmem:[%s3220_s7 + $0x58] sm:$0xff] }
  0x2d   :  { %159 = vmatmul.f32.gmra.mxu0 %v109_v61  ;;  %231 = vmatmul.f32.gmra.mxu3 %v133_v25  ;;  %v72_v61 = vld [vmem:[%s3217_s0 + $0x60] sm:$0xff] }
  0x2e   :  { %420 = vmatpush.msrb.mxu2 %v375_v32  ;;  %259 = vmatpush.msrb.mxu1 %v53_v33  ;;  %v68_v33 = vld [vmem:[%s3217_s0 + $0x40] sm:$0xff] }
  0x2f   :  { %649 = vmatpush.msrb.mxu3 %v640_v26 }
  0x30   :  { %421 = vmatpush.msrb.mxu2 %v374_v34  ;;  %260 = vmatpush.msrb.mxu1 %v52_v35  ;;  %v390_v34 = vld [vmem:[%s3218_s2 + $0x40] sm:$0xff]  ;;  %v637_v35 = vld [vmem:[%s3220_s7 + $0x50] sm:$0xff] }
  0x31   :  { %186 = vmatmul.f32.gmra.mxu1 %v118_v36  ;;  %210 = vmatmul.f32.gmra.mxu2 %v126_v37  ;;  %v135_v36 = vld [vmem:[%s3214_s1 + $0xd8] sm:$0xff]  ;;  %v636_v37 = vld [vmem:[%s3220_s7 + $0x48] sm:$0xff] }
  0x32   :  { %422 = vmatpush.msrb.mxu2 %v373_v38  ;;  %261 = vmatpush.msrb.mxu1 %v51_v39 }
  0x33   :  { %650 = vmatpush.msrb.mxu3 %v639_v29 }
  0x34   :  { %423 = vmatpush.msrb.mxu2 %v372_v40  ;;  %262 = vmatpush.msrb.mxu1 %v50_v41  ;;  %v69_v40 = vld [vmem:[%s3217_s0 + $0x48] sm:$0xff] }
  0x35   :  { %162 = vmatmul.f32.gmra.mxu0 %v110_v0  ;;  %234 = vmatmul.f32.gmra.mxu3 %v134_v30  ;;  %v391_v41 = vld [vmem:[%s3218_s2 + $0x48] sm:$0xff]  ;;  %v139_v0 = vld [vmem:[%s3214_s1 + $0xf8] sm:$0xff] }
  0x36   :  { %424 = vmatpush.msrb.mxu2 %v371_v42  ;;  %263 = vmatpush.msrb.mxu1 %v49_v43  ;;  %v635_v42 = vld [vmem:[%s3220_s7 + $0x40] sm:$0xff] }
  0x37   :  { %651 = vmatpush.msrb.mxu3 %v638_v31  ;;  %v136_v43 = vld [vmem:[%s3214_s1 + $0xe0] sm:$0xff] }
  0x38   :  { %425 = vmatpush.msrb.mxu2 %v370_v44  ;;  %264 = vmatpush.msrb.mxu1 %v48_v45  ;;  %v634_v44 = vld [vmem:[%s3220_s7 + $0x38] sm:$0xff] }
  0x39   :  { %189 = vmatmul.f32.gmra.mxu1 %v119_v46  ;;  %213 = vmatmul.f32.gmra.mxu2 %v127_v47  ;;  %v70_v47 = vld [vmem:[%s3217_s0 + $0x50] sm:$0xff] }
  0x3a   :  { %426 = vmatpush.msrb.mxu2 %v369_v48  ;;  %265 = vmatpush.msrb.mxu1 %v47_v49  ;;  %v392_v48 = vld [vmem:[%s3218_s2 + $0x50] sm:$0xff] }
  0x3b   :  { %652 = vmatpush.msrb.mxu3 %v637_v35  ;;  %v633_v49 = vld [vmem:[%s3220_s7 + $0x30] sm:$0xff] }
  0x3c   :  { %427 = vmatpush.msrb.mxu2 %v368_v50  ;;  %266 = vmatpush.msrb.mxu1 %v46_v51  ;;  %v137_v50 = vld [vmem:[%s3214_s1 + $0xe8] sm:$0xff] }
  0x3d   :  { %165 = vmatmul.f32.gmra.mxu0 %v111_v3  ;;  %237 = vmatmul.f32.gmra.mxu3 %v135_v36  ;;  %v632_v51 = vld [vmem:[%s3220_s7 + $0x28] sm:$0xff]  ;;  %v78_v36 = vld [vmem:[%s3217_s0 + $0x90] sm:$0xff] }
  0x3e   :  { %428 = vmatpush.msrb.mxu2 %v367_v52  ;;  %267 = vmatpush.msrb.mxu1 %v45_v53 }
  0x3f   :  { %653 = vmatpush.msrb.mxu3 %v636_v37  ;;  %v400_v37 = vld [vmem:[%s3218_s2 + $0x90] sm:$0xff] }
  0x40   :  { %429 = vmatpush.msrb.mxu2 %v366_v54  ;;  %268 = vmatpush.msrb.mxu1 %v44_v55  ;;  %v71_v54 = vld [vmem:[%s3217_s0 + $0x58] sm:$0xff] }
  0x41   :  { %192 = vmatmul.f32.gmra.mxu1 %v120_v56  ;;  %216 = vmatmul.f32.gmra.mxu2 %v128_v57  ;;  %v393_v55 = vld [vmem:[%s3218_s2 + $0x58] sm:$0xff]  ;;  %v631_v56 = vld [vmem:[%s3220_s7 + $0x20] sm:$0xff]  ;;  %v138_v57 = vld [vmem:[%s3214_s1 + $0xf0] sm:$0xff] }
  0x42   :  { %654 = vmatpush.msrb.mxu3 %v635_v42 }
  0x44   :  { %655 = vmatpush.msrb.mxu3 %v634_v44 }
  0x45   :  { %168 = vmatmul.f32.gmra.mxu0 %v112_v6  ;;  %240 = vmatmul.f32.gmra.mxu3 %v136_v43  ;;  %v627_v6 = vld [vmem:[%s3220_s7] sm:$0xff] }
  0x46   :  { %656 = vmatpush.msrb.mxu3 %v633_v49  ;;  %v79_v49 = vld [vmem:[%s3217_s0 + $0x98] sm:$0xff] }
  0x48   :  { %657 = vmatpush.msrb.mxu3 %v632_v51 }
  0x49   :  { %195 = vmatmul.f32.gmra.mxu1 %v121_v59  ;;  %219 = vmatmul.f32.gmra.mxu2 %v129_v60 }
  0x4a   :  { %658 = vmatpush.msrb.mxu3 %v631_v56 }
  0x4c   :  { %659 = vmatpush.msrb.mxu3 %v630_v58 }
  0x4d   :  { %171 = vmatmul.f32.gmra.mxu0 %v113_v9  ;;  %243 = vmatmul.f32.gmra.mxu3 %v137_v50  ;;  %v74_v9 = vld [vmem:[%s3217_s0 + $0x70] sm:$0xff]  ;;  %v401_v50 = vld [vmem:[%s3218_s2 + $0x98] sm:$0xff] }
  0x51   :  { %198 = vmatmul.f32.gmra.mxu1 %v122_v62  ;;  %222 = vmatmul.f32.gmra.mxu2 %v130_v63  ;;  %v394_v62 = vld [vmem:[%s3218_s2 + $0x60] sm:$0xff]  ;;  %v629_v63 = vld [vmem:[%s3220_s7 + $0x10] sm:$0xff] }
  0x52   :  { %660 = vmatpush.msrb.mxu3 %v629_v63  ;;  %v402_v63 = vld [vmem:[%s3218_s2 + $0xa0] sm:$0xff] }
  0x55   :  { %174 = vmatmul.f32.gmra.mxu0 %v114_v12  ;;  %246 = vmatmul.f32.gmra.mxu3 %v138_v57 }
  0x59   :  { %201 = vmatmul.f32.gmra.mxu1 %v123_v1  ;;  %225 = vmatmul.f32.gmra.mxu2 %v131_v2  ;;  %v628_v1 = vld [vmem:[%s3220_s7 + $0x8] sm:$0xff] }
  0x5a   :  { %661 = vmatpush.msrb.mxu3 %v628_v1 }
  0x5c   :  { %662 = vmatpush.msrb.mxu3 %v627_v6 }
  0x5d   :  { %177 = vmatmul.f32.gmra.mxu0 %v115_v15  ;;  %249 = vmatmul.f32.gmra.mxu3 %v139_v0  ;;  %v397_v15 = vld [vmem:[%s3218_s2 + $0x78] sm:$0xff] }
  0x61   :  { %269 = vmatmul.f32.vlgmr.msrb.gmra.mxu1 %v60_v4  ;;  %430 = vmatmul.f32.vlgmr.msrb.gmra.mxu2 %v382_v5  ;;  %v73_v4 = vld [vmem:[%s3217_s0 + $0x68] sm:$0xff] }
  0x62   :  { %v395_v5 = vld [vmem:[%s3218_s2 + $0x68] sm:$0xff] }
  0x69   :  { %272 = vmatmul.f32.gmra.mxu1 %v61_v7  ;;  %433 = vmatmul.f32.gmra.mxu2 %v383_v8 }
  0x71   :  { %275 = vmatmul.f32.gmra.mxu1 %v62_v10  ;;  %436 = vmatmul.f32.gmra.mxu2 %v384_v11  ;;  %v396_v10 = vld [vmem:[%s3218_s2 + $0x70] sm:$0xff] }
  0x79   :  { %278 = vmatmul.f32.gmra.mxu1 %v63_v13  ;;  %439 = vmatmul.f32.gmra.mxu2 %v385_v14  ;;  %v75_v14 = vld [vmem:[%s3217_s0 + $0x78] sm:$0xff] }
  0x81   :  { %281 = vmatmul.f32.gmra.mxu1 %v64_v16  ;;  %442 = vmatmul.f32.gmra.mxu2 %v386_v17 }
  0x89   :  { %284 = vmatmul.f32.gmra.mxu1 %v65_v18  ;;  %445 = vmatmul.f32.gmra.mxu2 %v387_v19  ;;  %v76_v19 = vld [vmem:[%s3217_s0 + $0x80] sm:$0xff] }
  0x91   :  { %287 = vmatmul.f32.gmra.mxu1 %v66_v22  ;;  %448 = vmatmul.f32.gmra.mxu2 %v388_v23  ;;  %v2352_v22 = vld [vmem:[%s3219_s6] ss:$0 sm:$0xff] }
  0x99   :  { %290 = vmatmul.f32.gmra.mxu1 %v67_v27  ;;  %451 = vmatmul.f32.gmra.mxu2 %v389_v28  ;;  %v77_v27 = vld [vmem:[%s3217_s0 + $0x88] sm:$0xff] }
  0x9a   :  { %v399_v28 = vld [vmem:[%s3218_s2 + $0x88] sm:$0xff] }
  0x9e   :  { %v2215_v32 = vpop.f32.mrf.mxu1 }
  0xa1   :  { %293 = vmatmul.f32.gmra.mxu1 %v68_v33  ;;  %454 = vmatmul.f32.gmra.mxu2 %v390_v34 }
  0xa2   :  { %v157_v11 = vpop.f32.mrf.mxu0 }
  0xa4   :  { %v2232_v38 = vpop.f32.mrf.mxu2 }
  0xa6   :  { %v2234_v39 = vpop.f32.mrf.mxu1 }
  0xa9   :  { %296 = vmatmul.f32.gmra.mxu1 %v69_v40  ;;  %457 = vmatmul.f32.gmra.mxu2 %v391_v41 }
  0xaa   :  { %v160_v16 = vpop.f32.mrf.mxu0 }
  0xac   :  { %v2251_v45 = vpop.f32.mrf.mxu2 }
  0xae   :  { %v2253_v46 = vpop.f32.mrf.mxu1 }
  0xb1   :  { %299 = vmatmul.f32.gmra.mxu1 %v70_v47  ;;  %460 = vmatmul.f32.gmra.mxu2 %v392_v48 }
  0xb2   :  { %v163_v24 = vpop.f32.mrf.mxu0 }
  0xb4   :  { %v2270_v52 = vpop.f32.mrf.mxu2 }
  0xb6   :  { %v2272_v53 = vpop.f32.mrf.mxu1 }
  0xb9   :  { %302 = vmatmul.f32.gmra.mxu1 %v71_v54  ;;  %463 = vmatmul.f32.gmra.mxu2 %v393_v55 }
  0xba   :  { %v166_v40 = vpop.f32.mrf.mxu0 }
  0xbc   :  { %v2289_v59 = vpop.f32.mrf.mxu2 }
  0xbe   :  { %v2291_v60 = vpop.f32.mrf.mxu1 }
  0xc1   :  { %305 = vmatmul.f32.gmra.mxu1 %v72_v61  ;;  %466 = vmatmul.f32.gmra.mxu2 %v394_v62  ;;  %v80_v62 = vld [vmem:[%s3217_s0 + $0xa0] sm:$0xff] }
  0xc2   :  { %v169_v54 = vpop.f32.mrf.mxu0 }
  0xc4   :  { %v2308_v2 = vpop.f32.mrf.mxu2 }
  0xc6   :  { %v2310_v3 = vpop.f32.mrf.mxu1 }
  0xc9   :  { %308 = vmatmul.f32.gmra.mxu1 %v73_v4  ;;  %469 = vmatmul.f32.gmra.mxu2 %v395_v5 }
  0xca   :  { %v172_v5 = vpop.f32.mrf.mxu0 }
  0xcc   :  { %v2321_v7 = vpop.f32.mrf.mxu2 }
  0xce   :  { %v2323_v8 = vpop.f32.mrf.mxu1 }
  0xd1   :  { %311 = vmatmul.f32.gmra.mxu1 %v74_v9  ;;  %472 = vmatmul.f32.gmra.mxu2 %v396_v10 }
  0xd4   :  { %v2331_v12 = vpop.f32.mrf.mxu2 }
  0xd6   :  { %v2333_v13 = vpop.f32.mrf.mxu1 }
  0xd9   :  { %314 = vmatmul.f32.gmra.mxu1 %v75_v14  ;;  %475 = vmatmul.f32.gmra.mxu2 %v397_v15  ;;  %v403_v14 = vld [vmem:[%s3218_s2 + $0xa8] sm:$0xff] }
  0xdc   :  { %v2341_v17 = vpop.f32.mrf.mxu2 }
  0xde   :  { %v270_v18 = vpop.f32.mrf.mxu1 }
  0xdf   :  { %v271_v21 = vadd.f32 %v270_v18, %v157_v11  ;;  %v81_v11 = vld [vmem:[%s3217_s0 + $0xa8] sm:$0xff] }
  0xe1   :  { %317 = vmatmul.f32.gmra.mxu1 %v76_v19  ;;  %478 = vmatmul.f32.gmra.mxu2 %v398_v20  ;;  %v175_v20 = vpop.f32.mrf.mxu0 }
  0xe4   :  { %v431_v23 = vpop.f32.mrf.mxu2 }
  0xe5   :  { %v527_v25 = vadd.f32 %v431_v23, %v271_v21 }
  0xe6   :  { %v273_v26 = vpop.f32.mrf.mxu1 }
  0xe7   :  { %v563_v29 = vadd.f32 %v2352_v22, %v527_v25  ;;  %v274_v30 = vadd.f32 %v273_v26, %v160_v16  ;;  %v404_v25 = vld [vmem:[%s3218_s2 + $0xb0] sm:$0xff] }
  0xe9   :  { %320 = vmatmul.f32.gmra.mxu1 %v77_v27  ;;  %481 = vmatmul.f32.gmra.mxu2 %v399_v28  ;;  %v595_v31 = vmax.f32 %v563_v29, 0.0  ;;  %v807_v29 = vld [vmem:[%s3222_s9 + $0x78] sm:$0xff] }
  0xea   :  { %812 = vmatpush.msrb.mxu0 %v807_v29  ;;  %v409_v29 = vld [vmem:[%s3218_s2 + $0xd8] sm:$0xff] }
  0xeb   :  { %663 = vmatmul.f32.vlgmr.msrb.gmra.mxu3 %v595_v31 }
  0xec   :  { %v434_v33 = vpop.f32.mrf.mxu2 }
  0xed   :  { %v528_v34 = vadd.f32 %v434_v33, %v274_v30 }
  0xee   :  { %v276_v35 = vpop.f32.mrf.mxu1 }
  0xef   :  { %v564_v41 = vadd.f32 %v2352_v22, %v528_v34  ;;  %v277_v42 = vadd.f32 %v276_v35, %v163_v24  ;;  %v82_v24 = vld [vmem:[%s3217_s0 + $0xb0] sm:$0xff]  ;;  %v83_v34 = vld [vmem:[%s3217_s0 + $0xb8] sm:$0xff] }
  0xf0   :  { %v405_v35 = vld [vmem:[%s3218_s2 + $0xb8] sm:$0xff] }
  0xf1   :  { %323 = vmatmul.f32.gmra.mxu1 %v78_v36  ;;  %484 = vmatmul.f32.gmra.mxu2 %v400_v37  ;;  %v596_v43 = vmax.f32 %v564_v41, 0.0  ;;  %v178_v36 = vpop.f32.mrf.mxu0 }
  0xf3   :  { %666 = vmatmul.f32.gmra.mxu3 %v596_v43  ;;  %v805_v43 = vld [vmem:[%s3222_s9 + $0x68] sm:$0xff] }
  0xf4   :  { %v437_v44 = vpop.f32.mrf.mxu2 }
  0xf5   :  { %v529_v47 = vadd.f32 %v437_v44, %v277_v42 }
  0xf6   :  { %v279_v48 = vpop.f32.mrf.mxu1 }
  0xf7   :  { %v565_v51 = vadd.f32 %v2352_v22, %v529_v47  ;;  %v280_v55 = vadd.f32 %v279_v48, %v166_v40  ;;  %v806_v40 = vld [vmem:[%s3222_s9 + $0x70] sm:$0xff] }
  0xf8   :  { %813 = vmatpush.msrb.mxu0 %v806_v40 }
  0xf9   :  { %326 = vmatmul.f32.gmra.mxu1 %v79_v49  ;;  %487 = vmatmul.f32.gmra.mxu2 %v401_v50  ;;  %v597_v56 = vmax.f32 %v565_v51, 0.0  ;;  %v84_v49 = vld [vmem:[%s3217_s0 + $0xc0] sm:$0xff]  ;;  %v2418_v51 = vpop.f32.mrf.mxu3 }
  0xfa   :  { %814 = vmatpush.msrb.mxu0 %v805_v43  ;;  %v406_v50 = vld [vmem:[%s3218_s2 + $0xc0] sm:$0xff] }
  0xfb   :  { %669 = vmatmul.f32.gmra.mxu3 %v597_v56  ;;  %v796_v43 = vld [vmem:[%s3222_s9 + $0x20] sm:$0xff] }
  0xfc   :  { %v440_v57 = vpop.f32.mrf.mxu2 }
  0xfd   :  { %v530_v58 = vadd.f32 %v440_v57, %v280_v55  ;;  %v804_v55 = vld [vmem:[%s3222_s9 + $0x60] sm:$0xff] }
  0xfe   :  { %v282_v61 = vpop.f32.mrf.mxu1  ;;  %815 = vmatpush.msrb.mxu0 %v804_v55  ;;  %v89_v55 = vld [vmem:[%s3217_s0 + $0xe8] sm:$0xff] }
  0xff   :  { %v566_v0 = vadd.f32 %v2352_v22, %v530_v58  ;;  %v283_v1 = vadd.f32 %v282_v61, %v169_v54  ;;  %v803_v58 = vld [vmem:[%s3222_s9 + $0x58] sm:$0xff] }
 0x100   :  { %816 = vmatpush.msrb.mxu0 %v803_v58 }
 0x101   :  { %329 = vmatmul.f32.gmra.mxu1 %v80_v62  ;;  %490 = vmatmul.f32.gmra.mxu2 %v402_v63  ;;  %v598_v4 = vmax.f32 %v566_v0, 0.0  ;;  %v85_v0 = vld [vmem:[%s3217_s0 + $0xc8] sm:$0xff] }
 0x103   :  { %672 = vmatmul.f32.gmra.mxu3 %v598_v4 }
 0x104   :  { %v443_v6 = vpop.f32.mrf.mxu2 }
 0x105   :  { %v531_v9 = vadd.f32 %v443_v6, %v283_v1  ;;  %v407_v1 = vld [vmem:[%s3218_s2 + $0xc8] sm:$0xff] }
 0x106   :  { %v285_v10 = vpop.f32.mrf.mxu1 }
 0x107   :  { %v567_v15 = vadd.f32 %v2352_v22, %v531_v9  ;;  %v286_v16 = vadd.f32 %v285_v10, %v172_v5  ;;  %v2438_v5 = vpop.f32.mrf.mxu3  ;;  %v801_v10 = vld [vmem:[%s3222_s9 + $0x48] sm:$0xff] }
 0x109   :  { %332 = vmatmul.f32.gmra.mxu1 %v81_v11  ;;  %493 = vmatmul.f32.gmra.mxu2 %v403_v14  ;;  %v599_v18 = vmax.f32 %v567_v15, 0.0 }
 0x10b   :  { %675 = vmatmul.f32.gmra.mxu3 %v599_v18  ;;  %v408_v18 = vld [vmem:[%s3218_s2 + $0xd0] sm:$0xff] }
 0x10c   :  { %v446_v19 = vpop.f32.mrf.mxu2 }
 0x10d   :  { %v532_v21 = vadd.f32 %v446_v19, %v286_v16  ;;  %v86_v16 = vld [vmem:[%s3217_s0 + $0xd0] sm:$0xff] }
 0x10e   :  { %v288_v23 = vpop.f32.mrf.mxu1 }
 0x10f   :  { %v568_v26 = vadd.f32 %v2352_v22, %v532_v21  ;;  %v289_v27 = vadd.f32 %v288_v23, %v175_v20  ;;  %v2454_v21 = vpop.f32.mrf.mxu3 }
 0x111   :  { %335 = vmatmul.f32.gmra.mxu1 %v82_v24  ;;  %496 = vmatmul.f32.gmra.mxu2 %v404_v25  ;;  %v600_v28 = vmax.f32 %v568_v26, 0.0  ;;  %v799_v24 = vld [vmem:[%s3222_s9 + $0x38] sm:$0xff] }
 0x113   :  { %678 = vmatmul.f32.gmra.mxu3 %v600_v28  ;;  %v87_v28 = vld [vmem:[%s3217_s0 + $0xd8] sm:$0xff] }
 0x114   :  { %v449_v30 = vpop.f32.mrf.mxu2 }
 0x115   :  { %v533_v31 = vadd.f32 %v449_v30, %v289_v27 }
 0x116   :  { %v291_v33 = vpop.f32.mrf.mxu1 }
 0x117   :  { %v569_v37 = vadd.f32 %v2352_v22, %v533_v31  ;;  %v292_v41 = vadd.f32 %v291_v33, %v178_v36  ;;  %v2474_v36 = vpop.f32.mrf.mxu3 }
 0x119   :  { %338 = vmatmul.f32.gmra.mxu1 %v83_v34  ;;  %499 = vmatmul.f32.gmra.mxu2 %v405_v35  ;;  %v601_v42 = vmax.f32 %v569_v37, 0.0  ;;  %v797_v34 = vld [vmem:[%s3222_s9 + $0x28] sm:$0xff] }
 0x11b   :  { %681 = vmatmul.f32.gmra.mxu3 %v601_v42  ;;  %v410_v42 = vld [vmem:[%s3218_s2 + $0xe0] sm:$0xff] }
 0x11c   :  { %v452_v44 = vpop.f32.mrf.mxu2 }
 0x11d   :  { %v534_v47 = vadd.f32 %v452_v44, %v292_v41  ;;  %v88_v41 = vld [vmem:[%s3217_s0 + $0xe0] sm:$0xff] }
 0x11e   :  { %v294_v48 = vpop.f32.mrf.mxu1 }
 0x11f   :  { %v570_v54 = vadd.f32 %v2352_v22, %v534_v47  ;;  %v295_v57 = vadd.f32 %v294_v48, %v2215_v32  ;;  %v802_v32 = vld [vmem:[%s3222_s9 + $0x50] sm:$0xff]  ;;  %v795_v48 = vld [vmem:[%s3222_s9 + $0x18] sm:$0xff] }
 0x120   :  { %817 = vmatpush.msrb.mxu0 %v802_v32  ;;  %v90_v32 = vld [vmem:[%s3217_s0 + $0xf0] sm:$0xff] }
 0x121   :  { %341 = vmatmul.f32.gmra.mxu1 %v84_v49  ;;  %502 = vmatmul.f32.gmra.mxu2 %v406_v50  ;;  %v602_v56 = vmax.f32 %v570_v54, 0.0 }
 0x122   :  { %818 = vmatpush.msrb.mxu0 %v801_v10 }
 0x123   :  { %684 = vmatmul.f32.gmra.mxu3 %v602_v56  ;;  %v411_v56 = vld [vmem:[%s3218_s2 + $0xe8] sm:$0xff] }
 0x124   :  { %v455_v61 = vpop.f32.mrf.mxu2 }
 0x125   :  { %v535_v62 = vadd.f32 %v455_v61, %v295_v57  ;;  %v2496_v57 = vpop.f32.mrf.mxu3  ;;  %v794_v61 = vld [vmem:[%s3222_s9 + $0x10] sm:$0xff] }
 0x126   :  { %v297_v63 = vpop.f32.mrf.mxu1 }
 0x127   :  { %v571_v4 = vadd.f32 %v2352_v22, %v535_v62  ;;  %v298_v9 = vadd.f32 %v297_v63, %v2234_v39  ;;  %v800_v39 = vld [vmem:[%s3222_s9 + $0x40] sm:$0xff]  ;;  %v793_v63 = vld [vmem:[%s3222_s9 + $0x8] sm:$0xff] }
 0x128   :  { %819 = vmatpush.msrb.mxu0 %v800_v39  ;;  %v413_v39 = vld [vmem:[%s3218_s2 + $0xf8] sm:$0xff] }
 0x129   :  { %344 = vmatmul.f32.gmra.mxu1 %v85_v0  ;;  %505 = vmatmul.f32.gmra.mxu2 %v407_v1  ;;  %v603_v6 = vmax.f32 %v571_v4, 0.0 }
 0x12a   :  { %820 = vmatpush.msrb.mxu0 %v799_v24 }
 0x12b   :  { %687 = vmatmul.f32.gmra.mxu3 %v603_v6  ;;  %v412_v6 = vld [vmem:[%s3218_s2 + $0xf0] sm:$0xff] }
 0x12c   :  { %v458_v11 = vpop.f32.mrf.mxu2 }
 0x12d   :  { %v536_v14 = vadd.f32 %v458_v11, %v298_v9  ;;  %v792_v11 = vld [vmem:[%s3222_s9] sm:$0xff] }
 0x12e   :  { %v300_v15 = vpop.f32.mrf.mxu1 }
 0x12f   :  { %v572_v19 = vadd.f32 %v2352_v22, %v536_v14  ;;  %v301_v23 = vadd.f32 %v300_v15, %v2253_v46  ;;  %v798_v46 = vld [vmem:[%s3222_s9 + $0x30] sm:$0xff] }
 0x130   :  { %821 = vmatpush.msrb.mxu0 %v798_v46 }
 0x131   :  { %347 = vmatmul.f32.gmra.mxu1 %v86_v16  ;;  %508 = vmatmul.f32.gmra.mxu2 %v408_v18  ;;  %v604_v20 = vmax.f32 %v572_v19, 0.0  ;;  %v91_v19 = vld [vmem:[%s3217_s0 + $0xf8] sm:$0xff] }
 0x132   :  { %822 = vmatpush.msrb.mxu0 %v797_v34 }
 0x133   :  { %690 = vmatmul.f32.gmra.mxu3 %v604_v20 }
 0x134   :  { %v461_v25 = vpop.f32.mrf.mxu2  ;;  %823 = vmatpush.msrb.mxu0 %v796_v43 }
 0x135   :  { %v537_v26 = vadd.f32 %v461_v25, %v301_v23 }
 0x136   :  { %v303_v27 = vpop.f32.mrf.mxu1  ;;  %824 = vmatpush.msrb.mxu0 %v795_v48 }
 0x137   :  { %v573_v30 = vadd.f32 %v2352_v22, %v537_v26  ;;  %v304_v33 = vadd.f32 %v303_v27, %v2272_v53 }
 0x138   :  { %825 = vmatpush.msrb.mxu0 %v794_v61 }
 0x139   :  { %350 = vmatmul.f32.gmra.mxu1 %v87_v28  ;;  %511 = vmatmul.f32.gmra.mxu2 %v409_v29  ;;  %v605_v31 = vmax.f32 %v573_v30, 0.0 }
 0x13a   :  { %826 = vmatpush.msrb.mxu0 %v793_v63 }
 0x13b   :  { %693 = vmatmul.f32.gmra.mxu3 %v605_v31 }
 0x13c   :  { %v464_v35 = vpop.f32.mrf.mxu2  ;;  %827 = vmatpush.msrb.mxu0 %v792_v11 }
 0x13d   :  { %v538_v37 = vadd.f32 %v464_v35, %v304_v33 }
 0x13e   :  { %v306_v40 = vpop.f32.mrf.mxu1 }
 0x13f   :  { %v574_v53 = vadd.f32 %v2352_v22, %v538_v37  ;;  %v307_v47 = vadd.f32 %v306_v40, %v2291_v60  ;;  %v2538_v40 = vld [vmem:[%s3221_s8] ss:$0 sm:$0xff] }
 0x141   :  { %353 = vmatmul.f32.gmra.mxu1 %v88_v41  ;;  %514 = vmatmul.f32.gmra.mxu2 %v410_v42  ;;  %v606_v44 = vmax.f32 %v574_v53, 0.0 }
 0x143   :  { %696 = vmatmul.f32.gmra.mxu3 %v606_v44 }
 0x144   :  { %v467_v49 = vpop.f32.mrf.mxu2 }
 0x145   :  { %v539_v50 = vadd.f32 %v467_v49, %v307_v47 }
 0x146   :  { %v309_v54 = vpop.f32.mrf.mxu1 }
 0x147   :  { %v575_v60 = vadd.f32 %v2352_v22, %v539_v50  ;;  %v310_v62 = vadd.f32 %v309_v54, %v2310_v3  ;;  %v2513_v3 = vpop.f32.mrf.mxu3 }
 0x149   :  { %356 = vmatmul.f32.gmra.mxu1 %v89_v55  ;;  %517 = vmatmul.f32.gmra.mxu2 %v411_v56  ;;  %v607_v58 = vmax.f32 %v575_v60, 0.0 }
 0x14b   :  { %699 = vmatmul.f32.gmra.mxu3 %v607_v58 }
 0x14c   :  { %v470_v0 = vpop.f32.mrf.mxu2 }
 0x14d   :  { %v540_v1 = vadd.f32 %v470_v0, %v310_v62 }
 0x14e   :  { %v312_v4 = vpop.f32.mrf.mxu1 }
 0x14f   :  { %v576_v9 = vadd.f32 %v2352_v22, %v540_v1  ;;  %v313_v14 = vadd.f32 %v312_v4, %v2323_v8  ;;  %v2526_v24 = vpop.f32.mrf.mxu3 }
 0x151   :  { %359 = vmatmul.f32.gmra.mxu1 %v90_v32  ;;  %520 = vmatmul.f32.gmra.mxu2 %v412_v6  ;;  %v608_v10 = vmax.f32 %v576_v9, 0.0 }
 0x153   :  { %702 = vmatmul.f32.gmra.mxu3 %v608_v10 }
 0x154   :  { %v473_v15 = vpop.f32.mrf.mxu2 }
 0x155   :  { %v541_v16 = vadd.f32 %v473_v15, %v313_v14 }
 0x156   :  { %v315_v18 = vpop.f32.mrf.mxu1 }
 0x157   :  { %v577_v20 = vadd.f32 %v2352_v22, %v541_v16  ;;  %v316_v8 = vadd.f32 %v315_v18, %v2333_v13  ;;  %v2531_v31 = vpop.f32.mrf.mxu3 }
 0x159   :  { %362 = vmatmul.f32.gmra.mxu1 %v91_v19  ;;  %523 = vmatmul.f32.gmra.mxu2 %v413_v39  ;;  %v609_v23 = vmax.f32 %v577_v20, 0.0 }
 0x15b   :  { %705 = vmatmul.f32.gmra.mxu3 %v609_v23 }
 0x15c   :  { %v476_v25 = vpop.f32.mrf.mxu2 }
 0x15d   :  { %v542_v26 = vadd.f32 %v476_v25, %v316_v8 }
 0x15e   :  { %v318_v27 = vpop.f32.mrf.mxu1 }
 0x15f   :  { %v578_v28 = vadd.f32 %v2352_v22, %v542_v26  ;;  %v319_v30 = vadd.f32 %v318_v27, %v2232_v38 }
 0x161   :  { %v610_v29 = vmax.f32 %v578_v28, 0.0 }
 0x163   :  { %708 = vmatmul.f32.gmra.mxu3 %v610_v29 }
 0x164   :  { %v479_v46 = vpop.f32.mrf.mxu2 }
 0x165   :  { %v543_v33 = vadd.f32 %v479_v46, %v319_v30 }
 0x166   :  { %v321_v34 = vpop.f32.mrf.mxu1 }
 0x167   :  { %v579_v35 = vadd.f32 %v2352_v22, %v543_v33  ;;  %v322_v13 = vadd.f32 %v321_v34, %v2251_v45 }
 0x169   :  { %v611_v37 = vmax.f32 %v579_v35, 0.0 }
 0x16b   :  { %711 = vmatmul.f32.gmra.mxu3 %v611_v37 }
 0x16c   :  { %v482_v41 = vpop.f32.mrf.mxu2 }
 0x16d   :  { %v544_v42 = vadd.f32 %v482_v41, %v322_v13 }
 0x16e   :  { %v324_v38 = vpop.f32.mrf.mxu1  ;;  %v664_v53 = vpop.f32.mrf.mxu3 }
 0x16f   :  { %v580_v43 = vadd.f32 %v2352_v22, %v544_v42  ;;  %v665_v44 = vadd.f32 %v2538_v40, %v664_v53  ;;  %v325_v49 = vadd.f32 %v324_v38, %v2270_v52 }
 0x171   :  { %v612_v47 = vmax.f32 %v580_v43, 0.0  ;;  %v760_v48 = vmax.f32 %v665_v44, 0.0 }
 0x173   :  { %714 = vmatmul.f32.gmra.mxu3 %v612_v47  ;;  %828 = vmatmul.f32.vlgmr.msrb.gmra.mxu0 %v760_v48 }
 0x174   :  { %v485_v45 = vpop.f32.mrf.mxu2 }
 0x175   :  { %v545_v50 = vadd.f32 %v485_v45, %v325_v49 }
 0x176   :  { %v327_v54 = vpop.f32.mrf.mxu1  ;;  %v667_v55 = vpop.f32.mrf.mxu3 }
 0x177   :  { %v581_v56 = vadd.f32 %v2352_v22, %v545_v50  ;;  %v668_v60 = vadd.f32 %v2538_v40, %v667_v55  ;;  %v328_v62 = vadd.f32 %v327_v54, %v2289_v59 }
 0x179   :  { %v613_v58 = vmax.f32 %v581_v56, 0.0  ;;  %v761_v61 = vmax.f32 %v668_v60, 0.0 }
 0x17b   :  { %717 = vmatmul.f32.gmra.mxu3 %v613_v58  ;;  %831 = vmatmul.f32.gmra.mxu0 %v761_v61 }
 0x17c   :  { %v488_v63 = vpop.f32.mrf.mxu2 }
 0x17d   :  { %v546_v0 = vadd.f32 %v488_v63, %v328_v62 }
 0x17e   :  { %v330_v1 = vpop.f32.mrf.mxu1  ;;  %v670_v52 = vpop.f32.mrf.mxu3 }
 0x17f   :  { %v582_v4 = vadd.f32 %v2352_v22, %v546_v0  ;;  %v671_v32 = vadd.f32 %v2538_v40, %v670_v52  ;;  %v331_v10 = vadd.f32 %v330_v1, %v2308_v2 }
 0x181   :  { %v614_v6 = vmax.f32 %v582_v4, 0.0  ;;  %v762_v9 = vmax.f32 %v671_v32, 0.0 }
 0x183   :  { %720 = vmatmul.f32.gmra.mxu3 %v614_v6  ;;  %834 = vmatmul.f32.gmra.mxu0 %v762_v9 }
 0x184   :  { %v491_v11 = vpop.f32.mrf.mxu2 }
 0x185   :  { %v547_v14 = vadd.f32 %v491_v11, %v331_v10 }
 0x186   :  { %v333_v15 = vpop.f32.mrf.mxu1  ;;  %v673_v59 = vpop.f32.mrf.mxu3 }
 0x187   :  { %v583_v16 = vadd.f32 %v2352_v22, %v547_v14  ;;  %v674_v18 = vadd.f32 %v2538_v40, %v673_v59  ;;  %v334_v20 = vadd.f32 %v333_v15, %v2321_v7 }
 0x189   :  { %v615_v19 = vmax.f32 %v583_v16, 0.0  ;;  %v763_v39 = vmax.f32 %v674_v18, 0.0 }
 0x18b   :  { %723 = vmatmul.f32.gmra.mxu3 %v615_v19  ;;  %837 = vmatmul.f32.gmra.mxu0 %v763_v39 }
 0x18c   :  { %v494_v23 = vpop.f32.mrf.mxu2 }
 0x18d   :  { %v548_v8 = vadd.f32 %v494_v23, %v334_v20 }
 0x18e   :  { %v336_v25 = vpop.f32.mrf.mxu1  ;;  %v676_v2 = vpop.f32.mrf.mxu3 }
 0x18f   :  { %v584_v26 = vadd.f32 %v2352_v22, %v548_v8  ;;  %v677_v27 = vadd.f32 %v2538_v40, %v676_v2  ;;  %v337_v30 = vadd.f32 %v336_v25, %v2331_v12 }
 0x191   :  { %v616_v28 = vmax.f32 %v584_v26, 0.0  ;;  %v764_v29 = vmax.f32 %v677_v27, 0.0 }
 0x193   :  { %726 = vmatmul.f32.gmra.mxu3 %v616_v28  ;;  %840 = vmatmul.f32.gmra.mxu0 %v764_v29 }
 0x194   :  { %v497_v46 = vpop.f32.mrf.mxu2 }
 0x195   :  { %v549_v33 = vadd.f32 %v497_v46, %v337_v30 }
 0x196   :  { %v339_v34 = vpop.f32.mrf.mxu1  ;;  %v679_v7 = vpop.f32.mrf.mxu3 }
 0x197   :  { %v585_v35 = vadd.f32 %v2352_v22, %v549_v33  ;;  %v680_v37 = vadd.f32 %v2538_v40, %v679_v7  ;;  %v340_v42 = vadd.f32 %v339_v34, %v2341_v17 }
 0x199   :  { %v617_v13 = vmax.f32 %v585_v35, 0.0  ;;  %v765_v41 = vmax.f32 %v680_v37, 0.0 }
 0x19b   :  { %729 = vmatmul.f32.gmra.mxu3 %v617_v13  ;;  %843 = vmatmul.f32.gmra.mxu0 %v765_v41 }
 0x19c   :  { %v500_v38 = vpop.f32.mrf.mxu2 }
 0x19d   :  { %v550_v53 = vadd.f32 %v500_v38, %v340_v42 }
 0x19e   :  { %v342_v43 = vpop.f32.mrf.mxu1  ;;  %v682_v12 = vpop.f32.mrf.mxu3 }
 0x19f   :  { %v586_v44 = vadd.f32 %v2352_v22, %v550_v53  ;;  %v683_v47 = vadd.f32 %v2538_v40, %v682_v12  ;;  %v343_v45 = vadd.f32 %v342_v43, %v2418_v51 }
 0x1a1   :  { %v618_v48 = vmax.f32 %v586_v44, 0.0  ;;  %v766_v49 = vmax.f32 %v683_v47, 0.0 }
 0x1a3   :  { %732 = vmatmul.f32.gmra.mxu3 %v618_v48  ;;  %846 = vmatmul.f32.gmra.mxu0 %v766_v49 }
 0x1a4   :  { %v503_v50 = vpop.f32.mrf.mxu2 }
 0x1a5   :  { %v551_v54 = vadd.f32 %v503_v50, %v343_v45 }
 0x1a6   :  { %v345_v55 = vpop.f32.mrf.mxu1  ;;  %v685_v17 = vpop.f32.mrf.mxu3 }
 0x1a7   :  { %v587_v56 = vadd.f32 %v2352_v22, %v551_v54  ;;  %v686_v60 = vadd.f32 %v2538_v40, %v685_v17  ;;  %v346_v62 = vadd.f32 %v345_v55, %v2438_v5 }
 0x1a9   :  { %v619_v58 = vmax.f32 %v587_v56, 0.0  ;;  %v767_v61 = vmax.f32 %v686_v60, 0.0 }
 0x1ab   :  { %735 = vmatmul.f32.gmra.mxu3 %v619_v58  ;;  %849 = vmatmul.f32.gmra.mxu0 %v767_v61 }
 0x1ac   :  { %v506_v63 = vpop.f32.mrf.mxu2 }
 0x1ad   :  { %v552_v0 = vadd.f32 %v506_v63, %v346_v62 }
 0x1ae   :  { %v348_v1 = vpop.f32.mrf.mxu1  ;;  %v688_v51 = vpop.f32.mrf.mxu3 }
 0x1af   :  { %v588_v52 = vadd.f32 %v2352_v22, %v552_v0  ;;  %v689_v4 = vadd.f32 %v2538_v40, %v688_v51  ;;  %v349_v9 = vadd.f32 %v348_v1, %v2454_v21 }
 0x1b1   :  { %v620_v32 = vmax.f32 %v588_v52, 0.0  ;;  %v768_v6 = vmax.f32 %v689_v4, 0.0 }
 0x1b3   :  { %738 = vmatmul.f32.gmra.mxu3 %v620_v32  ;;  %852 = vmatmul.f32.gmra.mxu0 %v768_v6 }
 0x1b4   :  { %v509_v10 = vpop.f32.mrf.mxu2 }
 0x1b5   :  { %v553_v11 = vadd.f32 %v509_v10, %v349_v9 }
 0x1b6   :  { %v351_v14 = vpop.f32.mrf.mxu1  ;;  %v691_v5 = vpop.f32.mrf.mxu3 }
 0x1b7   :  { %v589_v15 = vadd.f32 %v2352_v22, %v553_v11  ;;  %v692_v59 = vadd.f32 %v2538_v40, %v691_v5  ;;  %v352_v19 = vadd.f32 %v351_v14, %v2474_v36 }
 0x1b9   :  { %v621_v16 = vmax.f32 %v589_v15, 0.0  ;;  %v769_v18 = vmax.f32 %v692_v59, 0.0 }
 0x1bb   :  { %741 = vmatmul.f32.gmra.mxu3 %v621_v16  ;;  %855 = vmatmul.f32.gmra.mxu0 %v769_v18 }
 0x1bc   :  { %v512_v39 = vpop.f32.mrf.mxu2 }
 0x1bd   :  { %v554_v20 = vadd.f32 %v512_v39, %v352_v19 }
 0x1be   :  { %v354_v23 = vpop.f32.mrf.mxu1  ;;  %v694_v21 = vpop.f32.mrf.mxu3 }
 0x1bf   :  { %v590_v8 = vadd.f32 %v2352_v22, %v554_v20  ;;  %v695_v25 = vadd.f32 %v2538_v40, %v694_v21  ;;  %v355_v27 = vadd.f32 %v354_v23, %v2496_v57 }
 0x1c1   :  { %v622_v2 = vmax.f32 %v590_v8, 0.0  ;;  %v770_v26 = vmax.f32 %v695_v25, 0.0 }
 0x1c3   :  { %744 = vmatmul.f32.gmra.mxu3 %v622_v2  ;;  %858 = vmatmul.f32.gmra.mxu0 %v770_v26 }
 0x1c4   :  { %v515_v28 = vpop.f32.mrf.mxu2 }
 0x1c5   :  { %v555_v29 = vadd.f32 %v515_v28, %v355_v27 }
 0x1c6   :  { %v357_v30 = vpop.f32.mrf.mxu1  ;;  %v697_v36 = vpop.f32.mrf.mxu3 }
 0x1c7   :  { %v591_v46 = vadd.f32 %v2352_v22, %v555_v29  ;;  %v698_v33 = vadd.f32 %v2538_v40, %v697_v36  ;;  %v358_v35 = vadd.f32 %v357_v30, %v2513_v3 }
 0x1c9   :  { %v623_v34 = vmax.f32 %v591_v46, 0.0  ;;  %v771_v7 = vmax.f32 %v698_v33, 0.0 }
 0x1cb   :  { %747 = vmatmul.f32.gmra.mxu3 %v623_v34  ;;  %861 = vmatmul.f32.gmra.mxu0 %v771_v7 }
 0x1cc   :  { %v518_v37 = vpop.f32.mrf.mxu2 }
 0x1cd   :  { %v556_v13 = vadd.f32 %v518_v37, %v358_v35 }
 0x1ce   :  { %v360_v41 = vpop.f32.mrf.mxu1  ;;  %v700_v57 = vpop.f32.mrf.mxu3 }
 0x1cf   :  { %v592_v42 = vadd.f32 %v2352_v22, %v556_v13  ;;  %v701_v38 = vadd.f32 %v2538_v40, %v700_v57  ;;  %v361_v12 = vadd.f32 %v360_v41, %v2526_v24 }
 0x1d1   :  { %v624_v53 = vmax.f32 %v592_v42, 0.0  ;;  %v772_v43 = vmax.f32 %v701_v38, 0.0 }
 0x1d3   :  { %750 = vmatmul.f32.gmra.mxu3 %v624_v53  ;;  %864 = vmatmul.f32.gmra.mxu0 %v772_v43 }
 0x1d4   :  { %v521_v44 = vpop.f32.mrf.mxu2 }
 0x1d5   :  { %v557_v47 = vadd.f32 %v521_v44, %v361_v12 }
 0x1d6   :  { %v703_v48 = vpop.f32.mrf.mxu3  ;;  %v363_v45 = vpop.f32.mrf.mxu1 }
 0x1d7   :  { %v593_v3 = vadd.f32 %v2352_v22, %v557_v47  ;;  %v704_v49 = vadd.f32 %v2538_v40, %v703_v48  ;;  %v364_v55 = vadd.f32 %v363_v45, %v2531_v31  ;;  %v2588_v31 = vld [vmem:[%s3223_s10] ss:$0 sm:$0xff] }
 0x1d9   :  { %v625_v50 = vmax.f32 %v593_v3, 0.0  ;;  %v773_v54 = vmax.f32 %v704_v49, 0.0 }
 0x1db   :  { %753 = vmatmul.f32.gmra.mxu3 %v625_v50  ;;  %867 = vmatmul.f32.gmra.mxu0 %v773_v54 }
 0x1dc   :  { %v524_v17 = vpop.f32.mrf.mxu2 }
 0x1dd   :  { %v558_v56 = vadd.f32 %v524_v17, %v364_v55 }
 0x1de   :  { %v706_v60 = vpop.f32.mrf.mxu3 }
 0x1df   :  { %v594_v24 = vadd.f32 %v2352_v22, %v558_v56  ;;  %v707_v58 = vadd.f32 %v2538_v40, %v706_v60 }
 0x1e1   :  { %v626_v61 = vmax.f32 %v594_v24, 0.0  ;;  %v774_v62 = vmax.f32 %v707_v58, 0.0 }
 0x1e3   :  { %756 = vmatmul.f32.gmra.mxu3 %v626_v61  ;;  %870 = vmatmul.f32.gmra.mxu0 %v774_v62 }
 0x1e6   :  { %v709_v63 = vpop.f32.mrf.mxu3 }
 0x1e7   :  { %v710_v0 = vadd.f32 %v2538_v40, %v709_v63 }
 0x1e9   :  { %v775_v1 = vmax.f32 %v710_v0, 0.0 }
 0x1eb   :  { %873 = vmatmul.f32.gmra.mxu0 %v775_v1 }
 0x1ee   :  { %v712_v51 = vpop.f32.mrf.mxu3 }
 0x1ef   :  { %v713_v52 = vadd.f32 %v2538_v40, %v712_v51 }
 0x1f0   :  { %v829_v22 = vpop.f32.mrf.mxu0 }
 0x1f1   :  { %v776_v4 = vmax.f32 %v713_v52, 0.0  ;;  %v2592_v32 = vadd.f32 %v2588_v31, %v829_v22 }
 0x1f3   :  { %876 = vmatmul.f32.gmra.mxu0 %v776_v4  ;;  %927 = vadd.xlane.f32.xlu0 %v2592_v32  ;;  %v991_v6 = vmul.f32 %v2592_v32, %v2592_v32 }
 0x1f5   :  { %1023 = vadd.xlane.f32.xlu2 %v991_v6 }
 0x1f6   :  { %v715_v9 = vpop.f32.mrf.mxu3 }
 0x1f7   :  { %v716_v10 = vadd.f32 %v2538_v40, %v715_v9 }
 0x1f8   :  { %v832_v11 = vpop.f32.mrf.mxu0 }
 0x1f9   :  { %v777_v14 = vmax.f32 %v716_v10, 0.0  ;;  %v2599_v5 = vadd.f32 %v2588_v31, %v832_v11 }
 0x1fb   :  { %879 = vmatmul.f32.gmra.mxu0 %v777_v14  ;;  %929 = vadd.xlane.f32.xlu0 %v2599_v5  ;;  %v992_v39 = vmul.f32 %v2599_v5, %v2599_v5 }
 0x1fe   :  { %v718_v15 = vpop.f32.mrf.mxu3 }
 0x1ff   :  { %v719_v59 = vadd.f32 %v2538_v40, %v718_v15 }
 0x200   :  { %v835_v16 = vpop.f32.mrf.mxu0 }
 0x201   :  { %v778_v18 = vmax.f32 %v719_v59, 0.0  ;;  %v2604_v19 = vadd.f32 %v2588_v31, %v835_v16 }
 0x203   :  { %882 = vmatmul.f32.gmra.mxu0 %v778_v18  ;;  %931 = vadd.xlane.f32.xlu1 %v2604_v19  ;;  %v993_v2 = vmul.f32 %v2604_v19, %v2604_v19 }
 0x204   :  { %1025 = vadd.xlane.f32.xlu0 %v992_v39 }
 0x206   :  { %v721_v20 = vpop.f32.mrf.mxu3 }
 0x207   :  { %v722_v23 = vadd.f32 %v2538_v40, %v721_v20 }
 0x208   :  { %v838_v21 = vpop.f32.mrf.mxu0 }
 0x209   :  { %v779_v8 = vmax.f32 %v722_v23, 0.0  ;;  %v2611_v25 = vadd.f32 %v2588_v31, %v838_v21 }
 0x20b   :  { %885 = vmatmul.f32.gmra.mxu0 %v779_v8  ;;  %1027 = vadd.xlane.f32.xlu1 %v993_v2  ;;  %v994_v26 = vmul.f32 %v2611_v25, %v2611_v25 }
 0x20d   :  { %1029 = vadd.xlane.f32.xlu2 %v994_v26 }
 0x20e   :  { %v724_v27 = vpop.f32.mrf.mxu3 }
 0x20f   :  { %v725_v28 = vadd.f32 %v2538_v40, %v724_v27 }
 0x210   :  { %v841_v29 = vpop.f32.mrf.mxu0 }
 0x211   :  { %v780_v30 = vmax.f32 %v725_v28, 0.0  ;;  %v2619_v36 = vadd.f32 %v2588_v31, %v841_v29 }
 0x213   :  { %888 = vmatmul.f32.gmra.mxu0 %v780_v30  ;;  %933 = vadd.xlane.f32.xlu1 %v2611_v25  ;;  %v995_v46 = vmul.f32 %v2619_v36, %v2619_v36 }
 0x215   :  { %1031 = vadd.xlane.f32.xlu0 %v995_v46  ;;  %935 = vadd.xlane.f32.xlu2 %v2619_v36 }
 0x216   :  { %v727_v33 = vpop.f32.mrf.mxu3 }
 0x217   :  { %v728_v34 = vadd.f32 %v2538_v40, %v727_v33 }
 0x218   :  { %v844_v7 = vpop.f32.mrf.mxu0 }
 0x219   :  { %v781_v35 = vmax.f32 %v728_v34, 0.0  ;;  %v2627_v37 = vadd.f32 %v2588_v31, %v844_v7 }
 0x21b   :  { %891 = vmatmul.f32.gmra.mxu0 %v781_v35  ;;  %v996_v13 = vmul.f32 %v2627_v37, %v2627_v37 }
 0x21d   :  { %1033 = vadd.xlane.f32.xlu1 %v996_v13  ;;  %937 = vadd.xlane.f32.xlu2 %v2627_v37 }
 0x21e   :  { %v730_v41 = vpop.f32.mrf.mxu3 }
 0x21f   :  { %v731_v57 = vadd.f32 %v2538_v40, %v730_v41 }
 0x220   :  { %v847_v42 = vpop.f32.mrf.mxu0 }
 0x221   :  { %v782_v38 = vmax.f32 %v731_v57, 0.0  ;;  %v2634_v53 = vadd.f32 %v2588_v31, %v847_v42 }
 0x223   :  { %894 = vmatmul.f32.gmra.mxu0 %v782_v38  ;;  %939 = vadd.xlane.f32.xlu0 %v2634_v53  ;;  %v997_v43 = vmul.f32 %v2634_v53, %v2634_v53 }
 0x225   :  { %1035 = vadd.xlane.f32.xlu2 %v997_v43 }
 0x226   :  { %v733_v12 = vpop.f32.mrf.mxu3 }
 0x227   :  { %v734_v44 = vadd.f32 %v2538_v40, %v733_v12 }
 0x228   :  { %v850_v47 = vpop.f32.mrf.mxu0 }
 0x229   :  { %v783_v48 = vmax.f32 %v734_v44, 0.0  ;;  %v2641_v3 = vadd.f32 %v2588_v31, %v850_v47 }
 0x22b   :  { %897 = vmatmul.f32.gmra.mxu0 %v783_v48  ;;  %941 = vadd.xlane.f32.xlu1 %v2641_v3  ;;  %v998_v49 = vmul.f32 %v2641_v3, %v2641_v3 }
 0x22d   :  { %1037 = vadd.xlane.f32.xlu0 %v998_v49 }
 0x22e   :  { %v736_v45 = vpop.f32.mrf.mxu3 }
 0x22f   :  { %v737_v50 = vadd.f32 %v2538_v40, %v736_v45 }
 0x230   :  { %v853_v54 = vpop.f32.mrf.mxu0 }
 0x231   :  { %v784_v55 = vmax.f32 %v737_v50, 0.0  ;;  %v2648_v17 = vadd.f32 %v2588_v31, %v853_v54 }
 0x233   :  { %900 = vmatmul.f32.gmra.mxu0 %v784_v55  ;;  %943 = vadd.xlane.f32.xlu2 %v2648_v17  ;;  %v999_v56 = vmul.f32 %v2648_v17, %v2648_v17 }
 0x235   :  { %1039 = vadd.xlane.f32.xlu1 %v999_v56 }
 0x236   :  { %v739_v60 = vpop.f32.mrf.mxu3 }
 0x237   :  { %v740_v24 = vadd.f32 %v2538_v40, %v739_v60 }
 0x238   :  { %v856_v58 = vpop.f32.mrf.mxu0 }
 0x239   :  { %v785_v61 = vmax.f32 %v740_v24, 0.0  ;;  %v2655_v62 = vadd.f32 %v2588_v31, %v856_v58 }
 0x23b   :  { %903 = vmatmul.f32.gmra.mxu0 %v785_v61  ;;  %945 = vadd.xlane.f32.xlu0 %v2655_v62  ;;  %v1000_v63 = vmul.f32 %v2655_v62, %v2655_v62 }
 0x23d   :  { %1041 = vadd.xlane.f32.xlu2 %v1000_v63 }
 0x23e   :  { %v742_v0 = vpop.f32.mrf.mxu3 }
 0x23f   :  { %v743_v1 = vadd.f32 %v2538_v40, %v742_v0 }
 0x240   :  { %v859_v51 = vpop.f32.mrf.mxu0 }
 0x241   :  { %v786_v52 = vmax.f32 %v743_v1, 0.0  ;;  %v2662_v22 = vadd.f32 %v2588_v31, %v859_v51 }
 0x243   :  { %906 = vmatmul.f32.gmra.mxu0 %v786_v52  ;;  %947 = vadd.xlane.f32.xlu1 %v2662_v22  ;;  %v1001_v4 = vmul.f32 %v2662_v22, %v2662_v22 }
 0x245   :  { %1043 = vadd.xlane.f32.xlu0 %v1001_v4 }
 0x246   :  { %v745_v6 = vpop.f32.mrf.mxu3 }
 0x247   :  { %v746_v9 = vadd.f32 %v2538_v40, %v745_v6 }
 0x248   :  { %v862_v10 = vpop.f32.mrf.mxu0 }
 0x249   :  { %v787_v11 = vmax.f32 %v746_v9, 0.0  ;;  %v2669_v14 = vadd.f32 %v2588_v31, %v862_v10 }
 0x24b   :  { %909 = vmatmul.f32.gmra.mxu0 %v787_v11  ;;  %949 = vadd.xlane.f32.xlu2 %v2669_v14  ;;  %v1002_v15 = vmul.f32 %v2669_v14, %v2669_v14 }
 0x24d   :  { %1045 = vadd.xlane.f32.xlu1 %v1002_v15 }
 0x24e   :  { %v748_v59 = vpop.f32.mrf.mxu3 }
 0x24f   :  { %v749_v16 = vadd.f32 %v2538_v40, %v748_v59 }
 0x250   :  { %v865_v18 = vpop.f32.mrf.mxu0 }
 0x251   :  { %v788_v39 = vmax.f32 %v749_v16, 0.0  ;;  %v2676_v20 = vadd.f32 %v2588_v31, %v865_v18 }
 0x253   :  { %912 = vmatmul.f32.gmra.mxu0 %v788_v39  ;;  %951 = vadd.xlane.f32.xlu0 %v2676_v20  ;;  %v1003_v23 = vmul.f32 %v2676_v20, %v2676_v20 }
 0x255   :  { %1047 = vadd.xlane.f32.xlu2 %v1003_v23 }
 0x256   :  { %v751_v21 = vpop.f32.mrf.mxu3 }
 0x257   :  { %v752_v8 = vadd.f32 %v2538_v40, %v751_v21  ;;  %v2726_v21 = vld [vmem:[%s3224_s11] ss:$0 sm:$0xff] }
 0x258   :  { %v868_v2 = vpop.f32.mrf.mxu0 }
 0x259   :  { %v789_v26 = vmax.f32 %v752_v8, 0.0  ;;  %v2683_v27 = vadd.f32 %v2588_v31, %v868_v2 }
 0x25b   :  { %915 = vmatmul.f32.gmra.mxu0 %v789_v26  ;;  %953 = vadd.xlane.f32.xlu1 %v2683_v27  ;;  %v1004_v28 = vmul.f32 %v2683_v27, %v2683_v27 }
 0x25d   :  { %1049 = vadd.xlane.f32.xlu0 %v1004_v28 }
 0x25e   :  { %v754_v29 = vpop.f32.mrf.mxu3 }
 0x25f   :  { %v755_v30 = vadd.f32 %v2538_v40, %v754_v29 }
 0x260   :  { %v871_v46 = vpop.f32.mrf.mxu0 }
 0x261   :  { %v790_v33 = vmax.f32 %v755_v30, 0.0  ;;  %v2690_v34 = vadd.f32 %v2588_v31, %v871_v46  ;;  %v2734_v30 = vld [vmem:[%s3225_s12] ss:$0 sm:$0xff] }
 0x263   :  { %918 = vmatmul.f32.gmra.mxu0 %v790_v33  ;;  %955 = vadd.xlane.f32.xlu2 %v2690_v34  ;;  %v1005_v7 = vmul.f32 %v2690_v34, %v2690_v34 }
 0x265   :  { %1051 = vadd.xlane.f32.xlu1 %v1005_v7 }
 0x266   :  { %v757_v35 = vpop.f32.mrf.mxu3  ;;  %v928_v13 = vpop.xlane.xlu0 %927 }
 0x267   :  { %v758_v41 = vadd.f32 %v2538_v40, %v757_v35  ;;  %v1087_v57 = vmul.f32 0.0078125, %v928_v13 }
 0x268   :  { %v874_v42 = vpop.f32.mrf.mxu0  ;;  %v1024_v38 = vpop.xlane.xlu2 %1023 }
 0x269   :  { %v791_v43 = vmax.f32 %v758_v41, 0.0  ;;  %v1151_v12 = vmul.f32 %v1087_v57, %v1087_v57  ;;  %v2697_v44 = vadd.f32 %v2588_v31, %v874_v42  ;;  %v1119_v47 = vmul.f32 0.0078125, %v1024_v38 }
 0x26a   :  { %v1215_v23 = vsub.f32 %v2592_v32, %v1087_v57 }
 0x26b   :  { %921 = vmatmul.f32.gmra.mxu0 %v791_v43  ;;  %957 = vadd.xlane.f32.xlu0 %v2697_v44  ;;  %v1006_v48 = vmul.f32 %v2697_v44, %v2697_v44  ;;  %v1183_v49 = vsub.f32 %v1119_v47, %v1151_v12 }
 0x26d   :  { %1053 = vadd.xlane.f32.xlu2 %v1006_v48  ;;  %v1247_v45 = vadd.f32 1e-05, %v1183_v49 }
 0x26e   :  { %v930_v50 = vpop.xlane.xlu0 %929 }
 0x26f   :  { %1790 = vrsqrt.f32 %v1247_v45  ;;  %v2708_v56 = vmul.f32 0.0078125, %v930_v50  ;;  %vm1285_vm1 = vweird.f32 %v1247_v45 }
 0x270   :  { %v877_v40 = vpop.f32.mrf.mxu0 }
 0x271   :  { %v2703_v54 = vadd.f32 %v2588_v31, %v877_v40  ;;  %v1152_v63 = vmul.f32 %v2708_v56, %v2708_v56 }
 0x273   :  { %959 = vadd.xlane.f32.xlu1 %v2703_v54  ;;  %v1007_v55 = vmul.f32 %v2703_v54, %v2703_v54 }
 0x275   :  { %1055 = vadd.xlane.f32.xlu0 %v1007_v55  ;;  %v1791_v60 = vpop.eup %1790 }
 0x276   :  { %v932_v24 = vpop.xlane.xlu1 %931  ;;  %v1280_v58 = vmul.f32 %v1791_v60, %v1247_v45  ;;  %vm1286_vm0 = vweird.f32 %v1791_v60 }
 0x277   :  { %v1026_v61 = vpop.xlane.xlu0 %1025  ;;  %v2715_v9 = vmul.f32 0.0078125, %v932_v24  ;;  %vm1287_vm2 = vmor %vm1285_vm1, %vm1286_vm0 }
 0x278   :  { %v1120_v0 = vmul.f32 0.0078125, %v1026_v61  ;;  %v880_v1 = vpop.f32.mrf.mxu0  ;;  %v1281_v51 = vmul.f32 %v1791_v60, %v1280_v58 }
 0x279   :  { %v2713_v52 = vadd.f32 %v2588_v31, %v880_v1  ;;  %v1153_v18 = vmul.f32 %v2715_v9, %v2715_v9 }
 0x27a   :  { %v1184_v4 = vsub.f32 %v1120_v0, %v1152_v63  ;;  %v1282_v6 = vmul.f32 0.5, %v1281_v51 }
 0x27b   :  { %961 = vadd.xlane.f32.xlu2 %v2713_v52  ;;  %v1008_v10 = vmul.f32 %v2713_v52, %v2713_v52 }
 0x27c   :  { %v1248_v11 = vadd.f32 1e-05, %v1184_v4  ;;  %v1283_v15 = vsub.f32 1.5, %v1282_v6  ;;  %v1216_v4 = vsub.f32 %v2599_v5, %v2708_v56 }
 0x27d   :  { %1057 = vadd.xlane.f32.xlu1 %v1008_v10 }
 0x27e   :  { %1792 = vrsqrt.f32 %v1248_v11  ;;  %v1028_v59 = vpop.xlane.xlu1 %1027  ;;  %v1284_v16 = vmul.f32 %v1791_v60, %v1283_v15  ;;  %vm1295_vm4 = vweird.f32 %v1248_v11 }
 0x27f   :  { %v1121_v39 = vmul.f32 0.0078125, %v1028_v59 }
 0x280   :  { %v883_v8 = vpop.f32.mrf.mxu0  ;;  %v1030_v2 = vpop.xlane.xlu2 %1029  ;;  %v1288_v26 = vsel %vm1287_vm2, %v1791_v60, %v1284_v16 }
 0x281   :  { %v1185_v28 = vsub.f32 %v1121_v39, %v1153_v18  ;;  %v2729_v29 = vadd.f32 %v2588_v31, %v883_v8  ;;  %v1599_v46 = vmul.f32 %v1288_v26, %v1215_v23  ;;  %v1122_v47 = vmul.f32 0.0078125, %v1030_v2 }
 0x283   :  { %v1249_v32 = vadd.f32 1e-05, %v1185_v28  ;;  %963 = vadd.xlane.f32.xlu0 %v2729_v29  ;;  %v1009_v33 = vmul.f32 %v2729_v29, %v2729_v29  ;;  %v1634_v35 = vmul.f32 %v2726_v21, %v1599_v46 }
 0x284   :  { %v1793_v7 = vpop.eup %1792 }
 0x285   :  { %v1290_v13 = vmul.f32 %v1793_v7, %v1248_v11  ;;  %1794 = vrsqrt.f32 %v1249_v32  ;;  %1059 = vadd.xlane.f32.xlu2 %v1009_v33  ;;  %v1669_v41 = vadd.f32 %v2734_v30, %v1634_v35  ;;  %vm1296_vm3 = vweird.f32 %v1793_v7 }
 0x286   :  { %v934_v57 = vpop.xlane.xlu1 %933  ;;  %vm1297_vm5 = vmor %vm1295_vm4, %vm1296_vm3  ;;  %vm1305_vm7 = vweird.f32 %v1249_v32 }
 0x287   :  { %v1291_v42 = vmul.f32 %v1793_v7, %v1290_v13  ;;  %v2741_v38 = vmul.f32 0.0078125, %v934_v57  ;;  %1701 = vst [vmem:[%s3226_s13] sm:$0xff] %v1669_v41 }
 0x288   :  { %v886_v43 = vpop.f32.mrf.mxu0  ;;  %v1032_v45 = vpop.xlane.xlu0 %1031 }
 0x289   :  { %v1292_v12 = vmul.f32 0.5, %v1291_v42  ;;  %v1154_v48 = vmul.f32 %v2741_v38, %v2741_v38  ;;  %v2749_v49 = vadd.f32 %v2588_v31, %v886_v43  ;;  %v936_v50 = vpop.xlane.xlu2 %935  ;;  %v1123_v63 = vmul.f32 0.0078125, %v1032_v45 }
 0x28a   :  { %v2751_v40 = vmul.f32 0.0078125, %v936_v50 }
 0x28b   :  { %v1795_v55 = vpop.eup %1794  ;;  %v1293_v60 = vsub.f32 1.5, %v1292_v12  ;;  %v1186_v24 = vsub.f32 %v1122_v47, %v1154_v48  ;;  %965 = vadd.xlane.f32.xlu1 %v2749_v49  ;;  %v1010_v58 = vmul.f32 %v2749_v49, %v2749_v49 }
 0x28c   :  { %v1300_v61 = vmul.f32 %v1795_v55, %v1249_v32  ;;  %v1155_v0 = vmul.f32 %v2751_v40, %v2751_v40  ;;  %vm1306_vm6 = vweird.f32 %v1795_v55 }
 0x28d   :  { %v1294_v1 = vmul.f32 %v1793_v7, %v1293_v60  ;;  %v2758_v51 = vadd.f32 1e-05, %v1186_v24  ;;  %1061 = vadd.xlane.f32.xlu0 %v1010_v58  ;;  %vm1307_vm8 = vmor %vm1305_vm7, %vm1306_vm6 }
 0x28e   :  { %v1301_v6 = vmul.f32 %v1795_v55, %v1300_v61  ;;  %v1187_v10 = vsub.f32 %v1123_v63, %v1155_v0 }
 0x28f   :  { %v1298_v15 = vsel %vm1297_vm5, %v1793_v7, %v1294_v1  ;;  %1796 = vrsqrt.f32 %v2758_v51  ;;  %v1217_v7 = vsub.f32 %v2604_v19, %v2715_v9  ;;  %vm1315_vm10 = vweird.f32 %v2758_v51 }
 0x290   :  { %v1600_v59 = vmul.f32 %v1298_v15, %v1216_v4  ;;  %v1302_v16 = vmul.f32 0.5, %v1301_v6  ;;  %v2763_v18 = vadd.f32 1e-05, %v1187_v10  ;;  %v889_v39 = vpop.f32.mrf.mxu0  ;;  %v1034_v5 = vpop.xlane.xlu1 %1033 }
 0x291   :  { %v2766_v23 = vadd.f32 %v2588_v31, %v889_v39  ;;  %v938_v11 = vpop.xlane.xlu2 %937  ;;  %v1124_v35 = vmul.f32 0.0078125, %v1034_v5 }
 0x292   :  { %v1635_v8 = vmul.f32 %v2726_v21, %v1600_v59  ;;  %v1303_v2 = vsub.f32 1.5, %v1302_v16  ;;  %1798 = vrsqrt.f32 %v2763_v18  ;;  %v2770_v56 = vmul.f32 0.0078125, %v938_v11 }
 0x293   :  { %967 = vadd.xlane.f32.xlu2 %v2766_v23  ;;  %v1011_v26 = vmul.f32 %v2766_v23, %v2766_v23  ;;  %v1218_v16 = vsub.f32 %v2611_v25, %v2741_v38  ;;  %vm1325_vm13 = vweird.f32 %v2763_v18  ;;  %v1219_v25 = vsub.f32 %v2619_v36, %v2751_v40 }
 0x294   :  { %v1670_v28 = vadd.f32 %v2734_v30, %v1635_v8  ;;  %v1304_v46 = vmul.f32 %v1795_v55, %v1303_v2  ;;  %v1156_v13 = vmul.f32 %v2770_v56, %v2770_v56 }
 0x295   :  { %v1797_v33 = vpop.eup %1796  ;;  %1063 = vadd.xlane.f32.xlu1 %v1011_v26 }
 0x296   :  { %1702 = vst [vmem:[%s3226_s13 + $0x8] sm:$0xff] %v1670_v28  ;;  %v1308_v41 = vsel %vm1307_vm8, %v1795_v55, %v1304_v46  ;;  %v1310_v57 = vmul.f32 %v1797_v33, %v2758_v51  ;;  %v940_v42 = vpop.xlane.xlu0 %939  ;;  %v1188_v32 = vsub.f32 %v1124_v35, %v1156_v13  ;;  %vm1316_vm9 = vweird.f32 %v1797_v33 }
 0x297   :  { %v1601_v43 = vmul.f32 %v1308_v41, %v1217_v7  ;;  %v2784_v12 = vmul.f32 0.0078125, %v940_v42  ;;  %vm1317_vm11 = vmor %vm1315_vm10, %vm1316_vm9 }
 0x298   :  { %v1799_v47 = vpop.eup %1798  ;;  %v1311_v19 = vmul.f32 %v1797_v33, %v1310_v57  ;;  %v892_v9 = vpop.f32.mrf.mxu0  ;;  %v2788_v50 = vadd.f32 1e-05, %v1188_v32 }
 0x299   :  { %v1636_v48 = vmul.f32 %v2726_v21, %v1601_v43  ;;  %v1320_v45 = vmul.f32 %v1799_v47, %v2763_v18  ;;  %v1036_v60 = vpop.xlane.xlu2 %1035  ;;  %v1157_v55 = vmul.f32 %v2784_v12, %v2784_v12  ;;  %v2793_v58 = vadd.f32 %v2588_v31, %v892_v9 }
 0x29a   :  { %v1312_v24 = vmul.f32 0.5, %v1311_v19  ;;  %1800 = vrsqrt.f32 %v2788_v50  ;;  %v1125_v1 = vmul.f32 0.0078125, %v1036_v60  ;;  %vm1326_vm12 = vweird.f32 %v1799_v47 }
 0x29b   :  { %v1671_v61 = vadd.f32 %v2734_v30, %v1636_v48  ;;  %v1321_v63 = vmul.f32 %v1799_v47, %v1320_v45  ;;  %969 = vadd.xlane.f32.xlu0 %v2793_v58  ;;  %v1012_v4 = vmul.f32 %v2793_v58, %v2793_v58  ;;  %vm1327_vm14 = vmor %vm1325_vm13, %vm1326_vm12  ;;  %vm1335_vm0 = vweird.f32 %v2788_v50 }
 0x29c   :  { %v1313_v0 = vsub.f32 1.5, %v1312_v24  ;;  %v1189_v15 = vsub.f32 %v1125_v1, %v1157_v55 }
 0x29d   :  { %1703 = vst [vmem:[%s3226_s13 + $0x10] sm:$0xff] %v1671_v61  ;;  %v1322_v6 = vmul.f32 0.5, %v1321_v63  ;;  %1065 = vadd.xlane.f32.xlu2 %v1012_v4  ;;  %v1220_v4 = vsub.f32 %v2627_v37, %v2770_v56 }
 0x29e   :  { %v1314_v10 = vmul.f32 %v1797_v33, %v1313_v0  ;;  %v942_v59 = vpop.xlane.xlu1 %941  ;;  %v2808_v2 = vadd.f32 1e-05, %v1189_v15 }
 0x29f   :  { %v1323_v39 = vsub.f32 1.5, %v1322_v6  ;;  %v2806_v11 = vmul.f32 0.0078125, %v942_v59 }
 0x2a0   :  { %v1318_v8 = vsel %vm1317_vm11, %v1797_v33, %v1314_v10  ;;  %v895_v5 = vpop.f32.mrf.mxu0  ;;  %v1038_v26 = vpop.xlane.xlu0 %1037  ;;  %1802 = vrsqrt.f32 %v2808_v2  ;;  %vm1345_vm3 = vweird.f32 %v2808_v2 }
 0x2a1   :  { %v1801_v28 = vpop.eup %1800  ;;  %v1602_v46 = vmul.f32 %v1318_v8, %v1218_v16  ;;  %v1324_v7 = vmul.f32 %v1799_v47, %v1323_v39  ;;  %v1158_v51 = vmul.f32 %v2806_v11, %v2806_v11  ;;  %v2819_v13 = vadd.f32 %v2588_v31, %v895_v5 }
 0x2a2   :  { %v1330_v38 = vmul.f32 %v1801_v28, %v2788_v50  ;;  %v1126_v41 = vmul.f32 0.0078125, %v1038_v26  ;;  %vm1336_vm15 = vweird.f32 %v1801_v28 }
 0x2a3   :  { %v1637_v33 = vmul.f32 %v2726_v21, %v1602_v46  ;;  %v1328_v35 = vsel %vm1327_vm14, %v1799_v47, %v1324_v7  ;;  %971 = vadd.xlane.f32.xlu1 %v2819_v13  ;;  %v1013_v36 = vmul.f32 %v2819_v13, %v2819_v13  ;;  %vm1337_vm1 = vmor %vm1335_vm0, %vm1336_vm15 }
 0x2a4   :  { %v1603_v57 = vmul.f32 %v1328_v35, %v1219_v25  ;;  %v1331_v18 = vmul.f32 %v1801_v28, %v1330_v38  ;;  %v1190_v43 = vsub.f32 %v1126_v41, %v1158_v51 }
 0x2a5   :  { %v1672_v42 = vadd.f32 %v2734_v30, %v1637_v33  ;;  %1067 = vadd.xlane.f32.xlu0 %v1013_v36  ;;  %v1221_v33 = vsub.f32 %v2634_v53, %v2784_v12 }
 0x2a6   :  { %v1638_v40 = vmul.f32 %v2726_v21, %v1603_v57  ;;  %v1332_v32 = vmul.f32 0.5, %v1331_v18  ;;  %v944_v19 = vpop.xlane.xlu2 %943  ;;  %v2829_v47 = vadd.f32 1e-05, %v1190_v43  ;;  %v1803_v48 = vpop.eup %1802 }
 0x2a7   :  { %1704 = vst [vmem:[%s3226_s13 + $0x18] sm:$0xff] %v1672_v42  ;;  %v2831_v9 = vmul.f32 0.0078125, %v944_v19  ;;  %v1340_v61 = vmul.f32 %v1803_v48, %v2808_v2  ;;  %vm1346_vm2 = vweird.f32 %v1803_v48 }
 0x2a8   :  { %v1673_v45 = vadd.f32 %v2734_v30, %v1638_v40  ;;  %v1333_v60 = vsub.f32 1.5, %v1332_v32  ;;  %v898_v24 = vpop.f32.mrf.mxu0  ;;  %v1040_v55 = vpop.xlane.xlu1 %1039  ;;  %1804 = vrsqrt.f32 %v2829_v47  ;;  %vm1347_vm4 = vmor %vm1345_vm3, %vm1346_vm2  ;;  %vm1355_vm6 = vweird.f32 %v2829_v47 }
 0x2a9   :  { %v1159_v0 = vmul.f32 %v2831_v9, %v2831_v9  ;;  %v2843_v1 = vadd.f32 %v2588_v31, %v898_v24  ;;  %v1341_v6 = vmul.f32 %v1803_v48, %v1340_v61  ;;  %v1127_v10 = vmul.f32 0.0078125, %v1040_v55 }
 0x2aa   :  { %1705 = vst [vmem:[%s3226_s13 + $0x20] sm:$0xff] %v1673_v45  ;;  %v1334_v63 = vmul.f32 %v1801_v28, %v1333_v60 }
 0x2ab   :  { %973 = vadd.xlane.f32.xlu2 %v2843_v1  ;;  %v1014_v59 = vmul.f32 %v2843_v1, %v2843_v1  ;;  %v1342_v50 = vmul.f32 0.5, %v1341_v6  ;;  %v1191_v39 = vsub.f32 %v1127_v10, %v1159_v0  ;;  %v1222_v0 = vsub.f32 %v2641_v3, %v2806_v11 }
 0x2ac   :  { %v1338_v15 = vsel %vm1337_vm1, %v1801_v28, %v1334_v63 }
 0x2ad   :  { %v1604_v16 = vmul.f32 %v1338_v15, %v1220_v4  ;;  %1069 = vadd.xlane.f32.xlu1 %v1014_v59  ;;  %v1343_v46 = vsub.f32 1.5, %v1342_v50  ;;  %v2851_v37 = vadd.f32 1e-05, %v1191_v39 }
 0x2ae   :  { %v946_v8 = vpop.xlane.xlu0 %945  ;;  %v1805_v5 = vpop.eup %1804 }
 0x2af   :  { %v1639_v26 = vmul.f32 %v2726_v21, %v1604_v16  ;;  %v2853_v56 = vmul.f32 0.0078125, %v946_v8  ;;  %v1350_v28 = vmul.f32 %v1805_v5, %v2829_v47  ;;  %v1344_v38 = vmul.f32 %v1803_v48, %v1343_v46 }
 0x2b0   :  { %v901_v7 = vpop.f32.mrf.mxu0  ;;  %v1042_v51 = vpop.xlane.xlu2 %1041  ;;  %1806 = vrsqrt.f32 %v2851_v37  ;;  %vm1356_vm5 = vweird.f32 %v1805_v5  ;;  %vm1365_vm9 = vweird.f32 %v2851_v37 }
 0x2b1   :  { %v1674_v25 = vadd.f32 %v2734_v30, %v1639_v26  ;;  %v1351_v35 = vmul.f32 %v1805_v5, %v1350_v28  ;;  %v1160_v41 = vmul.f32 %v2853_v56, %v2853_v56  ;;  %v2865_v57 = vadd.f32 %v2588_v31, %v901_v7  ;;  %vm1357_vm7 = vmor %vm1355_vm6, %vm1356_vm5 }
 0x2b2   :  { %v1348_v18 = vsel %vm1347_vm4, %v1803_v48, %v1344_v38  ;;  %v1128_v2 = vmul.f32 0.0078125, %v1042_v51 }
 0x2b3   :  { %1706 = vst [vmem:[%s3226_s13 + $0x28] sm:$0xff] %v1674_v25  ;;  %v1605_v42 = vmul.f32 %v1348_v18, %v1221_v33  ;;  %v1352_v43 = vmul.f32 0.5, %v1351_v35  ;;  %975 = vadd.xlane.f32.xlu0 %v2865_v57  ;;  %v1015_v53 = vmul.f32 %v2865_v57, %v2865_v57  ;;  %v1223_v33 = vsub.f32 %v2648_v17, %v2831_v9 }
 0x2b4   :  { %v1192_v12 = vsub.f32 %v1128_v2, %v1160_v41 }
 0x2b5   :  { %v1640_v36 = vmul.f32 %v2726_v21, %v1605_v42  ;;  %v1353_v40 = vsub.f32 1.5, %v1352_v43  ;;  %1071 = vadd.xlane.f32.xlu2 %v1015_v53 }
 0x2b6   :  { %v948_v32 = vpop.xlane.xlu1 %947  ;;  %v1807_v19 = vpop.eup %1806  ;;  %v2874_v45 = vadd.f32 1e-05, %v1192_v12 }
 0x2b7   :  { %v2876_v60 = vmul.f32 0.0078125, %v948_v32  ;;  %v1675_v48 = vadd.f32 %v2734_v30, %v1640_v36  ;;  %v1354_v24 = vmul.f32 %v1805_v5, %v1353_v40  ;;  %v1360_v55 = vmul.f32 %v1807_v19, %v2851_v37 }
 0x2b8   :  { %v904_v61 = vpop.f32.mrf.mxu0  ;;  %v1044_v63 = vpop.xlane.xlu0 %1043  ;;  %1808 = vrsqrt.f32 %v2874_v45  ;;  %vm1366_vm8 = vweird.f32 %v1807_v19  ;;  %vm1375_vm12 = vweird.f32 %v2874_v45 }
 0x2b9   :  { %v1161_v4 = vmul.f32 %v2876_v60, %v2876_v60  ;;  %1707 = vst [vmem:[%s3226_s13 + $0x30] sm:$0xff] %v1675_v48  ;;  %v1358_v6 = vsel %vm1357_vm7, %v1805_v5, %v1354_v24  ;;  %v1361_v10 = vmul.f32 %v1807_v19, %v1360_v55  ;;  %v2890_v47 = vadd.f32 %v2588_v31, %v904_v61  ;;  %vm1367_vm10 = vmor %vm1365_vm9, %vm1366_vm8 }
 0x2ba   :  { %v1129_v15 = vmul.f32 0.0078125, %v1044_v63  ;;  %v1606_v59 = vmul.f32 %v1358_v6, %v1222_v0  ;;  %v1224_v0 = vsub.f32 %v2655_v62, %v2853_v56 }
 0x2bb   :  { %v1362_v16 = vmul.f32 0.5, %v1361_v10  ;;  %977 = vadd.xlane.f32.xlu1 %v2890_v47  ;;  %v1016_v3 = vmul.f32 %v2890_v47, %v2890_v47 }
 0x2bc   :  { %v1193_v50 = vsub.f32 %v1129_v15, %v1161_v4  ;;  %v1641_v11 = vmul.f32 %v2726_v21, %v1606_v59 }
 0x2bd   :  { %v1363_v39 = vsub.f32 1.5, %v1362_v16  ;;  %1073 = vadd.xlane.f32.xlu0 %v1016_v3 }
 0x2be   :  { %v2896_v8 = vadd.f32 1e-05, %v1193_v50  ;;  %v950_v5 = vpop.xlane.xlu2 %949  ;;  %v1809_v26 = vpop.eup %1808  ;;  %v1676_v46 = vadd.f32 %v2734_v30, %v1641_v11 }
 0x2bf   :  { %v2899_v28 = vmul.f32 0.0078125, %v950_v5  ;;  %v1364_v7 = vmul.f32 %v1807_v19, %v1363_v39  ;;  %v1370_v51 = vmul.f32 %v1809_v26, %v2874_v45  ;;  %vm1376_vm11 = vweird.f32 %v1809_v26 }
 0x2c0   :  { %1810 = vrsqrt.f32 %v2896_v8  ;;  %v907_v25 = vpop.f32.mrf.mxu0  ;;  %v1046_v38 = vpop.xlane.xlu1 %1045  ;;  %1708 = vst [vmem:[%s3226_s13 + $0x38] sm:$0xff] %v1676_v46  ;;  %vm1377_vm13 = vmor %vm1375_vm12, %vm1376_vm11  ;;  %vm1385_vm15 = vweird.f32 %v2896_v8 }
 0x2c1   :  { %v1162_v35 = vmul.f32 %v2899_v28, %v2899_v28  ;;  %v2913_v37 = vadd.f32 %v2588_v31, %v907_v25  ;;  %v1368_v41 = vsel %vm1367_vm10, %v1807_v19, %v1364_v7  ;;  %v1371_v18 = vmul.f32 %v1809_v26, %v1370_v51 }
 0x2c2   :  { %v1130_v2 = vmul.f32 0.0078125, %v1046_v38  ;;  %v1607_v42 = vmul.f32 %v1368_v41, %v1223_v33  ;;  %v1225_v51 = vsub.f32 %v2662_v22, %v2876_v60 }
 0x2c3   :  { %979 = vadd.xlane.f32.xlu2 %v2913_v37  ;;  %v1017_v43 = vmul.f32 %v2913_v37, %v2913_v37  ;;  %v1372_v53 = vmul.f32 0.5, %v1371_v18 }
 0x2c4   :  { %v1194_v12 = vsub.f32 %v1130_v2, %v1162_v35  ;;  %v1642_v17 = vmul.f32 %v2726_v21, %v1607_v42 }
 0x2c5   :  { %1075 = vadd.xlane.f32.xlu1 %v1017_v43  ;;  %v1373_v36 = vsub.f32 1.5, %v1372_v53 }
 0x2c6   :  { %v1811_v9 = vpop.eup %1810  ;;  %v2919_v40 = vadd.f32 1e-05, %v1194_v12  ;;  %v952_v32 = vpop.xlane.xlu0 %951  ;;  %v1677_v19 = vadd.f32 %v2734_v30, %v1642_v17 }
 0x2c7   :  { %v1380_v48 = vmul.f32 %v1811_v9, %v2896_v8  ;;  %v2923_v24 = vmul.f32 0.0078125, %v952_v32  ;;  %v1374_v55 = vmul.f32 %v1809_v26, %v1373_v36  ;;  %vm1386_vm14 = vweird.f32 %v1811_v9 }
 0x2c8   :  { %1812 = vrsqrt.f32 %v2919_v40  ;;  %v910_v61 = vpop.f32.mrf.mxu0  ;;  %v1048_v63 = vpop.xlane.xlu2 %1047  ;;  %1709 = vst [vmem:[%s3226_s13 + $0x40] sm:$0xff] %v1677_v19  ;;  %vm1387_vm0 = vmor %vm1385_vm15, %vm1386_vm14  ;;  %vm1395_vm2 = vweird.f32 %v2919_v40 }
 0x2c9   :  { %v1381_v4 = vmul.f32 %v1811_v9, %v1380_v48  ;;  %v1163_v6 = vmul.f32 %v2923_v24, %v2923_v24  ;;  %v2935_v10 = vadd.f32 %v2588_v31, %v910_v61  ;;  %v1378_v45 = vsel %vm1377_vm13, %v1809_v26, %v1374_v55 }
 0x2ca   :  { %v1131_v15 = vmul.f32 0.0078125, %v1048_v63  ;;  %v1608_v59 = vmul.f32 %v1378_v45, %v1224_v0  ;;  %v1226_v61 = vsub.f32 %v2669_v14, %v2899_v28 }
 0x2cb   :  { %v1382_v16 = vmul.f32 0.5, %v1381_v4  ;;  %981 = vadd.xlane.f32.xlu0 %v2935_v10  ;;  %v1018_v50 = vmul.f32 %v2935_v10, %v2935_v10 }
 0x2cc   :  { %v1195_v3 = vsub.f32 %v1131_v15, %v1163_v6  ;;  %v1643_v62 = vmul.f32 %v2726_v21, %v1608_v59 }
 0x2cd   :  { %v1383_v56 = vsub.f32 1.5, %v1382_v16  ;;  %1077 = vadd.xlane.f32.xlu2 %v1018_v50 }
 0x2ce   :  { %v1813_v11 = vpop.eup %1812  ;;  %v2941_v39 = vadd.f32 1e-05, %v1195_v3  ;;  %v954_v5 = vpop.xlane.xlu1 %953  ;;  %v1678_v26 = vadd.f32 %v2734_v30, %v1643_v62 }
 0x2cf   :  { %v1384_v46 = vmul.f32 %v1811_v9, %v1383_v56  ;;  %v1390_v7 = vmul.f32 %v1813_v11, %v2919_v40  ;;  %v2949_v25 = vmul.f32 0.0078125, %v954_v5  ;;  %vm1396_vm1 = vweird.f32 %v1813_v11 }
 0x2d0   :  { %1814 = vrsqrt.f32 %v2941_v39  ;;  %v913_v38 = vpop.f32.mrf.mxu0  ;;  %v1050_v33 = vpop.xlane.xlu0 %1049  ;;  %1710 = vst [vmem:[%s3226_s13 + $0x48] sm:$0xff] %v1678_v26  ;;  %vm1397_vm3 = vmor %vm1395_vm2, %vm1396_vm1  ;;  %vm1405_vm5 = vweird.f32 %v2941_v39 }
 0x2d1   :  { %v1388_v35 = vsel %vm1387_vm0, %v1811_v9, %v1384_v46  ;;  %v1391_v41 = vmul.f32 %v1813_v11, %v1390_v7  ;;  %v2955_v8 = vadd.f32 %v2588_v31, %v913_v38  ;;  %v1132_v18 = vmul.f32 0.0078125, %v1050_v33 }
 0x2d2   :  { %v1609_v2 = vmul.f32 %v1388_v35, %v1225_v51  ;;  %v1164_v22 = vmul.f32 %v2949_v25, %v2949_v25  ;;  %v1227_v46 = vsub.f32 %v2676_v20, %v2923_v24 }
 0x2d3   :  { %v1392_v60 = vmul.f32 0.5, %v1391_v41  ;;  %983 = vadd.xlane.f32.xlu1 %v2955_v8  ;;  %v1019_v42 = vmul.f32 %v2955_v8, %v2955_v8  ;;  %v1854_v41 = vld [vmem:[%s3223_s10] ss:$0 sm:$0xff] }
 0x2d4   :  { %v1644_v43 = vmul.f32 %v2726_v21, %v1609_v2  ;;  %v1196_v53 = vsub.f32 %v1132_v18, %v1164_v22 }
 0x2d5   :  { %v1393_v12 = vsub.f32 1.5, %v1392_v60  ;;  %1079 = vadd.xlane.f32.xlu0 %v1019_v42 }
 0x2d6   :  { %v1815_v17 = vpop.eup %1814  ;;  %v1679_v9 = vadd.f32 %v2734_v30, %v1644_v43  ;;  %v2964_v36 = vadd.f32 1e-05, %v1196_v53  ;;  %v956_v32 = vpop.xlane.xlu2 %955 }
 0x2d7   :  { %v1394_v19 = vmul.f32 %v1813_v11, %v1393_v12  ;;  %v1400_v48 = vmul.f32 %v1815_v17, %v2941_v39  ;;  %v2968_v55 = vmul.f32 0.0078125, %v956_v32  ;;  %vm1406_vm4 = vweird.f32 %v1815_v17 }
 0x2d8   :  { %1711 = vst [vmem:[%s3226_s13 + $0x50] sm:$0xff] %v1679_v9  ;;  %1816 = vrsqrt.f32 %v2964_v36  ;;  %v916_v63 = vpop.f32.mrf.mxu0  ;;  %v1052_v0 = vpop.xlane.xlu1 %1051  ;;  %vm1407_vm6 = vmor %vm1405_vm5, %vm1406_vm4  ;;  %vm1415_vm8 = vweird.f32 %v2964_v36 }
 0x2d9   :  { %v1398_v4 = vsel %vm1397_vm3, %v1813_v11, %v1394_v19  ;;  %v1401_v6 = vmul.f32 %v1815_v17, %v1400_v48  ;;  %v1165_v40 = vmul.f32 %v2968_v55, %v2968_v55  ;;  %v2979_v15 = vadd.f32 %v2588_v31, %v916_v63 }
 0x2da   :  { %v1610_v45 = vmul.f32 %v1398_v4, %v1226_v61  ;;  %v1133_v59 = vmul.f32 0.0078125, %v1052_v0  ;;  %v1228_v48 = vsub.f32 %v2683_v27, %v2949_v25 }
 0x2db   :  { %v1402_v16 = vmul.f32 0.5, %v1401_v6  ;;  %985 = vadd.xlane.f32.xlu2 %v2979_v15 }
 0x2dc   :  { %v1645_v50 = vmul.f32 %v2726_v21, %v1610_v45  ;;  %v1197_v3 = vsub.f32 %v1133_v59, %v1165_v40 }
 0x2dd   :  { %v1403_v14 = vsub.f32 1.5, %v1402_v16 }
 0x2de   :  { %v1817_v28 = vpop.eup %1816  ;;  %v1680_v62 = vadd.f32 %v2734_v30, %v1645_v50  ;;  %v2984_v56 = vadd.f32 1e-05, %v1197_v3  ;;  %v958_v11 = vpop.xlane.xlu0 %957 }
 0x2df   :  { %v1404_v5 = vmul.f32 %v1815_v17, %v1403_v14  ;;  %v1410_v31 = vmul.f32 %v1817_v28, %v2964_v36  ;;  %v2988_v26 = vmul.f32 0.0078125, %v958_v11  ;;  %vm1416_vm7 = vweird.f32 %v1817_v28 }
 0x2e0   :  { %1712 = vst [vmem:[%s3226_s13 + $0x58] sm:$0xff] %v1680_v62  ;;  %1818 = vrsqrt.f32 %v2984_v56  ;;  %v919_v7 = vpop.f32.mrf.mxu0  ;;  %v1054_v51 = vpop.xlane.xlu2 %1053  ;;  %vm1417_vm9 = vmor %vm1415_vm8, %vm1416_vm7  ;;  %vm1425_vm11 = vweird.f32 %v2984_v56 }
 0x2e1   :  { %v1408_v38 = vsel %vm1407_vm6, %v1815_v17, %v1404_v5  ;;  %v1411_v33 = vmul.f32 %v1817_v28, %v1410_v31  ;;  %v1166_v39 = vmul.f32 %v2988_v26, %v2988_v26  ;;  %v3001_v18 = vadd.f32 %v1854_v41, %v919_v7 }
 0x2e2   :  { %v1611_v35 = vmul.f32 %v1408_v38, %v1227_v46  ;;  %v1134_v2 = vmul.f32 0.0078125, %v1054_v51  ;;  %v1229_v46 = vsub.f32 %v2690_v34, %v2968_v55 }
 0x2e3   :  { %v1412_v22 = vmul.f32 0.5, %v1411_v33  ;;  %987 = vadd.xlane.f32.xlu0 %v3001_v18  ;;  %v1021_v60 = vmul.f32 %v3001_v18, %v3001_v18 }
 0x2e4   :  { %v1646_v20 = vmul.f32 %v2726_v21, %v1611_v35  ;;  %v1198_v24 = vsub.f32 %v1134_v2, %v1166_v39  ;;  %v1020_v35 = vmul.f32 %v2979_v15, %v2979_v15 }
 0x2e5   :  { %v1413_v42 = vsub.f32 1.5, %v1412_v22  ;;  %1083 = vadd.xlane.f32.xlu2 %v1021_v60 }
 0x2e6   :  { %v1819_v43 = vpop.eup %1818  ;;  %v1681_v53 = vadd.f32 %v2734_v30, %v1646_v20  ;;  %v1262_v12 = vadd.f32 1e-05, %v1198_v24  ;;  %v960_v17 = vpop.xlane.xlu1 %959 }
 0x2e7   :  { %v1414_v9 = vmul.f32 %v1817_v28, %v1413_v42  ;;  %v1420_v32 = vmul.f32 %v1819_v43, %v2984_v56  ;;  %v3010_v19 = vmul.f32 0.0078125, %v960_v17  ;;  %vm1426_vm10 = vweird.f32 %v1819_v43 }
 0x2e8   :  { %1713 = vst [vmem:[%s3226_s13 + $0x60] sm:$0xff] %v1681_v53  ;;  %1820 = vrsqrt.f32 %v1262_v12  ;;  %v922_v61 = vpop.f32.mrf.mxu0  ;;  %v1056_v63 = vpop.xlane.xlu0 %1055  ;;  %vm1427_vm12 = vmor %vm1425_vm11, %vm1426_vm10  ;;  %vm1435_vm14 = vweird.f32 %v1262_v12  ;;  %v1230_v17 = vsub.f32 %v2697_v44, %v2988_v26 }
 0x2e9   :  { %v1418_v0 = vsel %vm1417_vm9, %v1817_v28, %v1414_v9  ;;  %v1421_v4 = vmul.f32 %v1819_v43, %v1420_v32  ;;  %v1167_v36 = vmul.f32 %v3010_v19, %v3010_v19  ;;  %v3019_v40 = vadd.f32 %v1854_v41, %v922_v61 }
 0x2ea   :  { %v1612_v6 = vmul.f32 %v1418_v0, %v1228_v48  ;;  %v1135_v45 = vmul.f32 0.0078125, %v1056_v63 }
 0x2eb   :  { %v1422_v59 = vmul.f32 0.5, %v1421_v4  ;;  %989 = vadd.xlane.f32.xlu1 %v3019_v40  ;;  %v1022_v27 = vmul.f32 %v3019_v40, %v3019_v40 }
 0x2ec   :  { %v1647_v16 = vmul.f32 %v2726_v21, %v1612_v6  ;;  %v1199_v50 = vsub.f32 %v1135_v45, %v1167_v36 }
 0x2ed   :  { %v1423_v25 = vsub.f32 1.5, %v1422_v59  ;;  %1085 = vadd.xlane.f32.xlu0 %v1022_v27 }
 0x2ee   :  { %v1821_v3 = vpop.eup %1820  ;;  %v1682_v14 = vadd.f32 %v2734_v30, %v1647_v16  ;;  %v1263_v28 = vadd.f32 1e-05, %v1199_v50  ;;  %v962_v62 = vpop.xlane.xlu2 %961 }
 0x2ef   :  { %v1424_v11 = vmul.f32 %v1819_v43, %v1423_v25  ;;  %v1430_v5 = vmul.f32 %v1821_v3, %v1262_v12  ;;  %v3027_v31 = vmul.f32 0.0078125, %v962_v62  ;;  %vm1436_vm13 = vweird.f32 %v1821_v3 }
 0x2f0   :  { %1714 = vst [vmem:[%s3226_s13 + $0x68] sm:$0xff] %v1682_v14  ;;  %1822 = vrsqrt.f32 %v1263_v28  ;;  %v1058_v7 = vpop.xlane.xlu1 %1057  ;;  %vm1437_vm15 = vmor %vm1435_vm14, %vm1436_vm13  ;;  %vm1445_vm1 = vweird.f32 %v1263_v28  ;;  %v1231_v25 = vsub.f32 %v2703_v54, %v3010_v19 }
 0x2f1   :  { %v1428_v51 = vsel %vm1427_vm12, %v1819_v43, %v1424_v11  ;;  %v1431_v38 = vmul.f32 %v1821_v3, %v1430_v5  ;;  %v1168_v33 = vmul.f32 %v3027_v31, %v3027_v31  ;;  %v1136_v56 = vmul.f32 0.0078125, %v1058_v7 }
 0x2f2   :  { %v1613_v39 = vmul.f32 %v1428_v51, %v1229_v46 }
 0x2f3   :  { %v1432_v41 = vmul.f32 0.5, %v1431_v38  ;;  %v1200_v22 = vsub.f32 %v1136_v56, %v1168_v33  ;;  %1081 = vadd.xlane.f32.xlu1 %v1020_v35 }
 0x2f4   :  { %v1648_v2 = vmul.f32 %v2726_v21, %v1613_v39 }
 0x2f5   :  { %v1433_v20 = vsub.f32 1.5, %v1432_v41  ;;  %v1264_v24 = vadd.f32 1e-05, %v1200_v22 }
 0x2f6   :  { %v1823_v34 = vpop.eup %1822  ;;  %v1683_v55 = vadd.f32 %v2734_v30, %v1648_v2  ;;  %v964_v60 = vpop.xlane.xlu0 %963  ;;  %v1232_v2 = vsub.f32 %v2713_v52, %v3027_v31 }
 0x2f7   :  { %v1434_v42 = vmul.f32 %v1821_v3, %v1433_v20  ;;  %v1440_v43 = vmul.f32 %v1823_v34, %v1263_v28  ;;  %v3040_v53 = vmul.f32 0.0078125, %v964_v60  ;;  %1824 = vrsqrt.f32 %v1264_v24 }
 0x2f8   :  { %1715 = vst [vmem:[%s3226_s13 + $0x70] sm:$0xff] %v1683_v55  ;;  %v1060_v9 = vpop.xlane.xlu2 %1059  ;;  %vm1446_vm0 = vweird.f32 %v1823_v34  ;;  %vm1455_vm4 = vweird.f32 %v1264_v24 }
 0x2f9   :  { %v1438_v32 = vsel %vm1437_vm15, %v1821_v3, %v1434_v42  ;;  %v1441_v48 = vmul.f32 %v1823_v34, %v1440_v43  ;;  %v1169_v61 = vmul.f32 %v3040_v53, %v3040_v53  ;;  %v1137_v12 = vmul.f32 0.0078125, %v1060_v9  ;;  %vm1447_vm2 = vmor %vm1445_vm1, %vm1446_vm0 }
 0x2fa   :  { %v1614_v63 = vmul.f32 %v1438_v32, %v1230_v17 }
 0x2fb   :  { %v1442_v0 = vmul.f32 0.5, %v1441_v48  ;;  %v1201_v36 = vsub.f32 %v1137_v12, %v1169_v61  ;;  %v1233_v12 = vsub.f32 %v2729_v29, %v3040_v53 }
 0x2fc   :  { %v1649_v4 = vmul.f32 %v2726_v21, %v1614_v63 }
 0x2fd   :  { %v1443_v6 = vsub.f32 1.5, %v1442_v0  ;;  %v1825_v45 = vpop.eup %1824  ;;  %v1265_v44 = vadd.f32 1e-05, %v1201_v36 }
 0x2fe   :  { %v1684_v59 = vadd.f32 %v2734_v30, %v1649_v4  ;;  %v966_v26 = vpop.xlane.xlu1 %965  ;;  %v1450_v50 = vmul.f32 %v1825_v45, %v1264_v24  ;;  %vm1456_vm3 = vweird.f32 %v1825_v45 }
 0x2ff   :  { %v1444_v16 = vmul.f32 %v1823_v34, %v1443_v6  ;;  %v3051_v27 = vmul.f32 0.0078125, %v966_v26  ;;  %1826 = vrsqrt.f32 %v1265_v44  ;;  %vm1457_vm5 = vmor %vm1455_vm4, %vm1456_vm3  ;;  %vm1465_vm7 = vweird.f32 %v1265_v44 }
 0x300   :  { %1716 = vst [vmem:[%s3226_s13 + $0x78] sm:$0xff] %v1684_v59  ;;  %v1062_v3 = vpop.xlane.xlu0 %1061  ;;  %v1451_v62 = vmul.f32 %v1825_v45, %v1450_v50 }
 0x301   :  { %v1448_v14 = vsel %vm1447_vm2, %v1823_v34, %v1444_v16  ;;  %v1170_v11 = vmul.f32 %v3051_v27, %v3051_v27  ;;  %v1138_v28 = vmul.f32 0.0078125, %v1062_v3 }
 0x302   :  { %v1615_v5 = vmul.f32 %v1448_v14, %v1231_v25  ;;  %v1452_v46 = vmul.f32 0.5, %v1451_v62 }
 0x303   :  { %v1202_v51 = vsub.f32 %v1138_v28, %v1170_v11  ;;  %v1234_v11 = vsub.f32 %v2749_v49, %v3051_v27 }
 0x304   :  { %v1650_v7 = vmul.f32 %v2726_v21, %v1615_v5  ;;  %v1453_v38 = vsub.f32 1.5, %v1452_v46 }
 0x305   :  { %v1827_v33 = vpop.eup %1826  ;;  %v1266_v54 = vadd.f32 1e-05, %v1202_v51 }
 0x306   :  { %v1685_v39 = vadd.f32 %v2734_v30, %v1650_v7  ;;  %v968_v19 = vpop.xlane.xlu2 %967  ;;  %v1454_v56 = vmul.f32 %v1825_v45, %v1453_v38  ;;  %v1460_v35 = vmul.f32 %v1827_v33, %v1265_v44  ;;  %vm1466_vm6 = vweird.f32 %v1827_v33 }
 0x307   :  { %v3062_v41 = vmul.f32 0.0078125, %v968_v19  ;;  %1828 = vrsqrt.f32 %v1266_v54  ;;  %vm1467_vm8 = vmor %vm1465_vm7, %vm1466_vm6  ;;  %vm1475_vm10 = vweird.f32 %v1266_v54 }
 0x308   :  { %1717 = vst [vmem:[%s3226_s13 + $0x80] sm:$0xff] %v1685_v39  ;;  %v1064_v22 = vpop.xlane.xlu1 %1063  ;;  %v1458_v20 = vsel %vm1457_vm5, %v1825_v45, %v1454_v56  ;;  %v1461_v34 = vmul.f32 %v1827_v33, %v1460_v35  ;;  %v3096_v39 = vld [vmem:[%s3224_s11] ss:$0 sm:$0xff] }
 0x309   :  { %v1171_v55 = vmul.f32 %v3062_v41, %v3062_v41  ;;  %v1616_v60 = vmul.f32 %v1458_v20, %v1232_v2  ;;  %v1139_v24 = vmul.f32 0.0078125, %v1064_v22  ;;  %v3102_v56 = vld [vmem:[%s3225_s12] ss:$0 sm:$0xff] }
 0x30a   :  { %v1462_v42 = vmul.f32 0.5, %v1461_v34 }
 0x30b   :  { %v1651_v43 = vmul.f32 %v2726_v21, %v1616_v60  ;;  %v1203_v17 = vsub.f32 %v1139_v24, %v1171_v55  ;;  %v1235_v55 = vsub.f32 %v2766_v23, %v3062_v41 }
 0x30c   :  { %v1463_v9 = vsub.f32 1.5, %v1462_v42 }
 0x30d   :  { %v1829_v32 = vpop.eup %1828  ;;  %v1686_v48 = vadd.f32 %v2734_v30, %v1651_v43  ;;  %v1267_v52 = vadd.f32 1e-05, %v1203_v17 }
 0x30e   :  { %v1464_v31 = vmul.f32 %v1827_v33, %v1463_v9  ;;  %v1470_v61 = vmul.f32 %v1829_v32, %v1266_v54  ;;  %v970_v63 = vpop.xlane.xlu0 %969  ;;  %vm1476_vm9 = vweird.f32 %v1829_v32 }
 0x30f   :  { %1718 = vst [vmem:[%s3226_s13 + $0x88] sm:$0xff] %v1686_v48  ;;  %1830 = vrsqrt.f32 %v1267_v52  ;;  %v3078_v0 = vmul.f32 0.0078125, %v970_v63  ;;  %vm1477_vm11 = vmor %vm1475_vm10, %vm1476_vm9  ;;  %vm1485_vm13 = vweird.f32 %v1267_v52 }
 0x310   :  { %v1468_v4 = vsel %vm1467_vm8, %v1827_v33, %v1464_v31  ;;  %v1471_v36 = vmul.f32 %v1829_v32, %v1470_v61  ;;  %v1066_v6 = vpop.xlane.xlu2 %1065 }
 0x311   :  { %v1617_v45 = vmul.f32 %v1468_v4, %v1233_v12  ;;  %v1172_v59 = vmul.f32 %v3078_v0, %v3078_v0  ;;  %v1140_v44 = vmul.f32 0.0078125, %v1066_v6 }
 0x312   :  { %v1472_v26 = vmul.f32 0.5, %v1471_v36  ;;  %v1236_v36 = vsub.f32 %v2793_v58, %v3078_v0 }
 0x313   :  { %v1652_v16 = vmul.f32 %v2726_v21, %v1617_v45  ;;  %v1204_v50 = vsub.f32 %v1140_v44, %v1172_v59 }
 0x314   :  { %v1473_v25 = vsub.f32 1.5, %v1472_v26 }
 0x315   :  { %v1831_v3 = vpop.eup %1830  ;;  %v1687_v29 = vadd.f32 %v2734_v30, %v1652_v16  ;;  %v1268_v53 = vadd.f32 1e-05, %v1204_v50 }
 0x316   :  { %v1474_v14 = vmul.f32 %v1829_v32, %v1473_v25  ;;  %v1480_v62 = vmul.f32 %v1831_v3, %v1267_v52  ;;  %v972_v21 = vpop.xlane.xlu1 %971  ;;  %vm1486_vm12 = vweird.f32 %v1831_v3 }
 0x317   :  { %1719 = vst [vmem:[%s3226_s13 + $0x90] sm:$0xff] %v1687_v29  ;;  %1832 = vrsqrt.f32 %v1268_v53  ;;  %v3089_v46 = vmul.f32 0.0078125, %v972_v21  ;;  %vm1487_vm14 = vmor %vm1485_vm13, %vm1486_vm12  ;;  %vm1495_vm0 = vweird.f32 %v1268_v53 }
 0x318   :  { %v1478_v5 = vsel %vm1477_vm11, %v1829_v32, %v1474_v14  ;;  %v1481_v28 = vmul.f32 %v1831_v3, %v1480_v62  ;;  %v1068_v30 = vpop.xlane.xlu0 %1067 }
 0x319   :  { %v1618_v7 = vmul.f32 %v1478_v5, %v1234_v11  ;;  %v1173_v38 = vmul.f32 %v3089_v46, %v3089_v46  ;;  %v1141_v33 = vmul.f32 0.0078125, %v1068_v30 }
 0x31a   :  { %v1482_v51 = vmul.f32 0.5, %v1481_v28 }
 0x31b   :  { %v1653_v49 = vmul.f32 %v3096_v39, %v1618_v7  ;;  %v1205_v54 = vsub.f32 %v1141_v33, %v1173_v38  ;;  %v1237_v7 = vsub.f32 %v2819_v13, %v3089_v46 }
 0x31c   :  { %v1483_v27 = vsub.f32 1.5, %v1482_v51 }
 0x31d   :  { %v1833_v19 = vpop.eup %1832  ;;  %v1688_v35 = vadd.f32 %v3102_v56, %v1653_v49  ;;  %v1269_v20 = vadd.f32 1e-05, %v1205_v54 }
 0x31e   :  { %v1484_v2 = vmul.f32 %v1831_v3, %v1483_v27  ;;  %v1490_v22 = vmul.f32 %v1833_v19, %v1268_v53  ;;  %v974_v34 = vpop.xlane.xlu2 %973  ;;  %vm1496_vm15 = vweird.f32 %v1833_v19 }
 0x31f   :  { %1720 = vst [vmem:[%s3226_s13 + $0x98] sm:$0xff] %v1688_v35  ;;  %v3110_v60 = vmul.f32 0.0078125, %v974_v34  ;;  %1834 = vrsqrt.f32 %v1269_v20  ;;  %vm1497_vm1 = vmor %vm1495_vm0, %vm1496_vm15  ;;  %vm1505_vm3 = vweird.f32 %v1269_v20 }
 0x320   :  { %v1488_v24 = vsel %vm1487_vm14, %v1831_v3, %v1484_v2  ;;  %v1491_v42 = vmul.f32 %v1833_v19, %v1490_v22  ;;  %v1070_v43 = vpop.xlane.xlu1 %1069 }
 0x321   :  { %v1619_v17 = vmul.f32 %v1488_v24, %v1235_v55  ;;  %v1174_v9 = vmul.f32 %v3110_v60, %v3110_v60  ;;  %v1142_v32 = vmul.f32 0.0078125, %v1070_v43  ;;  %v1238_v24 = vsub.f32 %v2843_v1, %v3110_v60 }
 0x322   :  { %v1492_v48 = vmul.f32 0.5, %v1491_v42 }
 0x323   :  { %v1654_v52 = vmul.f32 %v3096_v39, %v1619_v17  ;;  %v1206_v31 = vsub.f32 %v1142_v32, %v1174_v9 }
 0x324   :  { %v1493_v61 = vsub.f32 1.5, %v1492_v48 }
 0x325   :  { %v1689_v23 = vadd.f32 %v3102_v56, %v1654_v52  ;;  %v1270_v41 = vadd.f32 1e-05, %v1206_v31  ;;  %v1835_v63 = vpop.eup %1834 }
 0x326   :  { %v1494_v12 = vmul.f32 %v1833_v19, %v1493_v61  ;;  %v976_v4 = vpop.xlane.xlu0 %975  ;;  %v1500_v6 = vmul.f32 %v1835_v63, %v1269_v20  ;;  %vm1506_vm2 = vweird.f32 %v1835_v63 }
 0x327   :  { %1721 = vst [vmem:[%s3226_s13 + $0xa0] sm:$0xff] %v1689_v23  ;;  %1836 = vrsqrt.f32 %v1270_v41  ;;  %v3121_v59 = vmul.f32 0.0078125, %v976_v4  ;;  %vm1507_vm4 = vmor %vm1505_vm3, %vm1506_vm2  ;;  %vm1515_vm6 = vweird.f32 %v1270_v41 }
 0x328   :  { %v1498_v45 = vsel %vm1497_vm1, %v1833_v19, %v1494_v12  ;;  %v1072_v44 = vpop.xlane.xlu2 %1071  ;;  %v1501_v16 = vmul.f32 %v1835_v63, %v1500_v6 }
 0x329   :  { %v1620_v26 = vmul.f32 %v1498_v45, %v1236_v36  ;;  %v1143_v50 = vmul.f32 0.0078125, %v1072_v44  ;;  %v1175_v25 = vmul.f32 %v3121_v59, %v3121_v59  ;;  %v1239_v44 = vsub.f32 %v2865_v57, %v3121_v59 }
 0x32a   :  { %v1502_v29 = vmul.f32 0.5, %v1501_v16 }
 0x32b   :  { %v1655_v3 = vmul.f32 %v3096_v39, %v1620_v26  ;;  %v1207_v53 = vsub.f32 %v1143_v50, %v1175_v25 }
 0x32c   :  { %v1503_v0 = vsub.f32 1.5, %v1502_v29 }
 0x32d   :  { %v1837_v14 = vpop.eup %1836  ;;  %v1690_v58 = vadd.f32 %v3102_v56, %v1655_v3  ;;  %v1271_v11 = vadd.f32 1e-05, %v1207_v53 }
 0x32e   :  { %v1510_v62 = vmul.f32 %v1837_v14, %v1270_v41  ;;  %v978_v21 = vpop.xlane.xlu1 %977  ;;  %v1504_v5 = vmul.f32 %v1835_v63, %v1503_v0  ;;  %vm1516_vm5 = vweird.f32 %v1837_v14 }
 0x32f   :  { %1722 = vst [vmem:[%s3226_s13 + $0xa8] sm:$0xff] %v1690_v58  ;;  %v3130_v28 = vmul.f32 0.0078125, %v978_v21  ;;  %1838 = vrsqrt.f32 %v1271_v11  ;;  %vm1517_vm7 = vmor %vm1515_vm6, %vm1516_vm5  ;;  %vm1525_vm9 = vweird.f32 %v1271_v11 }
 0x330   :  { %v1511_v30 = vmul.f32 %v1837_v14, %v1510_v62  ;;  %v1074_v51 = vpop.xlane.xlu0 %1073  ;;  %v1508_v38 = vsel %vm1507_vm4, %v1835_v63, %v1504_v5 }
 0x331   :  { %v1176_v33 = vmul.f32 %v3130_v28, %v3130_v28  ;;  %v1144_v49 = vmul.f32 0.0078125, %v1074_v51  ;;  %v1621_v27 = vmul.f32 %v1508_v38, %v1237_v7  ;;  %v1240_v7 = vsub.f32 %v2890_v47, %v3130_v28 }
 0x332   :  { %v1512_v54 = vmul.f32 0.5, %v1511_v30 }
 0x333   :  { %v1208_v19 = vsub.f32 %v1144_v49, %v1176_v33  ;;  %v1656_v35 = vmul.f32 %v3096_v39, %v1621_v27 }
 0x334   :  { %v1513_v2 = vsub.f32 1.5, %v1512_v54 }
 0x335   :  { %v1272_v22 = vadd.f32 1e-05, %v1208_v19  ;;  %v1839_v34 = vpop.eup %1838  ;;  %v1691_v13 = vadd.f32 %v3102_v56, %v1656_v35 }
 0x336   :  { %v980_v20 = vpop.xlane.xlu2 %979  ;;  %v1514_v46 = vmul.f32 %v1837_v14, %v1513_v2  ;;  %v1520_v42 = vmul.f32 %v1839_v34, %v1271_v11  ;;  %vm1526_vm8 = vweird.f32 %v1839_v34 }
 0x337   :  { %v3138_v55 = vmul.f32 0.0078125, %v980_v20  ;;  %1840 = vrsqrt.f32 %v1272_v22  ;;  %1723 = vst [vmem:[%s3226_s13 + $0xb0] sm:$0xff] %v1691_v13  ;;  %vm1527_vm10 = vmor %vm1525_vm9, %vm1526_vm8  ;;  %vm1535_vm12 = vweird.f32 %v1272_v22 }
 0x338   :  { %v1076_v43 = vpop.xlane.xlu1 %1075  ;;  %v1518_v17 = vsel %vm1517_vm7, %v1837_v14, %v1514_v46  ;;  %v1521_v52 = vmul.f32 %v1839_v34, %v1520_v42 }
 0x339   :  { %v1177_v9 = vmul.f32 %v3138_v55, %v3138_v55  ;;  %v1145_v32 = vmul.f32 0.0078125, %v1076_v43  ;;  %v1622_v48 = vmul.f32 %v1518_v17, %v1238_v24 }
 0x33a   :  { %v1522_v23 = vmul.f32 0.5, %v1521_v52 }
 0x33b   :  { %v1209_v31 = vsub.f32 %v1145_v32, %v1177_v9  ;;  %v1657_v61 = vmul.f32 %v3096_v39, %v1622_v48 }
 0x33c   :  { %v1523_v63 = vsub.f32 1.5, %v1522_v23 }
 0x33d   :  { %v1273_v1 = vadd.f32 1e-05, %v1209_v31  ;;  %v1841_v60 = vpop.eup %1840  ;;  %v1692_v41 = vadd.f32 %v3102_v56, %v1657_v61 }
 0x33e   :  { %v982_v12 = vpop.xlane.xlu0 %981  ;;  %v1530_v4 = vmul.f32 %v1841_v60, %v1272_v22  ;;  %v1524_v36 = vmul.f32 %v1839_v34, %v1523_v63  ;;  %vm1536_vm11 = vweird.f32 %v1841_v60 }
 0x33f   :  { %1842 = vrsqrt.f32 %v1273_v1  ;;  %1724 = vst [vmem:[%s3226_s13 + $0xb8] sm:$0xff] %v1692_v41  ;;  %v3152_v6 = vmul.f32 0.0078125, %v982_v12  ;;  %vm1537_vm13 = vmor %vm1535_vm12, %vm1536_vm11  ;;  %vm1545_vm15 = vweird.f32 %v1273_v1 }
 0x340   :  { %v1078_v45 = vpop.xlane.xlu2 %1077  ;;  %v1531_v26 = vmul.f32 %v1841_v60, %v1530_v4  ;;  %v1528_v50 = vsel %vm1527_vm10, %v1839_v34, %v1524_v36  ;;  %v1241_v34 = vsub.f32 %v2913_v37, %v3138_v55 }
 0x341   :  { %v1146_v16 = vmul.f32 0.0078125, %v1078_v45  ;;  %v1178_v25 = vmul.f32 %v3152_v6, %v3152_v6  ;;  %v1623_v3 = vmul.f32 %v1528_v50, %v1239_v44  ;;  %v1242_v61 = vsub.f32 %v2935_v10, %v3152_v6 }
 0x342   :  { %v1532_v29 = vmul.f32 0.5, %v1531_v26 }
 0x343   :  { %v1210_v53 = vsub.f32 %v1146_v16, %v1178_v25  ;;  %v1658_v58 = vmul.f32 %v3096_v39, %v1623_v3 }
 0x344   :  { %v1533_v0 = vsub.f32 1.5, %v1532_v29 }
 0x345   :  { %v1843_v14 = vpop.eup %1842  ;;  %v1274_v11 = vadd.f32 1e-05, %v1210_v53  ;;  %v1693_v57 = vadd.f32 %v3102_v56, %v1658_v58 }
 0x346   :  { %v1540_v62 = vmul.f32 %v1843_v14, %v1273_v1  ;;  %v984_v21 = vpop.xlane.xlu1 %983  ;;  %v1534_v59 = vmul.f32 %v1841_v60, %v1533_v0  ;;  %vm1546_vm14 = vweird.f32 %v1843_v14 }
 0x347   :  { %v3160_v5 = vmul.f32 0.0078125, %v984_v21  ;;  %1844 = vrsqrt.f32 %v1274_v11  ;;  %1725 = vst [vmem:[%s3226_s13 + $0xc0] sm:$0xff] %v1693_v57  ;;  %vm1547_vm0 = vmor %vm1545_vm15, %vm1546_vm14  ;;  %vm1555_vm2 = vweird.f32 %v1274_v11 }
 0x348   :  { %v1541_v30 = vmul.f32 %v1843_v14, %v1540_v62  ;;  %v1080_v51 = vpop.xlane.xlu0 %1079  ;;  %v1538_v38 = vsel %vm1537_vm13, %v1841_v60, %v1534_v59 }
 0x349   :  { %v1179_v33 = vmul.f32 %v3160_v5, %v3160_v5  ;;  %v1147_v49 = vmul.f32 0.0078125, %v1080_v51  ;;  %v1624_v27 = vmul.f32 %v1538_v38, %v1240_v7  ;;  %v1243_v10 = vsub.f32 %v2955_v8, %v3160_v5 }
 0x34a   :  { %v1542_v54 = vmul.f32 0.5, %v1541_v30 }
 0x34b   :  { %v1211_v19 = vsub.f32 %v1147_v49, %v1179_v33  ;;  %v1659_v35 = vmul.f32 %v3096_v39, %v1624_v27 }
 0x34c   :  { %v1543_v2 = vsub.f32 1.5, %v1542_v54 }
 0x34d   :  { %v1275_v47 = vadd.f32 1e-05, %v1211_v19  ;;  %v1845_v28 = vpop.eup %1844  ;;  %v1694_v22 = vadd.f32 %v3102_v56, %v1659_v35 }
 0x34e   :  { %v1544_v20 = vmul.f32 %v1843_v14, %v1543_v2  ;;  %v1550_v13 = vmul.f32 %v1845_v28, %v1274_v11  ;;  %v986_v43 = vpop.xlane.xlu2 %985  ;;  %vm1556_vm1 = vweird.f32 %v1845_v28 }
 0x34f   :  { %1846 = vrsqrt.f32 %v1275_v47  ;;  %1726 = vst [vmem:[%s3226_s13 + $0xc8] sm:$0xff] %v1694_v22  ;;  %vm1557_vm3 = vmor %vm1555_vm2, %vm1556_vm1  ;;  %vm1565_vm5 = vweird.f32 %v1275_v47  ;;  %v1116_v8 = vmul.f32 0.0078125, %v986_v43 }
 0x350   :  { %v1548_v46 = vsel %vm1547_vm0, %v1843_v14, %v1544_v20  ;;  %v1551_v42 = vmul.f32 %v1845_v28, %v1550_v13 }
 0x351   :  { %v1625_v24 = vmul.f32 %v1548_v46, %v1241_v34  ;;  %v1180_v30 = vmul.f32 %v1116_v8, %v1116_v8 }
 0x352   :  { %v1552_v9 = vmul.f32 0.5, %v1551_v42 }
 0x353   :  { %v1660_v17 = vmul.f32 %v3096_v39, %v1625_v24 }
 0x354   :  { %v1553_v52 = vsub.f32 1.5, %v1552_v9 }
 0x355   :  { %v1847_v32 = vpop.eup %1846  ;;  %v1695_v48 = vadd.f32 %v3102_v56, %v1660_v17 }
 0x356   :  { %v1560_v37 = vmul.f32 %v1847_v32, %v1275_v47  ;;  %v1554_v55 = vmul.f32 %v1845_v28, %v1553_v52  ;;  %v988_v31 = vpop.xlane.xlu0 %987  ;;  %vm1566_vm4 = vweird.f32 %v1847_v32 }
 0x357   :  { %1727 = vst [vmem:[%s3226_s13 + $0xd0] sm:$0xff] %v1695_v48  ;;  %v1117_v1 = vmul.f32 0.0078125, %v988_v31  ;;  %vm1567_vm6 = vmor %vm1565_vm5, %vm1566_vm4 }
 0x358   :  { %v1561_v23 = vmul.f32 %v1847_v32, %v1560_v37  ;;  %v1558_v60 = vsel %vm1557_vm3, %v1845_v28, %v1554_v55  ;;  %v1084_v41 = vpop.xlane.xlu2 %1083 }
 0x359   :  { %v1626_v63 = vmul.f32 %v1558_v60, %v1242_v61  ;;  %v1181_v4 = vmul.f32 %v1117_v1, %v1117_v1  ;;  %v1149_v36 = vmul.f32 0.0078125, %v1084_v41  ;;  %v1245_v47 = vsub.f32 %v3001_v18, %v1117_v1 }
 0x35a   :  { %v1562_v12 = vmul.f32 0.5, %v1561_v23  ;;  %v1244_v23 = vsub.f32 %v2979_v15, %v1116_v8 }
 0x35b   :  { %v1661_v45 = vmul.f32 %v3096_v39, %v1626_v63  ;;  %v1213_v26 = vsub.f32 %v1149_v36, %v1181_v4 }
 0x35c   :  { %v1563_v44 = vsub.f32 1.5, %v1562_v12 }
 0x35d   :  { %v1696_v16 = vadd.f32 %v3102_v56, %v1661_v45  ;;  %v1277_v6 = vadd.f32 1e-05, %v1213_v26 }
 0x35e   :  { %v1564_v50 = vmul.f32 %v1847_v32, %v1563_v44  ;;  %v990_v25 = vpop.xlane.xlu1 %989 }
 0x35f   :  { %1728 = vst [vmem:[%s3226_s13 + $0xd8] sm:$0xff] %v1696_v16  ;;  %v1118_v29 = vmul.f32 0.0078125, %v990_v25  ;;  %1848 = vrsqrt.f32 %v1277_v6  ;;  %vm1585_vm8 = vweird.f32 %v1277_v6 }
 0x360   :  { %v1568_v3 = vsel %vm1567_vm6, %v1847_v32, %v1564_v50  ;;  %v1086_v14 = vpop.xlane.xlu0 %1085 }
 0x361   :  { %v1627_v53 = vmul.f32 %v1568_v3, %v1243_v10  ;;  %v1182_v58 = vmul.f32 %v1118_v29, %v1118_v29  ;;  %v1150_v0 = vmul.f32 0.0078125, %v1086_v14  ;;  %v1246_v9 = vsub.f32 %v3019_v40, %v1118_v29 }
 0x363   :  { %v1662_v62 = vmul.f32 %v3096_v39, %v1627_v53  ;;  %v1214_v11 = vsub.f32 %v1150_v0, %v1182_v58 }
 0x365   :  { %v1697_v21 = vadd.f32 %v3102_v56, %v1662_v62  ;;  %v1278_v57 = vadd.f32 1e-05, %v1214_v11  ;;  %v1849_v59 = vpop.eup %1848 }
 0x366   :  { %v1082_v5 = vpop.xlane.xlu1 %1081  ;;  %v1580_v7 = vmul.f32 %v1849_v59, %v1277_v6  ;;  %vm1586_vm7 = vweird.f32 %v1849_v59 }
 0x367   :  { %1729 = vst [vmem:[%s3226_s13 + $0xe0] sm:$0xff] %v1697_v21  ;;  %1850 = vrsqrt.f32 %v1278_v57  ;;  %v1148_v51 = vmul.f32 0.0078125, %v1082_v5  ;;  %vm1587_vm9 = vmor %vm1585_vm8, %vm1586_vm7  ;;  %vm1595_vm11 = vweird.f32 %v1278_v57 }
 0x368   :  { %v1581_v38 = vmul.f32 %v1849_v59, %v1580_v7 }
 0x369   :  { %v1212_v33 = vsub.f32 %v1148_v51, %v1180_v30 }
 0x36a   :  { %v1582_v49 = vmul.f32 0.5, %v1581_v38 }
 0x36b   :  { %v1276_v27 = vadd.f32 1e-05, %v1212_v33 }
 0x36c   :  { %v1583_v19 = vsub.f32 1.5, %v1582_v49 }
 0x36d   :  { %v1851_v54 = vpop.eup %1850  ;;  %1852 = vrsqrt.f32 %v1276_v27  ;;  %vm1575_vm14 = vweird.f32 %v1276_v27 }
 0x36e   :  { %v1590_v35 = vmul.f32 %v1851_v54, %v1278_v57  ;;  %v1584_v2 = vmul.f32 %v1849_v59, %v1583_v19  ;;  %vm1596_vm10 = vweird.f32 %v1851_v54 }
 0x36f   :  { %vm1597_vm12 = vmor %vm1595_vm11, %vm1596_vm10 }
 0x370   :  { %v1591_v28 = vmul.f32 %v1851_v54, %v1590_v35  ;;  %v1588_v22 = vsel %vm1587_vm9, %v1849_v59, %v1584_v2 }
 0x371   :  { %v1629_v20 = vmul.f32 %v1588_v22, %v1245_v47 }
 0x372   :  { %v1592_v34 = vmul.f32 0.5, %v1591_v28 }
 0x373   :  { %v1853_v13 = vpop.eup %1852  ;;  %v1664_v46 = vmul.f32 %v3096_v39, %v1629_v20 }
 0x374   :  { %v1593_v24 = vsub.f32 1.5, %v1592_v34  ;;  %v1570_v42 = vmul.f32 %v1853_v13, %v1276_v27  ;;  %vm1576_vm13 = vweird.f32 %v1853_v13 }
 0x375   :  { %v1699_v43 = vadd.f32 %v3102_v56, %v1664_v46  ;;  %vm1577_vm15 = vmor %vm1575_vm14, %vm1576_vm13 }
 0x376   :  { %v1594_v17 = vmul.f32 %v1851_v54, %v1593_v24  ;;  %v1571_v32 = vmul.f32 %v1853_v13, %v1570_v42 }
 0x377   :  { %1731 = vst [vmem:[%s3226_s13 + $0xf0] sm:$0xff] %v1699_v43 }
 0x378   :  { %v1598_v18 = vsel %vm1597_vm12, %v1851_v54, %v1594_v17  ;;  %v1572_v52 = vmul.f32 0.5, %v1571_v32 }
 0x379   :  { %v1630_v48 = vmul.f32 %v1598_v18, %v1246_v9 }
 0x37a   :  { %v1573_v55 = vsub.f32 1.5, %v1572_v52 }
 0x37b   :  { %v1665_v37 = vmul.f32 %v3096_v39, %v1630_v48 }
 0x37c   :  { %v1574_v61 = vmul.f32 %v1853_v13, %v1573_v55 }
 0x37d   :  { %v1700_v31 = vadd.f32 %v3102_v56, %v1665_v37 }
 0x37e   :  { %v1578_v40 = vsel %vm1577_vm15, %v1853_v13, %v1574_v61 }
 0x37f   :  { %1732 = vst [vmem:[%s3226_s13 + $0xf8] sm:$0xff] %v1700_v31  ;;  %v1628_v1 = vmul.f32 %v1578_v40, %v1244_v23 }
 0x381   :  { %v1663_v60 = vmul.f32 %v3096_v39, %v1628_v1 }
 0x383   :  { %v1698_v41 = vadd.f32 %v3102_v56, %v1663_v60 }
 0x385   :  { %1730 = vst [vmem:[%s3226_s13 + $0xe8] sm:$0xff] %v1698_v41 }

// kernel: simulator_forward.12
= control target key start
LH: loop header
LB: loop body
LE: loop exit
PB: predicated region body
PF: predicated region fallthrough
CT: control target
= control target key end

     0   :  { %s1046_s4 = inlined_call_operand.vmem [shape: f32[128,128], index: 4, kind: input, shape index: {}]   ;;  %s1047_s3 = inlined_call_operand.vmem [shape: f32[128,128], index: 3, kind: input, shape index: {}]   ;;  %s1048_s1 = inlined_call_operand.vmem [shape: f32[64,128], index: 1, kind: input, shape index: {}]   ;;  %s1049_s0 = inlined_call_operand.vmem [shape: f32[64,128], index: 0, kind: input, shape index: {}, may-alias: {0,2}]   ;;  %s1050_s5 = inlined_call_operand.vmem [shape: f32[1,128], index: 5, kind: input, shape index: {}]   ;;  %s1051_s6 = inlined_call_operand.vmem [shape: f32[128,128], index: 6, kind: input, shape index: {}]   ;;  %s1052_s7 = inlined_call_operand.vmem [shape: f32[1,128], index: 7, kind: input, shape index: {}]   ;;  %s1053_s8 = inlined_call_operand.vmem [shape: f32[128,128], index: 8, kind: input, shape index: {}]   ;;  %s1054_s9 = inlined_call_operand.vmem [shape: f32[1,128], index: 9, kind: input, shape index: {}]   ;;  %s1055_s10 = inlined_call_operand.vmem [shape: f32[1,128], index: 10, kind: input, shape index: {}]   ;;  %s1056_s11 = inlined_call_operand.vmem [shape: f32[1,128], index: 11, kind: input, shape index: {}]   ;;  %s1057_s2 = inlined_call_operand.vmem [shape: f32[64,128], index: 2, kind: input, shape index: {}, may-alias: {0,2}]   ;;  %s1058_s12 = inlined_call_operand.vmem [shape: f32[64,128], index: 12, kind: output, shape index: {}]  }
   0x1   :  { %v80_v0 = vld [vmem:[%s1046_s4 + $0x78] sm:$0xff]  ;;  %v79_v2 = vld [vmem:[%s1046_s4 + $0x70] sm:$0xff]  ;;  %v78_v4 = vld [vmem:[%s1046_s4 + $0x68] sm:$0xff] }
   0x2   :  { %v56_v1 = vld [vmem:[%s1047_s3 + $0x78] sm:$0xff]  ;;  %89 = vmatpush.msra.mxu0 %v80_v0  ;;  %v55_v3 = vld [vmem:[%s1047_s3 + $0x70] sm:$0xff]  ;;  %v54_v5 = vld [vmem:[%s1047_s3 + $0x68] sm:$0xff] }
   0x3   :  { %130 = vmatpush.msra.mxu1 %v56_v1  ;;  %v77_v6 = vld [vmem:[%s1046_s4 + $0x60] sm:$0xff]  ;;  %v76_v8 = vld [vmem:[%s1046_s4 + $0x58] sm:$0xff]  ;;  %v75_v10 = vld [vmem:[%s1046_s4 + $0x50] sm:$0xff] }
   0x4   :  { %90 = vmatpush.msra.mxu0 %v79_v2  ;;  %v53_v7 = vld [vmem:[%s1047_s3 + $0x60] sm:$0xff]  ;;  %v52_v9 = vld [vmem:[%s1047_s3 + $0x58] sm:$0xff]  ;;  %v51_v11 = vld [vmem:[%s1047_s3 + $0x50] sm:$0xff] }
   0x5   :  { %131 = vmatpush.msra.mxu1 %v55_v3  ;;  %v74_v12 = vld [vmem:[%s1046_s4 + $0x48] sm:$0xff]  ;;  %v73_v14 = vld [vmem:[%s1046_s4 + $0x40] sm:$0xff]  ;;  %v72_v16 = vld [vmem:[%s1046_s4 + $0x38] sm:$0xff] }
   0x6   :  { %91 = vmatpush.msra.mxu0 %v78_v4  ;;  %v50_v13 = vld [vmem:[%s1047_s3 + $0x48] sm:$0xff]  ;;  %v49_v15 = vld [vmem:[%s1047_s3 + $0x40] sm:$0xff]  ;;  %v48_v17 = vld [vmem:[%s1047_s3 + $0x38] sm:$0xff] }
   0x7   :  { %132 = vmatpush.msra.mxu1 %v54_v5  ;;  %v71_v18 = vld [vmem:[%s1046_s4 + $0x30] sm:$0xff]  ;;  %v70_v20 = vld [vmem:[%s1046_s4 + $0x28] sm:$0xff]  ;;  %v69_v22 = vld [vmem:[%s1046_s4 + $0x20] sm:$0xff] }
   0x8   :  { %92 = vmatpush.msra.mxu0 %v77_v6  ;;  %v47_v19 = vld [vmem:[%s1047_s3 + $0x30] sm:$0xff]  ;;  %v46_v21 = vld [vmem:[%s1047_s3 + $0x28] sm:$0xff]  ;;  %v45_v23 = vld [vmem:[%s1047_s3 + $0x20] sm:$0xff] }
   0x9   :  { %133 = vmatpush.msra.mxu1 %v53_v7  ;;  %v68_v24 = vld [vmem:[%s1046_s4 + $0x18] sm:$0xff]  ;;  %v67_v26 = vld [vmem:[%s1046_s4 + $0x10] sm:$0xff]  ;;  %v66_v28 = vld [vmem:[%s1046_s4 + $0x8] sm:$0xff] }
   0xa   :  { %93 = vmatpush.msra.mxu0 %v76_v8  ;;  %v44_v25 = vld [vmem:[%s1047_s3 + $0x18] sm:$0xff]  ;;  %v43_v27 = vld [vmem:[%s1047_s3 + $0x10] sm:$0xff]  ;;  %v42_v29 = vld [vmem:[%s1047_s3 + $0x8] sm:$0xff] }
   0xb   :  { %134 = vmatpush.msra.mxu1 %v52_v9  ;;  %v65_v30 = vld [vmem:[%s1046_s4] sm:$0xff]  ;;  %v82_v34 = vld [vmem:[%s1048_s1 + $0x8] sm:$0xff]  ;;  %v83_v36 = vld [vmem:[%s1048_s1 + $0x10] sm:$0xff] }
   0xc   :  { %94 = vmatpush.msra.mxu0 %v75_v10  ;;  %v41_v31 = vld [vmem:[%s1047_s3] sm:$0xff]  ;;  %v58_v35 = vld [vmem:[%s1049_s0 + $0x8] sm:$0xff]  ;;  %v59_v37 = vld [vmem:[%s1049_s0 + $0x10] sm:$0xff] }
   0xd   :  { %135 = vmatpush.msra.mxu1 %v51_v11  ;;  %v81_v32 = vld [vmem:[%s1048_s1] sm:$0xff]  ;;  %v84_v38 = vld [vmem:[%s1048_s1 + $0x18] sm:$0xff]  ;;  %v205_v41 = vld [vmem:[%s1051_s6 + $0x70] sm:$0xff] }
   0xe   :  { %95 = vmatpush.msra.mxu0 %v74_v12  ;;  %v57_v33 = vld [vmem:[%s1049_s0] sm:$0xff]  ;;  %v60_v39 = vld [vmem:[%s1049_s0 + $0x18] sm:$0xff]  ;;  %v204_v42 = vld [vmem:[%s1051_s6 + $0x68] sm:$0xff] }
   0xf   :  { %136 = vmatpush.msra.mxu1 %v50_v13  ;;  %v206_v40 = vld [vmem:[%s1051_s6 + $0x78] sm:$0xff]  ;;  %v203_v43 = vld [vmem:[%s1051_s6 + $0x60] sm:$0xff]  ;;  %v201_v47 = vld [vmem:[%s1051_s6 + $0x50] sm:$0xff] }
  0x10   :  { %96 = vmatpush.msra.mxu0 %v73_v14  ;;  %211 = vmatpush.msra.mxu2 %v206_v40  ;;  %v85_v44 = vld [vmem:[%s1048_s1 + $0x20] sm:$0xff]  ;;  %v202_v46 = vld [vmem:[%s1051_s6 + $0x58] sm:$0xff]  ;;  %v200_v48 = vld [vmem:[%s1051_s6 + $0x48] sm:$0xff] }
  0x11   :  { %137 = vmatpush.msra.mxu1 %v49_v15  ;;  %v61_v45 = vld [vmem:[%s1049_s0 + $0x20] sm:$0xff]  ;;  %v86_v50 = vld [vmem:[%s1048_s1 + $0x28] sm:$0xff]  ;;  %v198_v52 = vld [vmem:[%s1051_s6 + $0x38] sm:$0xff] }
  0x12   :  { %97 = vmatpush.msra.mxu0 %v72_v16  ;;  %212 = vmatpush.msra.mxu2 %v205_v41  ;;  %v199_v49 = vld [vmem:[%s1051_s6 + $0x40] sm:$0xff]  ;;  %v62_v51 = vld [vmem:[%s1049_s0 + $0x28] sm:$0xff]  ;;  %v197_v53 = vld [vmem:[%s1051_s6 + $0x30] sm:$0xff] }
  0x13   :  { %138 = vmatpush.msra.mxu1 %v48_v17  ;;  %v196_v54 = vld [vmem:[%s1051_s6 + $0x28] sm:$0xff]  ;;  %v195_v55 = vld [vmem:[%s1051_s6 + $0x20] sm:$0xff]  ;;  %v87_v56 = vld [vmem:[%s1048_s1 + $0x30] sm:$0xff] }
  0x14   :  { %98 = vmatpush.msra.mxu0 %v71_v18  ;;  %213 = vmatpush.msra.mxu2 %v204_v42  ;;  %v63_v57 = vld [vmem:[%s1049_s0 + $0x30] sm:$0xff]  ;;  %v88_v58 = vld [vmem:[%s1048_s1 + $0x38] sm:$0xff]  ;;  %v192_v62 = vld [vmem:[%s1051_s6 + $0x8] sm:$0xff] }
  0x15   :  { %139 = vmatpush.msra.mxu1 %v47_v19  ;;  %v64_v59 = vld [vmem:[%s1049_s0 + $0x38] sm:$0xff]  ;;  %v193_v61 = vld [vmem:[%s1051_s6 + $0x10] sm:$0xff]  ;;  %v191_v63 = vld [vmem:[%s1051_s6] sm:$0xff] }
  0x16   :  { %99 = vmatpush.msra.mxu0 %v70_v20  ;;  %214 = vmatpush.msra.mxu2 %v203_v43  ;;  %v194_v60 = vld [vmem:[%s1051_s6 + $0x18] sm:$0xff]  ;;  %v830_v0 = vld [vmem:[%s1050_s5] ss:$0 sm:$0xff]  ;;  %v266_v40 = vld [vmem:[%s1053_s8 + $0x30] sm:$0xff] }
  0x17   :  { %140 = vmatpush.msra.mxu1 %v46_v21  ;;  %v275_v21 = vld [vmem:[%s1053_s8 + $0x78] sm:$0xff] }
  0x18   :  { %100 = vmatpush.msra.mxu0 %v69_v22  ;;  %215 = vmatpush.msra.mxu2 %v202_v46  ;;  %v274_v22 = vld [vmem:[%s1053_s8 + $0x70] sm:$0xff]  ;;  %v264_v46 = vld [vmem:[%s1053_s8 + $0x20] sm:$0xff] }
  0x19   :  { %141 = vmatpush.msra.mxu1 %v45_v23  ;;  %280 = vmatpush.msra.mxu3 %v275_v21 }
  0x1a   :  { %101 = vmatpush.msra.mxu0 %v68_v24  ;;  %216 = vmatpush.msra.mxu2 %v201_v47 }
  0x1b   :  { %142 = vmatpush.msra.mxu1 %v44_v25  ;;  %281 = vmatpush.msra.mxu3 %v274_v22 }
  0x1c   :  { %102 = vmatpush.msra.mxu0 %v67_v26  ;;  %217 = vmatpush.msra.mxu2 %v200_v48  ;;  %v273_v26 = vld [vmem:[%s1053_s8 + $0x68] sm:$0xff]  ;;  %v263_v48 = vld [vmem:[%s1053_s8 + $0x18] sm:$0xff] }
  0x1d   :  { %143 = vmatpush.msra.mxu1 %v43_v27  ;;  %282 = vmatpush.msra.mxu3 %v273_v26 }
  0x1e   :  { %103 = vmatpush.msra.mxu0 %v66_v28  ;;  %218 = vmatpush.msra.mxu2 %v199_v49  ;;  %v272_v28 = vld [vmem:[%s1053_s8 + $0x60] sm:$0xff] }
  0x1f   :  { %144 = vmatpush.msra.mxu1 %v42_v29  ;;  %283 = vmatpush.msra.mxu3 %v272_v28 }
  0x20   :  { %104 = vmatpush.msra.mxu0 %v65_v30  ;;  %219 = vmatpush.msra.mxu2 %v198_v52  ;;  %v271_v30 = vld [vmem:[%s1053_s8 + $0x58] sm:$0xff] }
  0x21   :  { %145 = vmatpush.msra.mxu1 %v41_v31  ;;  %105 = vmatmul.f32.vlgmr.msra.gmra.mxu0 %v81_v32  ;;  %v270_v31 = vld [vmem:[%s1053_s8 + $0x50] sm:$0xff] }
  0x22   :  { %146 = vmatmul.f32.vlgmr.msra.gmra.mxu1 %v57_v33  ;;  %220 = vmatpush.msra.mxu2 %v197_v53 }
  0x23   :  { %284 = vmatpush.msra.mxu3 %v271_v30 }
  0x24   :  { %221 = vmatpush.msra.mxu2 %v196_v54  ;;  %v262_v54 = vld [vmem:[%s1053_s8 + $0x10] sm:$0xff] }
  0x25   :  { %285 = vmatpush.msra.mxu3 %v270_v31 }
  0x26   :  { %222 = vmatpush.msra.mxu2 %v195_v55  ;;  %v261_v55 = vld [vmem:[%s1053_s8 + $0x8] sm:$0xff] }
  0x28   :  { %223 = vmatpush.msra.mxu2 %v194_v60 }
  0x29   :  { %108 = vmatmul.f32.gmra.mxu0 %v82_v34 }
  0x2a   :  { %149 = vmatmul.f32.gmra.mxu1 %v58_v35  ;;  %224 = vmatpush.msra.mxu2 %v193_v61  ;;  %v269_v35 = vld [vmem:[%s1053_s8 + $0x48] sm:$0xff] }
  0x2b   :  { %286 = vmatpush.msra.mxu3 %v269_v35 }
  0x2c   :  { %225 = vmatpush.msra.mxu2 %v192_v62 }
  0x2e   :  { %226 = vmatpush.msra.mxu2 %v191_v63 }
  0x31   :  { %111 = vmatmul.f32.gmra.mxu0 %v83_v36 }
  0x32   :  { %152 = vmatmul.f32.gmra.mxu1 %v59_v37  ;;  %v268_v37 = vld [vmem:[%s1053_s8 + $0x40] sm:$0xff] }
  0x33   :  { %287 = vmatpush.msra.mxu3 %v268_v37 }
  0x39   :  { %114 = vmatmul.f32.gmra.mxu0 %v84_v38 }
  0x3a   :  { %155 = vmatmul.f32.gmra.mxu1 %v60_v39  ;;  %v267_v39 = vld [vmem:[%s1053_s8 + $0x38] sm:$0xff] }
  0x3b   :  { %288 = vmatpush.msra.mxu3 %v267_v39 }
  0x3d   :  { %289 = vmatpush.msra.mxu3 %v266_v40 }
  0x41   :  { %117 = vmatmul.f32.gmra.mxu0 %v85_v44  ;;  %v265_v44 = vld [vmem:[%s1053_s8 + $0x28] sm:$0xff] }
  0x42   :  { %158 = vmatmul.f32.gmra.mxu1 %v61_v45  ;;  %290 = vmatpush.msra.mxu3 %v265_v44 }
  0x44   :  { %291 = vmatpush.msra.mxu3 %v264_v46 }
  0x46   :  { %292 = vmatpush.msra.mxu3 %v263_v48 }
  0x48   :  { %293 = vmatpush.msra.mxu3 %v262_v54 }
  0x49   :  { %120 = vmatmul.f32.gmra.mxu0 %v86_v50 }
  0x4a   :  { %161 = vmatmul.f32.gmra.mxu1 %v62_v51  ;;  %294 = vmatpush.msra.mxu3 %v261_v55 }
  0x51   :  { %123 = vmatmul.f32.gmra.mxu0 %v87_v56  ;;  %v260_v56 = vld [vmem:[%s1053_s8] sm:$0xff] }
  0x52   :  { %164 = vmatmul.f32.gmra.mxu1 %v63_v57  ;;  %295 = vmatpush.msra.mxu3 %v260_v56  ;;  %v550_v57 = vld [vmem:[%s1052_s7] ss:$0 sm:$0xff] }
  0x59   :  { %126 = vmatmul.f32.gmra.mxu0 %v88_v58 }
  0x5a   :  { %167 = vmatmul.f32.gmra.mxu1 %v64_v59 }
  0x9e   :  { %v106_v1 = vpop.f32.mrf.mxu0 }
  0x9f   :  { %v147_v2 = vpop.f32.mrf.mxu1 }
  0xa0   :  { %v148_v3 = vadd.f32 %v147_v2, %v106_v1 }
  0xa2   :  { %v175_v4 = vadd.f32 %v830_v0, %v148_v3 }
  0xa4   :  { %v183_v5 = vmax.f32 %v175_v4, 0.0 }
  0xa6   :  { %227 = vmatmul.f32.vlgmr.msra.gmra.mxu2 %v183_v5  ;;  %v109_v6 = vpop.f32.mrf.mxu0 }
  0xa7   :  { %v150_v7 = vpop.f32.mrf.mxu1 }
  0xa8   :  { %v151_v8 = vadd.f32 %v150_v7, %v109_v6 }
  0xaa   :  { %v176_v9 = vadd.f32 %v830_v0, %v151_v8 }
  0xac   :  { %v184_v10 = vmax.f32 %v176_v9, 0.0 }
  0xae   :  { %230 = vmatmul.f32.gmra.mxu2 %v184_v10  ;;  %v112_v11 = vpop.f32.mrf.mxu0 }
  0xaf   :  { %v153_v12 = vpop.f32.mrf.mxu1 }
  0xb0   :  { %v154_v13 = vadd.f32 %v153_v12, %v112_v11 }
  0xb2   :  { %v177_v14 = vadd.f32 %v830_v0, %v154_v13 }
  0xb4   :  { %v185_v15 = vmax.f32 %v177_v14, 0.0 }
  0xb6   :  { %233 = vmatmul.f32.gmra.mxu2 %v185_v15  ;;  %v115_v16 = vpop.f32.mrf.mxu0 }
  0xb7   :  { %v156_v17 = vpop.f32.mrf.mxu1 }
  0xb8   :  { %v157_v18 = vadd.f32 %v156_v17, %v115_v16 }
  0xba   :  { %v178_v19 = vadd.f32 %v830_v0, %v157_v18  ;;  %v551_v18 = vld [vmem:[%s1054_s9] ss:$0 sm:$0xff] }
  0xbc   :  { %v186_v20 = vmax.f32 %v178_v19, 0.0 }
  0xbe   :  { %236 = vmatmul.f32.gmra.mxu2 %v186_v20  ;;  %v118_v23 = vpop.f32.mrf.mxu0 }
  0xbf   :  { %v159_v24 = vpop.f32.mrf.mxu1 }
  0xc0   :  { %v160_v25 = vadd.f32 %v159_v24, %v118_v23 }
  0xc2   :  { %v179_v27 = vadd.f32 %v830_v0, %v160_v25 }
  0xc4   :  { %v187_v29 = vmax.f32 %v179_v27, 0.0 }
  0xc6   :  { %239 = vmatmul.f32.gmra.mxu2 %v187_v29  ;;  %v121_v32 = vpop.f32.mrf.mxu0 }
  0xc7   :  { %v162_v33 = vpop.f32.mrf.mxu1 }
  0xc8   :  { %v163_v34 = vadd.f32 %v162_v33, %v121_v32 }
  0xca   :  { %v180_v36 = vadd.f32 %v830_v0, %v163_v34 }
  0xcc   :  { %v188_v38 = vmax.f32 %v180_v36, 0.0 }
  0xce   :  { %242 = vmatmul.f32.gmra.mxu2 %v188_v38  ;;  %v124_v41 = vpop.f32.mrf.mxu0 }
  0xcf   :  { %v165_v42 = vpop.f32.mrf.mxu1 }
  0xd0   :  { %v166_v43 = vadd.f32 %v165_v42, %v124_v41 }
  0xd2   :  { %v181_v45 = vadd.f32 %v830_v0, %v166_v43 }
  0xd4   :  { %v189_v47 = vmax.f32 %v181_v45, 0.0 }
  0xd6   :  { %245 = vmatmul.f32.gmra.mxu2 %v189_v47  ;;  %v127_v49 = vpop.f32.mrf.mxu0 }
  0xd7   :  { %v168_v50 = vpop.f32.mrf.mxu1 }
  0xd8   :  { %v169_v51 = vadd.f32 %v168_v50, %v127_v49 }
  0xda   :  { %v182_v52 = vadd.f32 %v830_v0, %v169_v51 }
  0xdc   :  { %v190_v53 = vmax.f32 %v182_v52, 0.0 }
  0xde   :  { %248 = vmatmul.f32.gmra.mxu2 %v190_v53 }
 0x129   :  { %v228_v58 = vpop.f32.mrf.mxu2 }
 0x12a   :  { %v229_v59 = vadd.f32 %v550_v57, %v228_v58 }
 0x12c   :  { %v252_v60 = vmax.f32 %v229_v59, 0.0 }
 0x12e   :  { %296 = vmatmul.f32.vlgmr.msra.gmra.mxu3 %v252_v60 }
 0x131   :  { %v231_v61 = vpop.f32.mrf.mxu2 }
 0x132   :  { %v232_v62 = vadd.f32 %v550_v57, %v231_v61 }
 0x134   :  { %v253_v63 = vmax.f32 %v232_v62, 0.0 }
 0x136   :  { %299 = vmatmul.f32.gmra.mxu3 %v253_v63 }
 0x139   :  { %v234_v0 = vpop.f32.mrf.mxu2 }
 0x13a   :  { %v235_v1 = vadd.f32 %v550_v57, %v234_v0 }
 0x13c   :  { %v254_v2 = vmax.f32 %v235_v1, 0.0 }
 0x13e   :  { %302 = vmatmul.f32.gmra.mxu3 %v254_v2 }
 0x141   :  { %v237_v3 = vpop.f32.mrf.mxu2 }
 0x142   :  { %v238_v4 = vadd.f32 %v550_v57, %v237_v3  ;;  %v944_v3 = vld [vmem:[%s1055_s10] ss:$0 sm:$0xff] }
 0x144   :  { %v255_v5 = vmax.f32 %v238_v4, 0.0 }
 0x146   :  { %305 = vmatmul.f32.gmra.mxu3 %v255_v5 }
 0x149   :  { %v240_v6 = vpop.f32.mrf.mxu2 }
 0x14a   :  { %v241_v7 = vadd.f32 %v550_v57, %v240_v6 }
 0x14c   :  { %v256_v8 = vmax.f32 %v241_v7, 0.0 }
 0x14e   :  { %308 = vmatmul.f32.gmra.mxu3 %v256_v8  ;;  %v951_v8 = vld [vmem:[%s1056_s11] ss:$0 sm:$0xff] }
 0x151   :  { %v243_v9 = vpop.f32.mrf.mxu2 }
 0x152   :  { %v244_v10 = vadd.f32 %v550_v57, %v243_v9 }
 0x154   :  { %v257_v11 = vmax.f32 %v244_v10, 0.0 }
 0x156   :  { %311 = vmatmul.f32.gmra.mxu3 %v257_v11 }
 0x159   :  { %v246_v12 = vpop.f32.mrf.mxu2 }
 0x15a   :  { %v247_v13 = vadd.f32 %v550_v57, %v246_v12 }
 0x15c   :  { %v258_v14 = vmax.f32 %v247_v13, 0.0 }
 0x15e   :  { %314 = vmatmul.f32.gmra.mxu3 %v258_v14  ;;  %v521_v14 = vld [vmem:[%s1057_s2] sm:$0xff] }
 0x161   :  { %v249_v15 = vpop.f32.mrf.mxu2 }
 0x162   :  { %v250_v16 = vadd.f32 %v550_v57, %v249_v15 }
 0x164   :  { %v259_v17 = vmax.f32 %v250_v16, 0.0 }
 0x166   :  { %317 = vmatmul.f32.gmra.mxu3 %v259_v17 }
 0x1b1   :  { %v297_v19 = vpop.f32.mrf.mxu3 }
 0x1b2   :  { %v894_v20 = vadd.f32 %v551_v18, %v297_v19 }
 0x1b4   :  { %323 = vadd.xlane.f32.xlu0 %v894_v20  ;;  %v339_v21 = vmul.f32 %v894_v20, %v894_v20 }
 0x1b6   :  { %347 = vadd.xlane.f32.xlu2 %v339_v21 }
 0x1b9   :  { %v300_v22 = vpop.f32.mrf.mxu3 }
 0x1ba   :  { %v899_v23 = vadd.f32 %v551_v18, %v300_v22 }
 0x1bc   :  { %325 = vadd.xlane.f32.xlu0 %v899_v23  ;;  %v340_v26 = vmul.f32 %v899_v23, %v899_v23 }
 0x1c1   :  { %v303_v24 = vpop.f32.mrf.mxu3 }
 0x1c2   :  { %v902_v25 = vadd.f32 %v551_v18, %v303_v24 }
 0x1c4   :  { %327 = vadd.xlane.f32.xlu1 %v902_v25  ;;  %349 = vadd.xlane.f32.xlu0 %v340_v26  ;;  %v341_v29 = vmul.f32 %v902_v25, %v902_v25 }
 0x1c9   :  { %v306_v27 = vpop.f32.mrf.mxu3 }
 0x1ca   :  { %v907_v28 = vadd.f32 %v551_v18, %v306_v27 }
 0x1cc   :  { %351 = vadd.xlane.f32.xlu1 %v341_v29  ;;  %v342_v30 = vmul.f32 %v907_v28, %v907_v28 }
 0x1ce   :  { %353 = vadd.xlane.f32.xlu2 %v342_v30 }
 0x1d1   :  { %v309_v31 = vpop.f32.mrf.mxu3 }
 0x1d2   :  { %v913_v32 = vadd.f32 %v551_v18, %v309_v31 }
 0x1d4   :  { %329 = vadd.xlane.f32.xlu1 %v907_v28  ;;  %v343_v33 = vmul.f32 %v913_v32, %v913_v32 }
 0x1d6   :  { %355 = vadd.xlane.f32.xlu0 %v343_v33  ;;  %331 = vadd.xlane.f32.xlu2 %v913_v32 }
 0x1d9   :  { %v312_v34 = vpop.f32.mrf.mxu3 }
 0x1da   :  { %v919_v35 = vadd.f32 %v551_v18, %v312_v34 }
 0x1dc   :  { %v344_v42 = vmul.f32 %v919_v35, %v919_v35 }
 0x1de   :  { %333 = vadd.xlane.f32.xlu2 %v919_v35 }
 0x1e1   :  { %v315_v36 = vpop.f32.mrf.mxu3 }
 0x1e2   :  { %v922_v37 = vadd.f32 %v551_v18, %v315_v36 }
 0x1e4   :  { %335 = vadd.xlane.f32.xlu0 %v922_v37  ;;  %v345_v38 = vmul.f32 %v922_v37, %v922_v37 }
 0x1e6   :  { %359 = vadd.xlane.f32.xlu2 %v345_v38 }
 0x1e9   :  { %v318_v39 = vpop.f32.mrf.mxu3 }
 0x1ea   :  { %v927_v40 = vadd.f32 %v551_v18, %v318_v39 }
 0x1ec   :  { %337 = vadd.xlane.f32.xlu1 %v927_v40  ;;  %v346_v41 = vmul.f32 %v927_v40, %v927_v40 }
 0x1ee   :  { %361 = vadd.xlane.f32.xlu0 %v346_v41 }
 0x1f4   :  { %357 = vadd.xlane.f32.xlu1 %v344_v42 }
 0x227   :  { %v324_v43 = vpop.xlane.xlu0 %323 }
 0x228   :  { %v363_v44 = vmul.f32 0.0078125, %v324_v43 }
 0x229   :  { %v348_v45 = vpop.xlane.xlu2 %347 }
 0x22a   :  { %v379_v46 = vmul.f32 %v363_v44, %v363_v44  ;;  %v371_v47 = vmul.f32 0.0078125, %v348_v45  ;;  %v395_v2 = vsub.f32 %v894_v20, %v363_v44 }
 0x22c   :  { %v387_v48 = vsub.f32 %v371_v47, %v379_v46 }
 0x22e   :  { %v403_v49 = vadd.f32 1e-05, %v387_v48 }
 0x22f   :  { %v326_v50 = vpop.xlane.xlu0 %325 }
 0x230   :  { %554 = vrsqrt.f32 %v403_v49  ;;  %v934_v51 = vmul.f32 0.0078125, %v326_v50  ;;  %vm417_vm1 = vweird.f32 %v403_v49 }
 0x232   :  { %v380_v56 = vmul.f32 %v934_v51, %v934_v51  ;;  %v396_v41 = vsub.f32 %v899_v23, %v934_v51 }
 0x236   :  { %v555_v52 = vpop.eup %554 }
 0x237   :  { %v412_v53 = vmul.f32 %v555_v52, %v403_v49  ;;  %v328_v54 = vpop.xlane.xlu1 %327  ;;  %v350_v55 = vpop.xlane.xlu0 %349  ;;  %vm418_vm0 = vweird.f32 %v555_v52 }
 0x238   :  { %v372_v57 = vmul.f32 0.0078125, %v350_v55  ;;  %v938_v61 = vmul.f32 0.0078125, %v328_v54  ;;  %vm419_vm2 = vmor %vm417_vm1, %vm418_vm0 }
 0x239   :  { %v413_v58 = vmul.f32 %v555_v52, %v412_v53 }
 0x23a   :  { %v388_v59 = vsub.f32 %v372_v57, %v380_v56  ;;  %v381_v4 = vmul.f32 %v938_v61, %v938_v61  ;;  %v397_v55 = vsub.f32 %v902_v25, %v938_v61 }
 0x23b   :  { %v414_v60 = vmul.f32 0.5, %v413_v58 }
 0x23c   :  { %v404_v62 = vadd.f32 1e-05, %v388_v59 }
 0x23d   :  { %v415_v63 = vsub.f32 1.5, %v414_v60 }
 0x23e   :  { %556 = vrsqrt.f32 %v404_v62  ;;  %vm427_vm4 = vweird.f32 %v404_v62 }
 0x23f   :  { %v416_v0 = vmul.f32 %v555_v52, %v415_v63  ;;  %v352_v1 = vpop.xlane.xlu1 %351 }
 0x240   :  { %v373_v5 = vmul.f32 0.0078125, %v352_v1 }
 0x241   :  { %v420_v6 = vsel %vm419_vm2, %v555_v52, %v416_v0  ;;  %v354_v7 = vpop.xlane.xlu2 %353  ;;  %v522_v52 = vld [vmem:[%s1057_s2 + $0x8] sm:$0xff] }
 0x242   :  { %v491_v9 = vmul.f32 %v420_v6, %v395_v2  ;;  %v389_v10 = vsub.f32 %v373_v5, %v381_v4  ;;  %v374_v26 = vmul.f32 0.0078125, %v354_v7  ;;  %v523_v5 = vld [vmem:[%s1057_s2 + $0x10] sm:$0xff] }
 0x244   :  { %v557_v11 = vpop.eup %556  ;;  %v502_v12 = vmul.f32 %v944_v3, %v491_v9  ;;  %v405_v13 = vadd.f32 1e-05, %v389_v10 }
 0x245   :  { %v422_v15 = vmul.f32 %v557_v11, %v404_v62  ;;  %vm428_vm3 = vweird.f32 %v557_v11 }
 0x246   :  { %v513_v16 = vadd.f32 %v951_v8, %v502_v12  ;;  %558 = vrsqrt.f32 %v405_v13  ;;  %vm429_vm5 = vmor %vm427_vm4, %vm428_vm3  ;;  %vm437_vm7 = vweird.f32 %v405_v13 }
 0x247   :  { %v423_v17 = vmul.f32 %v557_v11, %v422_v15  ;;  %v330_v18 = vpop.xlane.xlu1 %329 }
 0x248   :  { %v529_v19 = vadd.f32 %v521_v14, %v513_v16  ;;  %v958_v20 = vmul.f32 0.0078125, %v330_v18 }
 0x249   :  { %v424_v21 = vmul.f32 0.5, %v423_v17  ;;  %v356_v22 = vpop.xlane.xlu0 %355  ;;  %v332_v24 = vpop.xlane.xlu2 %331 }
 0x24a   :  { %537 = vst [vmem:[%s1058_s12] sm:$0xff] %v529_v19  ;;  %v382_v27 = vmul.f32 %v958_v20, %v958_v20  ;;  %v965_v29 = vmul.f32 0.0078125, %v332_v24  ;;  %v375_v34 = vmul.f32 0.0078125, %v356_v22  ;;  %v398_v18 = vsub.f32 %v907_v28, %v958_v20 }
 0x24b   :  { %v425_v30 = vsub.f32 1.5, %v424_v21 }
 0x24c   :  { %v559_v31 = vpop.eup %558  ;;  %v390_v33 = vsub.f32 %v374_v26, %v382_v27  ;;  %v383_v36 = vmul.f32 %v965_v29, %v965_v29  ;;  %v399_v27 = vsub.f32 %v913_v32, %v965_v29 }
 0x24d   :  { %v426_v38 = vmul.f32 %v557_v11, %v425_v30  ;;  %v432_v39 = vmul.f32 %v559_v31, %v405_v13  ;;  %vm438_vm6 = vweird.f32 %v559_v31 }
 0x24e   :  { %v406_v42 = vadd.f32 1e-05, %v390_v33  ;;  %v391_v43 = vsub.f32 %v375_v34, %v383_v36  ;;  %vm439_vm8 = vmor %vm437_vm7, %vm438_vm6  ;;  %v524_v36 = vld [vmem:[%s1057_s2 + $0x18] sm:$0xff] }
 0x24f   :  { %v430_v44 = vsel %vm429_vm5, %v557_v11, %v426_v38  ;;  %v433_v45 = vmul.f32 %v559_v31, %v432_v39 }
 0x250   :  { %v492_v46 = vmul.f32 %v430_v44, %v396_v41  ;;  %560 = vrsqrt.f32 %v406_v42  ;;  %v407_v47 = vadd.f32 1e-05, %v391_v43  ;;  %vm447_vm10 = vweird.f32 %v406_v42 }
 0x251   :  { %v434_v48 = vmul.f32 0.5, %v433_v45  ;;  %v334_v49 = vpop.xlane.xlu2 %333 }
 0x252   :  { %v503_v50 = vmul.f32 %v944_v3, %v492_v46  ;;  %562 = vrsqrt.f32 %v407_v47  ;;  %vm457_vm13 = vweird.f32 %v407_v47  ;;  %v368_v38 = vmul.f32 0.0078125, %v334_v49 }
 0x253   :  { %v435_v53 = vsub.f32 1.5, %v434_v48 }
 0x254   :  { %v514_v23 = vadd.f32 %v951_v8, %v503_v50 }
 0x255   :  { %v436_v51 = vmul.f32 %v559_v31, %v435_v53 }
 0x256   :  { %v561_v54 = vpop.eup %560  ;;  %v530_v56 = vadd.f32 %v522_v52, %v514_v23 }
 0x257   :  { %v440_v57 = vsel %vm439_vm8, %v559_v31, %v436_v51  ;;  %v442_v58 = vmul.f32 %v561_v54, %v406_v42  ;;  %v336_v59 = vpop.xlane.xlu0 %335  ;;  %vm448_vm9 = vweird.f32 %v561_v54  ;;  %v525_v42 = vld [vmem:[%s1057_s2 + $0x20] sm:$0xff] }
 0x258   :  { %v563_v60 = vpop.eup %562  ;;  %538 = vst [vmem:[%s1058_s12 + $0x8] sm:$0xff] %v530_v56  ;;  %v493_v62 = vmul.f32 %v440_v57, %v397_v55  ;;  %v981_v63 = vmul.f32 0.0078125, %v336_v59  ;;  %vm449_vm12 = vmor %vm447_vm10, %vm448_vm9 }
 0x259   :  { %v443_v0 = vmul.f32 %v561_v54, %v442_v58  ;;  %v452_v1 = vmul.f32 %v563_v60, %v407_v47  ;;  %v360_v2 = vpop.xlane.xlu2 %359  ;;  %vm458_vm11 = vweird.f32 %v563_v60  ;;  %v384_v47 = vmul.f32 %v368_v38, %v368_v38 }
 0x25a   :  { %v504_v4 = vmul.f32 %v944_v3, %v493_v62  ;;  %v385_v25 = vmul.f32 %v981_v63, %v981_v63  ;;  %v377_v61 = vmul.f32 0.0078125, %v360_v2  ;;  %vm459_vm14 = vmor %vm457_vm13, %vm458_vm11  ;;  %v401_v57 = vsub.f32 %v922_v37, %v981_v63  ;;  %v527_v2 = vld [vmem:[%s1057_s2 + $0x30] sm:$0xff] }
 0x25b   :  { %v444_v6 = vmul.f32 0.5, %v443_v0  ;;  %v453_v7 = vmul.f32 %v563_v60, %v452_v1 }
 0x25c   :  { %v515_v9 = vadd.f32 %v951_v8, %v504_v4  ;;  %v393_v10 = vsub.f32 %v377_v61, %v385_v25 }
 0x25d   :  { %v445_v11 = vsub.f32 1.5, %v444_v6  ;;  %v454_v12 = vmul.f32 0.5, %v453_v7 }
 0x25e   :  { %v531_v13 = vadd.f32 %v523_v5, %v515_v9  ;;  %v409_v14 = vadd.f32 1e-05, %v393_v10 }
 0x25f   :  { %v446_v15 = vmul.f32 %v561_v54, %v445_v11  ;;  %v455_v16 = vsub.f32 1.5, %v454_v12  ;;  %v338_v17 = vpop.xlane.xlu1 %337 }
 0x260   :  { %539 = vst [vmem:[%s1058_s12 + $0x10] sm:$0xff] %v531_v13  ;;  %564 = vrsqrt.f32 %v409_v14  ;;  %v995_v19 = vmul.f32 0.0078125, %v338_v17  ;;  %vm477_vm0 = vweird.f32 %v409_v14  ;;  %v528_v13 = vld [vmem:[%s1057_s2 + $0x38] sm:$0xff] }
 0x261   :  { %v450_v21 = vsel %vm449_vm12, %v561_v54, %v446_v15  ;;  %v456_v22 = vmul.f32 %v563_v60, %v455_v16  ;;  %v362_v24 = vpop.xlane.xlu0 %361  ;;  %v400_v15 = vsub.f32 %v919_v35, %v368_v38 }
 0x262   :  { %v494_v26 = vmul.f32 %v450_v21, %v398_v18  ;;  %v386_v30 = vmul.f32 %v995_v19, %v995_v19  ;;  %v378_v31 = vmul.f32 0.0078125, %v362_v24  ;;  %v402_v63 = vsub.f32 %v927_v40, %v995_v19  ;;  %v526_v21 = vld [vmem:[%s1057_s2 + $0x28] sm:$0xff] }
 0x263   :  { %v460_v33 = vsel %vm459_vm14, %v563_v60, %v456_v22 }
 0x264   :  { %v505_v28 = vmul.f32 %v944_v3, %v494_v26  ;;  %v495_v20 = vmul.f32 %v460_v33, %v399_v27  ;;  %v394_v34 = vsub.f32 %v378_v31, %v386_v30 }
 0x266   :  { %v565_v39 = vpop.eup %564  ;;  %v516_v41 = vadd.f32 %v951_v8, %v505_v28  ;;  %v506_v32 = vmul.f32 %v944_v3, %v495_v20  ;;  %v410_v29 = vadd.f32 1e-05, %v394_v34 }
 0x267   :  { %v472_v43 = vmul.f32 %v565_v39, %v409_v14  ;;  %v358_v44 = vpop.xlane.xlu1 %357  ;;  %vm478_vm15 = vweird.f32 %v565_v39 }
 0x268   :  { %v532_v45 = vadd.f32 %v524_v36, %v516_v41  ;;  %v517_v46 = vadd.f32 %v951_v8, %v506_v32  ;;  %566 = vrsqrt.f32 %v410_v29  ;;  %v376_v50 = vmul.f32 0.0078125, %v358_v44  ;;  %vm479_vm1 = vmor %vm477_vm0, %vm478_vm15 }
 0x269   :  { %v473_v48 = vmul.f32 %v565_v39, %v472_v43  ;;  %vm487_vm3 = vweird.f32 %v410_v29 }
 0x26a   :  { %540 = vst [vmem:[%s1058_s12 + $0x18] sm:$0xff] %v532_v45  ;;  %v533_v49 = vadd.f32 %v525_v42, %v517_v46  ;;  %v392_v53 = vsub.f32 %v376_v50, %v384_v47 }
 0x26b   :  { %v474_v52 = vmul.f32 0.5, %v473_v48 }
 0x26c   :  { %541 = vst [vmem:[%s1058_s12 + $0x20] sm:$0xff] %v533_v49  ;;  %v408_v51 = vadd.f32 1e-05, %v392_v53 }
 0x26d   :  { %v475_v23 = vsub.f32 1.5, %v474_v52 }
 0x26e   :  { %v567_v54 = vpop.eup %566  ;;  %568 = vrsqrt.f32 %v408_v51  ;;  %vm467_vm6 = vweird.f32 %v408_v51 }
 0x26f   :  { %v476_v55 = vmul.f32 %v565_v39, %v475_v23  ;;  %v482_v56 = vmul.f32 %v567_v54, %v410_v29  ;;  %vm488_vm2 = vweird.f32 %v567_v54 }
 0x270   :  { %vm489_vm4 = vmor %vm487_vm3, %vm488_vm2 }
 0x271   :  { %v480_v58 = vsel %vm479_vm1, %v565_v39, %v476_v55  ;;  %v483_v59 = vmul.f32 %v567_v54, %v482_v56 }
 0x272   :  { %v497_v60 = vmul.f32 %v480_v58, %v401_v57 }
 0x273   :  { %v484_v62 = vmul.f32 0.5, %v483_v59 }
 0x274   :  { %v508_v0 = vmul.f32 %v944_v3, %v497_v60  ;;  %v569_v1 = vpop.eup %568 }
 0x275   :  { %v485_v4 = vsub.f32 1.5, %v484_v62  ;;  %v462_v61 = vmul.f32 %v569_v1, %v408_v51  ;;  %vm468_vm5 = vweird.f32 %v569_v1 }
 0x276   :  { %v519_v25 = vadd.f32 %v951_v8, %v508_v0  ;;  %vm469_vm7 = vmor %vm467_vm6, %vm468_vm5 }
 0x277   :  { %v486_v5 = vmul.f32 %v567_v54, %v485_v4  ;;  %v463_v6 = vmul.f32 %v569_v1, %v462_v61 }
 0x278   :  { %v535_v37 = vadd.f32 %v527_v2, %v519_v25 }
 0x279   :  { %v490_v7 = vsel %vm489_vm4, %v567_v54, %v486_v5  ;;  %v464_v10 = vmul.f32 0.5, %v463_v6 }
 0x27a   :  { %543 = vst [vmem:[%s1058_s12 + $0x30] sm:$0xff] %v535_v37  ;;  %v498_v9 = vmul.f32 %v490_v7, %v402_v63 }
 0x27b   :  { %v465_v12 = vsub.f32 1.5, %v464_v10 }
 0x27c   :  { %v509_v11 = vmul.f32 %v944_v3, %v498_v9 }
 0x27d   :  { %v466_v40 = vmul.f32 %v569_v1, %v465_v12 }
 0x27e   :  { %v520_v14 = vadd.f32 %v951_v8, %v509_v11 }
 0x27f   :  { %v470_v17 = vsel %vm469_vm7, %v569_v1, %v466_v40 }
 0x280   :  { %v536_v16 = vadd.f32 %v528_v13, %v520_v14  ;;  %v496_v18 = vmul.f32 %v470_v17, %v400_v15 }
 0x282   :  { %544 = vst [vmem:[%s1058_s12 + $0x38] sm:$0xff] %v536_v16  ;;  %v507_v19 = vmul.f32 %v944_v3, %v496_v18 }
 0x284   :  { %v518_v22 = vadd.f32 %v951_v8, %v507_v19 }
 0x286   :  { %v534_v24 = vadd.f32 %v526_v21, %v518_v22 }
 0x288   :  { %542 = vst [vmem:[%s1058_s12 + $0x28] sm:$0xff] %v534_v24 }

// kernel: simulator_forward.17
= control target key start
LH: loop header
LB: loop body
LE: loop exit
PB: predicated region body
PF: predicated region fallthrough
CT: control target
= control target key end

     0   :  { %vm233_vm0 = vcmask 23552   ;;  %s530_s1 = inlined_call_operand.vmem [shape: f32[128,128], index: 1, kind: input, shape index: {}]   ;;  %s531_s2 = inlined_call_operand.vmem [shape: f32[1,128], index: 2, kind: input, shape index: {}]   ;;  %s532_s0 = inlined_call_operand.vmem [shape: f32[64,128], index: 0, kind: input, shape index: {}]   ;;  %s533_s3 = inlined_call_operand.vmem [shape: f32[128,128], index: 3, kind: input, shape index: {}]   ;;  %s534_s4 = inlined_call_operand.vmem [shape: f32[1,128], index: 4, kind: input, shape index: {}]   ;;  %s535_s5 = inlined_call_operand.vmem [shape: f32[128,3], index: 5, kind: input, shape index: {}]   ;;  %s536_s6 = inlined_call_operand.vmem [shape: f32[1,3], index: 6, kind: input, shape index: {}]   ;;  %s537_s7 = inlined_call_operand.vmem [shape: f32[64,3], index: 7, kind: output, shape index: {}]  }
   0x1   :  { %v41_v0 = vld [vmem:[%s530_s1 + $0x78] sm:$0xff]  ;;  %v40_v1 = vld [vmem:[%s530_s1 + $0x70] sm:$0xff]  ;;  %v39_v2 = vld [vmem:[%s530_s1 + $0x68] sm:$0xff] }
   0x2   :  { %54 = vmatpush.msra.mxu0 %v41_v0  ;;  %246 = vmatpush.msra.mxu3 %v41_v0  ;;  %v38_v3 = vld [vmem:[%s530_s1 + $0x60] sm:$0xff]  ;;  %v37_v4 = vld [vmem:[%s530_s1 + $0x58] sm:$0xff]  ;;  %v36_v5 = vld [vmem:[%s530_s1 + $0x50] sm:$0xff] }
   0x3   :  { %v35_v6 = vld [vmem:[%s530_s1 + $0x48] sm:$0xff]  ;;  %v34_v7 = vld [vmem:[%s530_s1 + $0x40] sm:$0xff]  ;;  %v33_v8 = vld [vmem:[%s530_s1 + $0x38] sm:$0xff] }
   0x4   :  { %55 = vmatpush.msra.mxu0 %v40_v1  ;;  %247 = vmatpush.msra.mxu3 %v40_v1  ;;  %v32_v9 = vld [vmem:[%s530_s1 + $0x30] sm:$0xff]  ;;  %v31_v10 = vld [vmem:[%s530_s1 + $0x28] sm:$0xff]  ;;  %v30_v11 = vld [vmem:[%s530_s1 + $0x20] sm:$0xff] }
   0x5   :  { %v29_v12 = vld [vmem:[%s530_s1 + $0x18] sm:$0xff]  ;;  %v28_v13 = vld [vmem:[%s530_s1 + $0x10] sm:$0xff]  ;;  %v27_v14 = vld [vmem:[%s530_s1 + $0x8] sm:$0xff] }
   0x6   :  { %56 = vmatpush.msra.mxu0 %v39_v2  ;;  %248 = vmatpush.msra.mxu3 %v39_v2  ;;  %v26_v15 = vld [vmem:[%s530_s1] sm:$0xff]  ;;  %v48_v17 = vld [vmem:[%s532_s0 + $0x30] sm:$0xff]  ;;  %v43_v18 = vld [vmem:[%s532_s0 + $0x8] sm:$0xff] }
   0x7   :  { %v42_v16 = vld [vmem:[%s532_s0] sm:$0xff]  ;;  %v49_v19 = vld [vmem:[%s532_s0 + $0x38] sm:$0xff]  ;;  %v117_v21 = vld [vmem:[%s533_s3 + $0x70] sm:$0xff] }
   0x8   :  { %57 = vmatpush.msra.mxu0 %v38_v3  ;;  %249 = vmatpush.msra.mxu3 %v38_v3  ;;  %v118_v20 = vld [vmem:[%s533_s3 + $0x78] sm:$0xff]  ;;  %v116_v22 = vld [vmem:[%s533_s3 + $0x68] sm:$0xff]  ;;  %v115_v23 = vld [vmem:[%s533_s3 + $0x60] sm:$0xff] }
   0x9   :  { %123 = vmatpush.msra.mxu1 %v118_v20  ;;  %v44_v24 = vld [vmem:[%s532_s0 + $0x10] sm:$0xff]  ;;  %v114_v25 = vld [vmem:[%s533_s3 + $0x58] sm:$0xff]  ;;  %v112_v27 = vld [vmem:[%s533_s3 + $0x48] sm:$0xff] }
   0xa   :  { %58 = vmatpush.msra.mxu0 %v37_v4  ;;  %250 = vmatpush.msra.mxu3 %v37_v4  ;;  %v113_v26 = vld [vmem:[%s533_s3 + $0x50] sm:$0xff]  ;;  %v111_v28 = vld [vmem:[%s533_s3 + $0x40] sm:$0xff]  ;;  %v45_v29 = vld [vmem:[%s532_s0 + $0x18] sm:$0xff] }
   0xb   :  { %124 = vmatpush.msra.mxu1 %v117_v21  ;;  %v110_v30 = vld [vmem:[%s533_s3 + $0x38] sm:$0xff]  ;;  %v109_v31 = vld [vmem:[%s533_s3 + $0x30] sm:$0xff]  ;;  %v108_v32 = vld [vmem:[%s533_s3 + $0x28] sm:$0xff] }
   0xc   :  { %59 = vmatpush.msra.mxu0 %v36_v5  ;;  %251 = vmatpush.msra.mxu3 %v36_v5  ;;  %v107_v33 = vld [vmem:[%s533_s3 + $0x20] sm:$0xff]  ;;  %v106_v35 = vld [vmem:[%s533_s3 + $0x18] sm:$0xff]  ;;  %v47_v36 = vld [vmem:[%s532_s0 + $0x28] sm:$0xff] }
   0xd   :  { %125 = vmatpush.msra.mxu1 %v116_v22  ;;  %v46_v34 = vld [vmem:[%s532_s0 + $0x20] sm:$0xff]  ;;  %v105_v37 = vld [vmem:[%s533_s3 + $0x10] sm:$0xff]  ;;  %v104_v38 = vld [vmem:[%s533_s3 + $0x8] sm:$0xff] }
   0xe   :  { %60 = vmatpush.msra.mxu0 %v35_v6  ;;  %252 = vmatpush.msra.mxu3 %v35_v6  ;;  %v103_v39 = vld [vmem:[%s533_s3] sm:$0xff]  ;;  %v187_v54 = vld [vmem:[%s535_s5 + $0x78] sm:$0xff]  ;;  %v186_v55 = vld [vmem:[%s535_s5 + $0x70] sm:$0xff] }
   0xf   :  { %126 = vmatpush.msra.mxu1 %v115_v23  ;;  %v278_v40 = vld [vmem:[%s531_s2] ss:$0 sm:$0xff]  ;;  %192 = vmatpush.msra.mxu2 %v187_v54  ;;  %v185_v56 = vld [vmem:[%s535_s5 + $0x68] sm:$0xff]  ;;  %v183_v61 = vld [vmem:[%s535_s5 + $0x58] sm:$0xff] }
  0x10   :  { %61 = vmatpush.msra.mxu0 %v34_v7  ;;  %253 = vmatpush.msra.mxu3 %v34_v7  ;;  %v184_v59 = vld [vmem:[%s535_s5 + $0x60] sm:$0xff]  ;;  %v182_v62 = vld [vmem:[%s535_s5 + $0x50] sm:$0xff]  ;;  %v181_v63 = vld [vmem:[%s535_s5 + $0x48] sm:$0xff] }
  0x11   :  { %127 = vmatpush.msra.mxu1 %v114_v25  ;;  %193 = vmatpush.msra.mxu2 %v186_v55  ;;  %v180_v2 = vld [vmem:[%s535_s5 + $0x40] sm:$0xff]  ;;  %v179_v4 = vld [vmem:[%s535_s5 + $0x38] sm:$0xff]  ;;  %v178_v5 = vld [vmem:[%s535_s5 + $0x30] sm:$0xff] }
  0x12   :  { %62 = vmatpush.msra.mxu0 %v33_v8  ;;  %254 = vmatpush.msra.mxu3 %v33_v8  ;;  %v177_v6 = vld [vmem:[%s535_s5 + $0x28] sm:$0xff] }
  0x13   :  { %128 = vmatpush.msra.mxu1 %v113_v26  ;;  %194 = vmatpush.msra.mxu2 %v185_v56 }
  0x14   :  { %63 = vmatpush.msra.mxu0 %v32_v9  ;;  %255 = vmatpush.msra.mxu3 %v32_v9  ;;  %v176_v9 = vld [vmem:[%s535_s5 + $0x20] sm:$0xff] }
  0x15   :  { %129 = vmatpush.msra.mxu1 %v112_v27  ;;  %195 = vmatpush.msra.mxu2 %v184_v59 }
  0x16   :  { %64 = vmatpush.msra.mxu0 %v31_v10  ;;  %256 = vmatpush.msra.mxu3 %v31_v10 }
  0x17   :  { %130 = vmatpush.msra.mxu1 %v111_v28  ;;  %196 = vmatpush.msra.mxu2 %v183_v61 }
  0x18   :  { %65 = vmatpush.msra.mxu0 %v30_v11  ;;  %257 = vmatpush.msra.mxu3 %v30_v11  ;;  %v175_v11 = vld [vmem:[%s535_s5 + $0x18] sm:$0xff] }
  0x19   :  { %131 = vmatpush.msra.mxu1 %v110_v30  ;;  %197 = vmatpush.msra.mxu2 %v182_v62 }
  0x1a   :  { %66 = vmatpush.msra.mxu0 %v29_v12  ;;  %258 = vmatpush.msra.mxu3 %v29_v12 }
  0x1b   :  { %132 = vmatpush.msra.mxu1 %v109_v31  ;;  %198 = vmatpush.msra.mxu2 %v181_v63 }
  0x1c   :  { %67 = vmatpush.msra.mxu0 %v28_v13  ;;  %259 = vmatpush.msra.mxu3 %v28_v13 }
  0x1d   :  { %133 = vmatpush.msra.mxu1 %v108_v32  ;;  %199 = vmatpush.msra.mxu2 %v180_v2 }
  0x1e   :  { %68 = vmatpush.msra.mxu0 %v27_v14  ;;  %260 = vmatpush.msra.mxu3 %v27_v14  ;;  %v174_v14 = vld [vmem:[%s535_s5 + $0x10] sm:$0xff] }
  0x1f   :  { %134 = vmatpush.msra.mxu1 %v107_v33  ;;  %200 = vmatpush.msra.mxu2 %v179_v4 }
  0x20   :  { %69 = vmatpush.msra.mxu0 %v26_v15  ;;  %261 = vmatpush.msra.mxu3 %v26_v15  ;;  %v173_v15 = vld [vmem:[%s535_s5 + $0x8] sm:$0xff] }
  0x21   :  { %70 = vmatmul.f32.vlgmr.msra.gmra.mxu0 %v42_v16  ;;  %88 = vmatmul.f32.vlgmr.msra.gmra.mxu3 %v48_v17  ;;  %v172_v16 = vld [vmem:[%s535_s5] sm:$0xff] }
  0x22   :  { %262 = vmatpush.msrb.mxu3 %v118_v20  ;;  %135 = vmatpush.msra.mxu1 %v106_v35  ;;  %v279_v17 = vld [vmem:[%s534_s4] ss:$0 sm:$0xff] }
  0x23   :  { %201 = vmatpush.msra.mxu2 %v178_v5 }
  0x24   :  { %263 = vmatpush.msrb.mxu3 %v117_v21  ;;  %136 = vmatpush.msra.mxu1 %v105_v37 }
  0x25   :  { %202 = vmatpush.msra.mxu2 %v177_v6 }
  0x26   :  { %264 = vmatpush.msrb.mxu3 %v116_v22  ;;  %137 = vmatpush.msra.mxu1 %v104_v38 }
  0x27   :  { %203 = vmatpush.msra.mxu2 %v176_v9 }
  0x28   :  { %265 = vmatpush.msrb.mxu3 %v115_v23  ;;  %138 = vmatpush.msra.mxu1 %v103_v39 }
  0x29   :  { %73 = vmatmul.f32.gmra.mxu0 %v43_v18  ;;  %91 = vmatmul.f32.gmra.mxu3 %v49_v19 }
  0x2a   :  { %266 = vmatpush.msrb.mxu3 %v114_v25  ;;  %204 = vmatpush.msra.mxu2 %v175_v11 }
  0x2c   :  { %267 = vmatpush.msrb.mxu3 %v113_v26  ;;  %205 = vmatpush.msra.mxu2 %v174_v14 }
  0x2e   :  { %268 = vmatpush.msrb.mxu3 %v112_v27  ;;  %206 = vmatpush.msra.mxu2 %v173_v15 }
  0x30   :  { %269 = vmatpush.msrb.mxu3 %v111_v28  ;;  %207 = vmatpush.msra.mxu2 %v172_v16 }
  0x31   :  { %76 = vmatmul.f32.gmra.mxu0 %v44_v24 }
  0x32   :  { %270 = vmatpush.msrb.mxu3 %v110_v30 }
  0x34   :  { %271 = vmatpush.msrb.mxu3 %v109_v31 }
  0x36   :  { %272 = vmatpush.msrb.mxu3 %v108_v32 }
  0x38   :  { %273 = vmatpush.msrb.mxu3 %v107_v33 }
  0x39   :  { %79 = vmatmul.f32.gmra.mxu0 %v45_v29 }
  0x3a   :  { %274 = vmatpush.msrb.mxu3 %v106_v35 }
  0x3c   :  { %275 = vmatpush.msrb.mxu3 %v105_v37 }
  0x3e   :  { %276 = vmatpush.msrb.mxu3 %v104_v38 }
  0x40   :  { %277 = vmatpush.msrb.mxu3 %v103_v39 }
  0x41   :  { %82 = vmatmul.f32.gmra.mxu0 %v46_v34 }
  0x49   :  { %85 = vmatmul.f32.gmra.mxu0 %v47_v36 }
  0x9e   :  { %v71_v41 = vpop.f32.mrf.mxu0 }
  0x9f   :  { %v72_v42 = vadd.f32 %v278_v40, %v71_v41 }
  0xa1   :  { %v95_v43 = vmax.f32 %v72_v42, 0.0  ;;  %v280_v42 = vld [vmem:[%s536_s6] ss:$0 sm:$0xff] }
  0xa3   :  { %139 = vmatmul.f32.vlgmr.msra.gmra.mxu1 %v95_v43 }
  0xa4   :  { %v89_v46 = vpop.f32.mrf.mxu3 }
  0xa5   :  { %v90_v12 = vadd.f32 %v278_v40, %v89_v46 }
  0xa6   :  { %v74_v44 = vpop.f32.mrf.mxu0 }
  0xa7   :  { %v75_v45 = vadd.f32 %v278_v40, %v74_v44  ;;  %v101_v13 = vmax.f32 %v90_v12, 0.0 }
  0xa9   :  { %v96_v47 = vmax.f32 %v75_v45, 0.0 }
  0xab   :  { %142 = vmatmul.f32.gmra.mxu1 %v96_v47 }
  0xac   :  { %v92_v50 = vpop.f32.mrf.mxu3 }
  0xad   :  { %v93_v52 = vadd.f32 %v278_v40, %v92_v50 }
  0xae   :  { %v77_v48 = vpop.f32.mrf.mxu0 }
  0xaf   :  { %v78_v49 = vadd.f32 %v278_v40, %v77_v48  ;;  %v102_v53 = vmax.f32 %v93_v52, 0.0 }
  0xb1   :  { %v97_v51 = vmax.f32 %v78_v49, 0.0  ;;  %160 = vmatmul.f32.vlgmr.msrb.gmra.mxu3 %v102_v53 }
  0xb3   :  { %145 = vmatmul.f32.gmra.mxu1 %v97_v51 }
  0xb6   :  { %v80_v57 = vpop.f32.mrf.mxu0 }
  0xb7   :  { %v81_v58 = vadd.f32 %v278_v40, %v80_v57 }
  0xb9   :  { %v98_v60 = vmax.f32 %v81_v58, 0.0 }
  0xbb   :  { %148 = vmatmul.f32.gmra.mxu1 %v98_v60 }
  0xbe   :  { %v83_v0 = vpop.f32.mrf.mxu0 }
  0xbf   :  { %v84_v1 = vadd.f32 %v278_v40, %v83_v0 }
  0xc1   :  { %v99_v3 = vmax.f32 %v84_v1, 0.0 }
  0xc3   :  { %151 = vmatmul.f32.gmra.mxu1 %v99_v3 }
  0xc6   :  { %v86_v7 = vpop.f32.mrf.mxu0 }
  0xc7   :  { %v87_v8 = vadd.f32 %v278_v40, %v86_v7 }
  0xc9   :  { %v100_v10 = vmax.f32 %v87_v8, 0.0 }
  0xcb   :  { %154 = vmatmul.f32.gmra.mxu1 %v100_v10 }
  0xd3   :  { %157 = vmatmul.f32.gmra.mxu1 %v101_v13 }
 0x120   :  { %v140_v18 = vpop.f32.mrf.mxu1 }
 0x121   :  { %v141_v19 = vadd.f32 %v279_v17, %v140_v18 }
 0x123   :  { %v164_v20 = vmax.f32 %v141_v19, 0.0 }
 0x125   :  { %208 = vmatmul.f32.vlgmr.msra.gmra.mxu2 %v164_v20 }
 0x128   :  { %v143_v21 = vpop.f32.mrf.mxu1 }
 0x129   :  { %v144_v22 = vadd.f32 %v279_v17, %v143_v21 }
 0x12b   :  { %v165_v23 = vmax.f32 %v144_v22, 0.0 }
 0x12d   :  { %211 = vmatmul.f32.gmra.mxu2 %v165_v23 }
 0x130   :  { %v146_v24 = vpop.f32.mrf.mxu1 }
 0x131   :  { %v147_v25 = vadd.f32 %v279_v17, %v146_v24 }
 0x133   :  { %v166_v26 = vmax.f32 %v147_v25, 0.0 }
 0x134   :  { %v161_v38 = vpop.f32.mrf.mxu3 }
 0x135   :  { %214 = vmatmul.f32.gmra.mxu2 %v166_v26  ;;  %v162_v40 = vadd.f32 %v279_v17, %v161_v38 }
 0x137   :  { %v171_v41 = vmax.f32 %v162_v40, 0.0 }
 0x138   :  { %v149_v27 = vpop.f32.mrf.mxu1 }
 0x139   :  { %v150_v28 = vadd.f32 %v279_v17, %v149_v27 }
 0x13b   :  { %v167_v29 = vmax.f32 %v150_v28, 0.0 }
 0x13d   :  { %217 = vmatmul.f32.gmra.mxu2 %v167_v29 }
 0x140   :  { %v152_v30 = vpop.f32.mrf.mxu1 }
 0x141   :  { %v153_v31 = vadd.f32 %v279_v17, %v152_v30 }
 0x143   :  { %v168_v32 = vmax.f32 %v153_v31, 0.0 }
 0x145   :  { %220 = vmatmul.f32.gmra.mxu2 %v168_v32 }
 0x148   :  { %v155_v33 = vpop.f32.mrf.mxu1 }
 0x149   :  { %v156_v34 = vadd.f32 %v279_v17, %v155_v33 }
 0x14b   :  { %v169_v35 = vmax.f32 %v156_v34, 0.0 }
 0x14d   :  { %223 = vmatmul.f32.gmra.mxu2 %v169_v35 }
 0x150   :  { %v158_v36 = vpop.f32.mrf.mxu1 }
 0x151   :  { %v159_v37 = vadd.f32 %v279_v17, %v158_v36 }
 0x153   :  { %v170_v39 = vmax.f32 %v159_v37, 0.0 }
 0x155   :  { %226 = vmatmul.f32.gmra.mxu2 %v170_v39 }
 0x15d   :  { %229 = vmatmul.f32.gmra.mxu2 %v171_v41 }
 0x1a8   :  { %v209_v43 = vpop.f32.mrf.mxu2 }
 0x1a9   :  { %v210_v44 = vadd.f32 %v280_v42, %v209_v43 }
 0x1ab   :  { %234 = vst.msk [vmem:[%s537_s7] sm:$0xff] %vm233_vm0, %v210_v44 }
 0x1b0   :  { %v212_v45 = vpop.f32.mrf.mxu2 }
 0x1b1   :  { %v213_v46 = vadd.f32 %v280_v42, %v212_v45 }
 0x1b3   :  { %235 = vst.msk [vmem:[%s537_s7 + $0x8] sm:$0xff] %vm233_vm0, %v213_v46 }
 0x1b8   :  { %v215_v47 = vpop.f32.mrf.mxu2 }
 0x1b9   :  { %v216_v48 = vadd.f32 %v280_v42, %v215_v47 }
 0x1bb   :  { %236 = vst.msk [vmem:[%s537_s7 + $0x10] sm:$0xff] %vm233_vm0, %v216_v48 }
 0x1c0   :  { %v218_v49 = vpop.f32.mrf.mxu2 }
 0x1c1   :  { %v219_v50 = vadd.f32 %v280_v42, %v218_v49 }
 0x1c3   :  { %237 = vst.msk [vmem:[%s537_s7 + $0x18] sm:$0xff] %vm233_vm0, %v219_v50 }
 0x1c8   :  { %v221_v51 = vpop.f32.mrf.mxu2 }
 0x1c9   :  { %v222_v52 = vadd.f32 %v280_v42, %v221_v51 }
 0x1cb   :  { %238 = vst.msk [vmem:[%s537_s7 + $0x20] sm:$0xff] %vm233_vm0, %v222_v52 }
 0x1d0   :  { %v224_v53 = vpop.f32.mrf.mxu2 }
 0x1d1   :  { %v225_v54 = vadd.f32 %v280_v42, %v224_v53 }
 0x1d3   :  { %239 = vst.msk [vmem:[%s537_s7 + $0x28] sm:$0xff] %vm233_vm0, %v225_v54 }
 0x1d8   :  { %v227_v55 = vpop.f32.mrf.mxu2 }
 0x1d9   :  { %v228_v56 = vadd.f32 %v280_v42, %v227_v55 }
 0x1db   :  { %240 = vst.msk [vmem:[%s537_s7 + $0x30] sm:$0xff] %vm233_vm0, %v228_v56 }
 0x1e0   :  { %v230_v57 = vpop.f32.mrf.mxu2 }
 0x1e1   :  { %v231_v58 = vadd.f32 %v280_v42, %v230_v57 }
 0x1e3   :  { %241 = vst.msk [vmem:[%s537_s7 + $0x38] sm:$0xff] %vm233_vm0, %v231_v58 }

</bundles_post_ra>
